<compile_context>
chip_gen: v7x
topology: tpu7x:2x2x1
jax: 0.10.0
libtpu: 0.0.40
codegen_flags: <defaults>
</compile_context>

<pallas_src>
import functools

import jax
import jax.numpy as jnp
from jax.experimental import pallas as pl
from jax.experimental.pallas import tpu as pltpu


def _round_up(a, b):
    return ((a + b - 1) // b) * b


# --------------------------------------------------------------------------
# Pallas kernels
# --------------------------------------------------------------------------
def _sconv_in_lrelu_kernel(x_ref, w_ref, b_ref, o_ref):
    """Fused stride-2 Conv3d (as transposed GEMM) + bias + InstanceNorm + LeakyReLU.

    x: (1, K, S) bf16  space-to-depth input, K = Cin*8, S = D2*H2*W2 (lane axis)
    w: (Cout, K) bf16   b: (Cout, 1) f32   o: (1, Cout, S)
    """
    acc = jnp.dot(w_ref[...], x_ref[0], preferred_element_type=jnp.float32)
    acc = acc + b_ref[...]                                   # (Cout, S) f32
    inv_s = 1.0 / acc.shape[1]
    mean = jnp.sum(acc, axis=1, keepdims=True) * inv_s
    var = jnp.sum(acc * acc, axis=1, keepdims=True) * inv_s - mean * mean
    var = jnp.maximum(var, 0.0)                              # one-pass variance, biased
    y = (acc - mean) * jax.lax.rsqrt(var + 1e-5)
    y = jnp.where(y >= 0, y, 0.01 * y)                       # LeakyReLU(0.01)
    o_ref[0] = y.astype(o_ref.dtype)


def _conv3_in_lrelu_kernel(x_ref, w_ref, b_ref, m_ref, o_ref, *, HP, WP, R, S):
    """Fused 3x3x3 conv (27 tap-accumulated GEMMs) + bias + InstanceNorm + LeakyReLU.

    x: (1, C, SP2) bf16 -- zero-padded volume flattened as row = (d*HP + h)*WP + w
    w: (27, Cout, C) bf16, tap-major in (kd, kh, kw)
    b: (Cout, 1) f32
    m: (1, R) f32 -- 1.0 on rows mapping to valid (d<D, h<H, w<W) outputs, else 0.0
    o: (1, Cout, R) -- rows where m==0 are garbage and sliced off by the caller
    """
    Cout = w_ref.shape[1]
    acc = jnp.zeros((Cout, R), jnp.float32)
    tap = 0
    for kd in range(3):
        for kh in range(3):
            for kw in range(3):
                off = (kd * HP + kh) * WP + kw               # static lane offset
                xs = x_ref[0, :, off:off + R]                # (C, R) shifted window
                acc = acc + jnp.dot(w_ref[tap], xs,
                                    preferred_element_type=jnp.float32)
                tap += 1
    acc = acc + b_ref[...]
    m = m_ref[...]
    inv_s = 1.0 / S
    mean = jnp.sum(acc * m, axis=1, keepdims=True) * inv_s   # stats over valid rows only
    var = jnp.sum(acc * acc * m, axis=1, keepdims=True) * inv_s - mean * mean
    var = jnp.maximum(var, 0.0)
    y = (acc - mean) * jax.lax.rsqrt(var + 1e-5)
    y = jnp.where(y >= 0, y, 0.01 * y)
    o_ref[0] = y.astype(o_ref.dtype)


# --------------------------------------------------------------------------
# pallas_call wrappers
# --------------------------------------------------------------------------
_CPARAMS = pltpu.CompilerParams(
    dimension_semantics=("parallel",),          # sample axis -> megacore on v7x
    vmem_limit_bytes=32 * 1024 * 1024,
)


def _conv_stride2_fused(xm, wt, b, out_dtype):
    N, K, S = xm.shape
    Cout = wt.shape[0]
    return pl.pallas_call(
        _sconv_in_lrelu_kernel,
        out_shape=jax.ShapeDtypeStruct((N, Cout, S), out_dtype),
        grid=(N,),
        in_specs=[
            pl.BlockSpec((1, K, S), lambda n: (n, 0, 0)),
            pl.BlockSpec((Cout, K), lambda n: (0, 0)),
            pl.BlockSpec((Cout, 1), lambda n: (0, 0)),
        ],
        out_specs=pl.BlockSpec((1, Cout, S), lambda n: (n, 0, 0)),
        compiler_params=_CPARAMS,
    )(xm, wt, b)


def _conv3x3_fused(xflat, wt, b, mask, HP, WP, R, S, out_dtype):
    N, C, SP2 = xflat.shape
    Cout = wt.shape[1]
    kernel = functools.partial(_conv3_in_lrelu_kernel, HP=HP, WP=WP, R=R, S=S)
    return pl.pallas_call(
        kernel,
        out_shape=jax.ShapeDtypeStruct((N, Cout, R), out_dtype),
        grid=(N,),
        in_specs=[
            pl.BlockSpec((1, C, SP2), lambda n: (n, 0, 0)),
            pl.BlockSpec((27, Cout, C), lambda n: (0, 0, 0)),
            pl.BlockSpec((Cout, 1), lambda n: (0, 0)),
            pl.BlockSpec((1, R), lambda n: (0, 0)),
        ],
        out_specs=pl.BlockSpec((1, Cout, R), lambda n: (n, 0, 0)),
        compiler_params=_CPARAMS,
    )(xflat, wt, b, mask)
    # TODO(synk): for large volumes (whole-sample block > VMEM on v7x) tile the flat
    # spatial axis with an "arbitrary" grid axis + two-pass sum/sumsq stats scratch.


# --------------------------------------------------------------------------
# Layout glue (plain JAX, one cheap pass each; everything stays NCDHW)
# --------------------------------------------------------------------------
def _space_to_depth2_cf(x):
    # x: (N, Cin, D, H, W) -> (N, 8*Cin, D2*H2*W2) bf16, K ordered (kd, kh, kw, ci)
    N, Cin, D, H, W = x.shape
    D2, H2, W2 = D // 2, H // 2, W // 2
    xr = x.reshape(N, Cin, D2, 2, H2, 2, W2, 2)
    xt = xr.transpose(0, 3, 5, 7, 1, 2, 4, 6)                # (N, kd, kh, kw, Cin, d2, h2, w2)
    return xt.reshape(N, 8 * Cin, D2 * H2 * W2).astype(jnp.bfloat16)


def _pad_flatten(y, SP2):
    # y: (N, C, D, H, W) -> zero-pad spatial by 1, flatten, pad rows to SP2, cast bf16
    N, C, D, H, W = y.shape
    yp = jnp.pad(y, ((0, 0), (0, 0), (1, 1), (1, 1), (1, 1)))
    yf = yp.reshape(N, C, (D + 2) * (H + 2) * (W + 2))
    yf = jnp.pad(yf, ((0, 0), (0, 0), (0, SP2 - yf.shape[2])))
    return yf.astype(jnp.bfloat16)


# --------------------------------------------------------------------------
# down.forward
# --------------------------------------------------------------------------
def down_forward(x_ncdhw, params):
    """x: (N, Cin, D, H, W) float32 -> (N, Cout, D/2, H/2, W/2) float32."""
    N, Cin, D, H, W = x_ncdhw.shape
    Cout = params["w1"].shape[0]
    D2, H2, W2 = D // 2, H // 2, W // 2
    HP, WP = H2 + 2, W2 + 2
    S = D2 * H2 * W2                      # valid output voxels per sample
    R = D2 * HP * WP                      # conv-output rows computed in padded-flat indexing
    SP = (D2 + 2) * HP * WP               # padded-flat rows
    SP2 = _round_up(SP + 2 * WP + 2, 128)  # + max tap offset, rounded up

    # Weights prepared once (tiny): bf16 for the MXU, f32 accumulation in-kernel.
    w1t = params["w1"].transpose(0, 2, 3, 4, 1).reshape(Cout, 8 * Cin).astype(jnp.bfloat16)
    b1 = params["b1"].reshape(Cout, 1).astype(jnp.float32)
    w2t = params["w2"].transpose(2, 3, 4, 0, 1).reshape(27, Cout, Cout).astype(jnp.bfloat16)
    b2 = params["b2"].reshape(Cout, 1).astype(jnp.float32)
    w3t = params["w3"].transpose(2, 3, 4, 0, 1).reshape(27, Cout, Cout).astype(jnp.bfloat16)
    b3 = params["b3"].reshape(Cout, 1).astype(jnp.float32)

    # Mask of valid conv-output rows in padded-flat indexing (shared by both 3x3x3 convs).
    r = jnp.arange(R)
    mask = (((r // WP) % HP < H2) & (r % WP < W2)).astype(jnp.float32).reshape(1, R)

    # Stage 1: Conv3d(k=2, s=2) + bias + InstanceNorm + LeakyReLU, fully fused.
    xm = _space_to_depth2_cf(x_ncdhw)                        # (N, 8*Cin, S) bf16
    y = _conv_stride2_fused(xm, w1t, b1, jnp.bfloat16)       # (N, Cout, S)
    y = y.reshape(N, Cout, D2, H2, W2)

    # Stages 2-3: Conv3d(3,1,p=1) + bias + IN + LeakyReLU, fused (tap-accumulated, no im2col).
    for wt, bt, odt in ((w2t, b2, jnp.bfloat16), (w3t, b3, jnp.float32)):
        yf = _pad_flatten(y, SP2)                            # (N, Cout, SP2) bf16
        of = _conv3x3_fused(yf, wt, bt, mask, HP, WP, R, S, odt)
        y = of.reshape(N, Cout, D2, HP, WP)[:, :, :, :H2, :W2]

    # Dropout(p=0.5): identity in eval mode.
    # TODO(synk): training-mode dropout would use pltpu.prng_random_bits + 1/(1-p) scaling.
    return y.astype(jnp.float32)                             # already NCDHW


def init_params(key, in_ch, out_ch):
    ks = jax.random.split(key, 6)
    return {
        "w1": jax.random.normal(ks[0], (out_ch, in_ch, 2, 2, 2), jnp.float32) * 0.1,
        "b1": jax.random.normal(ks[1], (out_ch,), jnp.float32) * 0.01,
        "w2": jax.random.normal(ks[2], (out_ch, out_ch, 3, 3, 3), jnp.float32) * 0.1,
        "b2": jax.random.normal(ks[3], (out_ch,), jnp.float32) * 0.01,
        "w3": jax.random.normal(ks[4], (out_ch, out_ch, 3, 3, 3), jnp.float32) * 0.1,
        "b3": jax.random.normal(ks[5], (out_ch,), jnp.float32) * 0.01,
    }


if __name__ == "__main__":
    key = jax.random.PRNGKey(0)
    kx, kp = jax.random.split(key)

    N, in_ch, out_ch = 2, 4, 8
    D = H = W = 16
    x = jax.random.normal(kx, (N, in_ch, D, H, W), jnp.float32)
    params = init_params(kp, in_ch, out_ch)

    fwd = jax.jit(functools.partial(down_forward, params=params))
    out = jax.block_until_ready(fwd(x))
    assert out.shape == (N, out_ch, D // 2, H // 2, W // 2), out.shape
    assert out.dtype == jnp.float32
    assert bool(jnp.all(jnp.isfinite(out)))
    print("KERNEL_OK")
</pallas_src>

<mosaic_0001>
module attributes {stable_mosaic.version = 11 : i64} {
  func.func @_sconv_in_lrelu_kernel(%arg0: i32, %arg1: memref<1x32x512xbf16, #tpu.memory_space<vmem>>, %arg2: memref<8x32xbf16, #tpu.memory_space<vmem>>, %arg3: memref<8x1xf32, #tpu.memory_space<vmem>>, %arg4: memref<1x8x512xbf16, #tpu.memory_space<vmem>>) attributes {dimension_semantics = [#tpu.dimension_semantics<parallel>], iteration_bounds = array<i64: 2>, scalar_prefetch = 0 : i64, scratch_operands = 0 : i64, tpu.core_type = #tpu.core_type<tc>, window_params = [{transform_indices = @transform_0, window_bounds = array<i64: 1, 32, 512>}, {pipeline_mode = #tpu.pipeline_mode<synchronous>, transform_indices = @transform_1, window_bounds = array<i64: 8, 32>}, {pipeline_mode = #tpu.pipeline_mode<synchronous>, transform_indices = @transform_2, window_bounds = array<i64: 8, 1>}, {transform_indices = @transform_3, window_bounds = array<i64: 1, 8, 512>}]} {
    %c0 = arith.constant 0 : index
    %c0_0 = arith.constant 0 : index
    %0 = vector.load %arg2[%c0, %c0_0] : memref<8x32xbf16, #tpu.memory_space<vmem>>, vector<8x32xbf16>
    %c0_1 = arith.constant 0 : index
    %c0_2 = arith.constant 0 : index
    %c0_3 = arith.constant 0 : index
    %1 = vector.load %arg1[%c0_1, %c0_2, %c0_3] : memref<1x32x512xbf16, #tpu.memory_space<vmem>>, vector<1x32x512xbf16>
    %2 = vector.shape_cast %1 : vector<1x32x512xbf16> to vector<32x512xbf16>
    %cst = arith.constant dense<0.000000e+00> : vector<8x512xf32>
    %3 = tpu.matmul %0, %2, %cst {dimension_numbers = #tpu.dot_dimension_numbers<[1], [0], [0], [1], [0, 0, 1, 1], [], []>} : vector<8x32xbf16>, vector<32x512xbf16>, vector<8x512xf32> -> vector<8x512xf32>
    %c0_4 = arith.constant 0 : index
    %c0_5 = arith.constant 0 : index
    %4 = vector.load %arg3[%c0_4, %c0_5] : memref<8x1xf32, #tpu.memory_space<vmem>>, vector<8x1xf32>
    %5 = vector.broadcast %4 : vector<8x1xf32> to vector<8x512xf32>
    %6 = arith.addf %3, %5 : vector<8x512xf32>
    %cst_6 = arith.constant dense<0.000000e+00> : vector<8xf32>
    %7 = vector.multi_reduction <add>, %6, %cst_6 [1] : vector<8x512xf32> to vector<8xf32>
    %8 = vector.shape_cast %7 : vector<8xf32> to vector<8x1xf32>
    %cst_7 = arith.constant 0.001953125 : f32
    %9 = vector.broadcast %cst_7 : f32 to vector<8x1xf32>
    %10 = arith.mulf %8, %9 : vector<8x1xf32>
    %11 = arith.mulf %6, %6 : vector<8x512xf32>
    %cst_8 = arith.constant dense<0.000000e+00> : vector<8xf32>
    %12 = vector.multi_reduction <add>, %11, %cst_8 [1] : vector<8x512xf32> to vector<8xf32>
    %13 = vector.shape_cast %12 : vector<8xf32> to vector<8x1xf32>
    %cst_9 = arith.constant 0.001953125 : f32
    %14 = vector.broadcast %cst_9 : f32 to vector<8x1xf32>
    %15 = arith.mulf %13, %14 : vector<8x1xf32>
    %16 = arith.mulf %10, %10 : vector<8x1xf32>
    %17 = arith.subf %15, %16 : vector<8x1xf32>
    %cst_10 = arith.constant 0.000000e+00 : f32
    %18 = vector.broadcast %cst_10 : f32 to vector<8x1xf32>
    %19 = arith.maximumf %17, %18 : vector<8x1xf32>
    %20 = vector.broadcast %10 : vector<8x1xf32> to vector<8x512xf32>
    %21 = arith.subf %6, %20 : vector<8x512xf32>
    %cst_11 = arith.constant 9.99999974E-6 : f32
    %22 = vector.broadcast %cst_11 : f32 to vector<8x1xf32>
    %23 = arith.addf %19, %22 : vector<8x1xf32>
    %24 = math.rsqrt %23 : vector<8x1xf32>
    %25 = vector.broadcast %24 : vector<8x1xf32> to vector<8x512xf32>
    %26 = arith.mulf %21, %25 : vector<8x512xf32>
    %cst_12 = arith.constant 0.000000e+00 : f32
    %27 = vector.broadcast %cst_12 : f32 to vector<8x512xf32>
    %28 = arith.cmpf oge, %26, %27 : vector<8x512xf32>
    %cst_13 = arith.constant 0.00999999977 : f32
    %29 = vector.broadcast %cst_13 : f32 to vector<8x512xf32>
    %30 = arith.mulf %29, %26 : vector<8x512xf32>
    %31 = arith.select %28, %26, %30 : vector<8x512xi1>, vector<8x512xf32>
    %32 = arith.truncf %31 : vector<8x512xf32> to vector<8x512xbf16>
    %c0_14 = arith.constant 0 : index
    %c0_15 = arith.constant 0 : index
    %c0_16 = arith.constant 0 : index
    %33 = vector.load %arg4[%c0_14, %c0_15, %c0_16] : memref<1x8x512xbf16, #tpu.memory_space<vmem>>, vector<1x8x512xbf16>
    %34 = vector.shape_cast %33 : vector<1x8x512xbf16> to vector<8x512xbf16>
    %35 = vector.shape_cast %32 : vector<8x512xbf16> to vector<1x8x512xbf16>
    tpu.vector_store %arg4[%c0_14, %c0_15, %c0_16], %35 {strides = array<i32>} : memref<1x8x512xbf16, #tpu.memory_space<vmem>>, vector<1x8x512xbf16>,
    return
  }
  func.func @transform_0(%arg0: i32) -> (i32, i32, i32) {
    %c0_i32 = arith.constant 0 : i32
    %c0_i32_0 = arith.constant 0 : i32
    %c0_i32_1 = arith.constant 0 : i32
    return %arg0, %c0_i32, %c0_i32_0 : i32, i32, i32
  }
  func.func @transform_1(%arg0: i32) -> (i32, i32) {
    %c0_i32 = arith.constant 0 : i32
    %c0_i32_0 = arith.constant 0 : i32
    %c0_i32_1 = arith.constant 0 : i32
    return %c0_i32, %c0_i32_0 : i32, i32
  }
  func.func @transform_2(%arg0: i32) -> (i32, i32) {
    %c0_i32 = arith.constant 0 : i32
    %c0_i32_0 = arith.constant 0 : i32
    %c0_i32_1 = arith.constant 0 : i32
    return %c0_i32, %c0_i32_0 : i32, i32
  }
  func.func @transform_3(%arg0: i32) -> (i32, i32, i32) {
    %c0_i32 = arith.constant 0 : i32
    %c0_i32_0 = arith.constant 0 : i32
    %c0_i32_1 = arith.constant 0 : i32
    return %arg0, %c0_i32, %c0_i32_0 : i32, i32, i32
  }
}

module attributes {stable_mosaic.version = 11 : i64} {
  func.func @_conv3_in_lrelu_kernel(%arg0: i32, %arg1: memref<1x8x1024xbf16, #tpu.memory_space<vmem>>, %arg2: memref<27x8x8xbf16, #tpu.memory_space<vmem>>, %arg3: memref<8x1xf32, #tpu.memory_space<vmem>>, %arg4: memref<1x800xf32, #tpu.memory_space<vmem>>, %arg5: memref<1x8x800xbf16, #tpu.memory_space<vmem>>) attributes {dimension_semantics = [#tpu.dimension_semantics<parallel>], iteration_bounds = array<i64: 2>, scalar_prefetch = 0 : i64, scratch_operands = 0 : i64, tpu.core_type = #tpu.core_type<tc>, window_params = [{transform_indices = @transform_0, window_bounds = array<i64: 1, 8, 1024>}, {pipeline_mode = #tpu.pipeline_mode<synchronous>, transform_indices = @transform_1, window_bounds = array<i64: 27, 8, 8>}, {pipeline_mode = #tpu.pipeline_mode<synchronous>, transform_indices = @transform_2, window_bounds = array<i64: 8, 1>}, {pipeline_mode = #tpu.pipeline_mode<synchronous>, transform_indices = @transform_3, window_bounds = array<i64: 1, 800>}, {transform_indices = @transform_4, window_bounds = array<i64: 1, 8, 800>}]} {
    %cst = arith.constant 0.000000e+00 : f32
    %0 = vector.broadcast %cst : f32 to vector<8x800xf32>
    %c0 = arith.constant 0 : index
    %c0_0 = arith.constant 0 : index
    %c0_1 = arith.constant 0 : index
    %1 = vector.load %arg1[%c0, %c0_0, %c0_1] : memref<1x8x1024xbf16, #tpu.memory_space<vmem>>, vector<1x8x800xbf16>
    %2 = vector.shape_cast %1 : vector<1x8x800xbf16> to vector<8x800xbf16>
    %c0_2 = arith.constant 0 : index
    %c0_3 = arith.constant 0 : index
    %c0_4 = arith.constant 0 : index
    %3 = vector.load %arg2[%c0_2, %c0_3, %c0_4] : memref<27x8x8xbf16, #tpu.memory_space<vmem>>, vector<1x8x8xbf16>
    %4 = vector.shape_cast %3 : vector<1x8x8xbf16> to vector<8x8xbf16>
    %cst_5 = arith.constant dense<0.000000e+00> : vector<8x800xf32>
    %5 = tpu.matmul %4, %2, %cst_5 {dimension_numbers = #tpu.dot_dimension_numbers<[1], [0], [0], [1], [0, 0, 1, 1], [], []>} : vector<8x8xbf16>, vector<8x800xbf16>, vector<8x800xf32> -> vector<8x800xf32>
    %6 = arith.addf %0, %5 : vector<8x800xf32>
    %c0_6 = arith.constant 0 : index
    %c0_7 = arith.constant 0 : index
    %c1 = arith.constant 1 : index
    %7 = vector.load %arg1[%c0_6, %c0_7, %c1] : memref<1x8x1024xbf16, #tpu.memory_space<vmem>>, vector<1x8x800xbf16>
    %8 = vector.shape_cast %7 : vector<1x8x800xbf16> to vector<8x800xbf16>
    %c1_8 = arith.constant 1 : index
    %c0_9 = arith.constant 0 : index
    %c0_10 = arith.constant 0 : index
    %9 = vector.load %arg2[%c1_8, %c0_9, %c0_10] : memref<27x8x8xbf16, #tpu.memory_space<vmem>>, vector<1x8x8xbf16>
    %10 = vector.shape_cast %9 : vector<1x8x8xbf16> to vector<8x8xbf16>
    %cst_11 = arith.constant dense<0.000000e+00> : vector<8x800xf32>
    %11 = tpu.matmul %10, %8, %cst_11 {dimension_numbers = #tpu.dot_dimension_numbers<[1], [0], [0], [1], [0, 0, 1, 1], [], []>} : vector<8x8xbf16>, vector<8x800xbf16>, vector<8x800xf32> -> vector<8x800xf32>
    %12 = arith.addf %6, %11 : vector<8x800xf32>
    %c0_12 = arith.constant 0 : index
    %c0_13 = arith.constant 0 : index
    %c2 = arith.constant 2 : index
    %13 = vector.load %arg1[%c0_12, %c0_13, %c2] : memref<1x8x1024xbf16, #tpu.memory_space<vmem>>, vector<1x8x800xbf16>
    %14 = vector.shape_cast %13 : vector<1x8x800xbf16> to vector<8x800xbf16>
    %c2_14 = arith.constant 2 : index
    %c0_15 = arith.constant 0 : index
    %c0_16 = arith.constant 0 : index
    %15 = vector.load %arg2[%c2_14, %c0_15, %c0_16] : memref<27x8x8xbf16, #tpu.memory_space<vmem>>, vector<1x8x8xbf16>
    %16 = vector.shape_cast %15 : vector<1x8x8xbf16> to vector<8x8xbf16>
    %cst_17 = arith.constant dense<0.000000e+00> : vector<8x800xf32>
    %17 = tpu.matmul %16, %14, %cst_17 {dimension_numbers = #tpu.dot_dimension_numbers<[1], [0], [0], [1], [0, 0, 1, 1], [], []>} : vector<8x8xbf16>, vector<8x800xbf16>, vector<8x800xf32> -> vector<8x800xf32>
    %18 = arith.addf %12, %17 : vector<8x800xf32>
    %c0_18 = arith.constant 0 : index
    %c0_19 = arith.constant 0 : index
    %c10 = arith.constant 10 : index
    %19 = vector.load %arg1[%c0_18, %c0_19, %c10] : memref<1x8x1024xbf16, #tpu.memory_space<vmem>>, vector<1x8x800xbf16>
    %20 = vector.shape_cast %19 : vector<1x8x800xbf16> to vector<8x800xbf16>
    %c3 = arith.constant 3 : index
    %c0_20 = arith.constant 0 : index
    %c0_21 = arith.constant 0 : index
    %21 = vector.load %arg2[%c3, %c0_20, %c0_21] : memref<27x8x8xbf16, #tpu.memory_space<vmem>>, vector<1x8x8xbf16>
    %22 = vector.shape_cast %21 : vector<1x8x8xbf16> to vector<8x8xbf16>
    %cst_22 = arith.constant dense<0.000000e+00> : vector<8x800xf32>
    %23 = tpu.matmul %22, %20, %cst_22 {dimension_numbers = #tpu.dot_dimension_numbers<[1], [0], [0], [1], [0, 0, 1, 1], [], []>} : vector<8x8xbf16>, vector<8x800xbf16>, vector<8x800xf32> -> vector<8x800xf32>
    %24 = arith.addf %18, %23 : vector<8x800xf32>
    %c0_23 = arith.constant 0 : index
    %c0_24 = arith.constant 0 : index
    %c11 = arith.constant 11 : index
    %25 = vector.load %arg1[%c0_23, %c0_24, %c11] : memref<1x8x1024xbf16, #tpu.memory_space<vmem>>, vector<1x8x800xbf16>
    %26 = vector.shape_cast %25 : vector<1x8x800xbf16> to vector<8x800xbf16>
    %c4 = arith.constant 4 : index
    %c0_25 = arith.constant 0 : index
    %c0_26 = arith.constant 0 : index
    %27 = vector.load %arg2[%c4, %c0_25, %c0_26] : memref<27x8x8xbf16, #tpu.memory_space<vmem>>, vector<1x8x8xbf16>
    %28 = vector.shape_cast %27 : vector<1x8x8xbf16> to vector<8x8xbf16>
    %cst_27 = arith.constant dense<0.000000e+00> : vector<8x800xf32>
    %29 = tpu.matmul %28, %26, %cst_27 {dimension_numbers = #tpu.dot_dimension_numbers<[1], [0], [0], [1], [0, 0, 1, 1], [], []>} : vector<8x8xbf16>, vector<8x800xbf16>, vector<8x800xf32> -> vector<8x800xf32>
    %30 = arith.addf %24, %29 : vector<8x800xf32>
    %c0_28 = arith.constant 0 : index
    %c0_29 = arith.constant 0 : index
    %c12 = arith.constant 12 : index
    %31 = vector.load %arg1[%c0_28, %c0_29, %c12] : memref<1x8x1024xbf16, #tpu.memory_space<vmem>>, vector<1x8x800xbf16>
    %32 = vector.shape_cast %31 : vector<1x8x800xbf16> to vector<8x800xbf16>
    %c5 = arith.constant 5 : index
    %c0_30 = arith.constant 0 : index
    %c0_31 = arith.constant 0 : index
    %33 = vector.load %arg2[%c5, %c0_30, %c0_31] : memref<27x8x8xbf16, #tpu.memory_space<vmem>>, vector<1x8x8xbf16>
    %34 = vector.shape_cast %33 : vector<1x8x8xbf16> to vector<8x8xbf16>
    %cst_32 = arith.constant dense<0.000000e+00> : vector<8x800xf32>
    %35 = tpu.matmul %34, %32, %cst_32 {dimension_numbers = #tpu.dot_dimension_numbers<[1], [0], [0], [1], [0, 0, 1, 1], [], []>} : vector<8x8xbf16>, vector<8x800xbf16>, vector<8x800xf32> -> vector<8x800xf32>
    %36 = arith.addf %30, %35 : vector<8x800xf32>
    %c0_33 = arith.constant 0 : index
    %c0_34 = arith.constant 0 : index
    %c20 = arith.constant 20 : index
    %37 = vector.load %arg1[%c0_33, %c0_34, %c20] : memref<1x8x1024xbf16, #tpu.memory_space<vmem>>, vector<1x8x800xbf16>
    %38 = vector.shape_cast %37 : vector<1x8x800xbf16> to vector<8x800xbf16>
    %c6 = arith.constant 6 : index
    %c0_35 = arith.constant 0 : index
    %c0_36 = arith.constant 0 : index
    %39 = vector.load %arg2[%c6, %c0_35, %c0_36] : memref<27x8x8xbf16, #tpu.memory_space<vmem>>, vector<1x8x8xbf16>
    %40 = vector.shape_cast %39 : vector<1x8x8xbf16> to vector<8x8xbf16>
    %cst_37 = arith.constant dense<0.000000e+00> : vector<8x800xf32>
    %41 = tpu.matmul %40, %38, %cst_37 {dimension_numbers = #tpu.dot_dimension_numbers<[1], [0], [0], [1], [0, 0, 1, 1], [], []>} : vector<8x8xbf16>, vector<8x800xbf16>, vector<8x800xf32> -> vector<8x800xf32>
    %42 = arith.addf %36, %41 : vector<8x800xf32>
    %c0_38 = arith.constant 0 : index
    %c0_39 = arith.constant 0 : index
    %c21 = arith.constant 21 : index
    %43 = vector.load %arg1[%c0_38, %c0_39, %c21] : memref<1x8x1024xbf16, #tpu.memory_space<vmem>>, vector<1x8x800xbf16>
    %44 = vector.shape_cast %43 : vector<1x8x800xbf16> to vector<8x800xbf16>
    %c7 = arith.constant 7 : index
    %c0_40 = arith.constant 0 : index
    %c0_41 = arith.constant 0 : index
    %45 = vector.load %arg2[%c7, %c0_40, %c0_41] : memref<27x8x8xbf16, #tpu.memory_space<vmem>>, vector<1x8x8xbf16>
    %46 = vector.shape_cast %45 : vector<1x8x8xbf16> to vector<8x8xbf16>
    %cst_42 = arith.constant dense<0.000000e+00> : vector<8x800xf32>
    %47 = tpu.matmul %46, %44, %cst_42 {dimension_numbers = #tpu.dot_dimension_numbers<[1], [0], [0], [1], [0, 0, 1, 1], [], []>} : vector<8x8xbf16>, vector<8x800xbf16>, vector<8x800xf32> -> vector<8x800xf32>
    %48 = arith.addf %42, %47 : vector<8x800xf32>
    %c0_43 = arith.constant 0 : index
    %c0_44 = arith.constant 0 : index
    %c22 = arith.constant 22 : index
    %49 = vector.load %arg1[%c0_43, %c0_44, %c22] : memref<1x8x1024xbf16, #tpu.memory_space<vmem>>, vector<1x8x800xbf16>
    %50 = vector.shape_cast %49 : vector<1x8x800xbf16> to vector<8x800xbf16>
    %c8 = arith.constant 8 : index
    %c0_45 = arith.constant 0 : index
    %c0_46 = arith.constant 0 : index
    %51 = vector.load %arg2[%c8, %c0_45, %c0_46] : memref<27x8x8xbf16, #tpu.memory_space<vmem>>, vector<1x8x8xbf16>
    %52 = vector.shape_cast %51 : vector<1x8x8xbf16> to vector<8x8xbf16>
    %cst_47 = arith.constant dense<0.000000e+00> : vector<8x800xf32>
    %53 = tpu.matmul %52, %50, %cst_47 {dimension_numbers = #tpu.dot_dimension_numbers<[1], [0], [0], [1], [0, 0, 1, 1], [], []>} : vector<8x8xbf16>, vector<8x800xbf16>, vector<8x800xf32> -> vector<8x800xf32>
    %54 = arith.addf %48, %53 : vector<8x800xf32>
    %c0_48 = arith.constant 0 : index
    %c0_49 = arith.constant 0 : index
    %c100 = arith.constant 100 : index
    %55 = vector.load %arg1[%c0_48, %c0_49, %c100] : memref<1x8x1024xbf16, #tpu.memory_space<vmem>>, vector<1x8x800xbf16>
    %56 = vector.shape_cast %55 : vector<1x8x800xbf16> to vector<8x800xbf16>
    %c9 = arith.constant 9 : index
    %c0_50 = arith.constant 0 : index
    %c0_51 = arith.constant 0 : index
    %57 = vector.load %arg2[%c9, %c0_50, %c0_51] : memref<27x8x8xbf16, #tpu.memory_space<vmem>>, vector<1x8x8xbf16>
    %58 = vector.shape_cast %57 : vector<1x8x8xbf16> to vector<8x8xbf16>
    %cst_52 = arith.constant dense<0.000000e+00> : vector<8x800xf32>
    %59 = tpu.matmul %58, %56, %cst_52 {dimension_numbers = #tpu.dot_dimension_numbers<[1], [0], [0], [1], [0, 0, 1, 1], [], []>} : vector<8x8xbf16>, vector<8x800xbf16>, vector<8x800xf32> -> vector<8x800xf32>
    %60 = arith.addf %54, %59 : vector<8x800xf32>
    %c0_53 = arith.constant 0 : index
    %c0_54 = arith.constant 0 : index
    %c101 = arith.constant 101 : index
    %61 = vector.load %arg1[%c0_53, %c0_54, %c101] : memref<1x8x1024xbf16, #tpu.memory_space<vmem>>, vector<1x8x800xbf16>
    %62 = vector.shape_cast %61 : vector<1x8x800xbf16> to vector<8x800xbf16>
    %c10_55 = arith.constant 10 : index
    %c0_56 = arith.constant 0 : index
    %c0_57 = arith.constant 0 : index
    %63 = vector.load %arg2[%c10_55, %c0_56, %c0_57] : memref<27x8x8xbf16, #tpu.memory_space<vmem>>, vector<1x8x8xbf16>
    %64 = vector.shape_cast %63 : vector<1x8x8xbf16> to vector<8x8xbf16>
    %cst_58 = arith.constant dense<0.000000e+00> : vector<8x800xf32>
    %65 = tpu.matmul %64, %62, %cst_58 {dimension_numbers = #tpu.dot_dimension_numbers<[1], [0], [0], [1], [0, 0, 1, 1], [], []>} : vector<8x8xbf16>, vector<8x800xbf16>, vector<8x800xf32> -> vector<8x800xf32>
    %66 = arith.addf %60, %65 : vector<8x800xf32>
    %c0_59 = arith.constant 0 : index
    %c0_60 = arith.constant 0 : index
    %c102 = arith.constant 102 : index
    %67 = vector.load %arg1[%c0_59, %c0_60, %c102] : memref<1x8x1024xbf16, #tpu.memory_space<vmem>>, vector<1x8x800xbf16>
    %68 = vector.shape_cast %67 : vector<1x8x800xbf16> to vector<8x800xbf16>
    %c11_61 = arith.constant 11 : index
    %c0_62 = arith.constant 0 : index
    %c0_63 = arith.constant 0 : index
    %69 = vector.load %arg2[%c11_61, %c0_62, %c0_63] : memref<27x8x8xbf16, #tpu.memory_space<vmem>>, vector<1x8x8xbf16>
    %70 = vector.shape_cast %69 : vector<1x8x8xbf16> to vector<8x8xbf16>
    %cst_64 = arith.constant dense<0.000000e+00> : vector<8x800xf32>
    %71 = tpu.matmul %70, %68, %cst_64 {dimension_numbers = #tpu.dot_dimension_numbers<[1], [0], [0], [1], [0, 0, 1, 1], [], []>} : vector<8x8xbf16>, vector<8x800xbf16>, vector<8x800xf32> -> vector<8x800xf32>
    %72 = arith.addf %66, %71 : vector<8x800xf32>
    %c0_65 = arith.constant 0 : index
    %c0_66 = arith.constant 0 : index
    %c110 = arith.constant 110 : index
    %73 = vector.load %arg1[%c0_65, %c0_66, %c110] : memref<1x8x1024xbf16, #tpu.memory_space<vmem>>, vector<1x8x800xbf16>
    %74 = vector.shape_cast %73 : vector<1x8x800xbf16> to vector<8x800xbf16>
    %c12_67 = arith.constant 12 : index
    %c0_68 = arith.constant 0 : index
    %c0_69 = arith.constant 0 : index
    %75 = vector.load %arg2[%c12_67, %c0_68, %c0_69] : memref<27x8x8xbf16, #tpu.memory_space<vmem>>, vector<1x8x8xbf16>
    %76 = vector.shape_cast %75 : vector<1x8x8xbf16> to vector<8x8xbf16>
    %cst_70 = arith.constant dense<0.000000e+00> : vector<8x800xf32>
    %77 = tpu.matmul %76, %74, %cst_70 {dimension_numbers = #tpu.dot_dimension_numbers<[1], [0], [0], [1], [0, 0, 1, 1], [], []>} : vector<8x8xbf16>, vector<8x800xbf16>, vector<8x800xf32> -> vector<8x800xf32>
    %78 = arith.addf %72, %77 : vector<8x800xf32>
    %c0_71 = arith.constant 0 : index
    %c0_72 = arith.constant 0 : index
    %c111 = arith.constant 111 : index
    %79 = vector.load %arg1[%c0_71, %c0_72, %c111] : memref<1x8x1024xbf16, #tpu.memory_space<vmem>>, vector<1x8x800xbf16>
    %80 = vector.shape_cast %79 : vector<1x8x800xbf16> to vector<8x800xbf16>
    %c13 = arith.constant 13 : index
    %c0_73 = arith.constant 0 : index
    %c0_74 = arith.constant 0 : index
    %81 = vector.load %arg2[%c13, %c0_73, %c0_74] : memref<27x8x8xbf16, #tpu.memory_space<vmem>>, vector<1x8x8xbf16>
    %82 = vector.shape_cast %81 : vector<1x8x8xbf16> to vector<8x8xbf16>
    %cst_75 = arith.constant dense<0.000000e+00> : vector<8x800xf32>
    %83 = tpu.matmul %82, %80, %cst_75 {dimension_numbers = #tpu.dot_dimension_numbers<[1], [0], [0], [1], [0, 0, 1, 1], [], []>} : vector<8x8xbf16>, vector<8x800xbf16>, vector<8x800xf32> -> vector<8x800xf32>
    %84 = arith.addf %78, %83 : vector<8x800xf32>
    %c0_76 = arith.constant 0 : index
    %c0_77 = arith.constant 0 : index
    %c112 = arith.constant 112 : index
    %85 = vector.load %arg1[%c0_76, %c0_77, %c112] : memref<1x8x1024xbf16, #tpu.memory_space<vmem>>, vector<1x8x800xbf16>
    %86 = vector.shape_cast %85 : vector<1x8x800xbf16> to vector<8x800xbf16>
    %c14 = arith.constant 14 : index
    %c0_78 = arith.constant 0 : index
    %c0_79 = arith.constant 0 : index
    %87 = vector.load %arg2[%c14, %c0_78, %c0_79] : memref<27x8x8xbf16, #tpu.memory_space<vmem>>, vector<1x8x8xbf16>
    %88 = vector.shape_cast %87 : vector<1x8x8xbf16> to vector<8x8xbf16>
    %cst_80 = arith.constant dense<0.000000e+00> : vector<8x800xf32>
    %89 = tpu.matmul %88, %86, %cst_80 {dimension_numbers = #tpu.dot_dimension_numbers<[1], [0], [0], [1], [0, 0, 1, 1], [], []>} : vector<8x8xbf16>, vector<8x800xbf16>, vector<8x800xf32> -> vector<8x800xf32>
    %90 = arith.addf %84, %89 : vector<8x800xf32>
    %c0_81 = arith.constant 0 : index
    %c0_82 = arith.constant 0 : index
    %c120 = arith.constant 120 : index
    %91 = vector.load %arg1[%c0_81, %c0_82, %c120] : memref<1x8x1024xbf16, #tpu.memory_space<vmem>>, vector<1x8x800xbf16>
    %92 = vector.shape_cast %91 : vector<1x8x800xbf16> to vector<8x800xbf16>
    %c15 = arith.constant 15 : index
    %c0_83 = arith.constant 0 : index
    %c0_84 = arith.constant 0 : index
    %93 = vector.load %arg2[%c15, %c0_83, %c0_84] : memref<27x8x8xbf16, #tpu.memory_space<vmem>>, vector<1x8x8xbf16>
    %94 = vector.shape_cast %93 : vector<1x8x8xbf16> to vector<8x8xbf16>
    %cst_85 = arith.constant dense<0.000000e+00> : vector<8x800xf32>
    %95 = tpu.matmul %94, %92, %cst_85 {dimension_numbers = #tpu.dot_dimension_numbers<[1], [0], [0], [1], [0, 0, 1, 1], [], []>} : vector<8x8xbf16>, vector<8x800xbf16>, vector<8x800xf32> -> vector<8x800xf32>
    %96 = arith.addf %90, %95 : vector<8x800xf32>
    %c0_86 = arith.constant 0 : index
    %c0_87 = arith.constant 0 : index
    %c121 = arith.constant 121 : index
    %97 = vector.load %arg1[%c0_86, %c0_87, %c121] : memref<1x8x1024xbf16, #tpu.memory_space<vmem>>, vector<1x8x800xbf16>
    %98 = vector.shape_cast %97 : vector<1x8x800xbf16> to vector<8x800xbf16>
    %c16 = arith.constant 16 : index
    %c0_88 = arith.constant 0 : index
    %c0_89 = arith.constant 0 : index
    %99 = vector.load %arg2[%c16, %c0_88, %c0_89] : memref<27x8x8xbf16, #tpu.memory_space<vmem>>, vector<1x8x8xbf16>
    %100 = vector.shape_cast %99 : vector<1x8x8xbf16> to vector<8x8xbf16>
    %cst_90 = arith.constant dense<0.000000e+00> : vector<8x800xf32>
    %101 = tpu.matmul %100, %98, %cst_90 {dimension_numbers = #tpu.dot_dimension_numbers<[1], [0], [0], [1], [0, 0, 1, 1], [], []>} : vector<8x8xbf16>, vector<8x800xbf16>, vector<8x800xf32> -> vector<8x800xf32>
    %102 = arith.addf %96, %101 : vector<8x800xf32>
    %c0_91 = arith.constant 0 : index
    %c0_92 = arith.constant 0 : index
    %c122 = arith.constant 122 : index
    %103 = vector.load %arg1[%c0_91, %c0_92, %c122] : memref<1x8x1024xbf16, #tpu.memory_space<vmem>>, vector<1x8x800xbf16>
    %104 = vector.shape_cast %103 : vector<1x8x800xbf16> to vector<8x800xbf16>
    %c17 = arith.constant 17 : index
    %c0_93 = arith.constant 0 : index
    %c0_94 = arith.constant 0 : index
    %105 = vector.load %arg2[%c17, %c0_93, %c0_94] : memref<27x8x8xbf16, #tpu.memory_space<vmem>>, vector<1x8x8xbf16>
    %106 = vector.shape_cast %105 : vector<1x8x8xbf16> to vector<8x8xbf16>
    %cst_95 = arith.constant dense<0.000000e+00> : vector<8x800xf32>
    %107 = tpu.matmul %106, %104, %cst_95 {dimension_numbers = #tpu.dot_dimension_numbers<[1], [0], [0], [1], [0, 0, 1, 1], [], []>} : vector<8x8xbf16>, vector<8x800xbf16>, vector<8x800xf32> -> vector<8x800xf32>
    %108 = arith.addf %102, %107 : vector<8x800xf32>
    %c0_96 = arith.constant 0 : index
    %c0_97 = arith.constant 0 : index
    %c200 = arith.constant 200 : index
    %109 = vector.load %arg1[%c0_96, %c0_97, %c200] : memref<1x8x1024xbf16, #tpu.memory_space<vmem>>, vector<1x8x800xbf16>
    %110 = vector.shape_cast %109 : vector<1x8x800xbf16> to vector<8x800xbf16>
    %c18 = arith.constant 18 : index
    %c0_98 = arith.constant 0 : index
    %c0_99 = arith.constant 0 : index
    %111 = vector.load %arg2[%c18, %c0_98, %c0_99] : memref<27x8x8xbf16, #tpu.memory_space<vmem>>, vector<1x8x8xbf16>
    %112 = vector.shape_cast %111 : vector<1x8x8xbf16> to vector<8x8xbf16>
    %cst_100 = arith.constant dense<0.000000e+00> : vector<8x800xf32>
    %113 = tpu.matmul %112, %110, %cst_100 {dimension_numbers = #tpu.dot_dimension_numbers<[1], [0], [0], [1], [0, 0, 1, 1], [], []>} : vector<8x8xbf16>, vector<8x800xbf16>, vector<8x800xf32> -> vector<8x800xf32>
    %114 = arith.addf %108, %113 : vector<8x800xf32>
    %c0_101 = arith.constant 0 : index
    %c0_102 = arith.constant 0 : index
    %c201 = arith.constant 201 : index
    %115 = vector.load %arg1[%c0_101, %c0_102, %c201] : memref<1x8x1024xbf16, #tpu.memory_space<vmem>>, vector<1x8x800xbf16>
    %116 = vector.shape_cast %115 : vector<1x8x800xbf16> to vector<8x800xbf16>
    %c19 = arith.constant 19 : index
    %c0_103 = arith.constant 0 : index
    %c0_104 = arith.constant 0 : index
    %117 = vector.load %arg2[%c19, %c0_103, %c0_104] : memref<27x8x8xbf16, #tpu.memory_space<vmem>>, vector<1x8x8xbf16>
    %118 = vector.shape_cast %117 : vector<1x8x8xbf16> to vector<8x8xbf16>
    %cst_105 = arith.constant dense<0.000000e+00> : vector<8x800xf32>
    %119 = tpu.matmul %118, %116, %cst_105 {dimension_numbers = #tpu.dot_dimension_numbers<[1], [0], [0], [1], [0, 0, 1, 1], [], []>} : vector<8x8xbf16>, vector<8x800xbf16>, vector<8x800xf32> -> vector<8x800xf32>
    %120 = arith.addf %114, %119 : vector<8x800xf32>
    %c0_106 = arith.constant 0 : index
    %c0_107 = arith.constant 0 : index
    %c202 = arith.constant 202 : index
    %121 = vector.load %arg1[%c0_106, %c0_107, %c202] : memref<1x8x1024xbf16, #tpu.memory_space<vmem>>, vector<1x8x800xbf16>
    %122 = vector.shape_cast %121 : vector<1x8x800xbf16> to vector<8x800xbf16>
    %c20_108 = arith.constant 20 : index
    %c0_109 = arith.constant 0 : index
    %c0_110 = arith.constant 0 : index
    %123 = vector.load %arg2[%c20_108, %c0_109, %c0_110] : memref<27x8x8xbf16, #tpu.memory_space<vmem>>, vector<1x8x8xbf16>
    %124 = vector.shape_cast %123 : vector<1x8x8xbf16> to vector<8x8xbf16>
    %cst_111 = arith.constant dense<0.000000e+00> : vector<8x800xf32>
    %125 = tpu.matmul %124, %122, %cst_111 {dimension_numbers = #tpu.dot_dimension_numbers<[1], [0], [0], [1], [0, 0, 1, 1], [], []>} : vector<8x8xbf16>, vector<8x800xbf16>, vector<8x800xf32> -> vector<8x800xf32>
    %126 = arith.addf %120, %125 : vector<8x800xf32>
    %c0_112 = arith.constant 0 : index
    %c0_113 = arith.constant 0 : index
    %c210 = arith.constant 210 : index
    %127 = vector.load %arg1[%c0_112, %c0_113, %c210] : memref<1x8x1024xbf16, #tpu.memory_space<vmem>>, vector<1x8x800xbf16>
    %128 = vector.shape_cast %127 : vector<1x8x800xbf16> to vector<8x800xbf16>
    %c21_114 = arith.constant 21 : index
    %c0_115 = arith.constant 0 : index
    %c0_116 = arith.constant 0 : index
    %129 = vector.load %arg2[%c21_114, %c0_115, %c0_116] : memref<27x8x8xbf16, #tpu.memory_space<vmem>>, vector<1x8x8xbf16>
    %130 = vector.shape_cast %129 : vector<1x8x8xbf16> to vector<8x8xbf16>
    %cst_117 = arith.constant dense<0.000000e+00> : vector<8x800xf32>
    %131 = tpu.matmul %130, %128, %cst_117 {dimension_numbers = #tpu.dot_dimension_numbers<[1], [0], [0], [1], [0, 0, 1, 1], [], []>} : vector<8x8xbf16>, vector<8x800xbf16>, vector<8x800xf32> -> vector<8x800xf32>
    %132 = arith.addf %126, %131 : vector<8x800xf32>
    %c0_118 = arith.constant 0 : index
    %c0_119 = arith.constant 0 : index
    %c211 = arith.constant 211 : index
    %133 = vector.load %arg1[%c0_118, %c0_119, %c211] : memref<1x8x1024xbf16, #tpu.memory_space<vmem>>, vector<1x8x800xbf16>
    %134 = vector.shape_cast %133 : vector<1x8x800xbf16> to vector<8x800xbf16>
    %c22_120 = arith.constant 22 : index
    %c0_121 = arith.constant 0 : index
    %c0_122 = arith.constant 0 : index
    %135 = vector.load %arg2[%c22_120, %c0_121, %c0_122] : memref<27x8x8xbf16, #tpu.memory_space<vmem>>, vector<1x8x8xbf16>
    %136 = vector.shape_cast %135 : vector<1x8x8xbf16> to vector<8x8xbf16>
    %cst_123 = arith.constant dense<0.000000e+00> : vector<8x800xf32>
    %137 = tpu.matmul %136, %134, %cst_123 {dimension_numbers = #tpu.dot_dimension_numbers<[1], [0], [0], [1], [0, 0, 1, 1], [], []>} : vector<8x8xbf16>, vector<8x800xbf16>, vector<8x800xf32> -> vector<8x800xf32>
    %138 = arith.addf %132, %137 : vector<8x800xf32>
    %c0_124 = arith.constant 0 : index
    %c0_125 = arith.constant 0 : index
    %c212 = arith.constant 212 : index
    %139 = vector.load %arg1[%c0_124, %c0_125, %c212] : memref<1x8x1024xbf16, #tpu.memory_space<vmem>>, vector<1x8x800xbf16>
    %140 = vector.shape_cast %139 : vector<1x8x800xbf16> to vector<8x800xbf16>
    %c23 = arith.constant 23 : index
    %c0_126 = arith.constant 0 : index
    %c0_127 = arith.constant 0 : index
    %141 = vector.load %arg2[%c23, %c0_126, %c0_127] : memref<27x8x8xbf16, #tpu.memory_space<vmem>>, vector<1x8x8xbf16>
    %142 = vector.shape_cast %141 : vector<1x8x8xbf16> to vector<8x8xbf16>
    %cst_128 = arith.constant dense<0.000000e+00> : vector<8x800xf32>
    %143 = tpu.matmul %142, %140, %cst_128 {dimension_numbers = #tpu.dot_dimension_numbers<[1], [0], [0], [1], [0, 0, 1, 1], [], []>} : vector<8x8xbf16>, vector<8x800xbf16>, vector<8x800xf32> -> vector<8x800xf32>
    %144 = arith.addf %138, %143 : vector<8x800xf32>
    %c0_129 = arith.constant 0 : index
    %c0_130 = arith.constant 0 : index
    %c220 = arith.constant 220 : index
    %145 = vector.load %arg1[%c0_129, %c0_130, %c220] : memref<1x8x1024xbf16, #tpu.memory_space<vmem>>, vector<1x8x800xbf16>
    %146 = vector.shape_cast %145 : vector<1x8x800xbf16> to vector<8x800xbf16>
    %c24 = arith.constant 24 : index
    %c0_131 = arith.constant 0 : index
    %c0_132 = arith.constant 0 : index
    %147 = vector.load %arg2[%c24, %c0_131, %c0_132] : memref<27x8x8xbf16, #tpu.memory_space<vmem>>, vector<1x8x8xbf16>
    %148 = vector.shape_cast %147 : vector<1x8x8xbf16> to vector<8x8xbf16>
    %cst_133 = arith.constant dense<0.000000e+00> : vector<8x800xf32>
    %149 = tpu.matmul %148, %146, %cst_133 {dimension_numbers = #tpu.dot_dimension_numbers<[1], [0], [0], [1], [0, 0, 1, 1], [], []>} : vector<8x8xbf16>, vector<8x800xbf16>, vector<8x800xf32> -> vector<8x800xf32>
    %150 = arith.addf %144, %149 : vector<8x800xf32>
    %c0_134 = arith.constant 0 : index
    %c0_135 = arith.constant 0 : index
    %c221 = arith.constant 221 : index
    %151 = vector.load %arg1[%c0_134, %c0_135, %c221] : memref<1x8x1024xbf16, #tpu.memory_space<vmem>>, vector<1x8x800xbf16>
    %152 = vector.shape_cast %151 : vector<1x8x800xbf16> to vector<8x800xbf16>
    %c25 = arith.constant 25 : index
    %c0_136 = arith.constant 0 : index
    %c0_137 = arith.constant 0 : index
    %153 = vector.load %arg2[%c25, %c0_136, %c0_137] : memref<27x8x8xbf16, #tpu.memory_space<vmem>>, vector<1x8x8xbf16>
    %154 = vector.shape_cast %153 : vector<1x8x8xbf16> to vector<8x8xbf16>
    %cst_138 = arith.constant dense<0.000000e+00> : vector<8x800xf32>
    %155 = tpu.matmul %154, %152, %cst_138 {dimension_numbers = #tpu.dot_dimension_numbers<[1], [0], [0], [1], [0, 0, 1, 1], [], []>} : vector<8x8xbf16>, vector<8x800xbf16>, vector<8x800xf32> -> vector<8x800xf32>
    %156 = arith.addf %150, %155 : vector<8x800xf32>
    %c0_139 = arith.constant 0 : index
    %c0_140 = arith.constant 0 : index
    %c222 = arith.constant 222 : index
    %157 = vector.load %arg1[%c0_139, %c0_140, %c222] : memref<1x8x1024xbf16, #tpu.memory_space<vmem>>, vector<1x8x800xbf16>
    %158 = vector.shape_cast %157 : vector<1x8x800xbf16> to vector<8x800xbf16>
    %c26 = arith.constant 26 : index
    %c0_141 = arith.constant 0 : index
    %c0_142 = arith.constant 0 : index
    %159 = vector.load %arg2[%c26, %c0_141, %c0_142] : memref<27x8x8xbf16, #tpu.memory_space<vmem>>, vector<1x8x8xbf16>
    %160 = vector.shape_cast %159 : vector<1x8x8xbf16> to vector<8x8xbf16>
    %cst_143 = arith.constant dense<0.000000e+00> : vector<8x800xf32>
    %161 = tpu.matmul %160, %158, %cst_143 {dimension_numbers = #tpu.dot_dimension_numbers<[1], [0], [0], [1], [0, 0, 1, 1], [], []>} : vector<8x8xbf16>, vector<8x800xbf16>, vector<8x800xf32> -> vector<8x800xf32>
    %162 = arith.addf %156, %161 : vector<8x800xf32>
    %c0_144 = arith.constant 0 : index
    %c0_145 = arith.constant 0 : index
    %163 = vector.load %arg3[%c0_144, %c0_145] : memref<8x1xf32, #tpu.memory_space<vmem>>, vector<8x1xf32>
    %164 = vector.broadcast %163 : vector<8x1xf32> to vector<8x800xf32>
    %165 = arith.addf %162, %164 : vector<8x800xf32>
    %c0_146 = arith.constant 0 : index
    %c0_147 = arith.constant 0 : index
    %166 = vector.load %arg4[%c0_146, %c0_147] : memref<1x800xf32, #tpu.memory_space<vmem>>, vector<1x800xf32>
    %167 = vector.broadcast %166 : vector<1x800xf32> to vector<8x800xf32>
    %168 = arith.mulf %165, %167 : vector<8x800xf32>
    %cst_148 = arith.constant dense<0.000000e+00> : vector<8xf32>
    %169 = vector.multi_reduction <add>, %168, %cst_148 [1] : vector<8x800xf32> to vector<8xf32>
    %170 = vector.shape_cast %169 : vector<8xf32> to vector<8x1xf32>
    %cst_149 = arith.constant 0.001953125 : f32
    %171 = vector.broadcast %cst_149 : f32 to vector<8x1xf32>
    %172 = arith.mulf %170, %171 : vector<8x1xf32>
    %173 = arith.mulf %165, %165 : vector<8x800xf32>
    %174 = vector.broadcast %166 : vector<1x800xf32> to vector<8x800xf32>
    %175 = arith.mulf %173, %174 : vector<8x800xf32>
    %cst_150 = arith.constant dense<0.000000e+00> : vector<8xf32>
    %176 = vector.multi_reduction <add>, %175, %cst_150 [1] : vector<8x800xf32> to vector<8xf32>
    %177 = vector.shape_cast %176 : vector<8xf32> to vector<8x1xf32>
    %cst_151 = arith.constant 0.001953125 : f32
    %178 = vector.broadcast %cst_151 : f32 to vector<8x1xf32>
    %179 = arith.mulf %177, %178 : vector<8x1xf32>
    %180 = arith.mulf %172, %172 : vector<8x1xf32>
    %181 = arith.subf %179, %180 : vector<8x1xf32>
    %cst_152 = arith.constant 0.000000e+00 : f32
    %182 = vector.broadcast %cst_152 : f32 to vector<8x1xf32>
    %183 = arith.maximumf %181, %182 : vector<8x1xf32>
    %184 = vector.broadcast %172 : vector<8x1xf32> to vector<8x800xf32>
    %185 = arith.subf %165, %184 : vector<8x800xf32>
    %cst_153 = arith.constant 9.99999974E-6 : f32
    %186 = vector.broadcast %cst_153 : f32 to vector<8x1xf32>
    %187 = arith.addf %183, %186 : vector<8x1xf32>
    %188 = math.rsqrt %187 : vector<8x1xf32>
    %189 = vector.broadcast %188 : vector<8x1xf32> to vector<8x800xf32>
    %190 = arith.mulf %185, %189 : vector<8x800xf32>
    %cst_154 = arith.constant 0.000000e+00 : f32
    %191 = vector.broadcast %cst_154 : f32 to vector<8x800xf32>
    %192 = arith.cmpf oge, %190, %191 : vector<8x800xf32>
    %cst_155 = arith.constant 0.00999999977 : f32
    %193 = vector.broadcast %cst_155 : f32 to vector<8x800xf32>
    %194 = arith.mulf %193, %190 : vector<8x800xf32>
    %195 = arith.select %192, %190, %194 : vector<8x800xi1>, vector<8x800xf32>
    %196 = arith.truncf %195 : vector<8x800xf32> to vector<8x800xbf16>
    %c0_156 = arith.constant 0 : index
    %c0_157 = arith.constant 0 : index
    %c0_158 = arith.constant 0 : index
    %197 = vector.load %arg5[%c0_156, %c0_157, %c0_158] : memref<1x8x800xbf16, #tpu.memory_space<vmem>>, vector<1x8x800xbf16>
    %198 = vector.shape_cast %197 : vector<1x8x800xbf16> to vector<8x800xbf16>
    %199 = vector.shape_cast %196 : vector<8x800xbf16> to vector<1x8x800xbf16>
    tpu.vector_store %arg5[%c0_156, %c0_157, %c0_158], %199 {strides = array<i32>} : memref<1x8x800xbf16, #tpu.memory_space<vmem>>, vector<1x8x800xbf16>,
    return
  }
  func.func @transform_0(%arg0: i32) -> (i32, i32, i32) {
    %c0_i32 = arith.constant 0 : i32
    %c0_i32_0 = arith.constant 0 : i32
    %c0_i32_1 = arith.constant 0 : i32
    return %arg0, %c0_i32, %c0_i32_0 : i32, i32, i32
  }
  func.func @transform_1(%arg0: i32) -> (i32, i32, i32) {
    %c0_i32 = arith.constant 0 : i32
    %c0_i32_0 = arith.constant 0 : i32
    %c0_i32_1 = arith.constant 0 : i32
    %c0_i32_2 = arith.constant 0 : i32
    return %c0_i32, %c0_i32_0, %c0_i32_1 : i32, i32, i32
  }
  func.func @transform_2(%arg0: i32) -> (i32, i32) {
    %c0_i32 = arith.constant 0 : i32
    %c0_i32_0 = arith.constant 0 : i32
    %c0_i32_1 = arith.constant 0 : i32
    return %c0_i32, %c0_i32_0 : i32, i32
  }
  func.func @transform_3(%arg0: i32) -> (i32, i32) {
    %c0_i32 = arith.constant 0 : i32
    %c0_i32_0 = arith.constant 0 : i32
    %c0_i32_1 = arith.constant 0 : i32
    return %c0_i32, %c0_i32_0 : i32, i32
  }
  func.func @transform_4(%arg0: i32) -> (i32, i32, i32) {
    %c0_i32 = arith.constant 0 : i32
    %c0_i32_0 = arith.constant 0 : i32
    %c0_i32_1 = arith.constant 0 : i32
    return %arg0, %c0_i32, %c0_i32_0 : i32, i32, i32
  }
}

module attributes {stable_mosaic.version = 11 : i64} {
  func.func @_conv3_in_lrelu_kernel(%arg0: i32, %arg1: memref<1x8x1024xbf16, #tpu.memory_space<vmem>>, %arg2: memref<27x8x8xbf16, #tpu.memory_space<vmem>>, %arg3: memref<8x1xf32, #tpu.memory_space<vmem>>, %arg4: memref<1x800xf32, #tpu.memory_space<vmem>>, %arg5: memref<1x8x800xf32, #tpu.memory_space<vmem>>) attributes {dimension_semantics = [#tpu.dimension_semantics<parallel>], iteration_bounds = array<i64: 2>, scalar_prefetch = 0 : i64, scratch_operands = 0 : i64, tpu.core_type = #tpu.core_type<tc>, window_params = [{transform_indices = @transform_0, window_bounds = array<i64: 1, 8, 1024>}, {pipeline_mode = #tpu.pipeline_mode<synchronous>, transform_indices = @transform_1, window_bounds = array<i64: 27, 8, 8>}, {pipeline_mode = #tpu.pipeline_mode<synchronous>, transform_indices = @transform_2, window_bounds = array<i64: 8, 1>}, {pipeline_mode = #tpu.pipeline_mode<synchronous>, transform_indices = @transform_3, window_bounds = array<i64: 1, 800>}, {transform_indices = @transform_4, window_bounds = array<i64: 1, 8, 800>}]} {
    %cst = arith.constant 0.000000e+00 : f32
    %0 = vector.broadcast %cst : f32 to vector<8x800xf32>
    %c0 = arith.constant 0 : index
    %c0_0 = arith.constant 0 : index
    %c0_1 = arith.constant 0 : index
    %1 = vector.load %arg1[%c0, %c0_0, %c0_1] : memref<1x8x1024xbf16, #tpu.memory_space<vmem>>, vector<1x8x800xbf16>
    %2 = vector.shape_cast %1 : vector<1x8x800xbf16> to vector<8x800xbf16>
    %c0_2 = arith.constant 0 : index
    %c0_3 = arith.constant 0 : index
    %c0_4 = arith.constant 0 : index
    %3 = vector.load %arg2[%c0_2, %c0_3, %c0_4] : memref<27x8x8xbf16, #tpu.memory_space<vmem>>, vector<1x8x8xbf16>
    %4 = vector.shape_cast %3 : vector<1x8x8xbf16> to vector<8x8xbf16>
    %cst_5 = arith.constant dense<0.000000e+00> : vector<8x800xf32>
    %5 = tpu.matmul %4, %2, %cst_5 {dimension_numbers = #tpu.dot_dimension_numbers<[1], [0], [0], [1], [0, 0, 1, 1], [], []>} : vector<8x8xbf16>, vector<8x800xbf16>, vector<8x800xf32> -> vector<8x800xf32>
    %6 = arith.addf %0, %5 : vector<8x800xf32>
    %c0_6 = arith.constant 0 : index
    %c0_7 = arith.constant 0 : index
    %c1 = arith.constant 1 : index
    %7 = vector.load %arg1[%c0_6, %c0_7, %c1] : memref<1x8x1024xbf16, #tpu.memory_space<vmem>>, vector<1x8x800xbf16>
    %8 = vector.shape_cast %7 : vector<1x8x800xbf16> to vector<8x800xbf16>
    %c1_8 = arith.constant 1 : index
    %c0_9 = arith.constant 0 : index
    %c0_10 = arith.constant 0 : index
    %9 = vector.load %arg2[%c1_8, %c0_9, %c0_10] : memref<27x8x8xbf16, #tpu.memory_space<vmem>>, vector<1x8x8xbf16>
    %10 = vector.shape_cast %9 : vector<1x8x8xbf16> to vector<8x8xbf16>
    %cst_11 = arith.constant dense<0.000000e+00> : vector<8x800xf32>
    %11 = tpu.matmul %10, %8, %cst_11 {dimension_numbers = #tpu.dot_dimension_numbers<[1], [0], [0], [1], [0, 0, 1, 1], [], []>} : vector<8x8xbf16>, vector<8x800xbf16>, vector<8x800xf32> -> vector<8x800xf32>
    %12 = arith.addf %6, %11 : vector<8x800xf32>
    %c0_12 = arith.constant 0 : index
    %c0_13 = arith.constant 0 : index
    %c2 = arith.constant 2 : index
    %13 = vector.load %arg1[%c0_12, %c0_13, %c2] : memref<1x8x1024xbf16, #tpu.memory_space<vmem>>, vector<1x8x800xbf16>
    %14 = vector.shape_cast %13 : vector<1x8x800xbf16> to vector<8x800xbf16>
    %c2_14 = arith.constant 2 : index
    %c0_15 = arith.constant 0 : index
    %c0_16 = arith.constant 0 : index
    %15 = vector.load %arg2[%c2_14, %c0_15, %c0_16] : memref<27x8x8xbf16, #tpu.memory_space<vmem>>, vector<1x8x8xbf16>
    %16 = vector.shape_cast %15 : vector<1x8x8xbf16> to vector<8x8xbf16>
    %cst_17 = arith.constant dense<0.000000e+00> : vector<8x800xf32>
    %17 = tpu.matmul %16, %14, %cst_17 {dimension_numbers = #tpu.dot_dimension_numbers<[1], [0], [0], [1], [0, 0, 1, 1], [], []>} : vector<8x8xbf16>, vector<8x800xbf16>, vector<8x800xf32> -> vector<8x800xf32>
    %18 = arith.addf %12, %17 : vector<8x800xf32>
    %c0_18 = arith.constant 0 : index
    %c0_19 = arith.constant 0 : index
    %c10 = arith.constant 10 : index
    %19 = vector.load %arg1[%c0_18, %c0_19, %c10] : memref<1x8x1024xbf16, #tpu.memory_space<vmem>>, vector<1x8x800xbf16>
    %20 = vector.shape_cast %19 : vector<1x8x800xbf16> to vector<8x800xbf16>
    %c3 = arith.constant 3 : index
    %c0_20 = arith.constant 0 : index
    %c0_21 = arith.constant 0 : index
    %21 = vector.load %arg2[%c3, %c0_20, %c0_21] : memref<27x8x8xbf16, #tpu.memory_space<vmem>>, vector<1x8x8xbf16>
    %22 = vector.shape_cast %21 : vector<1x8x8xbf16> to vector<8x8xbf16>
    %cst_22 = arith.constant dense<0.000000e+00> : vector<8x800xf32>
    %23 = tpu.matmul %22, %20, %cst_22 {dimension_numbers = #tpu.dot_dimension_numbers<[1], [0], [0], [1], [0, 0, 1, 1], [], []>} : vector<8x8xbf16>, vector<8x800xbf16>, vector<8x800xf32> -> vector<8x800xf32>
    %24 = arith.addf %18, %23 : vector<8x800xf32>
    %c0_23 = arith.constant 0 : index
    %c0_24 = arith.constant 0 : index
    %c11 = arith.constant 11 : index
    %25 = vector.load %arg1[%c0_23, %c0_24, %c11] : memref<1x8x1024xbf16, #tpu.memory_space<vmem>>, vector<1x8x800xbf16>
    %26 = vector.shape_cast %25 : vector<1x8x800xbf16> to vector<8x800xbf16>
    %c4 = arith.constant 4 : index
    %c0_25 = arith.constant 0 : index
    %c0_26 = arith.constant 0 : index
    %27 = vector.load %arg2[%c4, %c0_25, %c0_26] : memref<27x8x8xbf16, #tpu.memory_space<vmem>>, vector<1x8x8xbf16>
    %28 = vector.shape_cast %27 : vector<1x8x8xbf16> to vector<8x8xbf16>
    %cst_27 = arith.constant dense<0.000000e+00> : vector<8x800xf32>
    %29 = tpu.matmul %28, %26, %cst_27 {dimension_numbers = #tpu.dot_dimension_numbers<[1], [0], [0], [1], [0, 0, 1, 1], [], []>} : vector<8x8xbf16>, vector<8x800xbf16>, vector<8x800xf32> -> vector<8x800xf32>
    %30 = arith.addf %24, %29 : vector<8x800xf32>
    %c0_28 = arith.constant 0 : index
    %c0_29 = arith.constant 0 : index
    %c12 = arith.constant 12 : index
    %31 = vector.load %arg1[%c0_28, %c0_29, %c12] : memref<1x8x1024xbf16, #tpu.memory_space<vmem>>, vector<1x8x800xbf16>
    %32 = vector.shape_cast %31 : vector<1x8x800xbf16> to vector<8x800xbf16>
    %c5 = arith.constant 5 : index
    %c0_30 = arith.constant 0 : index
    %c0_31 = arith.constant 0 : index
    %33 = vector.load %arg2[%c5, %c0_30, %c0_31] : memref<27x8x8xbf16, #tpu.memory_space<vmem>>, vector<1x8x8xbf16>
    %34 = vector.shape_cast %33 : vector<1x8x8xbf16> to vector<8x8xbf16>
    %cst_32 = arith.constant dense<0.000000e+00> : vector<8x800xf32>
    %35 = tpu.matmul %34, %32, %cst_32 {dimension_numbers = #tpu.dot_dimension_numbers<[1], [0], [0], [1], [0, 0, 1, 1], [], []>} : vector<8x8xbf16>, vector<8x800xbf16>, vector<8x800xf32> -> vector<8x800xf32>
    %36 = arith.addf %30, %35 : vector<8x800xf32>
    %c0_33 = arith.constant 0 : index
    %c0_34 = arith.constant 0 : index
    %c20 = arith.constant 20 : index
    %37 = vector.load %arg1[%c0_33, %c0_34, %c20] : memref<1x8x1024xbf16, #tpu.memory_space<vmem>>, vector<1x8x800xbf16>
    %38 = vector.shape_cast %37 : vector<1x8x800xbf16> to vector<8x800xbf16>
    %c6 = arith.constant 6 : index
    %c0_35 = arith.constant 0 : index
    %c0_36 = arith.constant 0 : index
    %39 = vector.load %arg2[%c6, %c0_35, %c0_36] : memref<27x8x8xbf16, #tpu.memory_space<vmem>>, vector<1x8x8xbf16>
    %40 = vector.shape_cast %39 : vector<1x8x8xbf16> to vector<8x8xbf16>
    %cst_37 = arith.constant dense<0.000000e+00> : vector<8x800xf32>
    %41 = tpu.matmul %40, %38, %cst_37 {dimension_numbers = #tpu.dot_dimension_numbers<[1], [0], [0], [1], [0, 0, 1, 1], [], []>} : vector<8x8xbf16>, vector<8x800xbf16>, vector<8x800xf32> -> vector<8x800xf32>
    %42 = arith.addf %36, %41 : vector<8x800xf32>
    %c0_38 = arith.constant 0 : index
    %c0_39 = arith.constant 0 : index
    %c21 = arith.constant 21 : index
    %43 = vector.load %arg1[%c0_38, %c0_39, %c21] : memref<1x8x1024xbf16, #tpu.memory_space<vmem>>, vector<1x8x800xbf16>
    %44 = vector.shape_cast %43 : vector<1x8x800xbf16> to vector<8x800xbf16>
    %c7 = arith.constant 7 : index
    %c0_40 = arith.constant 0 : index
    %c0_41 = arith.constant 0 : index
    %45 = vector.load %arg2[%c7, %c0_40, %c0_41] : memref<27x8x8xbf16, #tpu.memory_space<vmem>>, vector<1x8x8xbf16>
    %46 = vector.shape_cast %45 : vector<1x8x8xbf16> to vector<8x8xbf16>
    %cst_42 = arith.constant dense<0.000000e+00> : vector<8x800xf32>
    %47 = tpu.matmul %46, %44, %cst_42 {dimension_numbers = #tpu.dot_dimension_numbers<[1], [0], [0], [1], [0, 0, 1, 1], [], []>} : vector<8x8xbf16>, vector<8x800xbf16>, vector<8x800xf32> -> vector<8x800xf32>
    %48 = arith.addf %42, %47 : vector<8x800xf32>
    %c0_43 = arith.constant 0 : index
    %c0_44 = arith.constant 0 : index
    %c22 = arith.constant 22 : index
    %49 = vector.load %arg1[%c0_43, %c0_44, %c22] : memref<1x8x1024xbf16, #tpu.memory_space<vmem>>, vector<1x8x800xbf16>
    %50 = vector.shape_cast %49 : vector<1x8x800xbf16> to vector<8x800xbf16>
    %c8 = arith.constant 8 : index
    %c0_45 = arith.constant 0 : index
    %c0_46 = arith.constant 0 : index
    %51 = vector.load %arg2[%c8, %c0_45, %c0_46] : memref<27x8x8xbf16, #tpu.memory_space<vmem>>, vector<1x8x8xbf16>
    %52 = vector.shape_cast %51 : vector<1x8x8xbf16> to vector<8x8xbf16>
    %cst_47 = arith.constant dense<0.000000e+00> : vector<8x800xf32>
    %53 = tpu.matmul %52, %50, %cst_47 {dimension_numbers = #tpu.dot_dimension_numbers<[1], [0], [0], [1], [0, 0, 1, 1], [], []>} : vector<8x8xbf16>, vector<8x800xbf16>, vector<8x800xf32> -> vector<8x800xf32>
    %54 = arith.addf %48, %53 : vector<8x800xf32>
    %c0_48 = arith.constant 0 : index
    %c0_49 = arith.constant 0 : index
    %c100 = arith.constant 100 : index
    %55 = vector.load %arg1[%c0_48, %c0_49, %c100] : memref<1x8x1024xbf16, #tpu.memory_space<vmem>>, vector<1x8x800xbf16>
    %56 = vector.shape_cast %55 : vector<1x8x800xbf16> to vector<8x800xbf16>
    %c9 = arith.constant 9 : index
    %c0_50 = arith.constant 0 : index
    %c0_51 = arith.constant 0 : index
    %57 = vector.load %arg2[%c9, %c0_50, %c0_51] : memref<27x8x8xbf16, #tpu.memory_space<vmem>>, vector<1x8x8xbf16>
    %58 = vector.shape_cast %57 : vector<1x8x8xbf16> to vector<8x8xbf16>
    %cst_52 = arith.constant dense<0.000000e+00> : vector<8x800xf32>
    %59 = tpu.matmul %58, %56, %cst_52 {dimension_numbers = #tpu.dot_dimension_numbers<[1], [0], [0], [1], [0, 0, 1, 1], [], []>} : vector<8x8xbf16>, vector<8x800xbf16>, vector<8x800xf32> -> vector<8x800xf32>
    %60 = arith.addf %54, %59 : vector<8x800xf32>
    %c0_53 = arith.constant 0 : index
    %c0_54 = arith.constant 0 : index
    %c101 = arith.constant 101 : index
    %61 = vector.load %arg1[%c0_53, %c0_54, %c101] : memref<1x8x1024xbf16, #tpu.memory_space<vmem>>, vector<1x8x800xbf16>
    %62 = vector.shape_cast %61 : vector<1x8x800xbf16> to vector<8x800xbf16>
    %c10_55 = arith.constant 10 : index
    %c0_56 = arith.constant 0 : index
    %c0_57 = arith.constant 0 : index
    %63 = vector.load %arg2[%c10_55, %c0_56, %c0_57] : memref<27x8x8xbf16, #tpu.memory_space<vmem>>, vector<1x8x8xbf16>
    %64 = vector.shape_cast %63 : vector<1x8x8xbf16> to vector<8x8xbf16>
    %cst_58 = arith.constant dense<0.000000e+00> : vector<8x800xf32>
    %65 = tpu.matmul %64, %62, %cst_58 {dimension_numbers = #tpu.dot_dimension_numbers<[1], [0], [0], [1], [0, 0, 1, 1], [], []>} : vector<8x8xbf16>, vector<8x800xbf16>, vector<8x800xf32> -> vector<8x800xf32>
    %66 = arith.addf %60, %65 : vector<8x800xf32>
    %c0_59 = arith.constant 0 : index
    %c0_60 = arith.constant 0 : index
    %c102 = arith.constant 102 : index
    %67 = vector.load %arg1[%c0_59, %c0_60, %c102] : memref<1x8x1024xbf16, #tpu.memory_space<vmem>>, vector<1x8x800xbf16>
    %68 = vector.shape_cast %67 : vector<1x8x800xbf16> to vector<8x800xbf16>
    %c11_61 = arith.constant 11 : index
    %c0_62 = arith.constant 0 : index
    %c0_63 = arith.constant 0 : index
    %69 = vector.load %arg2[%c11_61, %c0_62, %c0_63] : memref<27x8x8xbf16, #tpu.memory_space<vmem>>, vector<1x8x8xbf16>
    %70 = vector.shape_cast %69 : vector<1x8x8xbf16> to vector<8x8xbf16>
    %cst_64 = arith.constant dense<0.000000e+00> : vector<8x800xf32>
    %71 = tpu.matmul %70, %68, %cst_64 {dimension_numbers = #tpu.dot_dimension_numbers<[1], [0], [0], [1], [0, 0, 1, 1], [], []>} : vector<8x8xbf16>, vector<8x800xbf16>, vector<8x800xf32> -> vector<8x800xf32>
    %72 = arith.addf %66, %71 : vector<8x800xf32>
    %c0_65 = arith.constant 0 : index
    %c0_66 = arith.constant 0 : index
    %c110 = arith.constant 110 : index
    %73 = vector.load %arg1[%c0_65, %c0_66, %c110] : memref<1x8x1024xbf16, #tpu.memory_space<vmem>>, vector<1x8x800xbf16>
    %74 = vector.shape_cast %73 : vector<1x8x800xbf16> to vector<8x800xbf16>
    %c12_67 = arith.constant 12 : index
    %c0_68 = arith.constant 0 : index
    %c0_69 = arith.constant 0 : index
    %75 = vector.load %arg2[%c12_67, %c0_68, %c0_69] : memref<27x8x8xbf16, #tpu.memory_space<vmem>>, vector<1x8x8xbf16>
    %76 = vector.shape_cast %75 : vector<1x8x8xbf16> to vector<8x8xbf16>
    %cst_70 = arith.constant dense<0.000000e+00> : vector<8x800xf32>
    %77 = tpu.matmul %76, %74, %cst_70 {dimension_numbers = #tpu.dot_dimension_numbers<[1], [0], [0], [1], [0, 0, 1, 1], [], []>} : vector<8x8xbf16>, vector<8x800xbf16>, vector<8x800xf32> -> vector<8x800xf32>
    %78 = arith.addf %72, %77 : vector<8x800xf32>
    %c0_71 = arith.constant 0 : index
    %c0_72 = arith.constant 0 : index
    %c111 = arith.constant 111 : index
    %79 = vector.load %arg1[%c0_71, %c0_72, %c111] : memref<1x8x1024xbf16, #tpu.memory_space<vmem>>, vector<1x8x800xbf16>
    %80 = vector.shape_cast %79 : vector<1x8x800xbf16> to vector<8x800xbf16>
    %c13 = arith.constant 13 : index
    %c0_73 = arith.constant 0 : index
    %c0_74 = arith.constant 0 : index
    %81 = vector.load %arg2[%c13, %c0_73, %c0_74] : memref<27x8x8xbf16, #tpu.memory_space<vmem>>, vector<1x8x8xbf16>
    %82 = vector.shape_cast %81 : vector<1x8x8xbf16> to vector<8x8xbf16>
    %cst_75 = arith.constant dense<0.000000e+00> : vector<8x800xf32>
    %83 = tpu.matmul %82, %80, %cst_75 {dimension_numbers = #tpu.dot_dimension_numbers<[1], [0], [0], [1], [0, 0, 1, 1], [], []>} : vector<8x8xbf16>, vector<8x800xbf16>, vector<8x800xf32> -> vector<8x800xf32>
    %84 = arith.addf %78, %83 : vector<8x800xf32>
    %c0_76 = arith.constant 0 : index
    %c0_77 = arith.constant 0 : index
    %c112 = arith.constant 112 : index
    %85 = vector.load %arg1[%c0_76, %c0_77, %c112] : memref<1x8x1024xbf16, #tpu.memory_space<vmem>>, vector<1x8x800xbf16>
    %86 = vector.shape_cast %85 : vector<1x8x800xbf16> to vector<8x800xbf16>
    %c14 = arith.constant 14 : index
    %c0_78 = arith.constant 0 : index
    %c0_79 = arith.constant 0 : index
    %87 = vector.load %arg2[%c14, %c0_78, %c0_79] : memref<27x8x8xbf16, #tpu.memory_space<vmem>>, vector<1x8x8xbf16>
    %88 = vector.shape_cast %87 : vector<1x8x8xbf16> to vector<8x8xbf16>
    %cst_80 = arith.constant dense<0.000000e+00> : vector<8x800xf32>
    %89 = tpu.matmul %88, %86, %cst_80 {dimension_numbers = #tpu.dot_dimension_numbers<[1], [0], [0], [1], [0, 0, 1, 1], [], []>} : vector<8x8xbf16>, vector<8x800xbf16>, vector<8x800xf32> -> vector<8x800xf32>
    %90 = arith.addf %84, %89 : vector<8x800xf32>
    %c0_81 = arith.constant 0 : index
    %c0_82 = arith.constant 0 : index
    %c120 = arith.constant 120 : index
    %91 = vector.load %arg1[%c0_81, %c0_82, %c120] : memref<1x8x1024xbf16, #tpu.memory_space<vmem>>, vector<1x8x800xbf16>
    %92 = vector.shape_cast %91 : vector<1x8x800xbf16> to vector<8x800xbf16>
    %c15 = arith.constant 15 : index
    %c0_83 = arith.constant 0 : index
    %c0_84 = arith.constant 0 : index
    %93 = vector.load %arg2[%c15, %c0_83, %c0_84] : memref<27x8x8xbf16, #tpu.memory_space<vmem>>, vector<1x8x8xbf16>
    %94 = vector.shape_cast %93 : vector<1x8x8xbf16> to vector<8x8xbf16>
    %cst_85 = arith.constant dense<0.000000e+00> : vector<8x800xf32>
    %95 = tpu.matmul %94, %92, %cst_85 {dimension_numbers = #tpu.dot_dimension_numbers<[1], [0], [0], [1], [0, 0, 1, 1], [], []>} : vector<8x8xbf16>, vector<8x800xbf16>, vector<8x800xf32> -> vector<8x800xf32>
    %96 = arith.addf %90, %95 : vector<8x800xf32>
    %c0_86 = arith.constant 0 : index
    %c0_87 = arith.constant 0 : index
    %c121 = arith.constant 121 : index
    %97 = vector.load %arg1[%c0_86, %c0_87, %c121] : memref<1x8x1024xbf16, #tpu.memory_space<vmem>>, vector<1x8x800xbf16>
    %98 = vector.shape_cast %97 : vector<1x8x800xbf16> to vector<8x800xbf16>
    %c16 = arith.constant 16 : index
    %c0_88 = arith.constant 0 : index
    %c0_89 = arith.constant 0 : index
    %99 = vector.load %arg2[%c16, %c0_88, %c0_89] : memref<27x8x8xbf16, #tpu.memory_space<vmem>>, vector<1x8x8xbf16>
    %100 = vector.shape_cast %99 : vector<1x8x8xbf16> to vector<8x8xbf16>
    %cst_90 = arith.constant dense<0.000000e+00> : vector<8x800xf32>
    %101 = tpu.matmul %100, %98, %cst_90 {dimension_numbers = #tpu.dot_dimension_numbers<[1], [0], [0], [1], [0, 0, 1, 1], [], []>} : vector<8x8xbf16>, vector<8x800xbf16>, vector<8x800xf32> -> vector<8x800xf32>
    %102 = arith.addf %96, %101 : vector<8x800xf32>
    %c0_91 = arith.constant 0 : index
    %c0_92 = arith.constant 0 : index
    %c122 = arith.constant 122 : index
    %103 = vector.load %arg1[%c0_91, %c0_92, %c122] : memref<1x8x1024xbf16, #tpu.memory_space<vmem>>, vector<1x8x800xbf16>
    %104 = vector.shape_cast %103 : vector<1x8x800xbf16> to vector<8x800xbf16>
    %c17 = arith.constant 17 : index
    %c0_93 = arith.constant 0 : index
    %c0_94 = arith.constant 0 : index
    %105 = vector.load %arg2[%c17, %c0_93, %c0_94] : memref<27x8x8xbf16, #tpu.memory_space<vmem>>, vector<1x8x8xbf16>
    %106 = vector.shape_cast %105 : vector<1x8x8xbf16> to vector<8x8xbf16>
    %cst_95 = arith.constant dense<0.000000e+00> : vector<8x800xf32>
    %107 = tpu.matmul %106, %104, %cst_95 {dimension_numbers = #tpu.dot_dimension_numbers<[1], [0], [0], [1], [0, 0, 1, 1], [], []>} : vector<8x8xbf16>, vector<8x800xbf16>, vector<8x800xf32> -> vector<8x800xf32>
    %108 = arith.addf %102, %107 : vector<8x800xf32>
    %c0_96 = arith.constant 0 : index
    %c0_97 = arith.constant 0 : index
    %c200 = arith.constant 200 : index
    %109 = vector.load %arg1[%c0_96, %c0_97, %c200] : memref<1x8x1024xbf16, #tpu.memory_space<vmem>>, vector<1x8x800xbf16>
    %110 = vector.shape_cast %109 : vector<1x8x800xbf16> to vector<8x800xbf16>
    %c18 = arith.constant 18 : index
    %c0_98 = arith.constant 0 : index
    %c0_99 = arith.constant 0 : index
    %111 = vector.load %arg2[%c18, %c0_98, %c0_99] : memref<27x8x8xbf16, #tpu.memory_space<vmem>>, vector<1x8x8xbf16>
    %112 = vector.shape_cast %111 : vector<1x8x8xbf16> to vector<8x8xbf16>
    %cst_100 = arith.constant dense<0.000000e+00> : vector<8x800xf32>
    %113 = tpu.matmul %112, %110, %cst_100 {dimension_numbers = #tpu.dot_dimension_numbers<[1], [0], [0], [1], [0, 0, 1, 1], [], []>} : vector<8x8xbf16>, vector<8x800xbf16>, vector<8x800xf32> -> vector<8x800xf32>
    %114 = arith.addf %108, %113 : vector<8x800xf32>
    %c0_101 = arith.constant 0 : index
    %c0_102 = arith.constant 0 : index
    %c201 = arith.constant 201 : index
    %115 = vector.load %arg1[%c0_101, %c0_102, %c201] : memref<1x8x1024xbf16, #tpu.memory_space<vmem>>, vector<1x8x800xbf16>
    %116 = vector.shape_cast %115 : vector<1x8x800xbf16> to vector<8x800xbf16>
    %c19 = arith.constant 19 : index
    %c0_103 = arith.constant 0 : index
    %c0_104 = arith.constant 0 : index
    %117 = vector.load %arg2[%c19, %c0_103, %c0_104] : memref<27x8x8xbf16, #tpu.memory_space<vmem>>, vector<1x8x8xbf16>
    %118 = vector.shape_cast %117 : vector<1x8x8xbf16> to vector<8x8xbf16>
    %cst_105 = arith.constant dense<0.000000e+00> : vector<8x800xf32>
    %119 = tpu.matmul %118, %116, %cst_105 {dimension_numbers = #tpu.dot_dimension_numbers<[1], [0], [0], [1], [0, 0, 1, 1], [], []>} : vector<8x8xbf16>, vector<8x800xbf16>, vector<8x800xf32> -> vector<8x800xf32>
    %120 = arith.addf %114, %119 : vector<8x800xf32>
    %c0_106 = arith.constant 0 : index
    %c0_107 = arith.constant 0 : index
    %c202 = arith.constant 202 : index
    %121 = vector.load %arg1[%c0_106, %c0_107, %c202] : memref<1x8x1024xbf16, #tpu.memory_space<vmem>>, vector<1x8x800xbf16>
    %122 = vector.shape_cast %121 : vector<1x8x800xbf16> to vector<8x800xbf16>
    %c20_108 = arith.constant 20 : index
    %c0_109 = arith.constant 0 : index
    %c0_110 = arith.constant 0 : index
    %123 = vector.load %arg2[%c20_108, %c0_109, %c0_110] : memref<27x8x8xbf16, #tpu.memory_space<vmem>>, vector<1x8x8xbf16>
    %124 = vector.shape_cast %123 : vector<1x8x8xbf16> to vector<8x8xbf16>
    %cst_111 = arith.constant dense<0.000000e+00> : vector<8x800xf32>
    %125 = tpu.matmul %124, %122, %cst_111 {dimension_numbers = #tpu.dot_dimension_numbers<[1], [0], [0], [1], [0, 0, 1, 1], [], []>} : vector<8x8xbf16>, vector<8x800xbf16>, vector<8x800xf32> -> vector<8x800xf32>
    %126 = arith.addf %120, %125 : vector<8x800xf32>
    %c0_112 = arith.constant 0 : index
    %c0_113 = arith.constant 0 : index
    %c210 = arith.constant 210 : index
    %127 = vector.load %arg1[%c0_112, %c0_113, %c210] : memref<1x8x1024xbf16, #tpu.memory_space<vmem>>, vector<1x8x800xbf16>
    %128 = vector.shape_cast %127 : vector<1x8x800xbf16> to vector<8x800xbf16>
    %c21_114 = arith.constant 21 : index
    %c0_115 = arith.constant 0 : index
    %c0_116 = arith.constant 0 : index
    %129 = vector.load %arg2[%c21_114, %c0_115, %c0_116] : memref<27x8x8xbf16, #tpu.memory_space<vmem>>, vector<1x8x8xbf16>
    %130 = vector.shape_cast %129 : vector<1x8x8xbf16> to vector<8x8xbf16>
    %cst_117 = arith.constant dense<0.000000e+00> : vector<8x800xf32>
    %131 = tpu.matmul %130, %128, %cst_117 {dimension_numbers = #tpu.dot_dimension_numbers<[1], [0], [0], [1], [0, 0, 1, 1], [], []>} : vector<8x8xbf16>, vector<8x800xbf16>, vector<8x800xf32> -> vector<8x800xf32>
    %132 = arith.addf %126, %131 : vector<8x800xf32>
    %c0_118 = arith.constant 0 : index
    %c0_119 = arith.constant 0 : index
    %c211 = arith.constant 211 : index
    %133 = vector.load %arg1[%c0_118, %c0_119, %c211] : memref<1x8x1024xbf16, #tpu.memory_space<vmem>>, vector<1x8x800xbf16>
    %134 = vector.shape_cast %133 : vector<1x8x800xbf16> to vector<8x800xbf16>
    %c22_120 = arith.constant 22 : index
    %c0_121 = arith.constant 0 : index
    %c0_122 = arith.constant 0 : index
    %135 = vector.load %arg2[%c22_120, %c0_121, %c0_122] : memref<27x8x8xbf16, #tpu.memory_space<vmem>>, vector<1x8x8xbf16>
    %136 = vector.shape_cast %135 : vector<1x8x8xbf16> to vector<8x8xbf16>
    %cst_123 = arith.constant dense<0.000000e+00> : vector<8x800xf32>
    %137 = tpu.matmul %136, %134, %cst_123 {dimension_numbers = #tpu.dot_dimension_numbers<[1], [0], [0], [1], [0, 0, 1, 1], [], []>} : vector<8x8xbf16>, vector<8x800xbf16>, vector<8x800xf32> -> vector<8x800xf32>
    %138 = arith.addf %132, %137 : vector<8x800xf32>
    %c0_124 = arith.constant 0 : index
    %c0_125 = arith.constant 0 : index
    %c212 = arith.constant 212 : index
    %139 = vector.load %arg1[%c0_124, %c0_125, %c212] : memref<1x8x1024xbf16, #tpu.memory_space<vmem>>, vector<1x8x800xbf16>
    %140 = vector.shape_cast %139 : vector<1x8x800xbf16> to vector<8x800xbf16>
    %c23 = arith.constant 23 : index
    %c0_126 = arith.constant 0 : index
    %c0_127 = arith.constant 0 : index
    %141 = vector.load %arg2[%c23, %c0_126, %c0_127] : memref<27x8x8xbf16, #tpu.memory_space<vmem>>, vector<1x8x8xbf16>
    %142 = vector.shape_cast %141 : vector<1x8x8xbf16> to vector<8x8xbf16>
    %cst_128 = arith.constant dense<0.000000e+00> : vector<8x800xf32>
    %143 = tpu.matmul %142, %140, %cst_128 {dimension_numbers = #tpu.dot_dimension_numbers<[1], [0], [0], [1], [0, 0, 1, 1], [], []>} : vector<8x8xbf16>, vector<8x800xbf16>, vector<8x800xf32> -> vector<8x800xf32>
    %144 = arith.addf %138, %143 : vector<8x800xf32>
    %c0_129 = arith.constant 0 : index
    %c0_130 = arith.constant 0 : index
    %c220 = arith.constant 220 : index
    %145 = vector.load %arg1[%c0_129, %c0_130, %c220] : memref<1x8x1024xbf16, #tpu.memory_space<vmem>>, vector<1x8x800xbf16>
    %146 = vector.shape_cast %145 : vector<1x8x800xbf16> to vector<8x800xbf16>
    %c24 = arith.constant 24 : index
    %c0_131 = arith.constant 0 : index
    %c0_132 = arith.constant 0 : index
    %147 = vector.load %arg2[%c24, %c0_131, %c0_132] : memref<27x8x8xbf16, #tpu.memory_space<vmem>>, vector<1x8x8xbf16>
    %148 = vector.shape_cast %147 : vector<1x8x8xbf16> to vector<8x8xbf16>
    %cst_133 = arith.constant dense<0.000000e+00> : vector<8x800xf32>
    %149 = tpu.matmul %148, %146, %cst_133 {dimension_numbers = #tpu.dot_dimension_numbers<[1], [0], [0], [1], [0, 0, 1, 1], [], []>} : vector<8x8xbf16>, vector<8x800xbf16>, vector<8x800xf32> -> vector<8x800xf32>
    %150 = arith.addf %144, %149 : vector<8x800xf32>
    %c0_134 = arith.constant 0 : index
    %c0_135 = arith.constant 0 : index
    %c221 = arith.constant 221 : index
    %151 = vector.load %arg1[%c0_134, %c0_135, %c221] : memref<1x8x1024xbf16, #tpu.memory_space<vmem>>, vector<1x8x800xbf16>
    %152 = vector.shape_cast %151 : vector<1x8x800xbf16> to vector<8x800xbf16>
    %c25 = arith.constant 25 : index
    %c0_136 = arith.constant 0 : index
    %c0_137 = arith.constant 0 : index
    %153 = vector.load %arg2[%c25, %c0_136, %c0_137] : memref<27x8x8xbf16, #tpu.memory_space<vmem>>, vector<1x8x8xbf16>
    %154 = vector.shape_cast %153 : vector<1x8x8xbf16> to vector<8x8xbf16>
    %cst_138 = arith.constant dense<0.000000e+00> : vector<8x800xf32>
    %155 = tpu.matmul %154, %152, %cst_138 {dimension_numbers = #tpu.dot_dimension_numbers<[1], [0], [0], [1], [0, 0, 1, 1], [], []>} : vector<8x8xbf16>, vector<8x800xbf16>, vector<8x800xf32> -> vector<8x800xf32>
    %156 = arith.addf %150, %155 : vector<8x800xf32>
    %c0_139 = arith.constant 0 : index
    %c0_140 = arith.constant 0 : index
    %c222 = arith.constant 222 : index
    %157 = vector.load %arg1[%c0_139, %c0_140, %c222] : memref<1x8x1024xbf16, #tpu.memory_space<vmem>>, vector<1x8x800xbf16>
    %158 = vector.shape_cast %157 : vector<1x8x800xbf16> to vector<8x800xbf16>
    %c26 = arith.constant 26 : index
    %c0_141 = arith.constant 0 : index
    %c0_142 = arith.constant 0 : index
    %159 = vector.load %arg2[%c26, %c0_141, %c0_142] : memref<27x8x8xbf16, #tpu.memory_space<vmem>>, vector<1x8x8xbf16>
    %160 = vector.shape_cast %159 : vector<1x8x8xbf16> to vector<8x8xbf16>
    %cst_143 = arith.constant dense<0.000000e+00> : vector<8x800xf32>
    %161 = tpu.matmul %160, %158, %cst_143 {dimension_numbers = #tpu.dot_dimension_numbers<[1], [0], [0], [1], [0, 0, 1, 1], [], []>} : vector<8x8xbf16>, vector<8x800xbf16>, vector<8x800xf32> -> vector<8x800xf32>
    %162 = arith.addf %156, %161 : vector<8x800xf32>
    %c0_144 = arith.constant 0 : index
    %c0_145 = arith.constant 0 : index
    %163 = vector.load %arg3[%c0_144, %c0_145] : memref<8x1xf32, #tpu.memory_space<vmem>>, vector<8x1xf32>
    %164 = vector.broadcast %163 : vector<8x1xf32> to vector<8x800xf32>
    %165 = arith.addf %162, %164 : vector<8x800xf32>
    %c0_146 = arith.constant 0 : index
    %c0_147 = arith.constant 0 : index
    %166 = vector.load %arg4[%c0_146, %c0_147] : memref<1x800xf32, #tpu.memory_space<vmem>>, vector<1x800xf32>
    %167 = vector.broadcast %166 : vector<1x800xf32> to vector<8x800xf32>
    %168 = arith.mulf %165, %167 : vector<8x800xf32>
    %cst_148 = arith.constant dense<0.000000e+00> : vector<8xf32>
    %169 = vector.multi_reduction <add>, %168, %cst_148 [1] : vector<8x800xf32> to vector<8xf32>
    %170 = vector.shape_cast %169 : vector<8xf32> to vector<8x1xf32>
    %cst_149 = arith.constant 0.001953125 : f32
    %171 = vector.broadcast %cst_149 : f32 to vector<8x1xf32>
    %172 = arith.mulf %170, %171 : vector<8x1xf32>
    %173 = arith.mulf %165, %165 : vector<8x800xf32>
    %174 = vector.broadcast %166 : vector<1x800xf32> to vector<8x800xf32>
    %175 = arith.mulf %173, %174 : vector<8x800xf32>
    %cst_150 = arith.constant dense<0.000000e+00> : vector<8xf32>
    %176 = vector.multi_reduction <add>, %175, %cst_150 [1] : vector<8x800xf32> to vector<8xf32>
    %177 = vector.shape_cast %176 : vector<8xf32> to vector<8x1xf32>
    %cst_151 = arith.constant 0.001953125 : f32
    %178 = vector.broadcast %cst_151 : f32 to vector<8x1xf32>
    %179 = arith.mulf %177, %178 : vector<8x1xf32>
    %180 = arith.mulf %172, %172 : vector<8x1xf32>
    %181 = arith.subf %179, %180 : vector<8x1xf32>
    %cst_152 = arith.constant 0.000000e+00 : f32
    %182 = vector.broadcast %cst_152 : f32 to vector<8x1xf32>
    %183 = arith.maximumf %181, %182 : vector<8x1xf32>
    %184 = vector.broadcast %172 : vector<8x1xf32> to vector<8x800xf32>
    %185 = arith.subf %165, %184 : vector<8x800xf32>
    %cst_153 = arith.constant 9.99999974E-6 : f32
    %186 = vector.broadcast %cst_153 : f32 to vector<8x1xf32>
    %187 = arith.addf %183, %186 : vector<8x1xf32>
    %188 = math.rsqrt %187 : vector<8x1xf32>
    %189 = vector.broadcast %188 : vector<8x1xf32> to vector<8x800xf32>
    %190 = arith.mulf %185, %189 : vector<8x800xf32>
    %cst_154 = arith.constant 0.000000e+00 : f32
    %191 = vector.broadcast %cst_154 : f32 to vector<8x800xf32>
    %192 = arith.cmpf oge, %190, %191 : vector<8x800xf32>
    %cst_155 = arith.constant 0.00999999977 : f32
    %193 = vector.broadcast %cst_155 : f32 to vector<8x800xf32>
    %194 = arith.mulf %193, %190 : vector<8x800xf32>
    %195 = arith.select %192, %190, %194 : vector<8x800xi1>, vector<8x800xf32>
    %c0_156 = arith.constant 0 : index
    %c0_157 = arith.constant 0 : index
    %c0_158 = arith.constant 0 : index
    %196 = vector.load %arg5[%c0_156, %c0_157, %c0_158] : memref<1x8x800xf32, #tpu.memory_space<vmem>>, vector<1x8x800xf32>
    %197 = vector.shape_cast %196 : vector<1x8x800xf32> to vector<8x800xf32>
    %198 = vector.shape_cast %195 : vector<8x800xf32> to vector<1x8x800xf32>
    tpu.vector_store %arg5[%c0_156, %c0_157, %c0_158], %198 {strides = array<i32>} : memref<1x8x800xf32, #tpu.memory_space<vmem>>, vector<1x8x800xf32>,
    return
  }
  func.func @transform_0(%arg0: i32) -> (i32, i32, i32) {
    %c0_i32 = arith.constant 0 : i32
    %c0_i32_0 = arith.constant 0 : i32
    %c0_i32_1 = arith.constant 0 : i32
    return %arg0, %c0_i32, %c0_i32_0 : i32, i32, i32
  }
  func.func @transform_1(%arg0: i32) -> (i32, i32, i32) {
    %c0_i32 = arith.constant 0 : i32
    %c0_i32_0 = arith.constant 0 : i32
    %c0_i32_1 = arith.constant 0 : i32
    %c0_i32_2 = arith.constant 0 : i32
    return %c0_i32, %c0_i32_0, %c0_i32_1 : i32, i32, i32
  }
  func.func @transform_2(%arg0: i32) -> (i32, i32) {
    %c0_i32 = arith.constant 0 : i32
    %c0_i32_0 = arith.constant 0 : i32
    %c0_i32_1 = arith.constant 0 : i32
    return %c0_i32, %c0_i32_0 : i32, i32
  }
  func.func @transform_3(%arg0: i32) -> (i32, i32) {
    %c0_i32 = arith.constant 0 : i32
    %c0_i32_0 = arith.constant 0 : i32
    %c0_i32_1 = arith.constant 0 : i32
    return %c0_i32, %c0_i32_0 : i32, i32
  }
  func.func @transform_4(%arg0: i32) -> (i32, i32, i32) {
    %c0_i32 = arith.constant 0 : i32
    %c0_i32_0 = arith.constant 0 : i32
    %c0_i32_1 = arith.constant 0 : i32
    return %arg0, %c0_i32, %c0_i32_0 : i32, i32, i32
  }
}

</mosaic_0001>

<bundles_post_ra>
// kernel: down_forward.3
= control target key start
LH: loop header
LB: loop body
LE: loop exit
PB: predicated region body
PF: predicated region fallthrough
CT: control target
= control target key end

     0   :  { %s507_s12 = smov 0   ;;  %s534_s0 = inlined_call_operand.vmem [shape: bf16[2,32,512], index: 0, kind: input, shape index: {}]   ;;  %s535_s1 = inlined_call_operand.vmem [shape: bf16[8,32], index: 1, kind: input, shape index: {}]   ;;  %s536_s2 = inlined_call_operand.vmem [shape: f32[8,1], index: 2, kind: input, shape index: {}]   ;;  %s537_s3 = inlined_call_operand.vmem [shape: bf16[2,8,512], index: 3, kind: output, shape index: {}]  }
   0x1 LB: > { %s427_s13 = sadd.s32 4294967295, %s484_s12   ;;  %p431_p0 = scmp.ge.s32.totalorder %s484_s12, 1  ;;  %s484_s12 = sphi %s507_s12, %s13_s12  }
   0x2   : > { %p137_p1 = scmp.lt.s32.totalorder %s484_s12, 3 }
   0x4   : > { %p138_p2 = pnand %p431_p0, %p137_p1 }
   0x5   : > { %p161_p3 = scmp.lt.s32.totalorder (!%p138_p2), %s427_s13, 1  ;;  %v181_v0 = vld [vmem:[%s536_s2] sm:$0xff] (!%p138_p2)  ;;  %v486_v1 = vmov (!%p138_p2), 0   ;;  %vm227_vm0 = vcmask (!%p138_p2), 261120  }
   0x6   : > { %141 = sbr.rel (%p138_p2) target bundleno = 419 (0x1a3), region = 32  ;;  %263 = vmatprep.mubr.bf16.mxu0 (!%p138_p2), %v486_v1  ;;  %304 = vmatprep.mubr.bf16.mxu1 (!%p138_p2), %v486_v1  ;;  %v172_v10 = vld [vmem:[%s535_s1] sm:$0xf] (!%p138_p2) }
   0x7   : > { %463 = vset.pattern.permute.xlu0 (!%p138_p2), %v486_v1 }
   0x8   : > { %184 = vperm.xlu0 (!%p138_p2), %463, %v181_v0  }
   0xd   : > { %s539_s13 = smov (!%p161_p3, %s427_s13), 1 }
   0xe   : > { %s450_s16 = sshll.u32 %s539_s13, 6  ;;  %s451_s22 = sshll.u32 %s539_s13, 4 }
   0xf   : > { %s165_s19 = scalar_lea.vmem %s534_s0, %s450_s16  ;;  %s170_s25 = scalar_lea.vmem %s537_s3, %s451_s22 }
  0x10   : > { %v464_v2 = vld [vmem:[%s165_s19 + $0x4] ss:$16 sps:$4 sm:$0xff]   ;;  %v466_v3 = vld [vmem:[%s165_s19 + $0xc] ss:$16 sps:$4 sm:$0xff]   ;;  %v468_v4 = vld [vmem:[%s165_s19] ss:$16 sps:$4 sm:$0xff]  }
  0x11   : > { %231 = vmatprep.subr.bf16.mxu0 %v464_v2  ;;  %v469_v5 = vld [vmem:[%s165_s19 + $0x8] ss:$16 sps:$4 sm:$0xff]   ;;  %272 = vmatprep.subr.bf16.mxu1 %v466_v3  ;;  %v470_v6 = vld [vmem:[%s165_s19 + $0x24] ss:$16 sps:$4 sm:$0xff]   ;;  %v472_v7 = vld [vmem:[%s165_s19 + $0x2c] ss:$16 sps:$4 sm:$0xff]  }
  0x12   : > { %232 = vmatpush1.bf16.msra.mxu0 %v468_v4  ;;  %273 = vmatpush1.bf16.msra.mxu1 %v469_v5  ;;  %v474_v8 = vld [vmem:[%s165_s19 + $0x20] ss:$16 sps:$4 sm:$0xff]   ;;  %v475_v9 = vld [vmem:[%s165_s19 + $0x28] ss:$16 sps:$4 sm:$0xff]  }
  0x13   : > { %233 = vmatprep.subr.bf16.mxu0 %v470_v6  ;;  %274 = vmatprep.subr.bf16.mxu1 %v472_v7 }
  0x16   : > { %234 = vmatpush1.bf16.msra.mxu0 %v474_v8  ;;  %275 = vmatpush1.bf16.msra.mxu1 %v475_v9 }
  0x19   : > { %444 = vmatmul.mubr.msk.bf16.vlgmr.msra.gmra.mrb[0].mxu0 %vm227_vm0, %v172_v10  ;;  %445 = vmatmul.mubr.msk.bf16.vlgmr.msra.gmra.mrb[0].mxu1 %vm227_vm0, %v172_v10 }
  0x87   : > { %v185_v11 = vpop.permute.xlu0 %184 }
  0xec   : > { %v265_v12 = vpop.f32.mrb[0].mxu0  ;;  %v306_v13 = vpop.f32.mrb[0].mxu1 }
  0xed   : > { %v266_v14 = vadd.f32 %v265_v12, %v185_v11  ;;  %v267_v15 = vpop.f32.mrb[1].mxu0  ;;  %v308_v16 = vpop.f32.mrb[1].mxu1  ;;  %v307_v17 = vadd.f32 %v306_v13, %v185_v11 }
  0xee   : > { %v268_v18 = vadd.f32 %v267_v15, %v185_v11  ;;  %v269_v19 = vpop.f32.mrb[2].mxu0  ;;  %v310_v20 = vpop.f32.mrb[2].mxu1  ;;  %v309_v26 = vadd.f32 %v308_v16, %v185_v11 }
  0xef   : > { %v319_v21 = vmul.f32 %v266_v14, %v266_v14  ;;  %v270_v22 = vpop.f32.mrb[3].mxu0  ;;  %v311_v23 = vpop.f32.mrb[3].mxu1  ;;  %v321_v28 = vmul.f32 %v307_v17, %v307_v17 }
  0xf0   : > { %v313_v24 = vadd.f32 %v268_v18, %v266_v14  ;;  %v320_v25 = vmul.f32 %v268_v18, %v268_v18  ;;  %v322_v31 = vmul.f32 %v309_v26, %v309_v26 }
  0xf2   : > { %v314_v27 = vadd.f32 %v313_v24, %v307_v17  ;;  %v323_v29 = vadd.f32 %v320_v25, %v319_v21 }
  0xf4   : > { %v315_v30 = vadd.f32 %v314_v27, %v309_v26  ;;  %v324_v32 = vadd.f32 %v323_v29, %v321_v28 }
  0xf6   : > { %316 = vadd.xlane.f32.xlu0 %v315_v30  ;;  %v325_v33 = vadd.f32 %v324_v32, %v322_v31 }
  0xf8   : > { %326 = vadd.xlane.f32.xlu1 %v325_v33 }
 0x183   : > { %v317_v34 = vpop.xlane.xlu0 %316 }
 0x184   : > { %v318_v35 = vmul.f32 0.001953125, %v317_v34 }
 0x185   : > { %v327_v36 = vpop.xlane.xlu1 %326 }
 0x186   : > { %v328_v37 = vmul.f32 0.001953125, %v327_v36  ;;  %v329_v38 = vmul.f32 %v318_v35, %v318_v35  ;;  %v332_v42 = vsub.f32 %v266_v14, %v318_v35  ;;  %v333_v43 = vsub.f32 %v268_v18, %v318_v35 }
 0x187   : > { %v334_v44 = vsub.f32 %v307_v17, %v318_v35  ;;  %v335_v45 = vsub.f32 %v309_v26, %v318_v35 }
 0x188   : > { %v330_v39 = vsub.f32 %v328_v37, %v329_v38 }
 0x18a   : > { %v331_v40 = vmax.f32 %v330_v39, 0.0 }
 0x18c   : > { %v336_v41 = vadd.f32 1e-05, %v331_v40 }
 0x18e   : > { %476 = vrsqrt.f32 %v336_v41 }
 0x198   : > { %v477_v46 = vpop.eup %476 }
 0x199   : > { %v338_v47 = vmul.f32 %v477_v46, %v332_v42  ;;  %v339_v48 = vmul.f32 %v477_v46, %v333_v43  ;;  %v340_v49 = vmul.f32 %v477_v46, %v334_v44  ;;  %v341_v50 = vmul.f32 %v477_v46, %v335_v45 }
 0x19b   : > { %vm342_vm1 = vcmp.ge.f32.partialorder %v338_v47, 0.0  ;;  %vm343_vm2 = vcmp.ge.f32.partialorder %v339_v48, 0.0  ;;  %vm344_vm3 = vcmp.ge.f32.partialorder %v340_v49, 0.0  ;;  %vm345_vm4 = vcmp.ge.f32.partialorder %v341_v50, 0.0 }
 0x19c   : > { %v346_v51 = vmul.f32 0.01, %v338_v47  ;;  %v347_v52 = vmul.f32 0.01, %v339_v48  ;;  %v348_v53 = vmul.f32 0.01, %v340_v49 }
 0x19d   : > { %v349_v54 = vmul.f32 0.01, %v341_v50 }
 0x19e   : > { %v350_v55 = vsel %vm342_vm1, %v338_v47, %v346_v51  ;;  %v351_v56 = vsel %vm343_vm2, %v339_v48, %v347_v52  ;;  %v352_v57 = vsel %vm344_vm3, %v340_v49, %v348_v53 }
 0x19f   : > { %v353_v58 = vsel %vm345_vm4, %v341_v50, %v349_v54  ;;  %v452_v59 = vpack.c.bf16 %v351_v56, %v350_v55 }
 0x1a0   : > { %v453_v60 = vpack.c.bf16 %v353_v58, %v352_v57 }
 0x1a1   : > { %370 = vst [vmem:[%s170_s25] sm:$0xff] %v452_v59 }
 0x1a2   : > { %371 = vst [vmem:[%s170_s25 + $0x8] sm:$0xff] %v453_v60 }
 0x1a3 PF: > { %s13_s12 = sadd.s32 1, %s484_s12  }
 0x1a4   : > { %p10_p4 = scmp.ge.s32.totalorder %s13_s12, 4  }
 0x1a6   :  { %12 = sbr.rel (!%p10_p4) target bundleno = 1 (0x1), region = 62 }

// kernel: down_forward.4
= control target key start
LH: loop header
LB: loop body
LE: loop exit
PB: predicated region body
PF: predicated region fallthrough
CT: control target
= control target key end

     0   :  { %s6932_s15 = smov 0   ;;  %s8710_s0 = inlined_call_operand.vmem [shape: bf16[2,8,1024], index: 0, kind: input, shape index: {}]   ;;  %s8711_s1 = inlined_call_operand.vmem [shape: bf16[27,8,8], index: 1, kind: input, shape index: {}]   ;;  %s8712_s2 = inlined_call_operand.vmem [shape: f32[8,1], index: 2, kind: input, shape index: {}]   ;;  %s8713_s3 = inlined_call_operand.vmem [shape: f32[1,800], index: 3, kind: input, shape index: {}]   ;;  %s8714_s4 = inlined_call_operand.vmem [shape: bf16[2,8,800], index: 4, kind: output, shape index: {}]  }
   0x1 LB: > { %s6340_s16 = sadd.s32 4294967295, %s6876_s15   ;;  %p6344_p0 = scmp.ge.s32.totalorder %s6876_s15, 1  ;;  %s6876_s15 = sphi %s6932_s15, %s14_s15  }
   0x2   : > { %p162_p1 = scmp.lt.s32.totalorder %s6876_s15, 3 }
   0x4   : > { %p163_p2 = pnand %p6344_p0, %p162_p1 }
   0x5   : > { %p188_p3 = scmp.lt.s32.totalorder (!%p163_p2), %s6340_s16, 1  ;;  %v6878_v0 = vmov (!%p163_p2), 0   ;;  %s6879_s21 = smov (!%p163_p2), 127   ;;  %vm238_vm0 = vcmask (!%p163_p2), 1039360   ;;  %vm249_vm1 = vcmask (!%p163_p2), 1043456   ;;  %vm245_vm2 = vcmask (!%p163_p2), 64512  }
   0x6   : > { %166 = sbr.rel (%p163_p2) target bundleno = 968 (0x3c8), region = 36  ;;  %303 = vmatprep.mubr.bf16.mxu0 (!%p163_p2), %v6878_v0  ;;  %344 = vmatprep.mubr.bf16.mxu1 (!%p163_p2), %v6878_v0  ;;  %s6880_s22 = smov (!%p163_p2), 126   ;;  %v6348_v19 = vld [vmem:[%s8711_s1 + $0x4] sm:$0xf] (!%p163_p2)  ;;  %v6888_v29 = vmov (!%p163_p2), 0.0   ;;  %vm6889_vm3 = vmmov (!%p163_p2), 0  }
   0x7   : > { %6850 = vset.pattern.permute.xlu1 (!%p163_p2), %v6878_v0  ;;  %6851 = vset.pattern.permute.xlu0 (!%p163_p2), %v6878_v0  ;;  %s6881_s23 = smov (!%p163_p2), 118   ;;  %s6882_s24 = smov (!%p163_p2), 117   ;;  %vm637_vm4 = vcmask (!%p163_p2), 1031168   ;;  %v203_v40 = vld [vmem:[%s8711_s1] sm:$0xf] (!%p163_p2)  ;;  %vm854_vm5 = vcmask (!%p163_p2), 965632  }
   0x8   : > { %s6883_s25 = smov (!%p163_p2), 116   ;;  %s6884_s26 = smov (!%p163_p2), 108   ;;  %v6370_v59 = vld [vmem:[%s8711_s1 + $0x8] sm:$0xf] (!%p163_p2)  ;;  %vm1071_vm6 = vcmask (!%p163_p2), 957440   ;;  %vm1288_vm7 = vcmask (!%p163_p2), 949248  }
   0x9   : > { %s6885_s27 = smov (!%p163_p2), 107   ;;  %s6886_s28 = smov (!%p163_p2), 106   ;;  %vm1505_vm8 = vcmask (!%p163_p2), 883712   ;;  %vm1722_vm9 = vcmask (!%p163_p2), 875520   ;;  %vm1939_vm10 = vcmask (!%p163_p2), 867328   ;;  %vm2182_vm11 = vcmask (!%p163_p2), 228352  }
   0xa   : > { %s6887_s29 = smov (!%p163_p2), 28   ;;  %s6890_s6 = smov (!%p163_p2), 27   ;;  %vm2402_vm12 = vcmask (!%p163_p2), 220160   ;;  %vm2622_vm13 = vcmask (!%p163_p2), 211968   ;;  %vm2842_vm14 = vcmask (!%p163_p2), 146432   ;;  %vm3062_vm15 = vcmask (!%p163_p2), 138240  }
   0xb   : > { %s6891_s9 = smov (!%p163_p2), 26   ;;  %s6892_s12 = smov (!%p163_p2), 18  }
   0xc   : > { %s6897_s30 = smov (!%p163_p2), 6   ;;  %s6898_s7 = smov (!%p163_p2), 56  }
   0xd   : > { %s8716_s16 = smov (!%p188_p3, %s6340_s16), 1  ;;  %s6906_s5 = smov 34  }
   0xe   : > { %s6591_s17 = sshll.u32 %s8716_s16, 5  ;;  %s6812_s8 = smul.u32 28, %s8716_s16 }
   0xf   : > { %s6948_s20 = scalar_lea.vmem %s8710_s0, %s6591_s17  ;;  %s6893_s17 = smov 17  }
  0x10   : > { %v200_v1 = vld [vmem:[%s6948_s20 + $0x8] sm:$0xff]  ;;  %v199_v2 = vld [vmem:[%s6948_s20] sm:$0xff]  ;;  %v201_v7 = vld [vmem:[%s6948_s20 + $0x10] sm:$0xff]  ;;  %s197_s10 = scalar_lea.vmem %s8714_s4, %s6812_s8 }
  0x11   : > { %v6954_v3 = vcombine.low %v200_v1, %v200_v1  ;;  %v6956_v4 = vcombine.low %v199_v2, %v199_v2  ;;  %v6960_v5 = vcombine.high %v200_v1, %v200_v1  ;;  %v6962_v6 = vcombine.high %v199_v2, %v199_v2  ;;  %v6974_v10 = vld [vmem:[%s6948_s20 + $0x18] ss:$0 sps:$4 sm:$0xff]  }
  0x12   : > { %v6967_v8 = vcombine.high %v201_v7, %v201_v7  ;;  %v6969_v9 = vcombine.low %v201_v7, %v201_v7  ;;  %v2143_v17 = vld [vmem:[%s6948_s20 + $0x18] sm:$0xff]  ;;  %v456_v45 = vsel %vm249_vm1, %v6974_v10, 0 }
  0x13   : > { %228 = vrot.lane.b32.xlu1 %v6954_v3, %s6879_s21  ;;  %224 = vrot.lane.b32.xlu0 %v6956_v4, %s6879_s21  ;;  %v7047_v23 = vcombine.low %v2143_v17, %v2143_v17  ;;  %v7050_v25 = vcombine.high %v2143_v17, %v2143_v17  ;;  %v438_v34 = vsel %vm249_vm1, %v6956_v4, 0  ;;  %v444_v37 = vsel %vm249_vm1, %v6954_v3, 0 }
  0x14   : > { %v450_v41 = vsel %vm249_vm1, %v6969_v9, 0 }
  0x17   : > { %230 = vrot.lane.b32.xlu1 %v6960_v5, %s6879_s21  ;;  %226 = vrot.lane.b32.xlu0 %v6962_v6, %s6879_s21 }
  0x1b   : > { %234 = vrot.lane.b32.xlu1 %v6967_v8, %s6879_s21  ;;  %232 = vrot.lane.b32.xlu0 %v6969_v9, %s6879_s21 }
  0x1f   : > { %236 = vrot.lane.b32.xlu0 %v6974_v10, %s6879_s21  ;;  %623 = vrot.lane.b32.xlu1 %v6956_v4, %s6880_s22  ;;  %s6894_s21 = smov 16  }
  0x23   : > { %627 = vrot.lane.b32.xlu1 %v6954_v3, %s6880_s22  ;;  %625 = vrot.lane.b32.xlu0 %v6962_v6, %s6880_s22 }
  0x27   : > { %631 = vrot.lane.b32.xlu1 %v6969_v9, %s6880_s22  ;;  %629 = vrot.lane.b32.xlu0 %v6960_v5, %s6880_s22 }
  0x2b   : > { %635 = vrot.lane.b32.xlu1 %v6974_v10, %s6880_s22  ;;  %633 = vrot.lane.b32.xlu0 %v6967_v8, %s6880_s22  ;;  %s6903_s22 = smov 44  }
  0x2f   : > { %840 = vrot.lane.b32.xlu0 %v6956_v4, %s6881_s23  ;;  %842 = vrot.lane.b32.xlu1 %v6962_v6, %s6881_s23 }
  0x33   : > { %844 = vrot.lane.b32.xlu0 %v6954_v3, %s6881_s23  ;;  %846 = vrot.lane.b32.xlu1 %v6960_v5, %s6881_s23 }
  0x37   : > { %848 = vrot.lane.b32.xlu0 %v6969_v9, %s6881_s23  ;;  %850 = vrot.lane.b32.xlu1 %v6967_v8, %s6881_s23 }
  0x3b   : > { %852 = vrot.lane.b32.xlu0 %v6974_v10, %s6881_s23  ;;  %1057 = vrot.lane.b32.xlu1 %v6956_v4, %s6882_s24 }
  0x3f   : > { %1061 = vrot.lane.b32.xlu1 %v6954_v3, %s6882_s24  ;;  %1059 = vrot.lane.b32.xlu0 %v6962_v6, %s6882_s24 }
  0x43   : > { %1065 = vrot.lane.b32.xlu1 %v6969_v9, %s6882_s24  ;;  %1063 = vrot.lane.b32.xlu0 %v6960_v5, %s6882_s24 }
  0x47   : > { %1069 = vrot.lane.b32.xlu1 %v6974_v10, %s6882_s24  ;;  %1067 = vrot.lane.b32.xlu0 %v6967_v8, %s6882_s24  ;;  %s6895_s24 = smov 8  }
  0x4b   : > { %1274 = vrot.lane.b32.xlu0 %v6956_v4, %s6883_s25  ;;  %1276 = vrot.lane.b32.xlu1 %v6962_v6, %s6883_s25 }
  0x4f   : > { %1278 = vrot.lane.b32.xlu0 %v6954_v3, %s6883_s25  ;;  %1280 = vrot.lane.b32.xlu1 %v6960_v5, %s6883_s25 }
  0x53   : > { %1282 = vrot.lane.b32.xlu0 %v6969_v9, %s6883_s25  ;;  %1284 = vrot.lane.b32.xlu1 %v6967_v8, %s6883_s25 }
  0x57   : > { %1286 = vrot.lane.b32.xlu0 %v6974_v10, %s6883_s25  ;;  %1491 = vrot.lane.b32.xlu1 %v6956_v4, %s6884_s26  ;;  %s6904_s25 = smov 36  }
  0x5b   : > { %1495 = vrot.lane.b32.xlu1 %v6954_v3, %s6884_s26  ;;  %1493 = vrot.lane.b32.xlu0 %v6962_v6, %s6884_s26 }
  0x5f   : > { %1499 = vrot.lane.b32.xlu1 %v6969_v9, %s6884_s26  ;;  %1497 = vrot.lane.b32.xlu0 %v6960_v5, %s6884_s26 }
  0x63   : > { %1503 = vrot.lane.b32.xlu1 %v6974_v10, %s6884_s26  ;;  %1501 = vrot.lane.b32.xlu0 %v6967_v8, %s6884_s26 }
  0x67   : > { %1708 = vrot.lane.b32.xlu0 %v6956_v4, %s6885_s27  ;;  %1710 = vrot.lane.b32.xlu1 %v6962_v6, %s6885_s27 }
  0x6b   : > { %1712 = vrot.lane.b32.xlu0 %v6954_v3, %s6885_s27  ;;  %1714 = vrot.lane.b32.xlu1 %v6960_v5, %s6885_s27 }
  0x6f   : > { %1716 = vrot.lane.b32.xlu0 %v6969_v9, %s6885_s27  ;;  %1718 = vrot.lane.b32.xlu1 %v6967_v8, %s6885_s27 }
  0x73   : > { %1720 = vrot.lane.b32.xlu0 %v6974_v10, %s6885_s27  ;;  %1925 = vrot.lane.b32.xlu1 %v6956_v4, %s6886_s28  ;;  %s6896_s27 = smov 7  }
  0x77   : > { %1929 = vrot.lane.b32.xlu1 %v6954_v3, %s6886_s28  ;;  %1927 = vrot.lane.b32.xlu0 %v6962_v6, %s6886_s28 }
  0x7b   : > { %1933 = vrot.lane.b32.xlu1 %v6969_v9, %s6886_s28  ;;  %1931 = vrot.lane.b32.xlu0 %v6960_v5, %s6886_s28 }
  0x7f   : > { %1937 = vrot.lane.b32.xlu1 %v6974_v10, %s6886_s28  ;;  %1935 = vrot.lane.b32.xlu0 %v6967_v8, %s6886_s28  ;;  %s6905_s28 = smov 35  }
  0x83   : > { %2166 = vrot.lane.b32.xlu0 %v6956_v4, %s6887_s29  ;;  %2168 = vrot.lane.b32.xlu1 %v6962_v6, %s6887_s29 }
  0x85   : > { %v229_v11 = vpop.permute.xlu1 %228  ;;  %v225_v12 = vpop.permute.xlu0 %224 }
  0x87   : > { %2170 = vrot.lane.b32.xlu0 %v6954_v3, %s6887_s29  ;;  %2172 = vrot.lane.b32.xlu1 %v6960_v5, %s6887_s29 }
  0x89   : > { %v231_v13 = vpop.permute.xlu1 %230  ;;  %v227_v14 = vpop.permute.xlu0 %226 }
  0x8a   : > { %v240_v15 = vsel %vm238_vm0, %v227_v14, %v229_v11  ;;  %v239_v16 = vsel %vm238_vm0, %v225_v12, %v227_v14  ;;  %v241_v20 = vsel %vm238_vm0, %v229_v11, %v231_v13 }
  0x8b   : > { %6356 = vmatprep.subr.msk.bf16.mxu0 %vm249_vm1, %v240_v15  ;;  %v251_v18 = vsel %vm249_vm1, %v239_v16, 0  ;;  %2174 = vrot.lane.b32.xlu0 %v6969_v9, %s6887_s29  ;;  %v257_v26 = vsel %vm249_vm1, %v241_v20, 0 }
  0x8c   : > { %272 = vmatpush1.bf16.msra.mxu0 %v251_v18  ;;  %2176 = vrot.lane.b32.xlu1 %v6967_v8, %s6887_s29 }
  0x8d   : > { %v235_v21 = vpop.permute.xlu1 %234  ;;  %v233_v22 = vpop.permute.xlu0 %232 }
  0x8e   : > { %v242_v24 = vsel %vm238_vm0, %v231_v13, %v233_v22  ;;  %v243_v27 = vsel %vm238_vm0, %v233_v22, %v235_v21 }
  0x8f   : > { %6357 = vmatmul.mubr.msk.bf16.vlgmr.msra.gmra.mrb[0].mxu0 %vm245_vm2, %v6348_v19  ;;  %6358 = vmatprep.subr.msk.bf16.mxu1 %vm249_vm1, %v242_v24  ;;  %v263_v33 = vsel %vm249_vm1, %v243_v27, 0 }
  0x90   : > { %313 = vmatpush1.bf16.msra.mxu1 %v257_v26  ;;  %385 = vmatprep.mubr.bf16.mxu0 %v6878_v0 }
  0x91   : > { %v237_v28 = vpop.permute.xlu0 %236  ;;  %6650 = vmatprep.subr.bf16.mxu1 %v6888_v29  ;;  %v624_v30 = vpop.permute.xlu1 %623  ;;  %2178 = vrot.lane.b32.xlu0 %v7047_v23, %s6887_s29 }
  0x92   : > { %v244_v31 = vsel %vm238_vm0, %v235_v21, %v237_v28  ;;  %v269_v32 = vsel %vm249_vm1, %v237_v28, 0  ;;  %2180 = vrot.lane.b32.xlu1 %v7050_v25, %s6887_s29  ;;  %v6378_v21 = vld [vmem:[%s8711_s1 + $0xc] sm:$0xf]  ;;  %vm3282_vm0 = vcmask 130048  }
  0x93   : > { %6359 = vmatmul.mubr.msk.bf16.vlgmr.msra.gmra.mrb[0].mxu1 %vm245_vm2, %v6348_v19  ;;  %6360 = vmatprep.subr.msk.bf16.mxu0 %vm249_vm1, %v244_v31 }
  0x94   : > { %354 = vmatpush1.bf16.msra.mxu0 %v263_v33  ;;  %6651 = vmatpush3.bf16.msra.mxu1 %v269_v32 }
  0x95   : > { %6652 = vmatprep.mubr.msk.bf16.mxu1 %vm6889_vm3, %v6888_v29  ;;  %6363 = vmatprep.subr.msk.bf16.mxu0 %vm249_vm1, %v6962_v6  ;;  %v628_v35 = vpop.permute.xlu1 %627  ;;  %v626_v36 = vpop.permute.xlu0 %625 }
  0x96   : > { %6365 = vmatprep.subr.msk.bf16.mxu1 %vm249_vm1, %v6960_v5  ;;  %2386 = vrot.lane.b32.xlu0 %v6956_v4, %s6890_s6  ;;  %v639_v44 = vsel %vm637_vm4, %v626_v36, %v628_v35  ;;  %v638_v48 = vsel %vm637_vm4, %v624_v30, %v626_v36 }
  0x97   : > { %6361 = vmatmul.mubr.msk.bf16.vlgmr.msra.gmra.mrb[4].mxu0 %vm245_vm2, %v6348_v19  ;;  %2388 = vrot.lane.b32.xlu1 %v6962_v6, %s6890_s6  ;;  %v648_v50 = vsel %vm249_vm1, %v638_v48, 0 }
  0x98   : > { %459 = vmatpush1.bf16.msra.mxu0 %v438_v34  ;;  %490 = vmatprep.mubr.bf16.mxu0 %v6878_v0 }
  0x99   : > { %6367 = vmatprep.subr.msk.bf16.mxu0 %vm249_vm1, %v6967_v8  ;;  %v632_v38 = vpop.permute.xlu1 %631  ;;  %v630_v39 = vpop.permute.xlu0 %629 }
  0x9a   : > { %2390 = vrot.lane.b32.xlu0 %v6954_v3, %s6890_s6  ;;  %v641_v49 = vsel %vm637_vm4, %v630_v39, %v632_v38  ;;  %v640_v53 = vsel %vm637_vm4, %v628_v35, %v630_v39 }
  0x9b   : > { %6653 = vmatmul.mubr.msk.bf16.vlgmr.msra.gmra.mrb[4].mxu1 %vm245_vm2, %v6348_v19  ;;  %2392 = vrot.lane.b32.xlu1 %v6960_v5, %s6890_s6  ;;  %v654_v55 = vsel %vm249_vm1, %v640_v53, 0 }
  0x9c   : > { %500 = vmatpush1.bf16.msra.mxu1 %v444_v37  ;;  %531 = vmatprep.mubr.bf16.mxu1 %v6878_v0 }
  0x9d   : > { %6656 = vmatprep.subr.bf16.mxu1 %v6888_v29  ;;  %v636_v42 = vpop.permute.xlu1 %635  ;;  %v634_v43 = vpop.permute.xlu0 %633 }
  0x9e   : > { %2394 = vrot.lane.b32.xlu0 %v6969_v9, %s6890_s6  ;;  %v643_v54 = vsel %vm637_vm4, %v634_v43, %v636_v42  ;;  %v642_v58 = vsel %vm637_vm4, %v632_v38, %v634_v43  ;;  %v666_v1 = vsel %vm249_vm1, %v636_v42, 0  ;;  %v6386_v43 = vld [vmem:[%s8711_s1 + $0x10] sm:$0xf]  ;;  %vm3722_vm4 = vcmask 56320  }
  0x9f   : > { %6364 = vmatmul.mubr.msk.bf16.vlgmr.msra.gmra.mrb[8].mxu0 %vm245_vm2, %v203_v40  ;;  %2396 = vrot.lane.b32.xlu1 %v6967_v8, %s6890_s6  ;;  %v660_v60 = vsel %vm249_vm1, %v642_v58, 0 }
  0xa0   : > { %541 = vmatpush1.bf16.msra.mxu0 %v450_v41  ;;  %572 = vmatprep.mubr.bf16.mxu0 %v6878_v0 }
  0xa1   : > { %6371 = vmatprep.subr.msk.bf16.mxu0 %vm249_vm1, %v639_v44  ;;  %v841_v46 = vpop.permute.xlu0 %840  ;;  %v843_v47 = vpop.permute.xlu1 %842 }
  0xa2   : > { %2398 = vrot.lane.b32.xlu0 %v7047_v23, %s6890_s6  ;;  %v855_v10 = vsel %vm854_vm5, %v841_v46, %v843_v47 }
  0xa3   : > { %6366 = vmatmul.mubr.msk.bf16.vlgmr.msra.gmra.mrb[8].mxu1 %vm245_vm2, %v203_v40  ;;  %2400 = vrot.lane.b32.xlu1 %v7050_v25, %s6890_s6  ;;  %v865_v12 = vsel %vm249_vm1, %v855_v10, 0 }
  0xa4   : > { %6657 = vmatpush3.bf16.msra.mxu1 %v456_v45  ;;  %6658 = vmatprep.mubr.msk.bf16.mxu1 %vm6889_vm3, %v6888_v29 }
  0xa5   : > { %6373 = vmatprep.subr.msk.bf16.mxu1 %vm249_vm1, %v641_v49  ;;  %v845_v51 = vpop.permute.xlu0 %844  ;;  %v847_v52 = vpop.permute.xlu1 %846 }
  0xa6   : > { %2606 = vrot.lane.b32.xlu0 %v6956_v4, %s6891_s9  ;;  %v856_v63 = vsel %vm854_vm5, %v843_v47, %v845_v51  ;;  %v857_v15 = vsel %vm854_vm5, %v845_v51, %v847_v52 }
  0xa7   : > { %6368 = vmatmul.mubr.msk.bf16.vlgmr.msra.gmra.mrb[12].mxu0 %vm245_vm2, %v203_v40  ;;  %2608 = vrot.lane.b32.xlu1 %v6962_v6, %s6891_s9  ;;  %v871_v17 = vsel %vm249_vm1, %v857_v15, 0 }
  0xa8   : > { %669 = vmatpush1.bf16.msra.mxu0 %v648_v50  ;;  %700 = vmatprep.mubr.bf16.mxu0 %v6878_v0 }
  0xa9   : > { %6375 = vmatprep.subr.msk.bf16.mxu0 %vm249_vm1, %v643_v54  ;;  %v849_v56 = vpop.permute.xlu0 %848  ;;  %v851_v57 = vpop.permute.xlu1 %850 }
  0xaa   : > { %2610 = vrot.lane.b32.xlu0 %v6954_v3, %s6891_s9  ;;  %v858_v11 = vsel %vm854_vm5, %v847_v52, %v849_v56  ;;  %v859_v20 = vsel %vm854_vm5, %v849_v56, %v851_v57 }
  0xab   : > { %6659 = vmatmul.mubr.msk.bf16.vlgmr.msra.gmra.mrb[12].mxu1 %vm245_vm2, %v203_v40  ;;  %2612 = vrot.lane.b32.xlu1 %v6960_v5, %s6891_s9  ;;  %v877_v22 = vsel %vm249_vm1, %v859_v20, 0 }
  0xac   : > { %710 = vmatpush1.bf16.msra.mxu1 %v654_v55  ;;  %741 = vmatprep.mubr.bf16.mxu1 %v6878_v0 }
  0xad   : > { %6662 = vmatprep.subr.bf16.mxu1 %v6888_v29  ;;  %v853_v61 = vpop.permute.xlu0 %852  ;;  %v1058_v62 = vpop.permute.xlu1 %1057 }
  0xae   : > { %2614 = vrot.lane.b32.xlu0 %v6969_v9, %s6891_s9  ;;  %v860_v16 = vsel %vm854_vm5, %v851_v57, %v853_v61  ;;  %v883_v28 = vsel %vm249_vm1, %v853_v61, 0  ;;  %vm3942_vm5 = vcmask 48128  }
  0xaf   : > { %6372 = vmatmul.mubr.msk.bf16.vlgmr.msra.gmra.mrb[16].mxu0 %vm245_vm2, %v6370_v59  ;;  %2616 = vrot.lane.b32.xlu1 %v6967_v8, %s6891_s9 }
  0xb0   : > { %751 = vmatpush1.bf16.msra.mxu0 %v660_v60  ;;  %782 = vmatprep.mubr.bf16.mxu0 %v6878_v0 }
  0xb1   : > { %6379 = vmatprep.subr.msk.bf16.mxu0 %vm249_vm1, %v856_v63  ;;  %v1062_v2 = vpop.permute.xlu1 %1061  ;;  %v1060_v7 = vpop.permute.xlu0 %1059 }
  0xb2   : > { %2618 = vrot.lane.b32.xlu0 %v7047_v23, %s6891_s9  ;;  %v1073_v27 = vsel %vm1071_vm6, %v1060_v7, %v1062_v2  ;;  %v1072_v32 = vsel %vm1071_vm6, %v1058_v62, %v1060_v7  ;;  %v6394_v62 = vld [vmem:[%s8711_s1 + $0x14] sm:$0xf] }
  0xb3   : > { %6374 = vmatmul.mubr.msk.bf16.vlgmr.msra.gmra.mrb[16].mxu1 %vm245_vm2, %v6370_v59  ;;  %2620 = vrot.lane.b32.xlu1 %v7050_v25, %s6891_s9  ;;  %v1082_v34 = vsel %vm249_vm1, %v1072_v32, 0 }
  0xb4   : > { %6663 = vmatpush3.bf16.msra.mxu1 %v666_v1  ;;  %6664 = vmatprep.mubr.msk.bf16.mxu1 %vm6889_vm3, %v6888_v29 }
  0xb5   : > { %6381 = vmatprep.subr.msk.bf16.mxu1 %vm249_vm1, %v858_v11  ;;  %v1066_v13 = vpop.permute.xlu1 %1065  ;;  %v1064_v14 = vpop.permute.xlu0 %1063 }
  0xb6   : > { %2826 = vrot.lane.b32.xlu0 %v6956_v4, %s6892_s12  ;;  %v1075_v33 = vsel %vm1071_vm6, %v1064_v14, %v1066_v13  ;;  %v1074_v37 = vsel %vm1071_vm6, %v1062_v2, %v1064_v14 }
  0xb7   : > { %6376 = vmatmul.mubr.msk.bf16.vlgmr.msra.gmra.mrb[20].mxu0 %vm245_vm2, %v6370_v59  ;;  %2828 = vrot.lane.b32.xlu1 %v6962_v6, %s6892_s12  ;;  %v1088_v39 = vsel %vm249_vm1, %v1074_v37, 0 }
  0xb8   : > { %886 = vmatpush1.bf16.msra.mxu0 %v865_v12  ;;  %917 = vmatprep.mubr.bf16.mxu0 %v6878_v0 }
  0xb9   : > { %6383 = vmatprep.subr.msk.bf16.mxu0 %vm249_vm1, %v860_v16  ;;  %v7170_v18 = vpop.permute.xlu1 %1069  ;;  %v1068_v19 = vpop.permute.xlu0 %1067 }
  0xba   : > { %2830 = vrot.lane.b32.xlu0 %v6954_v3, %s6892_s12  ;;  %v1077_v38 = vsel %vm1071_vm6, %v1068_v19, %v7170_v18  ;;  %v1076_v42 = vsel %vm1071_vm6, %v1066_v13, %v1068_v19  ;;  %v1100_v48 = vsel %vm249_vm1, %v7170_v18, 0  ;;  %vm4182_vm6 = vcmask 457728  }
  0xbb   : > { %6665 = vmatmul.mubr.msk.bf16.vlgmr.msra.gmra.mrb[20].mxu1 %vm245_vm2, %v6370_v59  ;;  %2832 = vrot.lane.b32.xlu1 %v6960_v5, %s6892_s12  ;;  %v1094_v44 = vsel %vm249_vm1, %v1076_v42, 0 }
  0xbc   : > { %927 = vmatpush1.bf16.msra.mxu1 %v871_v17  ;;  %958 = vmatprep.mubr.bf16.mxu1 %v6878_v0 }
  0xbd   : > { %6668 = vmatprep.subr.bf16.mxu1 %v6888_v29  ;;  %v1275_v24 = vpop.permute.xlu0 %1274  ;;  %v1277_v26 = vpop.permute.xlu1 %1276 }
  0xbe   : > { %2834 = vrot.lane.b32.xlu0 %v6969_v9, %s6892_s12  ;;  %v1289_v51 = vsel %vm1288_vm7, %v1275_v24, %v1277_v26 }
  0xbf   : > { %6380 = vmatmul.mubr.msk.bf16.vlgmr.msra.gmra.mrb[24].mxu0 %vm245_vm2, %v6378_v21  ;;  %2836 = vrot.lane.b32.xlu1 %v6967_v8, %s6892_s12  ;;  %v1299_v53 = vsel %vm249_vm1, %v1289_v51, 0 }
  0xc0   : > { %968 = vmatpush1.bf16.msra.mxu0 %v877_v22  ;;  %999 = vmatprep.mubr.bf16.mxu0 %v6878_v0 }
  0xc1   : > { %6387 = vmatprep.subr.msk.bf16.mxu0 %vm249_vm1, %v1073_v27  ;;  %v1279_v30 = vpop.permute.xlu0 %1278  ;;  %v1281_v31 = vpop.permute.xlu1 %1280 }
  0xc2   : > { %2838 = vrot.lane.b32.xlu0 %v7047_v23, %s6892_s12  ;;  %v1290_v47 = vsel %vm1288_vm7, %v1277_v26, %v1279_v30  ;;  %v1291_v56 = vsel %vm1288_vm7, %v1279_v30, %v1281_v31  ;;  %v6402_v26 = vld [vmem:[%s8711_s1 + $0x18] sm:$0xf] }
  0xc3   : > { %6382 = vmatmul.mubr.msk.bf16.vlgmr.msra.gmra.mrb[24].mxu1 %vm245_vm2, %v6378_v21  ;;  %2840 = vrot.lane.b32.xlu1 %v7050_v25, %s6892_s12  ;;  %v1305_v58 = vsel %vm249_vm1, %v1291_v56, 0  ;;  %s6900_s12 = smov 54  }
  0xc4   : > { %6669 = vmatpush3.bf16.msra.mxu1 %v883_v28  ;;  %6670 = vmatprep.mubr.msk.bf16.mxu1 %vm6889_vm3, %v6888_v29 }
  0xc5   : > { %6389 = vmatprep.subr.msk.bf16.mxu1 %vm249_vm1, %v1075_v33  ;;  %v1283_v35 = vpop.permute.xlu0 %1282  ;;  %v1285_v36 = vpop.permute.xlu1 %1284 }
  0xc6   : > { %3046 = vrot.lane.b32.xlu0 %v6956_v4, %s6893_s17  ;;  %v1292_v52 = vsel %vm1288_vm7, %v1281_v31, %v1283_v35  ;;  %v1293_v61 = vsel %vm1288_vm7, %v1283_v35, %v1285_v36 }
  0xc7   : > { %6384 = vmatmul.mubr.msk.bf16.vlgmr.msra.gmra.mrb[28].mxu0 %vm245_vm2, %v6378_v21  ;;  %3048 = vrot.lane.b32.xlu1 %v6962_v6, %s6893_s17  ;;  %v1311_v63 = vsel %vm249_vm1, %v1293_v61, 0 }
  0xc8   : > { %1103 = vmatpush1.bf16.msra.mxu0 %v1082_v34  ;;  %1134 = vmatprep.mubr.bf16.mxu0 %v6878_v0 }
  0xc9   : > { %6391 = vmatprep.subr.msk.bf16.mxu0 %vm249_vm1, %v1077_v38  ;;  %v7215_v40 = vpop.permute.xlu0 %1286  ;;  %v7217_v41 = vpop.permute.xlu1 %1491 }
  0xca   : > { %3050 = vrot.lane.b32.xlu0 %v6954_v3, %s6893_s17  ;;  %v1294_v57 = vsel %vm1288_vm7, %v1285_v36, %v7215_v40  ;;  %v1317_v10 = vsel %vm249_vm1, %v7215_v40, 0  ;;  %vm4399_vm7 = vcmask 449536  }
  0xcb   : > { %6671 = vmatmul.mubr.msk.bf16.vlgmr.msra.gmra.mrb[28].mxu1 %vm245_vm2, %v6378_v21  ;;  %3052 = vrot.lane.b32.xlu1 %v6960_v5, %s6893_s17 }
  0xcc   : > { %1144 = vmatpush1.bf16.msra.mxu1 %v1088_v39  ;;  %1175 = vmatprep.mubr.bf16.mxu1 %v6878_v0 }
  0xcd   : > { %6674 = vmatprep.subr.bf16.mxu1 %v6888_v29  ;;  %v7231_v45 = vpop.permute.xlu1 %1495  ;;  %v1494_v46 = vpop.permute.xlu0 %1493 }
  0xce   : > { %3054 = vrot.lane.b32.xlu0 %v6969_v9, %s6893_s17  ;;  %v1507_v7 = vsel %vm1505_vm8, %v1494_v46, %v7231_v45  ;;  %v1506_v13 = vsel %vm1505_vm8, %v7217_v41, %v1494_v46  ;;  %v6410_v46 = vld [vmem:[%s8711_s1 + $0x1c] sm:$0xf] }
  0xcf   : > { %6388 = vmatmul.mubr.msk.bf16.vlgmr.msra.gmra.mrb[32].mxu0 %vm245_vm2, %v6386_v43  ;;  %3056 = vrot.lane.b32.xlu1 %v6967_v8, %s6893_s17  ;;  %v1516_v15 = vsel %vm249_vm1, %v1506_v13, 0  ;;  %v4145_v13 = vld [vmem:[%s6948_s20 + $0xc] sm:$0xff] }
  0xd0   : > { %1185 = vmatpush1.bf16.msra.mxu0 %v1094_v44  ;;  %1216 = vmatprep.mubr.bf16.mxu0 %v6878_v0 }
  0xd1   : > { %6395 = vmatprep.subr.msk.bf16.mxu0 %vm249_vm1, %v1290_v47  ;;  %v7243_v49 = vpop.permute.xlu1 %1499  ;;  %v1498_v50 = vpop.permute.xlu0 %1497 }
  0xd2   : > { %3058 = vrot.lane.b32.xlu0 %v7047_v23, %s6893_s17  ;;  %v1509_v14 = vsel %vm1505_vm8, %v1498_v50, %v7243_v49  ;;  %v1508_v18 = vsel %vm1505_vm8, %v7231_v45, %v1498_v50 }
  0xd3   : > { %6390 = vmatmul.mubr.msk.bf16.vlgmr.msra.gmra.mrb[32].mxu1 %vm245_vm2, %v6386_v43  ;;  %3060 = vrot.lane.b32.xlu1 %v7050_v25, %s6893_s17  ;;  %v1522_v20 = vsel %vm249_vm1, %v1508_v18, 0  ;;  %v7546_v18 = vcombine.high %v4145_v13, %v4145_v13  ;;  %s6901_s17 = smov 46  }
  0xd4   : > { %6675 = vmatpush3.bf16.msra.mxu1 %v1100_v48  ;;  %6676 = vmatprep.mubr.msk.bf16.mxu1 %vm6889_vm3, %v6888_v29 }
  0xd5   : > { %6397 = vmatprep.subr.msk.bf16.mxu1 %vm249_vm1, %v1292_v52  ;;  %v7256_v54 = vpop.permute.xlu1 %1503  ;;  %v1502_v55 = vpop.permute.xlu0 %1501 }
  0xd6   : > { %3266 = vrot.lane.b32.xlu0 %v6956_v4, %s6894_s21  ;;  %v1511_v19 = vsel %vm1505_vm8, %v1502_v55, %v7256_v54  ;;  %v1510_v24 = vsel %vm1505_vm8, %v7243_v49, %v1502_v55  ;;  %v1534_v32 = vsel %vm249_vm1, %v7256_v54, 0  ;;  %vm4616_vm8 = vcmask 441344  }
  0xd7   : > { %6392 = vmatmul.mubr.msk.bf16.vlgmr.msra.gmra.mrb[36].mxu0 %vm245_vm2, %v6386_v43  ;;  %3268 = vrot.lane.b32.xlu1 %v6962_v6, %s6894_s21  ;;  %v1528_v27 = vsel %vm249_vm1, %v1510_v24, 0 }
  0xd8   : > { %1320 = vmatpush1.bf16.msra.mxu0 %v1299_v53  ;;  %1351 = vmatprep.mubr.bf16.mxu0 %v6878_v0 }
  0xd9   : > { %6399 = vmatprep.subr.msk.bf16.mxu0 %vm249_vm1, %v1294_v57  ;;  %v7269_v59 = vpop.permute.xlu0 %1708  ;;  %v7271_v60 = vpop.permute.xlu1 %1710 }
  0xda   : > { %3270 = vrot.lane.b32.xlu0 %v6954_v3, %s6894_s21  ;;  %v1723_v35 = vsel %vm1722_vm9, %v7269_v59, %v7271_v60 }
  0xdb   : > { %6677 = vmatmul.mubr.msk.bf16.vlgmr.msra.gmra.mrb[36].mxu1 %vm245_vm2, %v6386_v43  ;;  %3272 = vrot.lane.b32.xlu1 %v6960_v5, %s6894_s21  ;;  %v1733_v37 = vsel %vm249_vm1, %v1723_v35, 0  ;;  %v7587_v35 = vld [vmem:[%s6948_s20 + $0x1c] ss:$0 sps:$4 sm:$0xff]  }
  0xdc   : > { %1361 = vmatpush1.bf16.msra.mxu1 %v1305_v58  ;;  %1392 = vmatprep.mubr.bf16.mxu1 %v6878_v0 }
  0xdd   : > { %6680 = vmatprep.subr.bf16.mxu1 %v6888_v29  ;;  %v7285_v1 = vpop.permute.xlu0 %1712  ;;  %v7287_v2 = vpop.permute.xlu1 %1714 }
  0xde   : > { %3274 = vrot.lane.b32.xlu0 %v6969_v9, %s6894_s21  ;;  %v1724_v31 = vsel %vm1722_vm9, %v7271_v60, %v7285_v1  ;;  %v1725_v40 = vsel %vm1722_vm9, %v7285_v1, %v7287_v2 }
  0xdf   : > { %6396 = vmatmul.mubr.msk.bf16.vlgmr.msra.gmra.mrb[40].mxu0 %vm245_vm2, %v6394_v62  ;;  %3276 = vrot.lane.b32.xlu1 %v6967_v8, %s6894_s21  ;;  %v1739_v42 = vsel %vm249_vm1, %v1725_v40, 0 }
  0xe0   : > { %1402 = vmatpush1.bf16.msra.mxu0 %v1311_v63  ;;  %1433 = vmatprep.mubr.bf16.mxu0 %v6878_v0 }
  0xe1   : > { %6403 = vmatprep.subr.msk.bf16.mxu0 %vm249_vm1, %v1507_v7  ;;  %v7300_v11 = vpop.permute.xlu0 %1716  ;;  %v7302_v12 = vpop.permute.xlu1 %1718 }
  0xe2   : > { %3278 = vrot.lane.b32.xlu0 %v7047_v23, %s6894_s21  ;;  %v1726_v36 = vsel %vm1722_vm9, %v7287_v2, %v7300_v11  ;;  %v1727_v45 = vsel %vm1722_vm9, %v7300_v11, %v7302_v12 }
  0xe3   : > { %6398 = vmatmul.mubr.msk.bf16.vlgmr.msra.gmra.mrb[40].mxu1 %vm245_vm2, %v6394_v62  ;;  %3280 = vrot.lane.b32.xlu1 %v7050_v25, %s6894_s21  ;;  %v1745_v47 = vsel %vm249_vm1, %v1727_v45, 0  ;;  %s6902_s21 = smov 45  }
  0xe4   : > { %6681 = vmatpush3.bf16.msra.mxu1 %v1317_v10  ;;  %6682 = vmatprep.mubr.msk.bf16.mxu1 %vm6889_vm3, %v6888_v29 }
  0xe5   : > { %6405 = vmatprep.subr.msk.bf16.mxu1 %vm249_vm1, %v1509_v14  ;;  %v7317_v16 = vpop.permute.xlu0 %1720  ;;  %v7319_v17 = vpop.permute.xlu1 %1925 }
  0xe6   : > { %3486 = vrot.lane.b32.xlu0 %v6956_v4, %s6895_s24  ;;  %v1728_v41 = vsel %vm1722_vm9, %v7302_v12, %v7317_v16  ;;  %v1751_v51 = vsel %vm249_vm1, %v7317_v16, 0  ;;  %vm4833_vm9 = vcmask 375808  }
  0xe7   : > { %6400 = vmatmul.mubr.msk.bf16.vlgmr.msra.gmra.mrb[44].mxu0 %vm245_vm2, %v6394_v62  ;;  %3488 = vrot.lane.b32.xlu1 %v6962_v6, %s6895_s24 }
  0xe8   : > { %1537 = vmatpush1.bf16.msra.mxu0 %v1516_v15  ;;  %1568 = vmatprep.mubr.bf16.mxu0 %v6878_v0 }
  0xe9   : > { %6407 = vmatprep.subr.msk.bf16.mxu0 %vm249_vm1, %v1511_v19  ;;  %v7333_v21 = vpop.permute.xlu1 %1929  ;;  %v7335_v22 = vpop.permute.xlu0 %1927  ;;  %v4146_v19 = vld [vmem:[%s6948_s20 + $0x14] sm:$0xff] }
  0xea   : > { %3490 = vrot.lane.b32.xlu0 %v6954_v3, %s6895_s24  ;;  %v1941_v49 = vsel %vm1939_vm10, %v7335_v22, %v7333_v21  ;;  %v1940_v52 = vsel %vm1939_vm10, %v7319_v17, %v7335_v22  ;;  %v7541_v17 = vcombine.low %v4145_v13, %v4145_v13 }
  0xeb   : > { %6683 = vmatmul.mubr.msk.bf16.vlgmr.msra.gmra.mrb[44].mxu1 %vm245_vm2, %v6394_v62  ;;  %3492 = vrot.lane.b32.xlu1 %v6960_v5, %s6895_s24  ;;  %v1950_v56 = vsel %vm249_vm1, %v1940_v52, 0 }
  0xec   : > { %1578 = vmatpush1.bf16.msra.mxu1 %v1522_v20  ;;  %1609 = vmatprep.mubr.bf16.mxu1 %v6878_v0 }
  0xed   : > { %6686 = vmatprep.subr.bf16.mxu1 %v6888_v29  ;;  %v7350_v28 = vpop.permute.xlu1 %1933  ;;  %v7352_v30 = vpop.permute.xlu0 %1931 }
  0xee   : > { %3494 = vrot.lane.b32.xlu0 %v6969_v9, %s6895_s24  ;;  %v1943_v53 = vsel %vm1939_vm10, %v7352_v30, %v7350_v28  ;;  %v1942_v57 = vsel %vm1939_vm10, %v7333_v21, %v7352_v30 }
  0xef   : > { %6404 = vmatmul.mubr.msk.bf16.vlgmr.msra.gmra.mrb[48].mxu0 %vm245_vm2, %v6402_v26  ;;  %3496 = vrot.lane.b32.xlu1 %v6967_v8, %s6895_s24  ;;  %v1956_v60 = vsel %vm249_vm1, %v1942_v57, 0 }
  0xf0   : > { %1619 = vmatpush1.bf16.msra.mxu0 %v1528_v27  ;;  %1650 = vmatprep.mubr.bf16.mxu0 %v6878_v0  ;;  %v7566_v27 = vcombine.high %v4146_v19, %v4146_v19 }
  0xf1   : > { %6411 = vmatprep.subr.msk.bf16.mxu0 %vm249_vm1, %v1724_v31  ;;  %v7366_v33 = vpop.permute.xlu1 %1937  ;;  %v7368_v34 = vpop.permute.xlu0 %1935 }
  0xf2   : > { %3498 = vrot.lane.b32.xlu0 %v7047_v23, %s6895_s24  ;;  %v1945_v58 = vsel %vm1939_vm10, %v7368_v34, %v7366_v33  ;;  %v1968_v7 = vsel %vm249_vm1, %v7366_v33, 0 }
  0xf3   : > { %6406 = vmatmul.mubr.msk.bf16.vlgmr.msra.gmra.mrb[48].mxu1 %vm245_vm2, %v6402_v26  ;;  %3500 = vrot.lane.b32.xlu1 %v7050_v25, %s6895_s24 }
  0xf4   : > { %6687 = vmatpush3.bf16.msra.mxu1 %v1534_v32  ;;  %6688 = vmatprep.mubr.msk.bf16.mxu1 %vm6889_vm3, %v6888_v29 }
  0xf5   : > { %6413 = vmatprep.subr.msk.bf16.mxu1 %vm249_vm1, %v1726_v36  ;;  %v7385_v38 = vpop.permute.xlu0 %2166  ;;  %v7387_v39 = vpop.permute.xlu1 %2168 }
  0xf6   : > { %3706 = vrot.lane.b32.xlu0 %v6956_v4, %s6896_s27 }
  0xf7   : > { %6408 = vmatmul.mubr.msk.bf16.vlgmr.msra.gmra.mrb[52].mxu0 %vm245_vm2, %v6402_v26  ;;  %3708 = vrot.lane.b32.xlu1 %v6962_v6, %s6896_s27 }
  0xf8   : > { %1754 = vmatpush1.bf16.msra.mxu0 %v1733_v37  ;;  %1785 = vmatprep.mubr.bf16.mxu0 %v6878_v0 }
  0xf9   : > { %6415 = vmatprep.subr.msk.bf16.mxu0 %vm249_vm1, %v1728_v41  ;;  %v7403_v43 = vpop.permute.xlu0 %2170  ;;  %v7405_v44 = vpop.permute.xlu1 %2172 }
  0xfa   : > { %3710 = vrot.lane.b32.xlu0 %v6954_v3, %s6896_s27  ;;  %v2184_v1 = vsel %vm2182_vm11, %v7387_v39, %v7403_v43 }
  0xfb   : > { %6689 = vmatmul.mubr.msk.bf16.vlgmr.msra.gmra.mrb[52].mxu1 %vm245_vm2, %v6402_v26  ;;  %3712 = vrot.lane.b32.xlu1 %v6960_v5, %s6896_s27  ;;  %v7561_v26 = vcombine.low %v4146_v19, %v4146_v19 }
  0xfc   : > { %1795 = vmatpush1.bf16.msra.mxu1 %v1739_v42  ;;  %1826 = vmatprep.mubr.bf16.mxu1 %v6878_v0 }
  0xfd   : > { %6692 = vmatprep.subr.bf16.mxu1 %v6888_v29  ;;  %v7421_v48 = vpop.permute.xlu0 %2174 }
  0xfe   : > { %3714 = vrot.lane.b32.xlu0 %v6969_v9, %s6896_s27  ;;  %v7428_v50 = vpop.permute.xlu1 %2176 }
  0xff   : > { %6412 = vmatmul.mubr.msk.bf16.vlgmr.msra.gmra.mrb[56].mxu0 %vm245_vm2, %v6410_v46  ;;  %3716 = vrot.lane.b32.xlu1 %v6967_v8, %s6896_s27  ;;  %v2187_v24 = vsel %vm2182_vm11, %v7421_v48, %v7428_v50 }
 0x100   : > { %1836 = vmatpush1.bf16.msra.mxu0 %v1745_v47  ;;  %1867 = vmatprep.mubr.bf16.mxu0 %v6878_v0  ;;  %v2206_v31 = vsel %vm249_vm1, %v2187_v24, 0 }
 0x101   : > { %6419 = vmatprep.subr.msk.bf16.mxu0 %vm249_vm1, %v1941_v49 }
 0x102   : > { %3718 = vrot.lane.b32.xlu0 %v7047_v23, %s6896_s27 }
 0x103   : > { %6414 = vmatmul.mubr.msk.bf16.vlgmr.msra.gmra.mrb[56].mxu1 %vm245_vm2, %v6410_v46  ;;  %v7446_v54 = vpop.permute.xlu0 %2178  ;;  %3720 = vrot.lane.b32.xlu1 %v7050_v25, %s6896_s27 }
 0x104   : > { %6693 = vmatpush3.bf16.msra.mxu1 %v1751_v51  ;;  %6694 = vmatprep.mubr.msk.bf16.mxu1 %vm6889_vm3, %v6888_v29  ;;  %v7452_v55 = vpop.permute.xlu1 %2180  ;;  %v2188_v16 = vsel %vm2182_vm11, %v7428_v50, %v7446_v54  ;;  %v6442_v50 = vld [vmem:[%s8711_s1 + $0x28] sm:$0xf] }
 0x105   : > { %6421 = vmatprep.subr.msk.bf16.mxu1 %vm249_vm1, %v1943_v53  ;;  %v2189_v33 = vsel %vm2182_vm11, %v7446_v54, %v7452_v55 }
 0x106   : > { %3926 = vrot.lane.b32.xlu0 %v6956_v4, %s6897_s30  ;;  %v1944_v4 = vsel %vm1939_vm10, %v7350_v28, %v7368_v34  ;;  %v6426_v28 = vld [vmem:[%s8711_s1 + $0x24] sm:$0xf]  ;;  %v2212_v37 = vsel %vm249_vm1, %v2189_v33, 0  ;;  %vm5050_vm10 = vcmask 367616  }
 0x107   : > { %6416 = vmatmul.mubr.msk.bf16.vlgmr.msra.gmra.mrb[60].mxu0 %vm245_vm2, %v6410_v46  ;;  %3928 = vrot.lane.b32.xlu1 %v6962_v6, %s6897_s30  ;;  %v6418_v6 = vld [vmem:[%s8711_s1 + $0x20] sm:$0xf]  ;;  %v1962_v63 = vsel %vm249_vm1, %v1944_v4, 0 }
 0x108   : > { %1971 = vmatpush1.bf16.msra.mxu0 %v1950_v56  ;;  %2002 = vmatprep.mubr.bf16.mxu0 %v6878_v0  ;;  %v7468_v59 = vpop.permute.xlu0 %2386 }
 0x109   : > { %6423 = vmatprep.subr.msk.bf16.mxu0 %vm249_vm1, %v1945_v58  ;;  %v7472_v61 = vpop.permute.xlu1 %2388 }
 0x10a   : > { %3930 = vrot.lane.b32.xlu0 %v6954_v3, %s6897_s30 }
 0x10b   : > { %6695 = vmatmul.mubr.msk.bf16.vlgmr.msra.gmra.mrb[60].mxu1 %vm245_vm2, %v6410_v46  ;;  %3932 = vrot.lane.b32.xlu1 %v6960_v5, %s6897_s30  ;;  %v4144_v5 = vld [vmem:[%s6948_s20 + $0x4] sm:$0xff]  ;;  %s6899_s20 = smov 55  }
 0x10c   : > { %2012 = vmatpush1.bf16.msra.mxu1 %v1956_v60  ;;  %2043 = vmatprep.mubr.bf16.mxu1 %v6878_v0  ;;  %v7486_v62 = vpop.permute.xlu0 %2390  ;;  %v7517_v11 = vcombine.low %v4144_v5, %v4144_v5  ;;  %v7522_v12 = vcombine.high %v4144_v5, %v4144_v5 }
 0x10d   : > { %6698 = vmatprep.subr.bf16.mxu1 %v6888_v29  ;;  %v7490_v3 = vpop.permute.xlu1 %2392  ;;  %v2404_v34 = vsel %vm2402_vm12, %v7472_v61, %v7486_v62 }
 0x10e   : > { %3934 = vrot.lane.b32.xlu0 %v6969_v9, %s6897_s30  ;;  %v2183_v9 = vsel %vm2182_vm11, %v7385_v38, %v7387_v39  ;;  %v2403_v39 = vsel %vm2402_vm12, %v7468_v59, %v7472_v61 }
 0x10f   : > { %6420 = vmatmul.mubr.msk.bf16.vlgmr.msra.gmra.mrb[64].mxu0 %vm245_vm2, %v6418_v6  ;;  %3936 = vrot.lane.b32.xlu1 %v6967_v8, %s6897_s30  ;;  %v2186_v8 = vsel %vm2182_vm11, %v7405_v44, %v7421_v48  ;;  %v2194_v15 = vsel %vm249_vm1, %v2183_v9, 0  ;;  %v2414_v42 = vsel %vm249_vm1, %v2403_v39, 0 }
 0x110   : > { %2053 = vmatpush1.bf16.msra.mxu0 %v1962_v63  ;;  %2084 = vmatprep.mubr.bf16.mxu0 %v6878_v0  ;;  %v7502_v2 = vpop.permute.xlu0 %2394 }
 0x111   : > { %6435 = vmatprep.subr.msk.bf16.mxu0 %vm249_vm1, %v2184_v1  ;;  %v7507_v10 = vpop.permute.xlu1 %2396  ;;  %v2406_v40 = vsel %vm2402_vm12, %v7490_v3, %v7502_v2 }
 0x112   : > { %3938 = vrot.lane.b32.xlu0 %v7047_v23, %s6897_s30  ;;  %v2407_v49 = vsel %vm2402_vm12, %v7502_v2, %v7507_v10 }
 0x113   : > { %6422 = vmatmul.mubr.msk.bf16.vlgmr.msra.gmra.mrb[64].mxu1 %vm245_vm2, %v6418_v6  ;;  %3940 = vrot.lane.b32.xlu1 %v7050_v25, %s6897_s30  ;;  %v2185_v25 = vsel %vm2182_vm11, %v7403_v43, %v7405_v44  ;;  %v2405_v44 = vsel %vm2402_vm12, %v7486_v62, %v7490_v3  ;;  %v2426_v52 = vsel %vm249_vm1, %v2407_v49, 0  ;;  %vm5267_vm11 = vcmask 359424  }
 0x114   : > { %6699 = vmatpush3.bf16.msra.mxu1 %v1968_v7  ;;  %6700 = vmatprep.mubr.msk.bf16.mxu1 %vm6889_vm3, %v6888_v29  ;;  %v7527_v14 = vpop.permute.xlu0 %2398  ;;  %v2200_v21 = vsel %vm249_vm1, %v2185_v25, 0  ;;  %v2420_v47 = vsel %vm249_vm1, %v2405_v44, 0  ;;  %v6450_v7 = vld [vmem:[%s8711_s1 + $0x2c] sm:$0xf] }
 0x115   : > { %6437 = vmatprep.subr.msk.bf16.mxu1 %vm249_vm1, %v2186_v8  ;;  %v7531_v23 = vpop.permute.xlu1 %2400  ;;  %v2408_v45 = vsel %vm2402_vm12, %v7507_v10, %v7527_v14 }
 0x116   : > { %4168 = vrot.lane.b32.xlu0 %v7517_v11, %s6898_s7  ;;  %v2409_v54 = vsel %vm2402_vm12, %v7527_v14, %v7531_v23  ;;  %vm5484_vm12 = vcmask 293888  }
 0x117   : > { %6424 = vmatmul.mubr.msk.bf16.vlgmr.msra.gmra.mrb[68].mxu0 %vm245_vm2, %v6418_v6  ;;  %4170 = vrot.lane.b32.xlu1 %v7522_v12, %s6898_s7  ;;  %v2432_v57 = vsel %vm249_vm1, %v2409_v54, 0 }
 0x118   : > { %2215 = vmatpush1.bf16.msra.mxu0 %v2194_v15  ;;  %2246 = vmatprep.mubr.bf16.mxu0 %v6878_v0  ;;  %v7550_v20 = vpop.permute.xlu0 %2606 }
 0x119   : > { %6439 = vmatprep.subr.msk.bf16.mxu0 %vm249_vm1, %v2188_v16  ;;  %v7554_v22 = vpop.permute.xlu1 %2608 }
 0x11a   : > { %4172 = vrot.lane.b32.xlu0 %v7541_v17, %s6898_s7  ;;  %v2623_v59 = vsel %vm2622_vm13, %v7550_v20, %v7554_v22 }
 0x11b   : > { %6701 = vmatmul.mubr.msk.bf16.vlgmr.msra.gmra.mrb[68].mxu1 %vm245_vm2, %v6418_v6  ;;  %4174 = vrot.lane.b32.xlu1 %v7546_v18, %s6898_s7  ;;  %v2634_v4 = vsel %vm249_vm1, %v2623_v59, 0 }
 0x11c   : > { %2256 = vmatpush1.bf16.msra.mxu1 %v2200_v21  ;;  %2287 = vmatprep.mubr.bf16.mxu1 %v6878_v0  ;;  %v7572_v30 = vpop.permute.xlu0 %2610 }
 0x11d   : > { %6704 = vmatprep.subr.bf16.mxu1 %v6888_v29  ;;  %v7576_v32 = vpop.permute.xlu1 %2612  ;;  %v2624_v55 = vsel %vm2622_vm13, %v7554_v22, %v7572_v30 }
 0x11e   : > { %4176 = vrot.lane.b32.xlu0 %v7561_v26, %s6898_s7  ;;  %v2625_v62 = vsel %vm2622_vm13, %v7572_v30, %v7576_v32 }
 0x11f   : > { %6436 = vmatmul.mubr.msk.bf16.vlgmr.msra.gmra.mrb[72].mxu0 %vm245_vm2, %v6426_v28  ;;  %4178 = vrot.lane.b32.xlu1 %v7566_v27, %s6898_s7  ;;  %v2640_v1 = vsel %vm249_vm1, %v2625_v62, 0 }
 0x120   : > { %2297 = vmatpush1.bf16.msra.mxu0 %v2206_v31  ;;  %2328 = vmatprep.mubr.bf16.mxu0 %v6878_v0  ;;  %v7593_v36 = vpop.permute.xlu0 %2614 }
 0x121   : > { %6443 = vmatprep.subr.msk.bf16.mxu0 %vm249_vm1, %v2404_v34  ;;  %v7597_v38 = vpop.permute.xlu1 %2616  ;;  %v2626_v60 = vsel %vm2622_vm13, %v7576_v32, %v7593_v36  ;;  %v6458_v34 = vld [vmem:[%s8711_s1 + $0x30] sm:$0xf] }
 0x122   : > { %4180 = vrot.lane.b32.xlu0 %v7587_v35, %s6898_s7  ;;  %v2627_v2 = vsel %vm2622_vm13, %v7593_v36, %v7597_v38 }
 0x123   : > { %6438 = vmatmul.mubr.msk.bf16.vlgmr.msra.gmra.mrb[72].mxu1 %vm245_vm2, %v6426_v28  ;;  %4385 = vrot.lane.b32.xlu1 %v7517_v11, %s6899_s20  ;;  %v2646_v9 = vsel %vm249_vm1, %v2627_v2, 0 }
 0x124   : > { %6705 = vmatpush3.bf16.msra.mxu1 %v2212_v37  ;;  %6706 = vmatprep.mubr.msk.bf16.mxu1 %vm6889_vm3, %v6888_v29  ;;  %v7612_v41 = vpop.permute.xlu0 %2618 }
 0x125   : > { %6445 = vmatprep.subr.msk.bf16.mxu1 %vm249_vm1, %v2406_v40  ;;  %v7616_v43 = vpop.permute.xlu1 %2620  ;;  %v2628_v63 = vsel %vm2622_vm13, %v7597_v38, %v7612_v41 }
 0x126   : > { %4387 = vrot.lane.b32.xlu0 %v7522_v12, %s6899_s20  ;;  %v2629_v13 = vsel %vm2622_vm13, %v7612_v41, %v7616_v43  ;;  %vm5701_vm13 = vcmask 285696  }
 0x127   : > { %6440 = vmatmul.mubr.msk.bf16.vlgmr.msra.gmra.mrb[76].mxu0 %vm245_vm2, %v6426_v28  ;;  %4389 = vrot.lane.b32.xlu1 %v7541_v17, %s6899_s20  ;;  %v2652_v23 = vsel %vm249_vm1, %v2629_v13, 0 }
 0x128   : > { %2435 = vmatpush1.bf16.msra.mxu0 %v2414_v42  ;;  %2466 = vmatprep.mubr.bf16.mxu0 %v6878_v0  ;;  %v7630_v46 = vpop.permute.xlu0 %2826 }
 0x129   : > { %6447 = vmatprep.subr.msk.bf16.mxu0 %vm249_vm1, %v2408_v45  ;;  %v7634_v48 = vpop.permute.xlu1 %2828 }
 0x12a   : > { %4391 = vrot.lane.b32.xlu0 %v7546_v18, %s6899_s20  ;;  %v2843_v16 = vsel %vm2842_vm14, %v7630_v46, %v7634_v48 }
 0x12b   : > { %6707 = vmatmul.mubr.msk.bf16.vlgmr.msra.gmra.mrb[76].mxu1 %vm245_vm2, %v6426_v28  ;;  %4393 = vrot.lane.b32.xlu1 %v7561_v26, %s6899_s20  ;;  %v2854_v21 = vsel %vm249_vm1, %v2843_v16, 0 }
 0x12c   : > { %2476 = vmatpush1.bf16.msra.mxu1 %v2420_v47  ;;  %2507 = vmatprep.mubr.bf16.mxu1 %v6878_v0  ;;  %v7648_v51 = vpop.permute.xlu0 %2830 }
 0x12d   : > { %6710 = vmatprep.subr.bf16.mxu1 %v6888_v29  ;;  %v7652_v53 = vpop.permute.xlu1 %2832  ;;  %v2844_v14 = vsel %vm2842_vm14, %v7634_v48, %v7648_v51 }
 0x12e   : > { %4395 = vrot.lane.b32.xlu0 %v7566_v27, %s6899_s20  ;;  %v2845_v24 = vsel %vm2842_vm14, %v7648_v51, %v7652_v53 }
 0x12f   : > { %6444 = vmatmul.mubr.msk.bf16.vlgmr.msra.gmra.mrb[80].mxu0 %vm245_vm2, %v6442_v50  ;;  %4397 = vrot.lane.b32.xlu1 %v7587_v35, %s6899_s20  ;;  %v2860_v31 = vsel %vm249_vm1, %v2845_v24, 0 }
 0x130   : > { %2517 = vmatpush1.bf16.msra.mxu0 %v2426_v52  ;;  %2548 = vmatprep.mubr.bf16.mxu0 %v6878_v0  ;;  %v7666_v56 = vpop.permute.xlu0 %2834 }
 0x131   : > { %6451 = vmatprep.subr.msk.bf16.mxu0 %vm249_vm1, %v2624_v55  ;;  %v7670_v58 = vpop.permute.xlu1 %2836  ;;  %v2846_v19 = vsel %vm2842_vm14, %v7652_v53, %v7666_v56  ;;  %v6466_v55 = vld [vmem:[%s8711_s1 + $0x34] sm:$0xf] }
 0x132   : > { %4602 = vrot.lane.b32.xlu0 %v7517_v11, %s6900_s12  ;;  %v2847_v33 = vsel %vm2842_vm14, %v7666_v56, %v7670_v58 }
 0x133   : > { %6446 = vmatmul.mubr.msk.bf16.vlgmr.msra.gmra.mrb[80].mxu1 %vm245_vm2, %v6442_v50  ;;  %4604 = vrot.lane.b32.xlu1 %v7522_v12, %s6900_s12  ;;  %v2866_v37 = vsel %vm249_vm1, %v2847_v33, 0 }
 0x134   : > { %6711 = vmatpush3.bf16.msra.mxu1 %v2432_v57  ;;  %6712 = vmatprep.mubr.msk.bf16.mxu1 %vm6889_vm3, %v6888_v29  ;;  %v7685_v61 = vpop.permute.xlu0 %2838 }
 0x135   : > { %6453 = vmatprep.subr.msk.bf16.mxu1 %vm249_vm1, %v2626_v60  ;;  %v7689_v6 = vpop.permute.xlu1 %2840  ;;  %v2848_v28 = vsel %vm2842_vm14, %v7670_v58, %v7685_v61 }
 0x136   : > { %4606 = vrot.lane.b32.xlu0 %v7541_v17, %s6900_s12  ;;  %v2849_v39 = vsel %vm2842_vm14, %v7685_v61, %v7689_v6  ;;  %vm5918_vm14 = vcmask 277504  }
 0x137   : > { %6448 = vmatmul.mubr.msk.bf16.vlgmr.msra.gmra.mrb[84].mxu0 %vm245_vm2, %v6442_v50  ;;  %4608 = vrot.lane.b32.xlu1 %v7546_v18, %s6900_s12  ;;  %v2872_v42 = vsel %vm249_vm1, %v2849_v39, 0 }
 0x138   : > { %2655 = vmatpush1.bf16.msra.mxu0 %v2634_v4  ;;  %2686 = vmatprep.mubr.bf16.mxu0 %v6878_v0  ;;  %v7703_v3 = vpop.permute.xlu0 %3046 }
 0x139   : > { %6455 = vmatprep.subr.msk.bf16.mxu0 %vm249_vm1, %v2628_v63  ;;  %v7707_v5 = vpop.permute.xlu1 %3048 }
 0x13a   : > { %4610 = vrot.lane.b32.xlu0 %v7561_v26, %s6900_s12  ;;  %v3063_v44 = vsel %vm3062_vm15, %v7703_v3, %v7707_v5 }
 0x13b   : > { %6713 = vmatmul.mubr.msk.bf16.vlgmr.msra.gmra.mrb[84].mxu1 %vm245_vm2, %v6442_v50  ;;  %4612 = vrot.lane.b32.xlu1 %v7566_v27, %s6900_s12  ;;  %v3074_v47 = vsel %vm249_vm1, %v3063_v44, 0 }
 0x13c   : > { %2696 = vmatpush1.bf16.msra.mxu1 %v2640_v1  ;;  %2727 = vmatprep.mubr.bf16.mxu1 %v6878_v0  ;;  %v7721_v10 = vpop.permute.xlu0 %3050 }
 0x13d   : > { %6716 = vmatprep.subr.bf16.mxu1 %v6888_v29  ;;  %v7725_v8 = vpop.permute.xlu1 %3052  ;;  %v3064_v40 = vsel %vm3062_vm15, %v7707_v5, %v7721_v10 }
 0x13e   : > { %4614 = vrot.lane.b32.xlu0 %v7587_v35, %s6900_s12  ;;  %v3065_v49 = vsel %vm3062_vm15, %v7721_v10, %v7725_v8 }
 0x13f   : > { %6452 = vmatmul.mubr.msk.bf16.vlgmr.msra.gmra.mrb[88].mxu0 %vm245_vm2, %v6450_v7  ;;  %4819 = vrot.lane.b32.xlu1 %v7517_v11, %s6901_s17  ;;  %v3080_v52 = vsel %vm249_vm1, %v3065_v49, 0 }
 0x140   : > { %2737 = vmatpush1.bf16.msra.mxu0 %v2646_v9  ;;  %2768 = vmatprep.mubr.bf16.mxu0 %v6878_v0  ;;  %v7739_v15 = vpop.permute.xlu0 %3054 }
 0x141   : > { %6459 = vmatprep.subr.msk.bf16.mxu0 %vm249_vm1, %v2844_v14  ;;  %v7743_v25 = vpop.permute.xlu1 %3056  ;;  %v3066_v45 = vsel %vm3062_vm15, %v7725_v8, %v7739_v15 }
 0x142   : > { %4821 = vrot.lane.b32.xlu0 %v7522_v12, %s6901_s17  ;;  %v3067_v54 = vsel %vm3062_vm15, %v7739_v15, %v7743_v25 }
 0x143   : > { %6454 = vmatmul.mubr.msk.bf16.vlgmr.msra.gmra.mrb[88].mxu1 %vm245_vm2, %v6450_v7  ;;  %4823 = vrot.lane.b32.xlu1 %v7541_v17, %s6901_s17  ;;  %v3086_v57 = vsel %vm249_vm1, %v3067_v54, 0 }
 0x144   : > { %6717 = vmatpush3.bf16.msra.mxu1 %v2652_v23  ;;  %6718 = vmatprep.mubr.msk.bf16.mxu1 %vm6889_vm3, %v6888_v29  ;;  %v7758_v20 = vpop.permute.xlu0 %3058 }
 0x145   : > { %6461 = vmatprep.subr.msk.bf16.mxu1 %vm249_vm1, %v2846_v19  ;;  %v7762_v22 = vpop.permute.xlu1 %3060  ;;  %v3068_v50 = vsel %vm3062_vm15, %v7743_v25, %v7758_v20 }
 0x146   : > { %4825 = vrot.lane.b32.xlu0 %v7546_v18, %s6901_s17  ;;  %v3069_v59 = vsel %vm3062_vm15, %v7758_v20, %v7762_v22 }
 0x147   : > { %6456 = vmatmul.mubr.msk.bf16.vlgmr.msra.gmra.mrb[92].mxu0 %vm245_vm2, %v6450_v7  ;;  %4827 = vrot.lane.b32.xlu1 %v7561_v26, %s6901_s17  ;;  %v3092_v4 = vsel %vm249_vm1, %v3069_v59, 0 }
 0x148   : > { %2875 = vmatpush1.bf16.msra.mxu0 %v2854_v21  ;;  %2906 = vmatprep.mubr.bf16.mxu0 %v6878_v0  ;;  %v7776_v30 = vpop.permute.xlu0 %3266 }
 0x149   : > { %6463 = vmatprep.subr.msk.bf16.mxu0 %vm249_vm1, %v2848_v28  ;;  %v7780_v32 = vpop.permute.xlu1 %3268 }
 0x14a   : > { %4829 = vrot.lane.b32.xlu0 %v7566_v27, %s6901_s17  ;;  %v3283_v62 = vsel %vm3282_vm0, %v7776_v30, %v7780_v32  ;;  %v6474_v30 = vld [vmem:[%s8711_s1 + $0x38] sm:$0xf] }
 0x14b   : > { %6719 = vmatmul.mubr.msk.bf16.vlgmr.msra.gmra.mrb[92].mxu1 %vm245_vm2, %v6450_v7  ;;  %4831 = vrot.lane.b32.xlu1 %v7587_v35, %s6901_s17  ;;  %v3294_v7 = vsel %vm249_vm1, %v3283_v62, 0 }
 0x14c   : > { %2916 = vmatpush1.bf16.msra.mxu1 %v2860_v31  ;;  %2947 = vmatprep.mubr.bf16.mxu1 %v6878_v0  ;;  %v7794_v36 = vpop.permute.xlu0 %3270 }
 0x14d   : > { %6722 = vmatprep.subr.bf16.mxu1 %v6888_v29  ;;  %v7798_v38 = vpop.permute.xlu1 %3272  ;;  %v3284_v60 = vsel %vm3282_vm0, %v7780_v32, %v7794_v36 }
 0x14e   : > { %5036 = vrot.lane.b32.xlu0 %v7517_v11, %s6902_s21  ;;  %v3285_v13 = vsel %vm3282_vm0, %v7794_v36, %v7798_v38 }
 0x14f   : > { %6460 = vmatmul.mubr.msk.bf16.vlgmr.msra.gmra.mrb[96].mxu0 %vm245_vm2, %v6458_v34  ;;  %5038 = vrot.lane.b32.xlu1 %v7522_v12, %s6902_s21  ;;  %v3300_v16 = vsel %vm249_vm1, %v3285_v13, 0 }
 0x150   : > { %2957 = vmatpush1.bf16.msra.mxu0 %v2866_v37  ;;  %2988 = vmatprep.mubr.bf16.mxu0 %v6878_v0  ;;  %v7812_v41 = vpop.permute.xlu0 %3274 }
 0x151   : > { %6467 = vmatprep.subr.msk.bf16.mxu0 %vm249_vm1, %v3064_v40  ;;  %v7816_v43 = vpop.permute.xlu1 %3276  ;;  %v3286_v3 = vsel %vm3282_vm0, %v7798_v38, %v7812_v41 }
 0x152   : > { %5040 = vrot.lane.b32.xlu0 %v7541_v17, %s6902_s21  ;;  %v3287_v21 = vsel %vm3282_vm0, %v7812_v41, %v7816_v43 }
 0x153   : > { %6462 = vmatmul.mubr.msk.bf16.vlgmr.msra.gmra.mrb[96].mxu1 %vm245_vm2, %v6458_v34  ;;  %5042 = vrot.lane.b32.xlu1 %v7546_v18, %s6902_s21  ;;  %v3306_v32 = vsel %vm249_vm1, %v3287_v21, 0 }
 0x154   : > { %6723 = vmatpush3.bf16.msra.mxu1 %v2872_v42  ;;  %6724 = vmatprep.mubr.msk.bf16.mxu1 %vm6889_vm3, %v6888_v29  ;;  %v7831_v46 = vpop.permute.xlu0 %3278 }
 0x155   : > { %6469 = vmatprep.subr.msk.bf16.mxu1 %vm249_vm1, %v3066_v45  ;;  %v7835_v48 = vpop.permute.xlu1 %3280  ;;  %v3288_v14 = vsel %vm3282_vm0, %v7816_v43, %v7831_v46 }
 0x156   : > { %5044 = vrot.lane.b32.xlu0 %v7561_v26, %s6902_s21  ;;  %v3289_v37 = vsel %vm3282_vm0, %v7831_v46, %v7835_v48 }
 0x157   : > { %6464 = vmatmul.mubr.msk.bf16.vlgmr.msra.gmra.mrb[100].mxu0 %vm245_vm2, %v6458_v34  ;;  %5046 = vrot.lane.b32.xlu1 %v7566_v27, %s6902_s21  ;;  %v3312_v42 = vsel %vm249_vm1, %v3289_v37, 0 }
 0x158   : > { %3095 = vmatpush1.bf16.msra.mxu0 %v3074_v47  ;;  %3126 = vmatprep.mubr.bf16.mxu0 %v6878_v0  ;;  %v7849_v51 = vpop.permute.xlu0 %3486 }
 0x159   : > { %6471 = vmatprep.subr.msk.bf16.mxu0 %vm249_vm1, %v3068_v50  ;;  %v7853_v53 = vpop.permute.xlu1 %3488 }
 0x15a   : > { %5048 = vrot.lane.b32.xlu0 %v7587_v35, %s6902_s21  ;;  %v3503_v46 = vsel %vm245_vm2, %v7849_v51, %v7853_v53 }
 0x15b   : > { %6725 = vmatmul.mubr.msk.bf16.vlgmr.msra.gmra.mrb[100].mxu1 %vm245_vm2, %v6458_v34  ;;  %5253 = vrot.lane.b32.xlu1 %v7517_v11, %s6903_s22 }
 0x15c   : > { %3136 = vmatpush1.bf16.msra.mxu1 %v3080_v52  ;;  %3167 = vmatprep.mubr.bf16.mxu1 %v6878_v0  ;;  %v7867_v56 = vpop.permute.xlu0 %3490 }
 0x15d   : > { %6728 = vmatprep.subr.bf16.mxu1 %v6888_v29  ;;  %v7871_v58 = vpop.permute.xlu1 %3492  ;;  %v3504_v38 = vsel %vm245_vm2, %v7853_v53, %v7867_v56  ;;  %v3514_v53 = vsel %vm249_vm1, %v3503_v46, 0 }
 0x15e   : > { %5255 = vrot.lane.b32.xlu0 %v7522_v12, %s6903_s22  ;;  %v3505_v59 = vsel %vm245_vm2, %v7867_v56, %v7871_v58 }
 0x15f   : > { %6468 = vmatmul.mubr.msk.bf16.vlgmr.msra.gmra.mrb[104].mxu0 %vm245_vm2, %v6466_v55  ;;  %5257 = vrot.lane.b32.xlu1 %v7541_v17, %s6903_s22 }
 0x160   : > { %3177 = vmatpush1.bf16.msra.mxu0 %v3086_v57  ;;  %3208 = vmatprep.mubr.bf16.mxu0 %v6878_v0  ;;  %v7885_v61 = vpop.permute.xlu0 %3494 }
 0x161   : > { %6475 = vmatprep.subr.msk.bf16.mxu0 %vm249_vm1, %v3284_v60  ;;  %v7889_v6 = vpop.permute.xlu1 %3496  ;;  %v3506_v47 = vsel %vm245_vm2, %v7871_v58, %v7885_v61 }
 0x162   : > { %v7894_v63 = vpop.f32.mrb[0].mxu0  ;;  %5259 = vrot.lane.b32.xlu0 %v7546_v18, %s6903_s22 }
 0x163   : > { %6470 = vmatmul.mubr.msk.bf16.vlgmr.msra.gmra.mrb[104].mxu1 %vm245_vm2, %v6466_v55  ;;  %v7902_v1 = vpop.f32.mrb[1].mxu0  ;;  %5261 = vrot.lane.b32.xlu1 %v7561_v26, %s6903_s22 }
 0x164   : > { %6729 = vmatpush3.bf16.msra.mxu1 %v3092_v4  ;;  %v309_v5 = vpop.f32.mrb[2].mxu0  ;;  %6730 = vmatprep.mubr.msk.bf16.mxu1 %vm6889_vm3, %v6888_v29  ;;  %v7908_v2 = vpop.permute.xlu0 %3498 }
 0x165   : > { %v310_v10 = vpop.f32.mrb[3].mxu0  ;;  %6477 = vmatprep.subr.msk.bf16.mxu1 %vm249_vm1, %v3286_v3  ;;  %v7912_v9 = vpop.permute.xlu1 %3500  ;;  %v3508_v60 = vsel %vm245_vm2, %v7889_v6, %v7908_v2  ;;  %v3520_v3 = vsel %vm249_vm1, %v3505_v59, 0 }
 0x166   : > { %v7914_v8 = vpop.f32.mrb[0].mxu1  ;;  %5263 = vrot.lane.b32.xlu0 %v7566_v27, %s6903_s22  ;;  %v3507_v10 = vsel %vm245_vm2, %v7885_v61, %v7889_v6  ;;  %v8044_v61 = vld [vmem:[%s8711_s1 + $0x3c] sm:$0xf] }
 0x167   : > { %6472 = vmatmul.mubr.msk.bf16.vlgmr.msra.gmra.mrb[108].mxu0 %vm245_vm2, %v6466_v55  ;;  %v7925_v15 = vpop.f32.mrb[1].mxu1  ;;  %5265 = vrot.lane.b32.xlu1 %v7587_v35, %s6903_s22 }
 0x168   : > { %3315 = vmatpush1.bf16.msra.mxu0 %v3294_v7  ;;  %v350_v23 = vpop.f32.mrb[2].mxu1  ;;  %3346 = vmatprep.mubr.bf16.mxu0 %v6878_v0  ;;  %v7930_v25 = vpop.permute.xlu0 %3706 }
 0x169   : > { %v351_v19 = vpop.f32.mrb[3].mxu1  ;;  %6479 = vmatprep.subr.msk.bf16.mxu0 %vm249_vm1, %v3288_v14  ;;  %v7934_v20 = vpop.permute.xlu1 %3708  ;;  %v3526_v23 = vsel %vm249_vm1, %v3507_v10, 0 }
 0x16a   : > { %v7939_v22 = vpop.f32.mrb[4].mxu0  ;;  %5470 = vrot.lane.b32.xlu0 %v7517_v11, %s6904_s25 }
 0x16b   : > { %6731 = vmatmul.mubr.msk.bf16.vlgmr.msra.gmra.mrb[108].mxu1 %vm245_vm2, %v6466_v55  ;;  %v7944_v24 = vpop.f32.mrb[5].mxu0  ;;  %5472 = vrot.lane.b32.xlu1 %v7522_v12, %s6904_s25 }
 0x16c   : > { %3356 = vmatpush1.bf16.msra.mxu1 %v3300_v16  ;;  %v391_v28 = vpop.f32.mrb[6].mxu0  ;;  %3387 = vmatprep.mubr.bf16.mxu1 %v6878_v0  ;;  %v7952_v31 = vpop.permute.xlu0 %3710 }
 0x16d   : > { %v392_v33 = vpop.f32.mrb[7].mxu0  ;;  %6734 = vmatprep.subr.bf16.mxu1 %v6888_v29  ;;  %v7956_v34 = vpop.permute.xlu1 %3712 }
 0x16e   : > { %v7958_v36 = vpop.f32.mrb[4].mxu1  ;;  %5474 = vrot.lane.b32.xlu0 %v7541_v17, %s6904_s25 }
 0x16f   : > { %6476 = vmatmul.mubr.msk.bf16.vlgmr.msra.gmra.mrb[112].mxu0 %vm245_vm2, %v6474_v30  ;;  %v6654_v39 = vpop.f32.mrb[5].mxu1  ;;  %5476 = vrot.lane.b32.xlu1 %v7546_v18, %s6904_s25 }
 0x170   : > { %3397 = vmatpush1.bf16.msra.mxu0 %v3306_v32  ;;  %v431_v40 = vpop.f32.mrb[6].mxu1  ;;  %3428 = vmatprep.mubr.bf16.mxu0 %v6878_v0  ;;  %v7972_v41 = vpop.permute.xlu0 %3714 }
 0x171   : > { %v6655_v43 = vpop.f32.mrb[7].mxu1  ;;  %6483 = vmatprep.subr.msk.bf16.mxu0 %vm249_vm1, %v3504_v38  ;;  %v7976_v44 = vpop.permute.xlu1 %3716  ;;  %v3723_v38 = vsel %vm3722_vm4, %v7930_v25, %v7934_v20  ;;  %v3726_v39 = vsel %vm3722_vm4, %v7956_v34, %v7972_v41 }
 0x172   : > { %v492_v45 = vpop.f32.mrb[8].mxu0  ;;  %5478 = vrot.lane.b32.xlu0 %v7561_v26, %s6904_s25 }
 0x173   : > { %v7987_v48 = vadd.f32 %v492_v45, %v7894_v63  ;;  %v494_v49 = vpop.f32.mrb[9].mxu0  ;;  %6478 = vmatmul.mubr.msk.bf16.vlgmr.msra.gmra.mrb[112].mxu1 %vm245_vm2, %v6474_v30  ;;  %5480 = vrot.lane.b32.xlu1 %v7566_v27, %s6904_s25  ;;  %v3734_v45 = vsel %vm249_vm1, %v3723_v38, 0 }
 0x174   : > { %v7993_v50 = vadd.f32 %v494_v49, %v7902_v1  ;;  %6735 = vmatpush3.bf16.msra.mxu1 %v3312_v42  ;;  %v496_v51 = vpop.f32.mrb[10].mxu0  ;;  %6736 = vmatprep.mubr.msk.bf16.mxu1 %vm6889_vm3, %v6888_v29  ;;  %v7997_v52 = vpop.permute.xlu0 %3718  ;;  %v3725_v49 = vsel %vm3722_vm4, %v7952_v31, %v7956_v34 }
 0x175   : > { %v497_v54 = vpop.f32.mrb[11].mxu0  ;;  %6485 = vmatprep.subr.msk.bf16.mxu1 %vm249_vm1, %v3506_v47  ;;  %v8001_v55 = vpop.permute.xlu1 %3720 }
 0x176   : > { %v533_v57 = vpop.f32.mrb[8].mxu1  ;;  %5482 = vrot.lane.b32.xlu0 %v7587_v35, %s6904_s25 }
 0x177   : > { %v8012_v4 = vadd.f32 %v533_v57, %v7914_v8  ;;  %v535_v62 = vpop.f32.mrb[9].mxu1  ;;  %6480 = vmatmul.mubr.msk.bf16.vlgmr.msra.gmra.mrb[116].mxu0 %vm245_vm2, %v6474_v30  ;;  %5687 = vrot.lane.b32.xlu1 %v7517_v11, %s6905_s28 }
 0x178   : > { %v8018_v63 = vadd.f32 %v535_v62, %v7925_v15  ;;  %3535 = vmatpush1.bf16.msra.mxu0 %v3514_v53  ;;  %v537_v56 = vpop.f32.mrb[10].mxu1  ;;  %3566 = vmatprep.mubr.bf16.mxu0 %v6878_v0  ;;  %v8021_v58 = vpop.permute.xlu0 %3926 }
 0x179   : > { %v538_v1 = vpop.f32.mrb[11].mxu1  ;;  %6487 = vmatprep.subr.msk.bf16.mxu0 %vm249_vm1, %v3508_v60  ;;  %v8025_v5 = vpop.permute.xlu1 %3928 }
 0x17a   : > { %v574_v7 = vpop.f32.mrb[12].mxu0  ;;  %5689 = vrot.lane.b32.xlu0 %v7522_v12, %s6905_s28 }
 0x17b   : > { %v8033_v8 = vadd.f32 %v574_v7, %v7939_v22  ;;  %v576_v13 = vpop.f32.mrb[13].mxu0  ;;  %6737 = vmatmul.mubr.msk.bf16.vlgmr.msra.gmra.mrb[116].mxu1 %vm245_vm2, %v6474_v30  ;;  %5691 = vrot.lane.b32.xlu1 %v7541_v17, %s6905_s28  ;;  %v3509_v22 = vsel %vm245_vm2, %v7908_v2, %v7912_v9  ;;  %v3729_v7 = vsel %vm3722_vm4, %v7997_v52, %v8001_v55 }
 0x17c   : > { %v8039_v14 = vadd.f32 %v576_v13, %v7944_v24  ;;  %3576 = vmatpush1.bf16.msra.mxu1 %v3520_v3  ;;  %v578_v15 = vpop.f32.mrb[14].mxu0  ;;  %3607 = vmatprep.mubr.bf16.mxu1 %v6878_v0  ;;  %v8047_v6 = vpop.permute.xlu0 %3930  ;;  %v3724_v24 = vsel %vm3722_vm4, %v7934_v20, %v7952_v31  ;;  %v3532_v9 = vsel %vm249_vm1, %v3509_v22, 0  ;;  %v3752_v55 = vsel %vm249_vm1, %v3729_v7, 0 }
 0x17d   : > { %v579_v16 = vpop.f32.mrb[15].mxu0  ;;  %6740 = vmatprep.subr.bf16.mxu1 %v6888_v29  ;;  %v8051_v19 = vpop.permute.xlu1 %3932  ;;  %v3944_v10 = vsel %vm3942_vm5, %v8025_v5, %v8047_v6 }
 0x17e   : > { %v615_v21 = vpop.f32.mrb[12].mxu1  ;;  %5693 = vrot.lane.b32.xlu0 %v7546_v18, %s6905_s28 }
 0x17f   : > { %v8062_v28 = vadd.f32 %v615_v21, %v7958_v36  ;;  %6484 = vmatmul.mubr.msk.bf16.vlgmr.msra.gmra.mrb[120].mxu0 %vm245_vm2, %v8044_v61  ;;  %v6660_v30 = vpop.f32.mrb[13].mxu1  ;;  %5695 = vrot.lane.b32.xlu1 %v7561_v26, %s6905_s28 }
 0x180   : > { %3617 = vmatpush1.bf16.msra.mxu0 %v3526_v23  ;;  %v618_v32 = vpop.f32.mrb[14].mxu1  ;;  %3648 = vmatprep.mubr.bf16.mxu0 %v6878_v0  ;;  %v8069_v2 = vpop.permute.xlu0 %3934  ;;  %v3943_v23 = vsel %vm3942_vm5, %v8021_v58, %v8025_v5 }
 0x181   : > { %v6661_v33 = vpop.f32.mrb[15].mxu1  ;;  %6491 = vmatprep.subr.msk.bf16.mxu0 %vm249_vm1, %v3724_v24  ;;  %v8073_v36 = vpop.permute.xlu1 %3936  ;;  %v3954_v5 = vsel %vm249_vm1, %v3943_v23, 0  ;;  %v3945_v32 = vsel %vm3942_vm5, %v8047_v6, %v8051_v19 }
 0x182   : > { %v702_v37 = vpop.f32.mrb[16].mxu0  ;;  %5697 = vrot.lane.b32.xlu0 %v7566_v27, %s6905_s28 }
 0x183   : > { %v8084_v40 = vadd.f32 %v702_v37, %v7987_v48  ;;  %v704_v42 = vpop.f32.mrb[17].mxu0  ;;  %6486 = vmatmul.mubr.msk.bf16.vlgmr.msra.gmra.mrb[120].mxu1 %vm245_vm2, %v8044_v61  ;;  %5699 = vrot.lane.b32.xlu1 %v7587_v35, %s6905_s28 }
 0x184   : > { %v8091_v43 = vadd.f32 %v704_v42, %v7993_v50  ;;  %6741 = vmatpush3.bf16.msra.mxu1 %v3532_v9  ;;  %v706_v25 = vpop.f32.mrb[18].mxu0  ;;  %6742 = vmatprep.mubr.msk.bf16.mxu1 %vm6889_vm3, %v6888_v29  ;;  %v8095_v20 = vpop.permute.xlu0 %3938  ;;  %v3728_v50 = vsel %vm3722_vm4, %v7976_v44, %v7997_v52  ;;  %v3960_v42 = vsel %vm249_vm1, %v3945_v32, 0 }
 0x185   : > { %v707_v46 = vpop.f32.mrb[19].mxu0  ;;  %6493 = vmatprep.subr.msk.bf16.mxu1 %vm249_vm1, %v3726_v39  ;;  %v8099_v47 = vpop.permute.xlu1 %3940  ;;  %v3948_v9 = vsel %vm3942_vm5, %v8073_v36, %v8095_v20  ;;  %v3947_v25 = vsel %vm3942_vm5, %v8069_v2, %v8073_v36 }
 0x186   : > { %v743_v48 = vpop.f32.mrb[16].mxu1  ;;  %5904 = vrot.lane.b32.xlu0 %v7517_v11, %s6906_s5  ;;  %v3740_v11 = vsel %vm249_vm1, %v3725_v49, 0 }
 0x187   : > { %v8110_v51 = vadd.f32 %v743_v48, %v8012_v4  ;;  %v745_v53 = vpop.f32.mrb[17].mxu1  ;;  %6488 = vmatmul.mubr.msk.bf16.vlgmr.msra.gmra.mrb[124].mxu0 %vm245_vm2, %v8044_v61  ;;  %5906 = vrot.lane.b32.xlu1 %v7522_v12, %s6906_s5  ;;  %v3727_v12 = vsel %vm3722_vm4, %v7972_v41, %v7976_v44 }
 0x188   : > { %v8117_v31 = vadd.f32 %v745_v53, %v8018_v63  ;;  %3755 = vmatpush1.bf16.msra.mxu0 %v3734_v45  ;;  %v747_v34 = vpop.f32.mrb[18].mxu1  ;;  %3786 = vmatprep.mubr.bf16.mxu0 %v6878_v0  ;;  %v8120_v54 = vpop.permute.xlu0 %4168  ;;  %v3746_v44 = vsel %vm249_vm1, %v3727_v12, 0 }
 0x189   : > { %v748_v57 = vpop.f32.mrb[19].mxu1  ;;  %6495 = vmatprep.subr.msk.bf16.mxu0 %vm249_vm1, %v3728_v50  ;;  %v8124_v59 = vpop.permute.xlu1 %4170  ;;  %v6498_v50 = vld [vmem:[%s8711_s1 + $0x44] sm:$0xf]  ;;  %v3949_v34 = vsel %vm3942_vm5, %v8095_v20, %v8099_v47 }
 0x18a   : > { %v784_v60 = vpop.f32.mrb[20].mxu0  ;;  %5908 = vrot.lane.b32.xlu0 %v7541_v17, %s6906_s5  ;;  %v6490_v17 = vld [vmem:[%s8711_s1 + $0x40] sm:$0xf] }
 0x18b   : > { %v8132_v4 = vadd.f32 %v784_v60, %v8033_v8  ;;  %v786_v62 = vpop.f32.mrb[21].mxu0  ;;  %6743 = vmatmul.mubr.msk.bf16.vlgmr.msra.gmra.mrb[124].mxu1 %vm245_vm2, %v8044_v61  ;;  %5910 = vrot.lane.b32.xlu1 %v7546_v18, %s6906_s5 }
 0x18c   : > { %v8139_v63 = vadd.f32 %v786_v62, %v8039_v14  ;;  %3796 = vmatpush1.bf16.msra.mxu1 %v3740_v11  ;;  %v788_v56 = vpop.f32.mrb[22].mxu0  ;;  %3827 = vmatprep.mubr.bf16.mxu1 %v6878_v0  ;;  %v8145_v41 = vpop.permute.xlu0 %4172  ;;  %v3972_v62 = vsel %vm249_vm1, %v3949_v34, 0 }
 0x18d   : > { %v789_v3 = vpop.f32.mrb[23].mxu0  ;;  %6746 = vmatprep.subr.bf16.mxu1 %v6888_v29  ;;  %v8149_v1 = vpop.permute.xlu1 %4174  ;;  %v4184_v11 = vsel %vm4182_vm6, %v8124_v59, %v8145_v41  ;;  %v4183_v56 = vsel %vm4182_vm6, %v8120_v54, %v8124_v59 }
 0x18e   : > { %v825_v18 = vpop.f32.mrb[20].mxu1  ;;  %5912 = vrot.lane.b32.xlu0 %v7561_v26, %s6906_s5 }
 0x18f   : > { %v8160_v8 = vadd.f32 %v825_v18, %v8062_v28  ;;  %6492 = vmatmul.mubr.msk.bf16.vlgmr.msra.gmra.mrb[128].mxu0 %vm245_vm2, %v6490_v17  ;;  %v6666_v13 = vpop.f32.mrb[21].mxu1  ;;  %5914 = vrot.lane.b32.xlu1 %v7566_v27, %s6906_s5  ;;  %v3946_v27 = vsel %vm3942_vm5, %v8051_v19, %v8069_v2  ;;  %v3966_v2 = vsel %vm249_vm1, %v3947_v25, 0 }
 0x190   : > { %3837 = vmatpush1.bf16.msra.mxu0 %v3746_v44  ;;  %v828_v14 = vpop.f32.mrb[22].mxu1  ;;  %3868 = vmatprep.mubr.bf16.mxu0 %v6878_v0  ;;  %v8166_v52 = vpop.permute.xlu0 %4176 }
 0x191   : > { %v6667_v15 = vpop.f32.mrb[23].mxu1  ;;  %6499 = vmatprep.subr.msk.bf16.mxu0 %vm249_vm1, %v3944_v10  ;;  %v8170_v26 = vpop.permute.xlu1 %4178  ;;  %v4185_v14 = vsel %vm4182_vm6, %v8145_v41, %v8149_v1 }
 0x192   : > { %v919_v61 = vpop.f32.mrb[24].mxu0  ;;  %5916 = vrot.lane.b32.xlu0 %v7587_v35, %s6906_s5 }
 0x193   : > { %v1048_v16 = vadd.f32 %v919_v61, %v8084_v40  ;;  %v921_v21 = vpop.f32.mrb[25].mxu0  ;;  %6494 = vmatmul.mubr.msk.bf16.vlgmr.msra.gmra.mrb[128].mxu1 %vm245_vm2, %v6490_v17 }
 0x194   : > { %v1049_v22 = vadd.f32 %v921_v21, %v8091_v43  ;;  %6747 = vmatpush3.bf16.msra.mxu1 %v3752_v55  ;;  %v923_v24 = vpop.f32.mrb[26].mxu0  ;;  %6748 = vmatprep.mubr.msk.bf16.mxu1 %vm6889_vm3, %v6888_v29  ;;  %v8185_v58 = vpop.permute.xlu0 %4180  ;;  %v4199_v21 = vsel %vm249_vm1, %v4185_v14, 0 }
 0x195   : > { %v924_v28 = vpop.f32.mrb[27].mxu0  ;;  %6501 = vmatprep.subr.msk.bf16.mxu1 %vm249_vm1, %v3946_v27  ;;  %v8189_v35 = vpop.permute.xlu1 %4385  ;;  %v4188_v55 = vsel %vm4182_vm6, %v8170_v26, %v8185_v58  ;;  %v4187_v24 = vsel %vm4182_vm6, %v8166_v52, %v8170_v26 }
 0x196   : > { %v960_v30 = vpop.f32.mrb[24].mxu1 }
 0x197   : > { %v1050_v33 = vadd.f32 %v960_v30, %v8110_v51  ;;  %v962_v37 = vpop.f32.mrb[25].mxu1  ;;  %6496 = vmatmul.mubr.msk.bf16.vlgmr.msra.gmra.mrb[132].mxu0 %vm245_vm2, %v6490_v17 }
 0x198   : > { %v1051_v38 = vadd.f32 %v962_v37, %v8117_v31  ;;  %3975 = vmatpush1.bf16.msra.mxu0 %v3954_v5  ;;  %v964_v39 = vpop.f32.mrb[26].mxu1  ;;  %4006 = vmatprep.mubr.bf16.mxu0 %v6878_v0  ;;  %v8201_v40 = vpop.permute.xlu0 %4387  ;;  %v4205_v37 = vsel %vm249_vm1, %v4187_v24, 0 }
 0x199   : > { %v965_v6 = vpop.f32.mrb[27].mxu1  ;;  %6503 = vmatprep.subr.msk.bf16.mxu0 %vm249_vm1, %v3948_v9  ;;  %v8205_v19 = vpop.permute.xlu1 %4389  ;;  %v6506_v9 = vld [vmem:[%s8711_s1 + $0x48] sm:$0xf] }
 0x19a   : > { %v1001_v43 = vpop.f32.mrb[28].mxu0  ;;  %v4401_v39 = vsel %vm4399_vm7, %v8201_v40, %v8205_v19 }
 0x19b   : > { %v1052_v45 = vadd.f32 %v1001_v43, %v8132_v4  ;;  %v1003_v46 = vpop.f32.mrb[29].mxu0  ;;  %6749 = vmatmul.mubr.msk.bf16.vlgmr.msra.gmra.mrb[132].mxu1 %vm245_vm2, %v6490_v17  ;;  %v4186_v17 = vsel %vm4182_vm6, %v8149_v1, %v8166_v52 }
 0x19c   : > { %v1053_v48 = vadd.f32 %v1003_v46, %v8139_v63  ;;  %4016 = vmatpush1.bf16.msra.mxu1 %v3960_v42  ;;  %v1005_v49 = vpop.f32.mrb[30].mxu0  ;;  %4047 = vmatprep.mubr.bf16.mxu1 %v6878_v0  ;;  %v8217_v51 = vpop.permute.xlu0 %4391 }
 0x19d   : > { %v1006_v36 = vpop.f32.mrb[31].mxu0  ;;  %6752 = vmatprep.subr.bf16.mxu1 %v6888_v29  ;;  %v8221_v53 = vpop.permute.xlu1 %4393 }
 0x19e   : > { %v1042_v31 = vpop.f32.mrb[28].mxu1 }
 0x19f   : > { %v1054_v57 = vadd.f32 %v1042_v31, %v8160_v8  ;;  %6500 = vmatmul.mubr.msk.bf16.vlgmr.msra.gmra.mrb[136].mxu0 %vm245_vm2, %v6498_v50  ;;  %v6672_v60 = vpop.f32.mrb[29].mxu1  ;;  %v4193_v8 = vsel %vm249_vm1, %v4183_v56, 0 }
 0x1a0   : > { %4057 = vmatpush1.bf16.msra.mxu0 %v3966_v2  ;;  %v1045_v12 = vpop.f32.mrb[30].mxu1  ;;  %4088 = vmatprep.mubr.bf16.mxu0 %v6878_v0  ;;  %v8232_v4 = vpop.permute.xlu0 %4395  ;;  %v4403_v2 = vsel %vm4399_vm7, %v8217_v51, %v8221_v53 }
 0x1a1   : > { %v6673_v63 = vpop.f32.mrb[31].mxu1  ;;  %6514 = vmatprep.subr.msk.bf16.mxu0 %vm249_vm1, %v4184_v11  ;;  %v8236_v20 = vpop.permute.xlu1 %4397  ;;  %v4402_v12 = vsel %vm4399_vm7, %v8205_v19, %v8217_v51  ;;  %v4404_v51 = vsel %vm4399_vm7, %v8221_v53, %v8232_v4 }
 0x1a2   : > { %v1136_v47 = vpop.f32.mrb[32].mxu0  ;;  %v4422_v53 = vsel %vm249_vm1, %v4404_v51, 0 }
 0x1a3   : > { %v1265_v44 = vadd.f32 %v1136_v47, %v1048_v16  ;;  %v1138_v3 = vpop.f32.mrb[33].mxu0  ;;  %6502 = vmatmul.mubr.msk.bf16.vlgmr.msra.gmra.mrb[136].mxu1 %vm245_vm2, %v6498_v50 }
 0x1a4   : > { %v1266_v18 = vadd.f32 %v1138_v3, %v1049_v22  ;;  %6753 = vmatpush3.bf16.msra.mxu1 %v3972_v62  ;;  %v1140_v7 = vpop.f32.mrb[34].mxu0  ;;  %6754 = vmatprep.mubr.msk.bf16.mxu1 %vm6889_vm3, %v6888_v29  ;;  %v8247_v10 = vpop.permute.xlu0 %4602  ;;  %v4405_v62 = vsel %vm4399_vm7, %v8232_v4, %v8236_v20  ;;  %v4416_v3 = vsel %vm249_vm1, %v4402_v12, 0 }
 0x1a5   : > { %v1141_v13 = vpop.f32.mrb[35].mxu0  ;;  %6516 = vmatprep.subr.msk.bf16.mxu1 %vm249_vm1, %v4186_v17  ;;  %v8251_v54 = vpop.permute.xlu1 %4604 }
 0x1a6   : > { %v1177_v59 = vpop.f32.mrb[32].mxu1 }
 0x1a7   : > { %v1267_v15 = vadd.f32 %v1177_v59, %v1050_v33  ;;  %v1179_v61 = vpop.f32.mrb[33].mxu1  ;;  %6504 = vmatmul.mubr.msk.bf16.vlgmr.msra.gmra.mrb[140].mxu0 %vm245_vm2, %v6498_v50 }
 0x1a8   : > { %v1268_v23 = vadd.f32 %v1179_v61, %v1051_v38  ;;  %4214 = vmatpush1.bf16.msra.mxu0 %v4193_v8  ;;  %v1181_v27 = vpop.f32.mrb[34].mxu1  ;;  %4245 = vmatprep.mubr.bf16.mxu0 %v6878_v0  ;;  %v8261_v16 = vpop.permute.xlu0 %4606 }
 0x1a9   : > { %v1182_v22 = vpop.f32.mrb[35].mxu1  ;;  %6518 = vmatprep.subr.msk.bf16.mxu0 %vm249_vm1, %v4188_v55  ;;  %v8265_v41 = vpop.permute.xlu1 %4608  ;;  %v6521_v55 = vld [vmem:[%s8711_s1 + $0x4c] sm:$0xf] }
 0x1aa   : > { %v1218_v1 = vpop.f32.mrb[36].mxu0 }
 0x1ab   : > { %v1269_v5 = vadd.f32 %v1218_v1, %v1052_v45  ;;  %v1220_v28 = vpop.f32.mrb[37].mxu0  ;;  %6755 = vmatmul.mubr.msk.bf16.vlgmr.msra.gmra.mrb[140].mxu1 %vm245_vm2, %v6498_v50  ;;  %v4211_v45 = vsel %vm249_vm1, %v8185_v58, 0  ;;  %v4400_v50 = vsel %vm4399_vm7, %v8189_v35, %v8201_v40  ;;  %v4428_v1 = vsel %vm249_vm1, %v8236_v20, 0 }
 0x1ac   : > { %v1270_v30 = vadd.f32 %v1220_v28, %v1053_v48  ;;  %4255 = vmatpush1.bf16.msra.mxu1 %v4199_v21  ;;  %v1222_v32 = vpop.f32.mrb[38].mxu0  ;;  %4286 = vmatprep.mubr.bf16.mxu1 %v6878_v0  ;;  %v8275_v33 = vpop.permute.xlu0 %4610  ;;  %vm6283_vm7 = vcmask 257024  }
 0x1ad   : > { %v1223_v38 = vpop.f32.mrb[39].mxu0  ;;  %6758 = vmatprep.subr.bf16.mxu1 %v6888_v29  ;;  %v8279_v52 = vpop.permute.xlu1 %4612  ;;  %v4620_v32 = vsel %vm4616_vm8, %v8265_v41, %v8275_v33 }
 0x1ae   : > { %v1259_v26 = vpop.f32.mrb[36].mxu1 }
 0x1af   : > { %v1271_v42 = vadd.f32 %v1259_v26, %v1054_v57  ;;  %6515 = vmatmul.mubr.msk.bf16.vlgmr.msra.gmra.mrb[144].mxu0 %vm245_vm2, %v6506_v9  ;;  %v6678_v6 = vpop.f32.mrb[37].mxu1  ;;  %v4410_v57 = vsel %vm249_vm1, %v4400_v50, 0 }
 0x1b0   : > { %4296 = vmatpush1.bf16.msra.mxu0 %v4205_v37  ;;  %v1262_v43 = vpop.f32.mrb[38].mxu1  ;;  %4327 = vmatprep.mubr.bf16.mxu0 %v6878_v0  ;;  %v8286_v25 = vpop.permute.xlu0 %4614 }
 0x1b1   : > { %v6679_v46 = vpop.f32.mrb[39].mxu1  ;;  %6522 = vmatprep.subr.msk.bf16.mxu0 %vm249_vm1, %v4401_v39  ;;  %v8291_v48 = vpop.permute.xlu1 %4819  ;;  %v4622_v6 = vsel %vm4616_vm8, %v8279_v52, %v8286_v25 }
 0x1b2   : > { %v1353_v49 = vpop.f32.mrb[40].mxu0 }
 0x1b3   : > { %v1482_v36 = vadd.f32 %v1353_v49, %v1265_v44  ;;  %v1355_v31 = vpop.f32.mrb[41].mxu0  ;;  %6517 = vmatmul.mubr.msk.bf16.vlgmr.msra.gmra.mrb[144].mxu1 %vm245_vm2, %v6506_v9 }
 0x1b4   : > { %v1483_v34 = vadd.f32 %v1355_v31, %v1266_v18  ;;  %6759 = vmatpush3.bf16.msra.mxu1 %v4211_v45  ;;  %v1357_v58 = vpop.f32.mrb[42].mxu0  ;;  %6760 = vmatprep.mubr.msk.bf16.mxu1 %vm6889_vm3, %v6888_v29  ;;  %v8302_v11 = vpop.permute.xlu0 %4821  ;;  %v4621_v31 = vsel %vm4616_vm8, %v8275_v33, %v8279_v52 }
 0x1b5   : > { %v1358_v60 = vpop.f32.mrb[43].mxu0  ;;  %6524 = vmatprep.subr.msk.bf16.mxu1 %vm249_vm1, %v4403_v2  ;;  %v8306_v35 = vpop.permute.xlu1 %4823 }
 0x1b6   : > { %v1394_v40 = vpop.f32.mrb[40].mxu1 }
 0x1b7   : > { %v1484_v63 = vadd.f32 %v1394_v40, %v1267_v15  ;;  %v1396_v47 = vpop.f32.mrb[41].mxu1  ;;  %6519 = vmatmul.mubr.msk.bf16.vlgmr.msra.gmra.mrb[148].mxu0 %vm245_vm2, %v6506_v9  ;;  %v6529_v40 = vld [vmem:[%s8711_s1 + $0x50] sm:$0xf] }
 0x1b8   : > { %v1485_v56 = vadd.f32 %v1396_v47, %v1268_v23  ;;  %4431 = vmatpush1.bf16.msra.mxu0 %v4410_v57  ;;  %v1398_v17 = vpop.f32.mrb[42].mxu1  ;;  %4462 = vmatprep.mubr.bf16.mxu0 %v6878_v0  ;;  %v8316_v44 = vpop.permute.xlu0 %4825  ;;  %v4618_v23 = vsel %vm4616_vm8, %v8251_v54, %v8261_v16  ;;  %v4835_v47 = vsel %vm4833_vm9, %v8302_v11, %v8306_v35 }
 0x1b9   : > { %v1399_v18 = vpop.f32.mrb[43].mxu1  ;;  %6526 = vmatprep.subr.msk.bf16.mxu0 %vm249_vm1, %v4405_v62  ;;  %v8324_v13 = vpop.permute.xlu1 %4827  ;;  %v4639_v62 = vsel %vm249_vm1, %v4621_v31, 0 }
 0x1ba   : > { %v1435_v19 = vpop.f32.mrb[44].mxu0  ;;  %v4645_v18 = vsel %vm249_vm1, %v8286_v25, 0 }
 0x1bb   : > { %v1486_v7 = vadd.f32 %v1435_v19, %v1269_v5  ;;  %v1437_v8 = vpop.f32.mrb[45].mxu0  ;;  %6761 = vmatmul.mubr.msk.bf16.vlgmr.msra.gmra.mrb[148].mxu1 %vm245_vm2, %v6506_v9 }
 0x1bc   : > { %v1487_v59 = vadd.f32 %v1437_v8, %v1270_v30  ;;  %4472 = vmatpush1.bf16.msra.mxu1 %v4416_v3  ;;  %v1439_v14 = vpop.f32.mrb[46].mxu0  ;;  %4503 = vmatprep.mubr.bf16.mxu1 %v6878_v0  ;;  %v8330_v15 = vpop.permute.xlu0 %4829  ;;  %v4617_v30 = vsel %vm4616_vm8, %v8247_v10, %v8251_v54  ;;  %v4619_v54 = vsel %vm4616_vm8, %v8261_v16, %v8265_v41 }
 0x1bd   : > { %v1440_v4 = vpop.f32.mrb[47].mxu0  ;;  %6764 = vmatprep.subr.bf16.mxu1 %v6888_v29  ;;  %v8350_v9 = vpop.permute.xlu1 %4831  ;;  %v4627_v39 = vsel %vm249_vm1, %v4617_v30, 0  ;;  %v4837_v8 = vsel %vm4833_vm9, %v8316_v44, %v8324_v13 }
 0x1be   : > { %v1476_v61 = vpop.f32.mrb[44].mxu1 }
 0x1bf   : > { %v1488_v27 = vadd.f32 %v1476_v61, %v1271_v42  ;;  %6523 = vmatmul.mubr.msk.bf16.vlgmr.msra.gmra.mrb[152].mxu0 %vm245_vm2, %v6521_v55  ;;  %v6684_v21 = vpop.f32.mrb[45].mxu1 }
 0x1c0   : > { %4513 = vmatpush1.bf16.msra.mxu0 %v4422_v53  ;;  %v1479_v22 = vpop.f32.mrb[46].mxu1  ;;  %4544 = vmatprep.mubr.bf16.mxu0 %v6878_v0  ;;  %v8342_v5 = vpop.permute.xlu0 %5036 }
 0x1c1   : > { %v6685_v24 = vpop.f32.mrb[47].mxu1  ;;  %6530 = vmatprep.subr.msk.bf16.mxu0 %vm249_vm1, %v4618_v23  ;;  %v8363_v43 = vpop.permute.xlu1 %5038  ;;  %v4836_v23 = vsel %vm4833_vm9, %v8306_v35, %v8316_v44 }
 0x1c2   : > { %v1570_v28 = vpop.f32.mrb[48].mxu0  ;;  %v5051_v31 = vsel %vm5050_vm10, %v8342_v5, %v8363_v43 }
 0x1c3   : > { %v1699_v37 = vadd.f32 %v1570_v28, %v1482_v36  ;;  %v1572_v38 = vpop.f32.mrb[49].mxu0  ;;  %6525 = vmatmul.mubr.msk.bf16.vlgmr.msra.gmra.mrb[152].mxu1 %vm245_vm2, %v6521_v55  ;;  %v4633_v36 = vsel %vm249_vm1, %v4619_v54, 0  ;;  %v5061_v5 = vsel %vm249_vm1, %v5051_v31, 0 }
 0x1c4   : > { %v1700_v20 = vadd.f32 %v1572_v38, %v1483_v34  ;;  %6765 = vmatpush3.bf16.msra.mxu1 %v4428_v1  ;;  %v1574_v26 = vpop.f32.mrb[50].mxu0  ;;  %6766 = vmatprep.mubr.msk.bf16.mxu1 %vm6889_vm3, %v6888_v29  ;;  %v8366_v49 = vpop.permute.xlu0 %5040 }
 0x1c5   : > { %v1575_v42 = vpop.f32.mrb[51].mxu0  ;;  %6532 = vmatprep.subr.msk.bf16.mxu1 %vm249_vm1, %v4620_v32  ;;  %v8379_v12 = vpop.permute.xlu1 %5042  ;;  %v4850_v32 = vsel %vm249_vm1, %v4836_v23, 0 }
 0x1c6   : > { %v1611_v10 = vpop.f32.mrb[48].mxu1  ;;  %v6537_v42 = vld [vmem:[%s8711_s1 + $0x54] sm:$0xf] }
 0x1c7   : > { %v1701_v45 = vadd.f32 %v1611_v10, %v1484_v63  ;;  %v1613_v46 = vpop.f32.mrb[49].mxu1  ;;  %6527 = vmatmul.mubr.msk.bf16.vlgmr.msra.gmra.mrb[156].mxu0 %vm245_vm2, %v6521_v55 }
 0x1c8   : > { %v1702_v50 = vadd.f32 %v1613_v46, %v1485_v56  ;;  %4648 = vmatpush1.bf16.msra.mxu0 %v4627_v39  ;;  %v1615_v2 = vpop.f32.mrb[50].mxu1  ;;  %4679 = vmatprep.mubr.bf16.mxu0 %v6878_v0  ;;  %v8383_v33 = vpop.permute.xlu0 %5044 }
 0x1c9   : > { %v1616_v16 = vpop.f32.mrb[51].mxu1  ;;  %6534 = vmatprep.subr.msk.bf16.mxu0 %vm249_vm1, %v4622_v6  ;;  %v5052_v6 = vsel %vm5050_vm10, %v8363_v43, %v8366_v49 }
 0x1ca   : > { %v1652_v41 = vpop.f32.mrb[52].mxu0 }
 0x1cb   : > { %v1703_v34 = vadd.f32 %v1652_v41, %v1486_v7  ;;  %v1654_v58 = vpop.f32.mrb[53].mxu0  ;;  %6767 = vmatmul.mubr.msk.bf16.vlgmr.msra.gmra.mrb[156].mxu1 %vm245_vm2, %v6521_v55  ;;  %v4834_v7 = vsel %vm4833_vm9, %v8291_v48, %v8302_v11 }
 0x1cc   : > { %v1704_v57 = vadd.f32 %v1654_v58, %v1487_v59  ;;  %4689 = vmatpush1.bf16.msra.mxu1 %v4633_v36  ;;  %v1656_v60 = vpop.f32.mrb[54].mxu0  ;;  %4720 = vmatprep.mubr.bf16.mxu1 %v6878_v0  ;;  %v8399_v59 = vpop.permute.xlu1 %5046  ;;  %v4844_v48 = vsel %vm249_vm1, %v4834_v7, 0  ;;  %v4862_v36 = vsel %vm249_vm1, %v8350_v9, 0 }
 0x1cd   : > { %v1657_v63 = vpop.f32.mrb[55].mxu0  ;;  %6770 = vmatprep.subr.bf16.mxu1 %v6888_v29  ;;  %v8402_v53 = vpop.permute.xlu0 %5048 }
 0x1ce   : > { %v1693_v52 = vpop.f32.mrb[52].mxu1 }
 0x1cf   : > { %v1705_v56 = vadd.f32 %v1693_v52, %v1488_v27  ;;  %6531 = vmatmul.mubr.msk.bf16.vlgmr.msra.gmra.mrb[160].mxu0 %vm245_vm2, %v6529_v40  ;;  %v6690_v17 = vpop.f32.mrb[53].mxu1  ;;  %v4839_v27 = vsel %vm4833_vm9, %v8330_v15, %v8350_v9  ;;  %v5053_v52 = vsel %vm5050_vm10, %v8366_v49, %v8379_v12 }
 0x1d0   : > { %4730 = vmatpush1.bf16.msra.mxu0 %v4639_v62  ;;  %v1696_v3 = vpop.f32.mrb[54].mxu1  ;;  %4761 = vmatprep.mubr.bf16.mxu0 %v6878_v0  ;;  %v8418_v30 = vpop.permute.xlu1 %5253 }
 0x1d1   : > { %v6691_v19 = vpop.f32.mrb[55].mxu1  ;;  %6538 = vmatprep.subr.msk.bf16.mxu0 %vm249_vm1, %v4835_v47  ;;  %v8415_v1 = vpop.permute.xlu0 %5255  ;;  %v5056_v47 = vsel %vm5050_vm10, %v8399_v59, %v8402_v53 }
 0x1d2   : > { %v1787_v51 = vpop.f32.mrb[56].mxu0  ;;  %v5067_v19 = vsel %vm249_vm1, %v5053_v52, 0 }
 0x1d3   : > { %v1916_v14 = vadd.f32 %v1787_v51, %v1699_v37  ;;  %v1789_v55 = vpop.f32.mrb[57].mxu0  ;;  %6533 = vmatmul.mubr.msk.bf16.vlgmr.msra.gmra.mrb[160].mxu1 %vm245_vm2, %v6529_v40  ;;  %v4838_v37 = vsel %vm4833_vm9, %v8324_v13, %v8330_v15 }
 0x1d4   : > { %v1917_v25 = vadd.f32 %v1789_v55, %v1700_v20  ;;  %6771 = vmatpush3.bf16.msra.mxu1 %v4645_v18  ;;  %v1791_v4 = vpop.f32.mrb[58].mxu0  ;;  %6772 = vmatprep.mubr.msk.bf16.mxu1 %vm6889_vm3, %v6888_v29  ;;  %v4856_v10 = vsel %vm249_vm1, %v4838_v37, 0 }
 0x1d5   : > { %v1792_v11 = vpop.f32.mrb[59].mxu0  ;;  %6540 = vmatprep.subr.msk.bf16.mxu1 %vm249_vm1, %v4837_v8  ;;  %v8432_v13 = vpop.permute.xlu0 %5259 }
 0x1d6   : > { %v1828_v61 = vpop.f32.mrb[56].mxu1 }
 0x1d7   : > { %v1918_v21 = vadd.f32 %v1828_v61, %v1701_v45  ;;  %v1830_v22 = vpop.f32.mrb[57].mxu1  ;;  %6535 = vmatmul.mubr.msk.bf16.vlgmr.msra.gmra.mrb[164].mxu0 %vm245_vm2, %v6529_v40  ;;  %v8437_v45 = vpop.permute.xlu1 %5257 }
 0x1d8   : > { %v1919_v24 = vadd.f32 %v1830_v22, %v1702_v50  ;;  %4865 = vmatpush1.bf16.msra.mxu0 %v4844_v48  ;;  %v1832_v28 = vpop.f32.mrb[58].mxu1  ;;  %4896 = vmatprep.mubr.bf16.mxu0 %v6878_v0  ;;  %v6545_v48 = vld [vmem:[%s8711_s1 + $0x58] sm:$0xf] }
 0x1d9   : > { %v1833_v35 = vpop.f32.mrb[59].mxu1  ;;  %6542 = vmatprep.subr.msk.bf16.mxu0 %vm249_vm1, %v4839_v27  ;;  %v8451_v60 = vpop.permute.xlu0 %5263  ;;  %v5079_v28 = vsel %vm249_vm1, %v8402_v53, 0 }
 0x1da   : > { %v1869_v44 = vpop.f32.mrb[60].mxu0 }
 0x1db   : > { %v1920_v38 = vadd.f32 %v1869_v44, %v1703_v34  ;;  %v1871_v20 = vpop.f32.mrb[61].mxu0  ;;  %6773 = vmatmul.mubr.msk.bf16.vlgmr.msra.gmra.mrb[164].mxu1 %vm245_vm2, %v6529_v40  ;;  %v5054_v34 = vsel %vm5050_vm10, %v8379_v12, %v8383_v33  ;;  %v8455_v62 = vpop.permute.xlu1 %5261  ;;  %v5055_v12 = vsel %vm5050_vm10, %v8383_v33, %v8399_v59  ;;  %v5269_v59 = vsel %vm5267_vm11, %v8415_v1, %v8437_v45 }
 0x1dc   : > { %v1921_v26 = vadd.f32 %v1871_v20, %v1704_v57  ;;  %4906 = vmatpush1.bf16.msra.mxu1 %v4850_v32  ;;  %v1873_v39 = vpop.f32.mrb[62].mxu0  ;;  %4937 = vmatprep.mubr.bf16.mxu1 %v6878_v0  ;;  %v5073_v11 = vsel %vm249_vm1, %v5055_v12, 0  ;;  %v5268_v44 = vsel %vm5267_vm11, %v8418_v30, %v8415_v1  ;;  %v5271_v37 = vsel %vm5267_vm11, %v8432_v13, %v8455_v62 }
 0x1dd   : > { %v1874_v54 = vpop.f32.mrb[63].mxu0  ;;  %6776 = vmatprep.subr.bf16.mxu1 %v6888_v29  ;;  %v8469_v7 = vpop.permute.xlu0 %5470 }
 0x1de   : > { %v1910_v15 = vpop.f32.mrb[60].mxu1  ;;  %v5270_v54 = vsel %vm5267_vm11, %v8437_v45, %v8432_v13  ;;  %v5272_v13 = vsel %vm5267_vm11, %v8455_v62, %v8451_v60 }
 0x1df   : > { %v1922_v46 = vadd.f32 %v1910_v15, %v1705_v56  ;;  %6539 = vmatmul.mubr.msk.bf16.vlgmr.msra.gmra.mrb[168].mxu0 %vm245_vm2, %v6537_v42  ;;  %v6696_v50 = vpop.f32.mrb[61].mxu1  ;;  %v8474_v8 = vpop.permute.xlu1 %5265 }
 0x1e0   : > { %4947 = vmatpush1.bf16.msra.mxu0 %v4856_v10  ;;  %v1913_v2 = vpop.f32.mrb[62].mxu1  ;;  %4978 = vmatprep.mubr.bf16.mxu0 %v6878_v0  ;;  %v5273_v15 = vsel %vm5267_vm11, %v8451_v60, %v8474_v8 }
 0x1e1   : > { %v6697_v16 = vpop.f32.mrb[63].mxu1  ;;  %6546 = vmatprep.subr.msk.bf16.mxu0 %vm249_vm1, %v5052_v6  ;;  %v8489_v22 = vpop.permute.xlu0 %5474 }
 0x1e2   : > { %v2004_v41 = vpop.f32.mrb[64].mxu0 }
 0x1e3   : > { %v2133_v58 = vadd.f32 %v2004_v41, %v1916_v14  ;;  %v2006_v57 = vpop.f32.mrb[65].mxu0  ;;  %6541 = vmatmul.mubr.msk.bf16.vlgmr.msra.gmra.mrb[168].mxu1 %vm245_vm2, %v6537_v42  ;;  %v8486_v23 = vpop.permute.xlu1 %5472 }
 0x1e4   : > { %v2134_v40 = vadd.f32 %v2006_v57, %v1917_v25  ;;  %6777 = vmatpush3.bf16.msra.mxu1 %v4862_v36  ;;  %v2008_v9 = vpop.f32.mrb[66].mxu0  ;;  %6778 = vmatprep.mubr.msk.bf16.mxu1 %vm6889_vm3, %v6888_v29  ;;  %v5284_v36 = vsel %vm249_vm1, %v5270_v54, 0 }
 0x1e5   : > { %v2009_v43 = vpop.f32.mrb[67].mxu0  ;;  %6548 = vmatprep.subr.msk.bf16.mxu1 %vm249_vm1, %v5054_v34  ;;  %v8508_v1 = vpop.permute.xlu0 %5478  ;;  %v6553_v9 = vld [vmem:[%s8711_s1 + $0x5c] sm:$0xf] }
 0x1e6   : > { %v2045_v63 = vpop.f32.mrb[64].mxu1  ;;  %v5486_v43 = vsel %vm5484_vm12, %v8486_v23, %v8489_v22 }
 0x1e7   : > { %v2135_v56 = vadd.f32 %v2045_v63, %v1918_v21  ;;  %v2047_v17 = vpop.f32.mrb[65].mxu1  ;;  %6543 = vmatmul.mubr.msk.bf16.vlgmr.msra.gmra.mrb[172].mxu0 %vm245_vm2, %v6537_v42  ;;  %v8504_v53 = vpop.permute.xlu1 %5476 }
 0x1e8   : > { %v2136_v3 = vadd.f32 %v2047_v17, %v1919_v24  ;;  %5082 = vmatpush1.bf16.msra.mxu0 %v5061_v5  ;;  %v2049_v18 = vpop.f32.mrb[66].mxu1  ;;  %5113 = vmatprep.mubr.bf16.mxu0 %v6878_v0  ;;  %v5290_v5 = vsel %vm249_vm1, %v5272_v13, 0 }
 0x1e9   : > { %v2050_v51 = vpop.f32.mrb[67].mxu1  ;;  %6550 = vmatprep.subr.msk.bf16.mxu0 %vm249_vm1, %v5056_v47 }
 0x1ea   : > { %v2086_v49 = vpop.f32.mrb[68].mxu0  ;;  %v5485_v51 = vsel %vm5484_vm12, %v8469_v7, %v8486_v23 }
 0x1eb   : > { %v2137_v14 = vadd.f32 %v2086_v49, %v1920_v38  ;;  %v2088_v55 = vpop.f32.mrb[69].mxu0  ;;  %6779 = vmatmul.mubr.msk.bf16.vlgmr.msra.gmra.mrb[172].mxu1 %vm245_vm2, %v6537_v42  ;;  %v5278_v42 = vsel %vm249_vm1, %v5268_v44, 0  ;;  %v5481_v45 = vpop.permute.xlu1 %5480  ;;  %v5488_v49 = vsel %vm5484_vm12, %v8504_v53, %v8508_v1  ;;  %v5495_v7 = vsel %vm249_vm1, %v5485_v51, 0 }
 0x1ec   : > { %v2138_v25 = vadd.f32 %v2088_v55, %v1921_v26  ;;  %5123 = vmatpush1.bf16.msra.mxu1 %v5067_v19  ;;  %v2090_v4 = vpop.f32.mrb[70].mxu0  ;;  %5154 = vmatprep.mubr.bf16.mxu1 %v6878_v0 }
 0x1ed   : > { %v2091_v61 = vpop.f32.mrb[71].mxu0  ;;  %6782 = vmatprep.subr.bf16.mxu1 %v6888_v29 }
 0x1ee   : > { %v2127_v33 = vpop.f32.mrb[68].mxu1  ;;  %v5487_v61 = vsel %vm5484_vm12, %v8489_v22, %v8504_v53  ;;  %v5489_v22 = vsel %vm5484_vm12, %v8508_v1, %v5481_v45 }
 0x1ef   : > { %v2139_v27 = vadd.f32 %v2127_v33, %v1922_v46  ;;  %6547 = vmatmul.mubr.msk.bf16.vlgmr.msra.gmra.mrb[176].mxu0 %vm245_vm2, %v6545_v48  ;;  %v6702_v21 = vpop.f32.mrb[69].mxu1  ;;  %v8539_v17 = vpop.permute.xlu1 %5687 }
 0x1f0   : > { %5164 = vmatpush1.bf16.msra.mxu0 %v5073_v11  ;;  %v2130_v24 = vpop.f32.mrb[70].mxu1  ;;  %5195 = vmatprep.mubr.bf16.mxu0 %v6878_v0 }
 0x1f1   : > { %v6703_v32 = vpop.f32.mrb[71].mxu1  ;;  %6554 = vmatprep.subr.msk.bf16.mxu0 %vm249_vm1, %v5269_v59 }
 0x1f2   : > { %v2248_v35 = vpop.f32.mrb[72].mxu0 }
 0x1f3   : > { %v2377_v38 = vadd.f32 %v2248_v35, %v2133_v58  ;;  %v2250_v20 = vpop.f32.mrb[73].mxu0  ;;  %6549 = vmatmul.mubr.msk.bf16.vlgmr.msra.gmra.mrb[176].mxu1 %vm245_vm2, %v6545_v48  ;;  %v8524_v58 = vpop.permute.xlu0 %5482 }
 0x1f4   : > { %v2378_v26 = vadd.f32 %v2250_v20, %v2134_v40  ;;  %6783 = vmatpush3.bf16.msra.mxu1 %v5079_v28  ;;  %v2252_v39 = vpop.f32.mrb[74].mxu0  ;;  %6784 = vmatprep.mubr.msk.bf16.mxu1 %vm6889_vm3, %v6888_v29  ;;  %v5490_v33 = vsel %vm5484_vm12, %v5481_v45, %v8524_v58  ;;  %v5692_v59 = vpop.permute.xlu1 %5691  ;;  %v5501_v28 = vsel %vm249_vm1, %v5487_v61, 0 }
 0x1f5   : > { %v2253_v10 = vpop.f32.mrb[75].mxu0  ;;  %6556 = vmatprep.subr.msk.bf16.mxu1 %vm249_vm1, %v5271_v37  ;;  %v6561_v39 = vld [vmem:[%s8711_s1 + $0x60] sm:$0xf] }
 0x1f6   : > { %v2289_v30 = vpop.f32.mrb[72].mxu1 }
 0x1f7   : > { %v2379_v6 = vadd.f32 %v2289_v30, %v2135_v56  ;;  %v2291_v46 = vpop.f32.mrb[73].mxu1  ;;  %6551 = vmatmul.mubr.msk.bf16.vlgmr.msra.gmra.mrb[180].mxu0 %vm245_vm2, %v6545_v48  ;;  %v8536_v47 = vpop.permute.xlu0 %5689 }
 0x1f8   : > { %v2380_v50 = vadd.f32 %v2291_v46, %v2136_v3  ;;  %5299 = vmatpush1.bf16.msra.mxu0 %v5278_v42  ;;  %v2293_v2 = vpop.f32.mrb[74].mxu1  ;;  %5330 = vmatprep.mubr.bf16.mxu0 %v6878_v0  ;;  %v5296_v3 = vsel %vm249_vm1, %v8474_v8, 0  ;;  %v6119_v8 = vld [vmem:[%s8712_s2] sm:$0xff]  ;;  %v5696_v53 = vpop.permute.xlu1 %5695  ;;  %v5507_v42 = vsel %vm249_vm1, %v5489_v22, 0  ;;  %v5703_v30 = vsel %vm5701_vm13, %v8536_v47, %v5692_v59 }
 0x1f9   : > { %v2294_v16 = vpop.f32.mrb[75].mxu1  ;;  %6558 = vmatprep.subr.msk.bf16.mxu0 %vm249_vm1, %v5273_v15  ;;  %6122 = vperm.xlu1 %6850, %v6119_v8   ;;  %v5513_v46 = vsel %vm249_vm1, %v8524_v58, 0 }
 0x1fa   : > { %v2330_v41 = vpop.f32.mrb[76].mxu0  ;;  %v5702_v16 = vsel %vm5701_vm13, %v8539_v17, %v8536_v47 }
 0x1fb   : > { %v2381_v31 = vadd.f32 %v2330_v41, %v2137_v14  ;;  %v2332_v34 = vpop.f32.mrb[77].mxu0  ;;  %6785 = vmatmul.mubr.msk.bf16.vlgmr.msra.gmra.mrb[180].mxu1 %vm245_vm2, %v6545_v48  ;;  %v5694_v48 = vpop.permute.xlu0 %5693  ;;  %v5712_v58 = vsel %vm249_vm1, %v5702_v16, 0 }
 0x1fc   : > { %v2382_v57 = vadd.f32 %v2332_v34, %v2138_v25  ;;  %5340 = vmatpush1.bf16.msra.mxu1 %v5284_v36  ;;  %v2334_v40 = vpop.f32.mrb[78].mxu0  ;;  %5371 = vmatprep.mubr.bf16.mxu1 %v6878_v0  ;;  %v5705_v41 = vsel %vm5701_vm13, %v5694_v48, %v5696_v53  ;;  %v5700_v13 = vpop.permute.xlu1 %5699 }
 0x1fd   : > { %v2335_v60 = vpop.f32.mrb[79].mxu0  ;;  %6788 = vmatprep.subr.bf16.mxu1 %v6888_v29 }
 0x1fe   : > { %v2371_v62 = vpop.f32.mrb[76].mxu1 }
 0x1ff   : > { %v2383_v63 = vadd.f32 %v2371_v62, %v2139_v27  ;;  %6555 = vmatmul.mubr.msk.bf16.vlgmr.msra.gmra.mrb[184].mxu0 %vm245_vm2, %v6553_v9  ;;  %v6708_v52 = vpop.f32.mrb[77].mxu1 }
 0x200   : > { %5381 = vmatpush1.bf16.msra.mxu0 %v5290_v5  ;;  %v2374_v56 = vpop.f32.mrb[78].mxu1  ;;  %5412 = vmatprep.mubr.bf16.mxu0 %v6878_v0  ;;  %v5704_v5 = vsel %vm5701_vm13, %v5692_v59, %v5694_v48  ;;  %v5907_v62 = vpop.permute.xlu1 %5906 }
 0x201   : > { %v6709_v18 = vpop.f32.mrb[79].mxu1  ;;  %6562 = vmatprep.subr.msk.bf16.mxu0 %vm249_vm1, %v5486_v43  ;;  %v5718_v17 = vsel %vm249_vm1, %v5704_v5, 0 }
 0x202   : > { %v2468_v19 = vpop.f32.mrb[80].mxu0 }
 0x203   : > { %v2597_v12 = vadd.f32 %v2468_v19, %v2377_v38  ;;  %v2470_v14 = vpop.f32.mrb[81].mxu0  ;;  %6557 = vmatmul.mubr.msk.bf16.vlgmr.msra.gmra.mrb[184].mxu1 %vm245_vm2, %v6553_v9  ;;  %v5698_v38 = vpop.permute.xlu0 %5697 }
 0x204   : > { %v2598_v55 = vadd.f32 %v2470_v14, %v2378_v26  ;;  %6789 = vmatpush3.bf16.msra.mxu1 %v5296_v3  ;;  %v2472_v25 = vpop.f32.mrb[82].mxu0  ;;  %6790 = vmatprep.mubr.msk.bf16.mxu1 %vm6889_vm3, %v6888_v29  ;;  %v5707_v60 = vsel %vm5701_vm13, %v5698_v38, %v5700_v13  ;;  %v5706_v19 = vsel %vm5701_vm13, %v5696_v53, %v5698_v38 }
 0x205   : > { %v2473_v4 = vpop.f32.mrb[83].mxu0  ;;  %6564 = vmatprep.subr.msk.bf16.mxu1 %vm249_vm1, %v5488_v49  ;;  %v5911_v25 = vpop.permute.xlu1 %5910  ;;  %v5724_v8 = vsel %vm249_vm1, %v5706_v19, 0 }
 0x206   : > { %v2509_v11 = vpop.f32.mrb[80].mxu1 }
 0x207   : > { %v2599_v23 = vadd.f32 %v2509_v11, %v2379_v6  ;;  %v2511_v27 = vpop.f32.mrb[81].mxu1  ;;  %6559 = vmatmul.mubr.msk.bf16.vlgmr.msra.gmra.mrb[188].mxu0 %vm245_vm2, %v6553_v9  ;;  %v5905_v2 = vpop.permute.xlu0 %5904 }
 0x208   : > { %v2600_v21 = vadd.f32 %v2511_v27, %v2380_v50  ;;  %5516 = vmatpush1.bf16.msra.mxu0 %v5495_v7  ;;  %v2513_v24 = vpop.f32.mrb[82].mxu1  ;;  %5547 = vmatprep.mubr.bf16.mxu0 %v6878_v0 }
 0x209   : > { %v2514_v32 = vpop.f32.mrb[83].mxu1  ;;  %6566 = vmatprep.subr.msk.bf16.mxu0 %vm249_vm1, %v5490_v33  ;;  %v5919_v24 = vsel %vm5918_vm14, %v5905_v2, %v5907_v62 }
 0x20a   : > { %v2550_v35 = vpop.f32.mrb[84].mxu0  ;;  %v5915_v32 = vpop.permute.xlu1 %5914 }
 0x20b   : > { %v2601_v44 = vadd.f32 %v2550_v35, %v2381_v31  ;;  %v2552_v37 = vpop.f32.mrb[85].mxu0  ;;  %6791 = vmatmul.mubr.msk.bf16.vlgmr.msra.gmra.mrb[188].mxu1 %vm245_vm2, %v6553_v9  ;;  %v5909_v52 = vpop.permute.xlu0 %5908 }
 0x20c   : > { %v2602_v20 = vadd.f32 %v2552_v37, %v2382_v57  ;;  %5557 = vmatpush1.bf16.msra.mxu1 %v5501_v28  ;;  %v2554_v26 = vpop.f32.mrb[86].mxu0  ;;  %5588 = vmatprep.mubr.bf16.mxu1 %v6878_v0  ;;  %v5920_v11 = vsel %vm5918_vm14, %v5907_v62, %v5909_v52  ;;  %v5921_v53 = vsel %vm5918_vm14, %v5909_v52, %v5911_v25 }
 0x20d   : > { %v2555_v10 = vpop.f32.mrb[87].mxu0  ;;  %6794 = vmatprep.subr.bf16.mxu1 %v6888_v29 }
 0x20e   : > { %v2591_v1 = vpop.f32.mrb[84].mxu1 }
 0x20f   : > { %v2603_v54 = vadd.f32 %v2591_v1, %v2383_v63  ;;  %6563 = vmatmul.mubr.msk.bf16.vlgmr.msra.gmra.mrb[192].mxu0 %vm245_vm2, %v6561_v39  ;;  %v6714_v15 = vpop.f32.mrb[85].mxu1  ;;  %v5913_v4 = vpop.permute.xlu0 %5912 }
 0x210   : > { %5598 = vmatpush1.bf16.msra.mxu0 %v5507_v42  ;;  %v2594_v6 = vpop.f32.mrb[86].mxu1  ;;  %5629 = vmatprep.mubr.bf16.mxu0 %v6878_v0  ;;  %v5922_v28 = vsel %vm5918_vm14, %v5911_v25, %v5913_v4  ;;  %v5935_v15 = vsel %vm249_vm1, %v5921_v53, 0 }
 0x211   : > { %v6715_v50 = vpop.f32.mrb[87].mxu1  ;;  %6570 = vmatprep.subr.msk.bf16.mxu0 %vm249_vm1, %v5703_v30 }
 0x212   : > { %v2688_v36 = vpop.f32.mrb[88].mxu0  ;;  %v5923_v50 = vsel %vm5918_vm14, %v5913_v4, %v5915_v32 }
 0x213   : > { %v2817_v45 = vadd.f32 %v2688_v36, %v2597_v12  ;;  %v2690_v31 = vpop.f32.mrb[89].mxu0  ;;  %6565 = vmatmul.mubr.msk.bf16.vlgmr.msra.gmra.mrb[192].mxu1 %vm245_vm2, %v6561_v39 }
 0x214   : > { %v2818_v34 = vadd.f32 %v2690_v31, %v2598_v55  ;;  %6795 = vmatpush3.bf16.msra.mxu1 %v5513_v46  ;;  %v2692_v57 = vpop.f32.mrb[90].mxu0  ;;  %6796 = vmatprep.mubr.msk.bf16.mxu1 %vm6889_vm3, %v6888_v29  ;;  %v6569_v55 = vld [vmem:[%s8711_s1 + $0x64] sm:$0xf] }
 0x215   : > { %v2693_v40 = vpop.f32.mrb[91].mxu0  ;;  %6572 = vmatprep.subr.msk.bf16.mxu1 %vm249_vm1, %v5705_v41 }
 0x216   : > { %v2729_v9 = vpop.f32.mrb[88].mxu1 }
 0x217   : > { %v2819_v43 = vadd.f32 %v2729_v9, %v2599_v23  ;;  %v2731_v63 = vpop.f32.mrb[89].mxu1  ;;  %6567 = vmatmul.mubr.msk.bf16.vlgmr.msra.gmra.mrb[196].mxu0 %vm245_vm2, %v6561_v39  ;;  %v5730_v23 = vsel %vm249_vm1, %v5700_v13, 0  ;;  %v6577_v13 = vld [vmem:[%s8711_s1 + $0x68] sm:$0xf] }
 0x218   : > { %v2820_v47 = vadd.f32 %v2731_v63, %v2600_v21  ;;  %5733 = vmatpush1.bf16.msra.mxu0 %v5712_v58  ;;  %v2733_v56 = vpop.f32.mrb[90].mxu1  ;;  %5764 = vmatprep.mubr.bf16.mxu0 %v6878_v0 }
 0x219   : > { %v2734_v3 = vpop.f32.mrb[91].mxu1  ;;  %6574 = vmatprep.subr.msk.bf16.mxu0 %vm249_vm1, %v5707_v60 }
 0x21a   : > { %v2770_v18 = vpop.f32.mrb[92].mxu0 }
 0x21b   : > { %v2821_v51 = vadd.f32 %v2770_v18, %v2601_v44  ;;  %v2772_v49 = vpop.f32.mrb[93].mxu0  ;;  %6797 = vmatmul.mubr.msk.bf16.vlgmr.msra.gmra.mrb[196].mxu1 %vm245_vm2, %v6561_v39  ;;  %v5917_v44 = vpop.permute.xlu0 %5916 }
 0x21c   : > { %v2822_v12 = vadd.f32 %v2772_v49, %v2602_v20  ;;  %5774 = vmatpush1.bf16.msra.mxu1 %v5718_v17  ;;  %v2774_v14 = vpop.f32.mrb[94].mxu0  ;;  %5805 = vmatprep.mubr.bf16.mxu1 %v6878_v0  ;;  %v5929_v20 = vsel %vm249_vm1, %v5919_v24, 0  ;;  %v5924_v42 = vsel %vm5918_vm14, %v5915_v32, %v5917_v44  ;;  %v5947_v9 = vsel %vm249_vm1, %v5917_v44, 0 }
 0x21d   : > { %v2775_v7 = vpop.f32.mrb[95].mxu0  ;;  %6800 = vmatprep.subr.bf16.mxu1 %v6888_v29 }
 0x21e   : > { %v2811_v48 = vpop.f32.mrb[92].mxu1 }
 0x21f   : > { %v2823_v61 = vadd.f32 %v2811_v48, %v2603_v54  ;;  %6571 = vmatmul.mubr.msk.bf16.vlgmr.msra.gmra.mrb[200].mxu0 %vm245_vm2, %v6569_v55  ;;  %v6720_v33 = vpop.f32.mrb[93].mxu1 }
 0x220   : > { %5815 = vmatpush1.bf16.msra.mxu0 %v5724_v8  ;;  %v2814_v59 = vpop.f32.mrb[94].mxu1  ;;  %5846 = vmatprep.mubr.bf16.mxu0 %v6878_v0 }
 0x221   : > { %v6721_v27 = vpop.f32.mrb[95].mxu1  ;;  %6578 = vmatprep.subr.msk.bf16.mxu0 %vm249_vm1, %v5920_v11 }
 0x222   : > { %v2908_v21 = vpop.f32.mrb[96].mxu0 }
 0x223   : > { %v3037_v35 = vadd.f32 %v2908_v21, %v2817_v45  ;;  %v2910_v22 = vpop.f32.mrb[97].mxu0  ;;  %6573 = vmatmul.mubr.msk.bf16.vlgmr.msra.gmra.mrb[200].mxu1 %vm245_vm2, %v6569_v55  ;;  %v5941_v45 = vsel %vm249_vm1, %v5923_v50, 0 }
 0x224   : > { %v3038_v37 = vadd.f32 %v2910_v22, %v2818_v34  ;;  %6801 = vmatpush3.bf16.msra.mxu1 %v5730_v23  ;;  %v2912_v38 = vpop.f32.mrb[98].mxu0  ;;  %6802 = vmatprep.mubr.msk.bf16.mxu1 %vm6889_vm3, %v6888_v29 }
 0x225   : > { %v2913_v26 = vpop.f32.mrb[99].mxu0  ;;  %6580 = vmatprep.subr.msk.bf16.mxu1 %vm249_vm1, %v5922_v28 }
 0x226   : > { %v2949_v39 = vpop.f32.mrb[96].mxu1 }
 0x227   : > { %v3039_v10 = vadd.f32 %v2949_v39, %v2819_v43  ;;  %v2951_v1 = vpop.f32.mrb[97].mxu1  ;;  %6575 = vmatmul.mubr.msk.bf16.vlgmr.msra.gmra.mrb[204].mxu0 %vm245_vm2, %v6569_v55 }
 0x228   : > { %v3040_v30 = vadd.f32 %v2951_v1, %v2820_v47  ;;  %5950 = vmatpush1.bf16.msra.mxu0 %v5929_v20  ;;  %v2953_v54 = vpop.f32.mrb[98].mxu1  ;;  %5981 = vmatprep.mubr.bf16.mxu0 %v6878_v0 }
 0x229   : > { %v2954_v6 = vpop.f32.mrb[99].mxu1  ;;  %6582 = vmatprep.subr.msk.bf16.mxu0 %vm249_vm1, %v5924_v42  ;;  %vm6181_vm1 = vcmask 261120  }
 0x22a   : > { %v2990_v46 = vpop.f32.mrb[100].mxu0 }
 0x22b   : > { %v3041_v2 = vadd.f32 %v2990_v46, %v2821_v51  ;;  %v2992_v36 = vpop.f32.mrb[101].mxu0  ;;  %6803 = vmatmul.mubr.msk.bf16.vlgmr.msra.gmra.mrb[204].mxu1 %vm245_vm2, %v6569_v55 }
 0x22c   : > { %v3042_v16 = vadd.f32 %v2992_v36, %v2822_v12  ;;  %5991 = vmatpush1.bf16.msra.mxu1 %v5935_v15  ;;  %v2994_v41 = vpop.f32.mrb[102].mxu0  ;;  %6022 = vmatprep.mubr.bf16.mxu1 %v6878_v0 }
 0x22d   : > { %v2995_v31 = vpop.f32.mrb[103].mxu0  ;;  %6806 = vmatprep.subr.bf16.mxu1 %v6888_v29 }
 0x22e   : > { %v3031_v34 = vpop.f32.mrb[100].mxu1 }
 0x22f   : > { %v3043_v57 = vadd.f32 %v3031_v34, %v2823_v61  ;;  %6579 = vmatmul.mubr.msk.bf16.vlgmr.msra.gmra.mrb[208].mxu0 %vm245_vm2, %v6577_v13  ;;  %v6726_v58 = vpop.f32.mrb[101].mxu1 }
 0x230   : > { %6032 = vmatpush1.bf16.msra.mxu0 %v5941_v45  ;;  %v3034_v40 = vpop.f32.mrb[102].mxu1  ;;  %6063 = vmatprep.mubr.bf16.mxu0 %v6878_v0 }
 0x231   : > { %v6727_v5 = vpop.f32.mrb[103].mxu1 }
 0x232   : > { %v3128_v60 = vpop.f32.mrb[104].mxu0 }
 0x233   : > { %v3257_v62 = vadd.f32 %v3128_v60, %v3037_v35  ;;  %v3130_v43 = vpop.f32.mrb[105].mxu0  ;;  %6581 = vmatmul.mubr.msk.bf16.vlgmr.msra.gmra.mrb[208].mxu1 %vm245_vm2, %v6577_v13 }
 0x234   : > { %v3258_v63 = vadd.f32 %v3130_v43, %v3038_v37  ;;  %6807 = vmatpush3.bf16.msra.mxu1 %v5947_v9  ;;  %v3132_v52 = vpop.f32.mrb[106].mxu0  ;;  %6808 = vmatprep.mubr.msk.bf16.mxu1 %vm6889_vm3, %v6888_v29 }
 0x235   : > { %v3133_v47 = vpop.f32.mrb[107].mxu0 }
 0x236   : > { %v3169_v56 = vpop.f32.mrb[104].mxu1 }
 0x237   : > { %v3259_v17 = vadd.f32 %v3169_v56, %v3039_v10  ;;  %v3171_v3 = vpop.f32.mrb[105].mxu1  ;;  %6583 = vmatmul.mubr.msk.bf16.vlgmr.msra.gmra.mrb[212].mxu0 %vm245_vm2, %v6577_v13 }
 0x238   : > { %v3260_v0 = vadd.f32 %v3171_v3, %v3040_v30  ;;  %v3173_v18 = vpop.f32.mrb[106].mxu1 }
 0x239   : > { %v3174_v19 = vpop.f32.mrb[107].mxu1 }
 0x23a   : > { %v3210_v51 = vpop.f32.mrb[108].mxu0 }
 0x23b   : > { %v3261_v49 = vadd.f32 %v3210_v51, %v3041_v2  ;;  %v3212_v12 = vpop.f32.mrb[109].mxu0  ;;  %6809 = vmatmul.mubr.msk.bf16.vlgmr.msra.gmra.mrb[212].mxu1 %vm245_vm2, %v6577_v13 }
 0x23c   : > { %v3262_v14 = vadd.f32 %v3212_v12, %v3042_v16  ;;  %v3214_v55 = vpop.f32.mrb[110].mxu0 }
 0x23d   : > { %v3215_v25 = vpop.f32.mrb[111].mxu0 }
 0x23e   : > { %v3251_v8 = vpop.f32.mrb[108].mxu1 }
 0x23f   : > { %v3263_v7 = vadd.f32 %v3251_v8, %v3043_v57  ;;  %v6732_v29 = vpop.f32.mrb[109].mxu1 }
 0x240   : > { %v3254_v4 = vpop.f32.mrb[110].mxu1 }
 0x241   : > { %v6733_v48 = vpop.f32.mrb[111].mxu1 }
 0x242   : > { %v3348_v11 = vpop.f32.mrb[112].mxu0 }
 0x243   : > { %v3477_v61 = vadd.f32 %v3348_v11, %v3257_v62  ;;  %v3350_v33 = vpop.f32.mrb[113].mxu0 }
 0x244   : > { %v3478_v59 = vadd.f32 %v3350_v33, %v3258_v63  ;;  %v3352_v23 = vpop.f32.mrb[114].mxu0 }
 0x245   : > { %v3353_v27 = vpop.f32.mrb[115].mxu0 }
 0x246   : > { %v3389_v21 = vpop.f32.mrb[112].mxu1 }
 0x247   : > { %v3479_v24 = vadd.f32 %v3389_v21, %v3259_v17  ;;  %v3391_v28 = vpop.f32.mrb[113].mxu1 }
 0x248   : > { %v3480_v32 = vadd.f32 %v3391_v28, %v3260_v0  ;;  %v3393_v35 = vpop.f32.mrb[114].mxu1 }
 0x249   : > { %v3394_v22 = vpop.f32.mrb[115].mxu1 }
 0x24a   : > { %v3430_v44 = vpop.f32.mrb[116].mxu0 }
 0x24b   : > { %v3481_v37 = vadd.f32 %v3430_v44, %v3261_v49  ;;  %v3432_v38 = vpop.f32.mrb[117].mxu0 }
 0x24c   : > { %v3482_v20 = vadd.f32 %v3432_v38, %v3262_v14  ;;  %v3434_v26 = vpop.f32.mrb[118].mxu0 }
 0x24d   : > { %v3435_v39 = vpop.f32.mrb[119].mxu0 }
 0x24e   : > { %v3471_v53 = vpop.f32.mrb[116].mxu1 }
 0x24f   : > { %v3483_v42 = vadd.f32 %v3471_v53, %v3263_v7  ;;  %v6738_v10 = vpop.f32.mrb[117].mxu1 }
 0x250   : > { %v3474_v1 = vpop.f32.mrb[118].mxu1 }
 0x251   : > { %v6739_v30 = vpop.f32.mrb[119].mxu1 }
 0x252   : > { %v3568_v54 = vpop.f32.mrb[120].mxu0 }
 0x253   : > { %v3697_v15 = vadd.f32 %v3568_v54, %v3477_v61  ;;  %v3570_v6 = vpop.f32.mrb[121].mxu0 }
 0x254   : > { %v3698_v46 = vadd.f32 %v3570_v6, %v3478_v59  ;;  %v3572_v50 = vpop.f32.mrb[122].mxu0 }
 0x255   : > { %v3573_v2 = vpop.f32.mrb[123].mxu0 }
 0x256   : > { %v3609_v36 = vpop.f32.mrb[120].mxu1 }
 0x257   : > { %v3699_v16 = vadd.f32 %v3609_v36, %v3479_v24  ;;  %v3611_v41 = vpop.f32.mrb[121].mxu1 }
 0x258   : > { %v3700_v13 = vadd.f32 %v3611_v41, %v3480_v32  ;;  %v3613_v45 = vpop.f32.mrb[122].mxu1 }
 0x259   : > { %v3614_v31 = vpop.f32.mrb[123].mxu1 }
 0x25a   : > { %v3650_v34 = vpop.f32.mrb[124].mxu0 }
 0x25b   : > { %v3701_v57 = vadd.f32 %v3650_v34, %v3481_v37  ;;  %v3652_v58 = vpop.f32.mrb[125].mxu0 }
 0x25c   : > { %v3702_v40 = vadd.f32 %v3652_v58, %v3482_v20  ;;  %v3654_v9 = vpop.f32.mrb[126].mxu0 }
 0x25d   : > { %v3655_v5 = vpop.f32.mrb[127].mxu0 }
 0x25e   : > { %v3691_v60 = vpop.f32.mrb[124].mxu1 }
 0x25f   : > { %v3703_v62 = vadd.f32 %v3691_v60, %v3483_v42  ;;  %v6744_v43 = vpop.f32.mrb[125].mxu1 }
 0x260   : > { %v3694_v63 = vpop.f32.mrb[126].mxu1 }
 0x261   : > { %v6745_v52 = vpop.f32.mrb[127].mxu1 }
 0x262   : > { %v3788_v47 = vpop.f32.mrb[128].mxu0 }
 0x263   : > { %v3917_v56 = vadd.f32 %v3788_v47, %v3697_v15  ;;  %v3790_v17 = vpop.f32.mrb[129].mxu0 }
 0x264   : > { %v3918_v3 = vadd.f32 %v3790_v17, %v3698_v46  ;;  %v3792_v0 = vpop.f32.mrb[130].mxu0 }
 0x265   : > { %v3793_v18 = vpop.f32.mrb[131].mxu0 }
 0x266   : > { %v3829_v19 = vpop.f32.mrb[128].mxu1 }
 0x267   : > { %v3919_v51 = vadd.f32 %v3829_v19, %v3699_v16  ;;  %v3831_v49 = vpop.f32.mrb[129].mxu1 }
 0x268   : > { %v3920_v12 = vadd.f32 %v3831_v49, %v3700_v13  ;;  %v3833_v14 = vpop.f32.mrb[130].mxu1 }
 0x269   : > { %v3834_v55 = vpop.f32.mrb[131].mxu1 }
 0x26a   : > { %v3870_v25 = vpop.f32.mrb[132].mxu0 }
 0x26b   : > { %v3921_v8 = vadd.f32 %v3870_v25, %v3701_v57  ;;  %v3872_v7 = vpop.f32.mrb[133].mxu0 }
 0x26c   : > { %v3922_v29 = vadd.f32 %v3872_v7, %v3702_v40  ;;  %v3874_v4 = vpop.f32.mrb[134].mxu0 }
 0x26d   : > { %v3875_v48 = vpop.f32.mrb[135].mxu0 }
 0x26e   : > { %v3911_v11 = vpop.f32.mrb[132].mxu1 }
 0x26f   : > { %v3923_v61 = vadd.f32 %v3911_v11, %v3703_v62  ;;  %v6750_v33 = vpop.f32.mrb[133].mxu1 }
 0x270   : > { %v3914_v59 = vpop.f32.mrb[134].mxu1 }
 0x271   : > { %v6751_v23 = vpop.f32.mrb[135].mxu1 }
 0x272   : > { %v4008_v27 = vpop.f32.mrb[136].mxu0 }
 0x273   : > { %v4137_v21 = vadd.f32 %v4008_v27, %v3917_v56  ;;  %v4010_v24 = vpop.f32.mrb[137].mxu0 }
 0x274   : > { %v4138_v28 = vadd.f32 %v4010_v24, %v3918_v3  ;;  %v4012_v32 = vpop.f32.mrb[138].mxu0 }
 0x275   : > { %v4013_v35 = vpop.f32.mrb[139].mxu0 }
 0x276   : > { %v4049_v22 = vpop.f32.mrb[136].mxu1 }
 0x277   : > { %v4139_v44 = vadd.f32 %v4049_v22, %v3919_v51  ;;  %v4051_v37 = vpop.f32.mrb[137].mxu1 }
 0x278   : > { %v4140_v38 = vadd.f32 %v4051_v37, %v3920_v12  ;;  %v4053_v20 = vpop.f32.mrb[138].mxu1 }
 0x279   : > { %v4054_v26 = vpop.f32.mrb[139].mxu1 }
 0x27a   : > { %v4090_v39 = vpop.f32.mrb[140].mxu0 }
 0x27b   : > { %v4141_v53 = vadd.f32 %v4090_v39, %v3921_v8  ;;  %v4092_v42 = vpop.f32.mrb[141].mxu0 }
 0x27c   : > { %v4142_v10 = vadd.f32 %v4092_v42, %v3922_v29  ;;  %v4094_v1 = vpop.f32.mrb[142].mxu0 }
 0x27d   : > { %v4095_v30 = vpop.f32.mrb[143].mxu0 }
 0x27e   : > { %v4131_v54 = vpop.f32.mrb[140].mxu1 }
 0x27f   : > { %v4143_v15 = vadd.f32 %v4131_v54, %v3923_v61  ;;  %v6756_v6 = vpop.f32.mrb[141].mxu1 }
 0x280   : > { %v4134_v46 = vpop.f32.mrb[142].mxu1 }
 0x281   : > { %v6757_v50 = vpop.f32.mrb[143].mxu1 }
 0x282   : > { %v4247_v2 = vpop.f32.mrb[144].mxu0 }
 0x283   : > { %v4376_v36 = vadd.f32 %v4247_v2, %v4137_v21  ;;  %v4249_v16 = vpop.f32.mrb[145].mxu0 }
 0x284   : > { %v4377_v41 = vadd.f32 %v4249_v16, %v4138_v28  ;;  %v4251_v13 = vpop.f32.mrb[146].mxu0 }
 0x285   : > { %v4252_v45 = vpop.f32.mrb[147].mxu0 }
 0x286   : > { %v4288_v31 = vpop.f32.mrb[144].mxu1 }
 0x287   : > { %v4378_v34 = vadd.f32 %v4288_v31, %v4139_v44  ;;  %v4290_v57 = vpop.f32.mrb[145].mxu1 }
 0x288   : > { %v4379_v58 = vadd.f32 %v4290_v57, %v4140_v38  ;;  %v4292_v40 = vpop.f32.mrb[146].mxu1 }
 0x289   : > { %v4293_v9 = vpop.f32.mrb[147].mxu1 }
 0x28a   : > { %v4329_v5 = vpop.f32.mrb[148].mxu0 }
 0x28b   : > { %v4380_v60 = vadd.f32 %v4329_v5, %v4141_v53  ;;  %v4331_v62 = vpop.f32.mrb[149].mxu0 }
 0x28c   : > { %v4381_v43 = vadd.f32 %v4331_v62, %v4142_v10  ;;  %v4333_v63 = vpop.f32.mrb[150].mxu0 }
 0x28d   : > { %v4334_v52 = vpop.f32.mrb[151].mxu0 }
 0x28e   : > { %v4370_v47 = vpop.f32.mrb[148].mxu1 }
 0x28f   : > { %v4382_v56 = vadd.f32 %v4370_v47, %v4143_v15  ;;  %v6762_v17 = vpop.f32.mrb[149].mxu1 }
 0x290   : > { %v4373_v3 = vpop.f32.mrb[150].mxu1 }
 0x291   : > { %v6763_v0 = vpop.f32.mrb[151].mxu1 }
 0x292   : > { %v4464_v18 = vpop.f32.mrb[152].mxu0 }
 0x293   : > { %v4593_v19 = vadd.f32 %v4464_v18, %v4376_v36  ;;  %v4466_v51 = vpop.f32.mrb[153].mxu0 }
 0x294   : > { %v4594_v49 = vadd.f32 %v4466_v51, %v4377_v41  ;;  %v4468_v12 = vpop.f32.mrb[154].mxu0 }
 0x295   : > { %v4469_v14 = vpop.f32.mrb[155].mxu0 }
 0x296   : > { %v4505_v55 = vpop.f32.mrb[152].mxu1 }
 0x297   : > { %v4595_v25 = vadd.f32 %v4505_v55, %v4378_v34  ;;  %v4507_v8 = vpop.f32.mrb[153].mxu1 }
 0x298   : > { %v4596_v7 = vadd.f32 %v4507_v8, %v4379_v58  ;;  %v4509_v29 = vpop.f32.mrb[154].mxu1 }
 0x299   : > { %v4510_v4 = vpop.f32.mrb[155].mxu1 }
 0x29a   : > { %v4546_v48 = vpop.f32.mrb[156].mxu0 }
 0x29b   : > { %v4597_v11 = vadd.f32 %v4546_v48, %v4380_v60  ;;  %v4548_v61 = vpop.f32.mrb[157].mxu0 }
 0x29c   : > { %v4598_v33 = vadd.f32 %v4548_v61, %v4381_v43  ;;  %v4550_v59 = vpop.f32.mrb[158].mxu0 }
 0x29d   : > { %v4551_v23 = vpop.f32.mrb[159].mxu0 }
 0x29e   : > { %v4587_v27 = vpop.f32.mrb[156].mxu1 }
 0x29f   : > { %v4599_v21 = vadd.f32 %v4587_v27, %v4382_v56  ;;  %v6768_v24 = vpop.f32.mrb[157].mxu1 }
 0x2a0   : > { %v4590_v28 = vpop.f32.mrb[158].mxu1 }
 0x2a1   : > { %v6769_v32 = vpop.f32.mrb[159].mxu1 }
 0x2a2   : > { %v4681_v35 = vpop.f32.mrb[160].mxu0 }
 0x2a3   : > { %v4810_v22 = vadd.f32 %v4681_v35, %v4593_v19  ;;  %v4683_v44 = vpop.f32.mrb[161].mxu0 }
 0x2a4   : > { %v4811_v37 = vadd.f32 %v4683_v44, %v4594_v49  ;;  %v4685_v38 = vpop.f32.mrb[162].mxu0 }
 0x2a5   : > { %v4686_v20 = vpop.f32.mrb[163].mxu0 }
 0x2a6   : > { %v4722_v26 = vpop.f32.mrb[160].mxu1 }
 0x2a7   : > { %v4812_v39 = vadd.f32 %v4722_v26, %v4595_v25  ;;  %v4724_v53 = vpop.f32.mrb[161].mxu1 }
 0x2a8   : > { %v4813_v42 = vadd.f32 %v4724_v53, %v4596_v7  ;;  %v4726_v10 = vpop.f32.mrb[162].mxu1 }
 0x2a9   : > { %v4727_v1 = vpop.f32.mrb[163].mxu1 }
 0x2aa   : > { %v4763_v30 = vpop.f32.mrb[164].mxu0 }
 0x2ab   : > { %v4814_v54 = vadd.f32 %v4763_v30, %v4597_v11  ;;  %v4765_v15 = vpop.f32.mrb[165].mxu0 }
 0x2ac   : > { %v4815_v6 = vadd.f32 %v4765_v15, %v4598_v33  ;;  %v4767_v46 = vpop.f32.mrb[166].mxu0 }
 0x2ad   : > { %v4768_v50 = vpop.f32.mrb[167].mxu0 }
 0x2ae   : > { %v4804_v2 = vpop.f32.mrb[164].mxu1 }
 0x2af   : > { %v4816_v36 = vadd.f32 %v4804_v2, %v4599_v21  ;;  %v6774_v16 = vpop.f32.mrb[165].mxu1 }
 0x2b0   : > { %v4807_v41 = vpop.f32.mrb[166].mxu1 }
 0x2b1   : > { %v6775_v13 = vpop.f32.mrb[167].mxu1 }
 0x2b2   : > { %v4898_v45 = vpop.f32.mrb[168].mxu0 }
 0x2b3   : > { %v5027_v31 = vadd.f32 %v4898_v45, %v4810_v22  ;;  %v4900_v34 = vpop.f32.mrb[169].mxu0 }
 0x2b4   : > { %v5028_v57 = vadd.f32 %v4900_v34, %v4811_v37  ;;  %v4902_v58 = vpop.f32.mrb[170].mxu0 }
 0x2b5   : > { %v4903_v40 = vpop.f32.mrb[171].mxu0 }
 0x2b6   : > { %v4939_v9 = vpop.f32.mrb[168].mxu1 }
 0x2b7   : > { %v5029_v5 = vadd.f32 %v4939_v9, %v4812_v39  ;;  %v4941_v60 = vpop.f32.mrb[169].mxu1 }
 0x2b8   : > { %v5030_v62 = vadd.f32 %v4941_v60, %v4813_v42  ;;  %v4943_v43 = vpop.f32.mrb[170].mxu1 }
 0x2b9   : > { %v4944_v63 = vpop.f32.mrb[171].mxu1 }
 0x2ba   : > { %v4980_v52 = vpop.f32.mrb[172].mxu0 }
 0x2bb   : > { %v5031_v47 = vadd.f32 %v4980_v52, %v4814_v54  ;;  %v4982_v56 = vpop.f32.mrb[173].mxu0 }
 0x2bc   : > { %v5032_v17 = vadd.f32 %v4982_v56, %v4815_v6  ;;  %v4984_v3 = vpop.f32.mrb[174].mxu0 }
 0x2bd   : > { %v4985_v0 = vpop.f32.mrb[175].mxu0 }
 0x2be   : > { %v5021_v18 = vpop.f32.mrb[172].mxu1 }
 0x2bf   : > { %v5033_v19 = vadd.f32 %v5021_v18, %v4816_v36  ;;  %v6780_v51 = vpop.f32.mrb[173].mxu1 }
 0x2c0   : > { %v5024_v49 = vpop.f32.mrb[174].mxu1 }
 0x2c1   : > { %v6781_v12 = vpop.f32.mrb[175].mxu1 }
 0x2c2   : > { %v5115_v14 = vpop.f32.mrb[176].mxu0 }
 0x2c3   : > { %v5244_v55 = vadd.f32 %v5115_v14, %v5027_v31  ;;  %v5117_v25 = vpop.f32.mrb[177].mxu0 }
 0x2c4   : > { %v5245_v8 = vadd.f32 %v5117_v25, %v5028_v57  ;;  %v5119_v7 = vpop.f32.mrb[178].mxu0 }
 0x2c5   : > { %v5120_v29 = vpop.f32.mrb[179].mxu0 }
 0x2c6   : > { %v5156_v4 = vpop.f32.mrb[176].mxu1 }
 0x2c7   : > { %v5246_v48 = vadd.f32 %v5156_v4, %v5029_v5  ;;  %v5158_v11 = vpop.f32.mrb[177].mxu1 }
 0x2c8   : > { %v5247_v61 = vadd.f32 %v5158_v11, %v5030_v62  ;;  %v5160_v33 = vpop.f32.mrb[178].mxu1 }
 0x2c9   : > { %v5161_v59 = vpop.f32.mrb[179].mxu1 }
 0x2ca   : > { %v5197_v23 = vpop.f32.mrb[180].mxu0 }
 0x2cb   : > { %v5248_v27 = vadd.f32 %v5197_v23, %v5031_v47  ;;  %v5199_v21 = vpop.f32.mrb[181].mxu0 }
 0x2cc   : > { %v5249_v24 = vadd.f32 %v5199_v21, %v5032_v17  ;;  %v5201_v28 = vpop.f32.mrb[182].mxu0  ;;  %v6134_v21 = vlaneseq }
 0x2cd   : > { %v5202_v32 = vpop.f32.mrb[183].mxu0 }
 0x2ce   : > { %v5238_v35 = vpop.f32.mrb[180].mxu1 }
 0x2cf   : > { %v5250_v22 = vadd.f32 %v5238_v35, %v5033_v19  ;;  %v6786_v44 = vpop.f32.mrb[181].mxu1 }
 0x2d0   : > { %v5241_v37 = vpop.f32.mrb[182].mxu1 }
 0x2d1   : > { %v6787_v38 = vpop.f32.mrb[183].mxu1  ;;  %v8640_v37 = vshrl.u32 %v6134_v21, 7 }
 0x2d2   : > { %v5332_v20 = vpop.f32.mrb[184].mxu0 }
 0x2d3   : > { %v5461_v26 = vadd.f32 %v5332_v20, %v5244_v55  ;;  %v5334_v39 = vpop.f32.mrb[185].mxu0 }
 0x2d4   : > { %v5462_v53 = vadd.f32 %v5334_v39, %v5245_v8  ;;  %v5336_v42 = vpop.f32.mrb[186].mxu0 }
 0x2d5   : > { %v5337_v10 = vpop.f32.mrb[187].mxu0 }
 0x2d6   : > { %v5373_v1 = vpop.f32.mrb[184].mxu1  ;;  %v6136_v10 = vsub.s32 0, %v8640_v37 }
 0x2d7   : > { %v5463_v30 = vadd.f32 %v5373_v1, %v5246_v48  ;;  %v5375_v54 = vpop.f32.mrb[185].mxu1 }
 0x2d8   : > { %v5464_v15 = vadd.f32 %v5375_v54, %v5247_v61  ;;  %v5377_v6 = vpop.f32.mrb[186].mxu1  ;;  %v6140_v54 = vsub.s32 1, %v8640_v37 }
 0x2d9   : > { %v5378_v46 = vpop.f32.mrb[187].mxu1 }
 0x2da   : > { %v5414_v50 = vpop.f32.mrb[188].mxu0  ;;  %v8651_v46 = vpop.permute.xlu1 %6122 }
 0x2db   : > { %v5465_v2 = vadd.f32 %v5414_v50, %v5248_v27  ;;  %v5416_v36 = vpop.f32.mrb[189].mxu0 }
 0x2dc   : > { %v5466_v16 = vadd.f32 %v5416_v36, %v5249_v24  ;;  %v5418_v41 = vpop.f32.mrb[190].mxu0 }
 0x2dd   : > { %v5419_v13 = vpop.f32.mrb[191].mxu0 }
 0x2de   : > { %v5455_v45 = vpop.f32.mrb[188].mxu1 }
 0x2df   : > { %v5467_v31 = vadd.f32 %v5455_v45, %v5250_v22  ;;  %v6792_v34 = vpop.f32.mrb[189].mxu1 }
 0x2e0   : > { %v5458_v57 = vpop.f32.mrb[190].mxu1 }
 0x2e1   : > { %v6793_v58 = vpop.f32.mrb[191].mxu1 }
 0x2e2   : > { %v5549_v40 = vpop.f32.mrb[192].mxu0  ;;  %v6152_v58 = vsub.s32 4, %v8640_v37 }
 0x2e3   : > { %v5678_v9 = vadd.f32 %v5549_v40, %v5461_v26  ;;  %v5551_v5 = vpop.f32.mrb[193].mxu0 }
 0x2e4   : > { %v5679_v60 = vadd.f32 %v5551_v5, %v5462_v53  ;;  %v5553_v62 = vpop.f32.mrb[194].mxu0  ;;  %v6156_v5 = vsub.s32 5, %v8640_v37 }
 0x2e5   : > { %v5554_v43 = vpop.f32.mrb[195].mxu0 }
 0x2e6   : > { %v5590_v63 = vpop.f32.mrb[192].mxu1 }
 0x2e7   : > { %v5680_v52 = vadd.f32 %v5590_v63, %v5463_v30  ;;  %v5592_v47 = vpop.f32.mrb[193].mxu1  ;;  %v8648_v30 = vld [vmem:[%s8713_s3] sm:$0x7f] }
 0x2e8   : > { %v5681_v56 = vadd.f32 %v5592_v47, %v5464_v15  ;;  %v5594_v17 = vpop.f32.mrb[194].mxu1  ;;  %v6137_v36 = vrot.slane %v8648_v30, %v6136_v10  ;;  %v6141_v45 = vrot.slane %v8648_v30, %v6140_v54 }
 0x2e9   : > { %v5595_v3 = vpop.f32.mrb[195].mxu1 }
 0x2ea   : > { %v5631_v0 = vpop.f32.mrb[196].mxu0 }
 0x2eb   : > { %v5682_v18 = vadd.f32 %v5631_v0, %v5465_v2  ;;  %v5633_v19 = vpop.f32.mrb[197].mxu0 }
 0x2ec   : > { %v5683_v51 = vadd.f32 %v5633_v19, %v5466_v16  ;;  %v5635_v49 = vpop.f32.mrb[198].mxu0  ;;  %v6144_v16 = vsub.s32 2, %v8640_v37 }
 0x2ed   : > { %v5636_v12 = vpop.f32.mrb[199].mxu0  ;;  %v6153_v49 = vrot.slane %v8648_v30, %v6152_v58 }
 0x2ee   : > { %v5672_v14 = vpop.f32.mrb[196].mxu1  ;;  %v6145_v62 = vrot.slane %v8648_v30, %v6144_v16 }
 0x2ef   : > { %v5684_v55 = vadd.f32 %v5672_v14, %v5467_v31  ;;  %v6798_v25 = vpop.f32.mrb[197].mxu1  ;;  %v6148_v31 = vsub.s32 3, %v8640_v37 }
 0x2f0   : > { %v5675_v8 = vpop.f32.mrb[198].mxu1 }
 0x2f1   : > { %v6799_v7 = vpop.f32.mrb[199].mxu1  ;;  %v6149_v3 = vrot.slane %v8648_v30, %v6148_v31  ;;  %v6157_v8 = vrot.slane %v8648_v30, %v6156_v5 }
 0x2f2   : > { %v5766_v29 = vpop.f32.mrb[200].mxu0 }
 0x2f3   : > { %v5895_v4 = vadd.f32 %v5766_v29, %v5678_v9  ;;  %v5768_v48 = vpop.f32.mrb[201].mxu0 }
 0x2f4   : > { %v5896_v11 = vadd.f32 %v5768_v48, %v5679_v60  ;;  %v5770_v61 = vpop.f32.mrb[202].mxu0 }
 0x2f5   : > { %v5771_v33 = vpop.f32.mrb[203].mxu0 }
 0x2f6   : > { %v5807_v59 = vpop.f32.mrb[200].mxu1 }
 0x2f7   : > { %v5897_v23 = vadd.f32 %v5807_v59, %v5680_v52  ;;  %v5809_v27 = vpop.f32.mrb[201].mxu1 }
 0x2f8   : > { %v5898_v24 = vadd.f32 %v5809_v27, %v5681_v56  ;;  %v5811_v28 = vpop.f32.mrb[202].mxu1 }
 0x2f9   : > { %v5812_v32 = vpop.f32.mrb[203].mxu1 }
 0x2fa   : > { %v5848_v35 = vpop.f32.mrb[204].mxu0 }
 0x2fb   : > { %v5899_v22 = vadd.f32 %v5848_v35, %v5682_v18  ;;  %v5850_v44 = vpop.f32.mrb[205].mxu0 }
 0x2fc   : > { %v5900_v38 = vadd.f32 %v5850_v44, %v5683_v51  ;;  %v5852_v20 = vpop.f32.mrb[206].mxu0 }
 0x2fd   : > { %v5853_v26 = vpop.f32.mrb[207].mxu0 }
 0x2fe   : > { %v5889_v39 = vpop.f32.mrb[204].mxu1 }
 0x2ff   : > { %v8642_v53 = vadd.f32 %v5889_v39, %v5684_v55  ;;  %v6804_v42 = vpop.f32.mrb[205].mxu1 }
 0x300   : > { %v5892_v1 = vpop.f32.mrb[206].mxu1 }
 0x301   : > { %v6805_v15 = vpop.f32.mrb[207].mxu1 }
 0x302   : > { %v5983_v6 = vpop.f32.mrb[208].mxu0 }
 0x303   : > { %v6112_v50 = vadd.f32 %v5983_v6, %v5895_v4  ;;  %v5985_v2 = vpop.f32.mrb[209].mxu0 }
 0x304   : > { %v6113_v41 = vadd.f32 %v5985_v2, %v5896_v11  ;;  %v5987_v13 = vpop.f32.mrb[210].mxu0  ;;  %v6160_v11 = vsub.s32 6, %v8640_v37 }
 0x305   : > { %v8658_v34 = vadd.f32 %v8651_v46, %v6112_v50  ;;  %v5988_v57 = vpop.f32.mrb[211].mxu0 }
 0x306   : > { %v8662_v40 = vadd.f32 %v8651_v46, %v6113_v41  ;;  %v6024_v9 = vpop.f32.mrb[208].mxu1  ;;  %v6161_v15 = vrot.slane %v8648_v30, %v6160_v11 }
 0x307   : > { %v6114_v60 = vadd.f32 %v6024_v9, %v5897_v23  ;;  %v6169_v43 = vmul.f32 %v6137_v36, %v8658_v34  ;;  %v6187_v63 = vmul.f32 %v8658_v34, %v8658_v34  ;;  %v6026_v52 = vpop.f32.mrb[209].mxu1 }
 0x308   : > { %v6170_v47 = vmul.f32 %v6141_v45, %v8662_v40  ;;  %v6188_v56 = vmul.f32 %v8662_v40, %v8662_v40  ;;  %v6115_v17 = vadd.f32 %v6026_v52, %v5898_v24  ;;  %v6028_v0 = vpop.f32.mrb[210].mxu1 }
 0x309   : > { %v8674_v18 = vadd.f32 %v8651_v46, %v6114_v60  ;;  %v6194_v19 = vmul.f32 %v6187_v63, %v6137_v36  ;;  %v6029_v51 = vpop.f32.mrb[211].mxu1 }
 0x30a   : > { %v6176_v12 = vadd.f32 %v6170_v47, %v6169_v43  ;;  %v6195_v14 = vmul.f32 %v6188_v56, %v6141_v45  ;;  %v8678_v55 = vadd.f32 %v8651_v46, %v6115_v17  ;;  %v6065_v25 = vpop.f32.mrb[212].mxu0 }
 0x30b   : > { %v6171_v7 = vmul.f32 %v6145_v62, %v8674_v18  ;;  %v6189_v29 = vmul.f32 %v8674_v18, %v8674_v18  ;;  %v6116_v4 = vadd.f32 %v6065_v25, %v5899_v22  ;;  %v6067_v48 = vpop.f32.mrb[213].mxu0 }
 0x30c   : > { %v6201_v61 = vadd.f32 %v6195_v14, %v6194_v19  ;;  %v6172_v33 = vmul.f32 %v6149_v3, %v8678_v55  ;;  %v6190_v59 = vmul.f32 %v8678_v55, %v8678_v55  ;;  %v6117_v23 = vadd.f32 %v6067_v48, %v5900_v38  ;;  %v6069_v27 = vpop.f32.mrb[214].mxu0 }
 0x30d   : > { %v6177_v21 = vadd.f32 %v6176_v12, %v6171_v7  ;;  %v6196_v24 = vmul.f32 %v6189_v29, %v6145_v62  ;;  %v6129_v28 = vadd.f32 %v8651_v46, %v6116_v4  ;;  %v6070_v32 = vpop.f32.mrb[215].mxu0 }
 0x30e   : > { %v6197_v35 = vmul.f32 %v6190_v59, %v6149_v3  ;;  %v6130_v44 = vadd.f32 %v8651_v46, %v6117_v23  ;;  %v6106_v22 = vpop.f32.mrb[212].mxu1 }
 0x30f   : > { %v6202_v20 = vadd.f32 %v6201_v61, %v6196_v24  ;;  %v6178_v26 = vadd.f32 %v6177_v21, %v6172_v33  ;;  %v6173_v37 = vmul.f32 %v6153_v49, %v6129_v28  ;;  %v6191_v39 = vmul.f32 %v6129_v28, %v6129_v28  ;;  %v6810_v42 = vpop.f32.mrb[213].mxu1 }
 0x310   : > { %v6174_v10 = vmul.f32 %v6157_v8, %v6130_v44  ;;  %v6192_v1 = vmul.f32 %v6130_v44, %v6130_v44  ;;  %v6118_v54 = vadd.f32 %v6106_v22, %v8642_v53  ;;  %v6109_v38 = vpop.f32.mrb[214].mxu1 }
 0x311   : > { %v6198_v6 = vmul.f32 %v6191_v39, %v6153_v49  ;;  %v6811_v50 = vpop.f32.mrb[215].mxu1  ;;  %v6179_v2 = vadd.f32 %v6178_v26, %v6173_v37  ;;  %v6203_v36 = vadd.f32 %v6202_v20, %v6197_v35 }
 0x312   : > { %v6131_v16 = vadd.f32 %v8651_v46, %v6118_v54  ;;  %v6199_v41 = vmul.f32 %v6192_v1, %v6157_v8 }
 0x313   : > { %v6180_v13 = vadd.f32 %v6179_v2, %v6174_v10  ;;  %v6204_v45 = vadd.f32 %v6203_v36, %v6198_v6 }
 0x314   : > { %v6193_v31 = vmul.f32 %v6131_v16, %v6131_v16  ;;  %v6175_v57 = vmul.f32 %v6161_v15, %v6131_v16 }
 0x315   : > { %v6205_v58 = vadd.f32 %v6204_v45, %v6199_v41 }
 0x316   : > { %v6182_v9 = vsel %vm6181_vm1, %v6175_v57, 0.0  ;;  %v6200_v5 = vmul.f32 %v6193_v31, %v6161_v15 }
 0x317   : > { %v6183_v60 = vadd.f32 %v6182_v9, %v6180_v13 }
 0x318   : > { %v6206_v53 = vsel %vm6181_vm1, %v6200_v5, 0.0 }
 0x319   : > { %6184 = vadd.xlane.f32.xlu0 %v6183_v60  ;;  %v6207_v62 = vadd.f32 %v6206_v53, %v6205_v58 }
 0x31b   : > { %6208 = vadd.xlane.f32.xlu1 %v6207_v62 }
 0x3a6   : > { %v6185_v30 = vpop.xlane.xlu0 %6184 }
 0x3a7   : > { %v6186_v43 = vmul.f32 0.001953125, %v6185_v30 }
 0x3a8   : > { %v6209_v63 = vpop.xlane.xlu1 %6208 }
 0x3a9   : > { %v6210_v52 = vmul.f32 0.001953125, %v6209_v63  ;;  %v6211_v47 = vmul.f32 %v6186_v43, %v6186_v43  ;;  %v6214_v3 = vsub.f32 %v8658_v34, %v6186_v43  ;;  %v6215_v0 = vsub.f32 %v8662_v40, %v6186_v43 }
 0x3aa   : > { %v6216_v19 = vsub.f32 %v8674_v18, %v6186_v43  ;;  %v6217_v51 = vsub.f32 %v8678_v55, %v6186_v43  ;;  %v6218_v12 = vsub.f32 %v6129_v28, %v6186_v43  ;;  %v6219_v14 = vsub.f32 %v6130_v44, %v6186_v43 }
 0x3ab   : > { %v6212_v46 = vsub.f32 %v6210_v52, %v6211_v47  ;;  %v6220_v25 = vsub.f32 %v6131_v16, %v6186_v43 }
 0x3ad   : > { %v6213_v56 = vmax.f32 %v6212_v46, 0.0 }
 0x3af   : > { %v6221_v17 = vadd.f32 1e-05, %v6213_v56 }
 0x3b1   : > { %6868 = vrsqrt.f32 %v6221_v17 }
 0x3bb   : > { %v6869_v49 = vpop.eup %6868 }
 0x3bc   : > { %v6223_v8 = vmul.f32 %v6869_v49, %v6214_v3  ;;  %v6224_v7 = vmul.f32 %v6869_v49, %v6215_v0  ;;  %v6225_v29 = vmul.f32 %v6869_v49, %v6216_v19  ;;  %v6226_v4 = vmul.f32 %v6869_v49, %v6217_v51 }
 0x3bd   : > { %v6227_v48 = vmul.f32 %v6869_v49, %v6218_v12  ;;  %v6228_v11 = vmul.f32 %v6869_v49, %v6219_v14  ;;  %v6229_v61 = vmul.f32 %v6869_v49, %v6220_v25 }
 0x3be   : > { %vm6230_vm2 = vcmp.ge.f32.partialorder %v6223_v8, 0.0  ;;  %vm6231_vm3 = vcmp.ge.f32.partialorder %v6224_v7, 0.0  ;;  %vm6232_vm15 = vcmp.ge.f32.partialorder %v6225_v29, 0.0  ;;  %vm6233_vm0 = vcmp.ge.f32.partialorder %v6226_v4, 0.0 }
 0x3bf   : > { %vm6234_vm4 = vcmp.ge.f32.partialorder %v6227_v48, 0.0  ;;  %vm6235_vm5 = vcmp.ge.f32.partialorder %v6228_v11, 0.0  ;;  %vm6236_vm6 = vcmp.ge.f32.partialorder %v6229_v61, 0.0  ;;  %v6237_v34 = vmul.f32 0.01, %v6223_v8 }
 0x3c0   : > { %v6238_v40 = vmul.f32 0.01, %v6224_v7  ;;  %v6239_v18 = vmul.f32 0.01, %v6225_v29  ;;  %v6240_v55 = vmul.f32 0.01, %v6226_v4 }
 0x3c1   : > { %v6241_v33 = vmul.f32 0.01, %v6227_v48  ;;  %v6242_v59 = vmul.f32 0.01, %v6228_v11  ;;  %v6243_v23 = vmul.f32 0.01, %v6229_v61  ;;  %v6244_v27 = vsel %vm6230_vm2, %v6223_v8, %v6237_v34 }
 0x3c2   : > { %v6245_v21 = vsel %vm6231_vm3, %v6224_v7, %v6238_v40  ;;  %v6246_v24 = vsel %vm6232_vm15, %v6225_v29, %v6239_v18  ;;  %v6247_v28 = vsel %vm6233_vm0, %v6226_v4, %v6240_v55 }
 0x3c3   : > { %v6248_v32 = vsel %vm6234_vm4, %v6227_v48, %v6241_v33  ;;  %v6249_v35 = vsel %vm6235_vm5, %v6228_v11, %v6242_v59  ;;  %v6250_v44 = vsel %vm6236_vm6, %v6229_v61, %v6243_v23  ;;  %v6592_v22 = vpack.c.bf16 %v6245_v21, %v6244_v27 }
 0x3c4   : > { %v6593_v20 = vpack.c.bf16 %v6247_v28, %v6246_v24  ;;  %v6594_v26 = vpack.c.bf16 %v6249_v35, %v6248_v32  ;;  %v6595_v37 = vpack.c.bf16 %v6250_v44, %v6250_v44 }
 0x3c5   : > { %6280 = vst [vmem:[%s197_s10] sm:$0xff] %v6592_v22 }
 0x3c6   : > { %6281 = vst [vmem:[%s197_s10 + $0x8] sm:$0xff] %v6593_v20  ;;  %6282 = vst [vmem:[%s197_s10 + $0x10] sm:$0xff] %v6594_v26 }
 0x3c7   : > { %6284 = vst.msk [vmem:[%s197_s10 + $0x18] sm:$0xf] %vm6283_vm7, %v6595_v37 }
 0x3c8 PF: > { %s14_s15 = sadd.s32 1, %s6876_s15  }
 0x3c9   : > { %p11_p4 = scmp.ge.s32.totalorder %s14_s15, 4  }
 0x3cb   :  { %13 = sbr.rel (!%p11_p4) target bundleno = 1 (0x1), region = 92 }

// kernel: down_forward.5
= control target key start
LH: loop header
LB: loop body
LE: loop exit
PB: predicated region body
PF: predicated region fallthrough
CT: control target
= control target key end

     0   :  { %s6897_s15 = smov 0   ;;  %s8672_s0 = inlined_call_operand.vmem [shape: bf16[2,8,1024], index: 0, kind: input, shape index: {}]   ;;  %s8673_s1 = inlined_call_operand.vmem [shape: bf16[27,8,8], index: 1, kind: input, shape index: {}]   ;;  %s8674_s2 = inlined_call_operand.vmem [shape: f32[8,1], index: 2, kind: input, shape index: {}]   ;;  %s8675_s3 = inlined_call_operand.vmem [shape: f32[1,800], index: 3, kind: input, shape index: {}]   ;;  %s8676_s4 = inlined_call_operand.vmem [shape: f32[2,8,800], index: 4, kind: output, shape index: {}]  }
   0x1 LB: > { %s6313_s16 = sadd.s32 4294967295, %s6841_s15   ;;  %p6317_p0 = scmp.ge.s32.totalorder %s6841_s15, 1  ;;  %s6841_s15 = sphi %s6897_s15, %s14_s15  }
   0x2   : > { %p162_p1 = scmp.lt.s32.totalorder %s6841_s15, 3 }
   0x4   : > { %p163_p2 = pnand %p6317_p0, %p162_p1 }
   0x5   : > { %p188_p3 = scmp.lt.s32.totalorder (!%p163_p2), %s6313_s16, 1  ;;  %v6843_v0 = vmov (!%p163_p2), 0   ;;  %s6844_s21 = smov (!%p163_p2), 127   ;;  %vm238_vm0 = vcmask (!%p163_p2), 1039360   ;;  %vm249_vm1 = vcmask (!%p163_p2), 1043456   ;;  %vm245_vm2 = vcmask (!%p163_p2), 64512  }
   0x6   : > { %166 = sbr.rel (%p163_p2) target bundleno = 966 (0x3c6), region = 36  ;;  %303 = vmatprep.mubr.bf16.mxu0 (!%p163_p2), %v6843_v0  ;;  %344 = vmatprep.mubr.bf16.mxu1 (!%p163_p2), %v6843_v0  ;;  %s6845_s22 = smov (!%p163_p2), 126   ;;  %v6321_v19 = vld [vmem:[%s8673_s1 + $0x4] sm:$0xf] (!%p163_p2)  ;;  %v6853_v29 = vmov (!%p163_p2), 0.0   ;;  %vm6854_vm3 = vmmov (!%p163_p2), 0  }
   0x7   : > { %6815 = vset.pattern.permute.xlu1 (!%p163_p2), %v6843_v0  ;;  %6816 = vset.pattern.permute.xlu0 (!%p163_p2), %v6843_v0  ;;  %s6846_s23 = smov (!%p163_p2), 118   ;;  %s6847_s24 = smov (!%p163_p2), 117   ;;  %vm637_vm4 = vcmask (!%p163_p2), 1031168   ;;  %v203_v40 = vld [vmem:[%s8673_s1] sm:$0xf] (!%p163_p2)  ;;  %vm854_vm5 = vcmask (!%p163_p2), 965632  }
   0x8   : > { %s6848_s25 = smov (!%p163_p2), 116   ;;  %s6849_s26 = smov (!%p163_p2), 108   ;;  %v6343_v59 = vld [vmem:[%s8673_s1 + $0x8] sm:$0xf] (!%p163_p2)  ;;  %vm1071_vm6 = vcmask (!%p163_p2), 957440   ;;  %vm1288_vm7 = vcmask (!%p163_p2), 949248  }
   0x9   : > { %s6850_s27 = smov (!%p163_p2), 107   ;;  %s6851_s28 = smov (!%p163_p2), 106   ;;  %vm1505_vm8 = vcmask (!%p163_p2), 883712   ;;  %vm1722_vm9 = vcmask (!%p163_p2), 875520   ;;  %vm1939_vm10 = vcmask (!%p163_p2), 867328   ;;  %vm2182_vm11 = vcmask (!%p163_p2), 228352  }
   0xa   : > { %s6852_s29 = smov (!%p163_p2), 28   ;;  %s6855_s6 = smov (!%p163_p2), 27   ;;  %vm2402_vm12 = vcmask (!%p163_p2), 220160   ;;  %vm2622_vm13 = vcmask (!%p163_p2), 211968   ;;  %vm2842_vm14 = vcmask (!%p163_p2), 146432   ;;  %vm3062_vm15 = vcmask (!%p163_p2), 138240  }
   0xb   : > { %s6856_s9 = smov (!%p163_p2), 26   ;;  %s6857_s12 = smov (!%p163_p2), 18  }
   0xc   : > { %s6862_s30 = smov (!%p163_p2), 6   ;;  %s6863_s7 = smov (!%p163_p2), 56  }
   0xd   : > { %s8678_s16 = smov (!%p188_p3, %s6313_s16), 1  ;;  %s6871_s5 = smov 34  }
   0xe   : > { %s6560_s17 = sshll.u32 %s8678_s16, 5  ;;  %s6777_s8 = smul.u32 56, %s8678_s16 }
   0xf   : > { %s6913_s20 = scalar_lea.vmem %s8672_s0, %s6560_s17  ;;  %s6858_s17 = smov 17  }
  0x10   : > { %v200_v1 = vld [vmem:[%s6913_s20 + $0x8] sm:$0xff]  ;;  %v199_v2 = vld [vmem:[%s6913_s20] sm:$0xff]  ;;  %v201_v7 = vld [vmem:[%s6913_s20 + $0x10] sm:$0xff]  ;;  %s197_s10 = scalar_lea.vmem %s8676_s4, %s6777_s8 }
  0x11   : > { %v6919_v3 = vcombine.low %v200_v1, %v200_v1  ;;  %v6921_v4 = vcombine.low %v199_v2, %v199_v2  ;;  %v6925_v5 = vcombine.high %v200_v1, %v200_v1  ;;  %v6927_v6 = vcombine.high %v199_v2, %v199_v2  ;;  %v6939_v10 = vld [vmem:[%s6913_s20 + $0x18] ss:$0 sps:$4 sm:$0xff]  }
  0x12   : > { %v6932_v8 = vcombine.high %v201_v7, %v201_v7  ;;  %v6934_v9 = vcombine.low %v201_v7, %v201_v7  ;;  %v2143_v17 = vld [vmem:[%s6913_s20 + $0x18] sm:$0xff]  ;;  %v456_v45 = vsel %vm249_vm1, %v6939_v10, 0 }
  0x13   : > { %228 = vrot.lane.b32.xlu1 %v6919_v3, %s6844_s21  ;;  %224 = vrot.lane.b32.xlu0 %v6921_v4, %s6844_s21  ;;  %v7012_v23 = vcombine.low %v2143_v17, %v2143_v17  ;;  %v7015_v25 = vcombine.high %v2143_v17, %v2143_v17  ;;  %v438_v34 = vsel %vm249_vm1, %v6921_v4, 0  ;;  %v444_v37 = vsel %vm249_vm1, %v6919_v3, 0 }
  0x14   : > { %v450_v41 = vsel %vm249_vm1, %v6934_v9, 0 }
  0x17   : > { %230 = vrot.lane.b32.xlu1 %v6925_v5, %s6844_s21  ;;  %226 = vrot.lane.b32.xlu0 %v6927_v6, %s6844_s21 }
  0x1b   : > { %234 = vrot.lane.b32.xlu1 %v6932_v8, %s6844_s21  ;;  %232 = vrot.lane.b32.xlu0 %v6934_v9, %s6844_s21 }
  0x1f   : > { %236 = vrot.lane.b32.xlu0 %v6939_v10, %s6844_s21  ;;  %623 = vrot.lane.b32.xlu1 %v6921_v4, %s6845_s22  ;;  %s6859_s21 = smov 16  }
  0x23   : > { %627 = vrot.lane.b32.xlu1 %v6919_v3, %s6845_s22  ;;  %625 = vrot.lane.b32.xlu0 %v6927_v6, %s6845_s22 }
  0x27   : > { %631 = vrot.lane.b32.xlu1 %v6934_v9, %s6845_s22  ;;  %629 = vrot.lane.b32.xlu0 %v6925_v5, %s6845_s22 }
  0x2b   : > { %635 = vrot.lane.b32.xlu1 %v6939_v10, %s6845_s22  ;;  %633 = vrot.lane.b32.xlu0 %v6932_v8, %s6845_s22  ;;  %s6868_s22 = smov 44  }
  0x2f   : > { %840 = vrot.lane.b32.xlu0 %v6921_v4, %s6846_s23  ;;  %842 = vrot.lane.b32.xlu1 %v6927_v6, %s6846_s23 }
  0x33   : > { %844 = vrot.lane.b32.xlu0 %v6919_v3, %s6846_s23  ;;  %846 = vrot.lane.b32.xlu1 %v6925_v5, %s6846_s23 }
  0x37   : > { %848 = vrot.lane.b32.xlu0 %v6934_v9, %s6846_s23  ;;  %850 = vrot.lane.b32.xlu1 %v6932_v8, %s6846_s23 }
  0x3b   : > { %852 = vrot.lane.b32.xlu0 %v6939_v10, %s6846_s23  ;;  %1057 = vrot.lane.b32.xlu1 %v6921_v4, %s6847_s24 }
  0x3f   : > { %1061 = vrot.lane.b32.xlu1 %v6919_v3, %s6847_s24  ;;  %1059 = vrot.lane.b32.xlu0 %v6927_v6, %s6847_s24 }
  0x43   : > { %1065 = vrot.lane.b32.xlu1 %v6934_v9, %s6847_s24  ;;  %1063 = vrot.lane.b32.xlu0 %v6925_v5, %s6847_s24 }
  0x47   : > { %1069 = vrot.lane.b32.xlu1 %v6939_v10, %s6847_s24  ;;  %1067 = vrot.lane.b32.xlu0 %v6932_v8, %s6847_s24  ;;  %s6860_s24 = smov 8  }
  0x4b   : > { %1274 = vrot.lane.b32.xlu0 %v6921_v4, %s6848_s25  ;;  %1276 = vrot.lane.b32.xlu1 %v6927_v6, %s6848_s25 }
  0x4f   : > { %1278 = vrot.lane.b32.xlu0 %v6919_v3, %s6848_s25  ;;  %1280 = vrot.lane.b32.xlu1 %v6925_v5, %s6848_s25 }
  0x53   : > { %1282 = vrot.lane.b32.xlu0 %v6934_v9, %s6848_s25  ;;  %1284 = vrot.lane.b32.xlu1 %v6932_v8, %s6848_s25 }
  0x57   : > { %1286 = vrot.lane.b32.xlu0 %v6939_v10, %s6848_s25  ;;  %1491 = vrot.lane.b32.xlu1 %v6921_v4, %s6849_s26  ;;  %s6869_s25 = smov 36  }
  0x5b   : > { %1495 = vrot.lane.b32.xlu1 %v6919_v3, %s6849_s26  ;;  %1493 = vrot.lane.b32.xlu0 %v6927_v6, %s6849_s26 }
  0x5f   : > { %1499 = vrot.lane.b32.xlu1 %v6934_v9, %s6849_s26  ;;  %1497 = vrot.lane.b32.xlu0 %v6925_v5, %s6849_s26 }
  0x63   : > { %1503 = vrot.lane.b32.xlu1 %v6939_v10, %s6849_s26  ;;  %1501 = vrot.lane.b32.xlu0 %v6932_v8, %s6849_s26 }
  0x67   : > { %1708 = vrot.lane.b32.xlu0 %v6921_v4, %s6850_s27  ;;  %1710 = vrot.lane.b32.xlu1 %v6927_v6, %s6850_s27 }
  0x6b   : > { %1712 = vrot.lane.b32.xlu0 %v6919_v3, %s6850_s27  ;;  %1714 = vrot.lane.b32.xlu1 %v6925_v5, %s6850_s27 }
  0x6f   : > { %1716 = vrot.lane.b32.xlu0 %v6934_v9, %s6850_s27  ;;  %1718 = vrot.lane.b32.xlu1 %v6932_v8, %s6850_s27 }
  0x73   : > { %1720 = vrot.lane.b32.xlu0 %v6939_v10, %s6850_s27  ;;  %1925 = vrot.lane.b32.xlu1 %v6921_v4, %s6851_s28  ;;  %s6861_s27 = smov 7  }
  0x77   : > { %1929 = vrot.lane.b32.xlu1 %v6919_v3, %s6851_s28  ;;  %1927 = vrot.lane.b32.xlu0 %v6927_v6, %s6851_s28 }
  0x7b   : > { %1933 = vrot.lane.b32.xlu1 %v6934_v9, %s6851_s28  ;;  %1931 = vrot.lane.b32.xlu0 %v6925_v5, %s6851_s28 }
  0x7f   : > { %1937 = vrot.lane.b32.xlu1 %v6939_v10, %s6851_s28  ;;  %1935 = vrot.lane.b32.xlu0 %v6932_v8, %s6851_s28  ;;  %s6870_s28 = smov 35  }
  0x83   : > { %2166 = vrot.lane.b32.xlu0 %v6921_v4, %s6852_s29  ;;  %2168 = vrot.lane.b32.xlu1 %v6927_v6, %s6852_s29 }
  0x85   : > { %v229_v11 = vpop.permute.xlu1 %228  ;;  %v225_v12 = vpop.permute.xlu0 %224 }
  0x87   : > { %2170 = vrot.lane.b32.xlu0 %v6919_v3, %s6852_s29  ;;  %2172 = vrot.lane.b32.xlu1 %v6925_v5, %s6852_s29 }
  0x89   : > { %v231_v13 = vpop.permute.xlu1 %230  ;;  %v227_v14 = vpop.permute.xlu0 %226 }
  0x8a   : > { %v240_v15 = vsel %vm238_vm0, %v227_v14, %v229_v11  ;;  %v239_v16 = vsel %vm238_vm0, %v225_v12, %v227_v14  ;;  %v241_v20 = vsel %vm238_vm0, %v229_v11, %v231_v13 }
  0x8b   : > { %6329 = vmatprep.subr.msk.bf16.mxu0 %vm249_vm1, %v240_v15  ;;  %v251_v18 = vsel %vm249_vm1, %v239_v16, 0  ;;  %2174 = vrot.lane.b32.xlu0 %v6934_v9, %s6852_s29  ;;  %v257_v26 = vsel %vm249_vm1, %v241_v20, 0 }
  0x8c   : > { %272 = vmatpush1.bf16.msra.mxu0 %v251_v18  ;;  %2176 = vrot.lane.b32.xlu1 %v6932_v8, %s6852_s29 }
  0x8d   : > { %v235_v21 = vpop.permute.xlu1 %234  ;;  %v233_v22 = vpop.permute.xlu0 %232 }
  0x8e   : > { %v242_v24 = vsel %vm238_vm0, %v231_v13, %v233_v22  ;;  %v243_v27 = vsel %vm238_vm0, %v233_v22, %v235_v21 }
  0x8f   : > { %6330 = vmatmul.mubr.msk.bf16.vlgmr.msra.gmra.mrb[0].mxu0 %vm245_vm2, %v6321_v19  ;;  %6331 = vmatprep.subr.msk.bf16.mxu1 %vm249_vm1, %v242_v24  ;;  %v263_v33 = vsel %vm249_vm1, %v243_v27, 0 }
  0x90   : > { %313 = vmatpush1.bf16.msra.mxu1 %v257_v26  ;;  %385 = vmatprep.mubr.bf16.mxu0 %v6843_v0 }
  0x91   : > { %v237_v28 = vpop.permute.xlu0 %236  ;;  %6615 = vmatprep.subr.bf16.mxu1 %v6853_v29  ;;  %v624_v30 = vpop.permute.xlu1 %623  ;;  %2178 = vrot.lane.b32.xlu0 %v7012_v23, %s6852_s29 }
  0x92   : > { %v244_v31 = vsel %vm238_vm0, %v235_v21, %v237_v28  ;;  %v269_v32 = vsel %vm249_vm1, %v237_v28, 0  ;;  %2180 = vrot.lane.b32.xlu1 %v7015_v25, %s6852_s29  ;;  %v6351_v21 = vld [vmem:[%s8673_s1 + $0xc] sm:$0xf]  ;;  %vm3282_vm0 = vcmask 130048  }
  0x93   : > { %6332 = vmatmul.mubr.msk.bf16.vlgmr.msra.gmra.mrb[0].mxu1 %vm245_vm2, %v6321_v19  ;;  %6333 = vmatprep.subr.msk.bf16.mxu0 %vm249_vm1, %v244_v31 }
  0x94   : > { %354 = vmatpush1.bf16.msra.mxu0 %v263_v33  ;;  %6616 = vmatpush3.bf16.msra.mxu1 %v269_v32 }
  0x95   : > { %6617 = vmatprep.mubr.msk.bf16.mxu1 %vm6854_vm3, %v6853_v29  ;;  %6336 = vmatprep.subr.msk.bf16.mxu0 %vm249_vm1, %v6927_v6  ;;  %v628_v35 = vpop.permute.xlu1 %627  ;;  %v626_v36 = vpop.permute.xlu0 %625 }
  0x96   : > { %6338 = vmatprep.subr.msk.bf16.mxu1 %vm249_vm1, %v6925_v5  ;;  %2386 = vrot.lane.b32.xlu0 %v6921_v4, %s6855_s6  ;;  %v639_v44 = vsel %vm637_vm4, %v626_v36, %v628_v35  ;;  %v638_v48 = vsel %vm637_vm4, %v624_v30, %v626_v36 }
  0x97   : > { %6334 = vmatmul.mubr.msk.bf16.vlgmr.msra.gmra.mrb[4].mxu0 %vm245_vm2, %v6321_v19  ;;  %2388 = vrot.lane.b32.xlu1 %v6927_v6, %s6855_s6  ;;  %v648_v50 = vsel %vm249_vm1, %v638_v48, 0 }
  0x98   : > { %459 = vmatpush1.bf16.msra.mxu0 %v438_v34  ;;  %490 = vmatprep.mubr.bf16.mxu0 %v6843_v0 }
  0x99   : > { %6340 = vmatprep.subr.msk.bf16.mxu0 %vm249_vm1, %v6932_v8  ;;  %v632_v38 = vpop.permute.xlu1 %631  ;;  %v630_v39 = vpop.permute.xlu0 %629 }
  0x9a   : > { %2390 = vrot.lane.b32.xlu0 %v6919_v3, %s6855_s6  ;;  %v641_v49 = vsel %vm637_vm4, %v630_v39, %v632_v38  ;;  %v640_v53 = vsel %vm637_vm4, %v628_v35, %v630_v39 }
  0x9b   : > { %6618 = vmatmul.mubr.msk.bf16.vlgmr.msra.gmra.mrb[4].mxu1 %vm245_vm2, %v6321_v19  ;;  %2392 = vrot.lane.b32.xlu1 %v6925_v5, %s6855_s6  ;;  %v654_v55 = vsel %vm249_vm1, %v640_v53, 0 }
  0x9c   : > { %500 = vmatpush1.bf16.msra.mxu1 %v444_v37  ;;  %531 = vmatprep.mubr.bf16.mxu1 %v6843_v0 }
  0x9d   : > { %6621 = vmatprep.subr.bf16.mxu1 %v6853_v29  ;;  %v636_v42 = vpop.permute.xlu1 %635  ;;  %v634_v43 = vpop.permute.xlu0 %633 }
  0x9e   : > { %2394 = vrot.lane.b32.xlu0 %v6934_v9, %s6855_s6  ;;  %v643_v54 = vsel %vm637_vm4, %v634_v43, %v636_v42  ;;  %v642_v58 = vsel %vm637_vm4, %v632_v38, %v634_v43  ;;  %v666_v1 = vsel %vm249_vm1, %v636_v42, 0  ;;  %v6359_v43 = vld [vmem:[%s8673_s1 + $0x10] sm:$0xf]  ;;  %vm3722_vm4 = vcmask 56320  }
  0x9f   : > { %6337 = vmatmul.mubr.msk.bf16.vlgmr.msra.gmra.mrb[8].mxu0 %vm245_vm2, %v203_v40  ;;  %2396 = vrot.lane.b32.xlu1 %v6932_v8, %s6855_s6  ;;  %v660_v60 = vsel %vm249_vm1, %v642_v58, 0 }
  0xa0   : > { %541 = vmatpush1.bf16.msra.mxu0 %v450_v41  ;;  %572 = vmatprep.mubr.bf16.mxu0 %v6843_v0 }
  0xa1   : > { %6344 = vmatprep.subr.msk.bf16.mxu0 %vm249_vm1, %v639_v44  ;;  %v841_v46 = vpop.permute.xlu0 %840  ;;  %v843_v47 = vpop.permute.xlu1 %842 }
  0xa2   : > { %2398 = vrot.lane.b32.xlu0 %v7012_v23, %s6855_s6  ;;  %v855_v10 = vsel %vm854_vm5, %v841_v46, %v843_v47 }
  0xa3   : > { %6339 = vmatmul.mubr.msk.bf16.vlgmr.msra.gmra.mrb[8].mxu1 %vm245_vm2, %v203_v40  ;;  %2400 = vrot.lane.b32.xlu1 %v7015_v25, %s6855_s6  ;;  %v865_v12 = vsel %vm249_vm1, %v855_v10, 0 }
  0xa4   : > { %6622 = vmatpush3.bf16.msra.mxu1 %v456_v45  ;;  %6623 = vmatprep.mubr.msk.bf16.mxu1 %vm6854_vm3, %v6853_v29 }
  0xa5   : > { %6346 = vmatprep.subr.msk.bf16.mxu1 %vm249_vm1, %v641_v49  ;;  %v845_v51 = vpop.permute.xlu0 %844  ;;  %v847_v52 = vpop.permute.xlu1 %846 }
  0xa6   : > { %2606 = vrot.lane.b32.xlu0 %v6921_v4, %s6856_s9  ;;  %v856_v63 = vsel %vm854_vm5, %v843_v47, %v845_v51  ;;  %v857_v15 = vsel %vm854_vm5, %v845_v51, %v847_v52 }
  0xa7   : > { %6341 = vmatmul.mubr.msk.bf16.vlgmr.msra.gmra.mrb[12].mxu0 %vm245_vm2, %v203_v40  ;;  %2608 = vrot.lane.b32.xlu1 %v6927_v6, %s6856_s9  ;;  %v871_v17 = vsel %vm249_vm1, %v857_v15, 0 }
  0xa8   : > { %669 = vmatpush1.bf16.msra.mxu0 %v648_v50  ;;  %700 = vmatprep.mubr.bf16.mxu0 %v6843_v0 }
  0xa9   : > { %6348 = vmatprep.subr.msk.bf16.mxu0 %vm249_vm1, %v643_v54  ;;  %v849_v56 = vpop.permute.xlu0 %848  ;;  %v851_v57 = vpop.permute.xlu1 %850 }
  0xaa   : > { %2610 = vrot.lane.b32.xlu0 %v6919_v3, %s6856_s9  ;;  %v858_v11 = vsel %vm854_vm5, %v847_v52, %v849_v56  ;;  %v859_v20 = vsel %vm854_vm5, %v849_v56, %v851_v57 }
  0xab   : > { %6624 = vmatmul.mubr.msk.bf16.vlgmr.msra.gmra.mrb[12].mxu1 %vm245_vm2, %v203_v40  ;;  %2612 = vrot.lane.b32.xlu1 %v6925_v5, %s6856_s9  ;;  %v877_v22 = vsel %vm249_vm1, %v859_v20, 0 }
  0xac   : > { %710 = vmatpush1.bf16.msra.mxu1 %v654_v55  ;;  %741 = vmatprep.mubr.bf16.mxu1 %v6843_v0 }
  0xad   : > { %6627 = vmatprep.subr.bf16.mxu1 %v6853_v29  ;;  %v853_v61 = vpop.permute.xlu0 %852  ;;  %v1058_v62 = vpop.permute.xlu1 %1057 }
  0xae   : > { %2614 = vrot.lane.b32.xlu0 %v6934_v9, %s6856_s9  ;;  %v860_v16 = vsel %vm854_vm5, %v851_v57, %v853_v61  ;;  %v883_v28 = vsel %vm249_vm1, %v853_v61, 0  ;;  %vm3942_vm5 = vcmask 48128  }
  0xaf   : > { %6345 = vmatmul.mubr.msk.bf16.vlgmr.msra.gmra.mrb[16].mxu0 %vm245_vm2, %v6343_v59  ;;  %2616 = vrot.lane.b32.xlu1 %v6932_v8, %s6856_s9 }
  0xb0   : > { %751 = vmatpush1.bf16.msra.mxu0 %v660_v60  ;;  %782 = vmatprep.mubr.bf16.mxu0 %v6843_v0 }
  0xb1   : > { %6352 = vmatprep.subr.msk.bf16.mxu0 %vm249_vm1, %v856_v63  ;;  %v1062_v2 = vpop.permute.xlu1 %1061  ;;  %v1060_v7 = vpop.permute.xlu0 %1059 }
  0xb2   : > { %2618 = vrot.lane.b32.xlu0 %v7012_v23, %s6856_s9  ;;  %v1073_v27 = vsel %vm1071_vm6, %v1060_v7, %v1062_v2  ;;  %v1072_v32 = vsel %vm1071_vm6, %v1058_v62, %v1060_v7  ;;  %v6367_v62 = vld [vmem:[%s8673_s1 + $0x14] sm:$0xf] }
  0xb3   : > { %6347 = vmatmul.mubr.msk.bf16.vlgmr.msra.gmra.mrb[16].mxu1 %vm245_vm2, %v6343_v59  ;;  %2620 = vrot.lane.b32.xlu1 %v7015_v25, %s6856_s9  ;;  %v1082_v34 = vsel %vm249_vm1, %v1072_v32, 0 }
  0xb4   : > { %6628 = vmatpush3.bf16.msra.mxu1 %v666_v1  ;;  %6629 = vmatprep.mubr.msk.bf16.mxu1 %vm6854_vm3, %v6853_v29 }
  0xb5   : > { %6354 = vmatprep.subr.msk.bf16.mxu1 %vm249_vm1, %v858_v11  ;;  %v1066_v13 = vpop.permute.xlu1 %1065  ;;  %v1064_v14 = vpop.permute.xlu0 %1063 }
  0xb6   : > { %2826 = vrot.lane.b32.xlu0 %v6921_v4, %s6857_s12  ;;  %v1075_v33 = vsel %vm1071_vm6, %v1064_v14, %v1066_v13  ;;  %v1074_v37 = vsel %vm1071_vm6, %v1062_v2, %v1064_v14 }
  0xb7   : > { %6349 = vmatmul.mubr.msk.bf16.vlgmr.msra.gmra.mrb[20].mxu0 %vm245_vm2, %v6343_v59  ;;  %2828 = vrot.lane.b32.xlu1 %v6927_v6, %s6857_s12  ;;  %v1088_v39 = vsel %vm249_vm1, %v1074_v37, 0 }
  0xb8   : > { %886 = vmatpush1.bf16.msra.mxu0 %v865_v12  ;;  %917 = vmatprep.mubr.bf16.mxu0 %v6843_v0 }
  0xb9   : > { %6356 = vmatprep.subr.msk.bf16.mxu0 %vm249_vm1, %v860_v16  ;;  %v7135_v18 = vpop.permute.xlu1 %1069  ;;  %v1068_v19 = vpop.permute.xlu0 %1067 }
  0xba   : > { %2830 = vrot.lane.b32.xlu0 %v6919_v3, %s6857_s12  ;;  %v1077_v38 = vsel %vm1071_vm6, %v1068_v19, %v7135_v18  ;;  %v1076_v42 = vsel %vm1071_vm6, %v1066_v13, %v1068_v19  ;;  %v1100_v48 = vsel %vm249_vm1, %v7135_v18, 0  ;;  %vm4182_vm6 = vcmask 457728  }
  0xbb   : > { %6630 = vmatmul.mubr.msk.bf16.vlgmr.msra.gmra.mrb[20].mxu1 %vm245_vm2, %v6343_v59  ;;  %2832 = vrot.lane.b32.xlu1 %v6925_v5, %s6857_s12  ;;  %v1094_v44 = vsel %vm249_vm1, %v1076_v42, 0 }
  0xbc   : > { %927 = vmatpush1.bf16.msra.mxu1 %v871_v17  ;;  %958 = vmatprep.mubr.bf16.mxu1 %v6843_v0 }
  0xbd   : > { %6633 = vmatprep.subr.bf16.mxu1 %v6853_v29  ;;  %v1275_v24 = vpop.permute.xlu0 %1274  ;;  %v1277_v26 = vpop.permute.xlu1 %1276 }
  0xbe   : > { %2834 = vrot.lane.b32.xlu0 %v6934_v9, %s6857_s12  ;;  %v1289_v51 = vsel %vm1288_vm7, %v1275_v24, %v1277_v26 }
  0xbf   : > { %6353 = vmatmul.mubr.msk.bf16.vlgmr.msra.gmra.mrb[24].mxu0 %vm245_vm2, %v6351_v21  ;;  %2836 = vrot.lane.b32.xlu1 %v6932_v8, %s6857_s12  ;;  %v1299_v53 = vsel %vm249_vm1, %v1289_v51, 0 }
  0xc0   : > { %968 = vmatpush1.bf16.msra.mxu0 %v877_v22  ;;  %999 = vmatprep.mubr.bf16.mxu0 %v6843_v0 }
  0xc1   : > { %6360 = vmatprep.subr.msk.bf16.mxu0 %vm249_vm1, %v1073_v27  ;;  %v1279_v30 = vpop.permute.xlu0 %1278  ;;  %v1281_v31 = vpop.permute.xlu1 %1280 }
  0xc2   : > { %2838 = vrot.lane.b32.xlu0 %v7012_v23, %s6857_s12  ;;  %v1290_v47 = vsel %vm1288_vm7, %v1277_v26, %v1279_v30  ;;  %v1291_v56 = vsel %vm1288_vm7, %v1279_v30, %v1281_v31  ;;  %v6375_v26 = vld [vmem:[%s8673_s1 + $0x18] sm:$0xf] }
  0xc3   : > { %6355 = vmatmul.mubr.msk.bf16.vlgmr.msra.gmra.mrb[24].mxu1 %vm245_vm2, %v6351_v21  ;;  %2840 = vrot.lane.b32.xlu1 %v7015_v25, %s6857_s12  ;;  %v1305_v58 = vsel %vm249_vm1, %v1291_v56, 0  ;;  %s6865_s12 = smov 54  }
  0xc4   : > { %6634 = vmatpush3.bf16.msra.mxu1 %v883_v28  ;;  %6635 = vmatprep.mubr.msk.bf16.mxu1 %vm6854_vm3, %v6853_v29 }
  0xc5   : > { %6362 = vmatprep.subr.msk.bf16.mxu1 %vm249_vm1, %v1075_v33  ;;  %v1283_v35 = vpop.permute.xlu0 %1282  ;;  %v1285_v36 = vpop.permute.xlu1 %1284 }
  0xc6   : > { %3046 = vrot.lane.b32.xlu0 %v6921_v4, %s6858_s17  ;;  %v1292_v52 = vsel %vm1288_vm7, %v1281_v31, %v1283_v35  ;;  %v1293_v61 = vsel %vm1288_vm7, %v1283_v35, %v1285_v36 }
  0xc7   : > { %6357 = vmatmul.mubr.msk.bf16.vlgmr.msra.gmra.mrb[28].mxu0 %vm245_vm2, %v6351_v21  ;;  %3048 = vrot.lane.b32.xlu1 %v6927_v6, %s6858_s17  ;;  %v1311_v63 = vsel %vm249_vm1, %v1293_v61, 0 }
  0xc8   : > { %1103 = vmatpush1.bf16.msra.mxu0 %v1082_v34  ;;  %1134 = vmatprep.mubr.bf16.mxu0 %v6843_v0 }
  0xc9   : > { %6364 = vmatprep.subr.msk.bf16.mxu0 %vm249_vm1, %v1077_v38  ;;  %v7180_v40 = vpop.permute.xlu0 %1286  ;;  %v7182_v41 = vpop.permute.xlu1 %1491 }
  0xca   : > { %3050 = vrot.lane.b32.xlu0 %v6919_v3, %s6858_s17  ;;  %v1294_v57 = vsel %vm1288_vm7, %v1285_v36, %v7180_v40  ;;  %v1317_v10 = vsel %vm249_vm1, %v7180_v40, 0  ;;  %vm4399_vm7 = vcmask 449536  }
  0xcb   : > { %6636 = vmatmul.mubr.msk.bf16.vlgmr.msra.gmra.mrb[28].mxu1 %vm245_vm2, %v6351_v21  ;;  %3052 = vrot.lane.b32.xlu1 %v6925_v5, %s6858_s17 }
  0xcc   : > { %1144 = vmatpush1.bf16.msra.mxu1 %v1088_v39  ;;  %1175 = vmatprep.mubr.bf16.mxu1 %v6843_v0 }
  0xcd   : > { %6639 = vmatprep.subr.bf16.mxu1 %v6853_v29  ;;  %v7196_v45 = vpop.permute.xlu1 %1495  ;;  %v1494_v46 = vpop.permute.xlu0 %1493 }
  0xce   : > { %3054 = vrot.lane.b32.xlu0 %v6934_v9, %s6858_s17  ;;  %v1507_v7 = vsel %vm1505_vm8, %v1494_v46, %v7196_v45  ;;  %v1506_v13 = vsel %vm1505_vm8, %v7182_v41, %v1494_v46  ;;  %v6383_v46 = vld [vmem:[%s8673_s1 + $0x1c] sm:$0xf] }
  0xcf   : > { %6361 = vmatmul.mubr.msk.bf16.vlgmr.msra.gmra.mrb[32].mxu0 %vm245_vm2, %v6359_v43  ;;  %3056 = vrot.lane.b32.xlu1 %v6932_v8, %s6858_s17  ;;  %v1516_v15 = vsel %vm249_vm1, %v1506_v13, 0  ;;  %v4145_v13 = vld [vmem:[%s6913_s20 + $0xc] sm:$0xff] }
  0xd0   : > { %1185 = vmatpush1.bf16.msra.mxu0 %v1094_v44  ;;  %1216 = vmatprep.mubr.bf16.mxu0 %v6843_v0 }
  0xd1   : > { %6368 = vmatprep.subr.msk.bf16.mxu0 %vm249_vm1, %v1290_v47  ;;  %v7208_v49 = vpop.permute.xlu1 %1499  ;;  %v1498_v50 = vpop.permute.xlu0 %1497 }
  0xd2   : > { %3058 = vrot.lane.b32.xlu0 %v7012_v23, %s6858_s17  ;;  %v1509_v14 = vsel %vm1505_vm8, %v1498_v50, %v7208_v49  ;;  %v1508_v18 = vsel %vm1505_vm8, %v7196_v45, %v1498_v50 }
  0xd3   : > { %6363 = vmatmul.mubr.msk.bf16.vlgmr.msra.gmra.mrb[32].mxu1 %vm245_vm2, %v6359_v43  ;;  %3060 = vrot.lane.b32.xlu1 %v7015_v25, %s6858_s17  ;;  %v1522_v20 = vsel %vm249_vm1, %v1508_v18, 0  ;;  %v7511_v18 = vcombine.high %v4145_v13, %v4145_v13  ;;  %s6866_s17 = smov 46  }
  0xd4   : > { %6640 = vmatpush3.bf16.msra.mxu1 %v1100_v48  ;;  %6641 = vmatprep.mubr.msk.bf16.mxu1 %vm6854_vm3, %v6853_v29 }
  0xd5   : > { %6370 = vmatprep.subr.msk.bf16.mxu1 %vm249_vm1, %v1292_v52  ;;  %v7221_v54 = vpop.permute.xlu1 %1503  ;;  %v1502_v55 = vpop.permute.xlu0 %1501 }
  0xd6   : > { %3266 = vrot.lane.b32.xlu0 %v6921_v4, %s6859_s21  ;;  %v1511_v19 = vsel %vm1505_vm8, %v1502_v55, %v7221_v54  ;;  %v1510_v24 = vsel %vm1505_vm8, %v7208_v49, %v1502_v55  ;;  %v1534_v32 = vsel %vm249_vm1, %v7221_v54, 0  ;;  %vm4616_vm8 = vcmask 441344  }
  0xd7   : > { %6365 = vmatmul.mubr.msk.bf16.vlgmr.msra.gmra.mrb[36].mxu0 %vm245_vm2, %v6359_v43  ;;  %3268 = vrot.lane.b32.xlu1 %v6927_v6, %s6859_s21  ;;  %v1528_v27 = vsel %vm249_vm1, %v1510_v24, 0 }
  0xd8   : > { %1320 = vmatpush1.bf16.msra.mxu0 %v1299_v53  ;;  %1351 = vmatprep.mubr.bf16.mxu0 %v6843_v0 }
  0xd9   : > { %6372 = vmatprep.subr.msk.bf16.mxu0 %vm249_vm1, %v1294_v57  ;;  %v7234_v59 = vpop.permute.xlu0 %1708  ;;  %v7236_v60 = vpop.permute.xlu1 %1710 }
  0xda   : > { %3270 = vrot.lane.b32.xlu0 %v6919_v3, %s6859_s21  ;;  %v1723_v35 = vsel %vm1722_vm9, %v7234_v59, %v7236_v60 }
  0xdb   : > { %6642 = vmatmul.mubr.msk.bf16.vlgmr.msra.gmra.mrb[36].mxu1 %vm245_vm2, %v6359_v43  ;;  %3272 = vrot.lane.b32.xlu1 %v6925_v5, %s6859_s21  ;;  %v1733_v37 = vsel %vm249_vm1, %v1723_v35, 0  ;;  %v7552_v35 = vld [vmem:[%s6913_s20 + $0x1c] ss:$0 sps:$4 sm:$0xff]  }
  0xdc   : > { %1361 = vmatpush1.bf16.msra.mxu1 %v1305_v58  ;;  %1392 = vmatprep.mubr.bf16.mxu1 %v6843_v0 }
  0xdd   : > { %6645 = vmatprep.subr.bf16.mxu1 %v6853_v29  ;;  %v7250_v1 = vpop.permute.xlu0 %1712  ;;  %v7252_v2 = vpop.permute.xlu1 %1714 }
  0xde   : > { %3274 = vrot.lane.b32.xlu0 %v6934_v9, %s6859_s21  ;;  %v1724_v31 = vsel %vm1722_vm9, %v7236_v60, %v7250_v1  ;;  %v1725_v40 = vsel %vm1722_vm9, %v7250_v1, %v7252_v2 }
  0xdf   : > { %6369 = vmatmul.mubr.msk.bf16.vlgmr.msra.gmra.mrb[40].mxu0 %vm245_vm2, %v6367_v62  ;;  %3276 = vrot.lane.b32.xlu1 %v6932_v8, %s6859_s21  ;;  %v1739_v42 = vsel %vm249_vm1, %v1725_v40, 0 }
  0xe0   : > { %1402 = vmatpush1.bf16.msra.mxu0 %v1311_v63  ;;  %1433 = vmatprep.mubr.bf16.mxu0 %v6843_v0 }
  0xe1   : > { %6376 = vmatprep.subr.msk.bf16.mxu0 %vm249_vm1, %v1507_v7  ;;  %v7265_v11 = vpop.permute.xlu0 %1716  ;;  %v7267_v12 = vpop.permute.xlu1 %1718 }
  0xe2   : > { %3278 = vrot.lane.b32.xlu0 %v7012_v23, %s6859_s21  ;;  %v1726_v36 = vsel %vm1722_vm9, %v7252_v2, %v7265_v11  ;;  %v1727_v45 = vsel %vm1722_vm9, %v7265_v11, %v7267_v12 }
  0xe3   : > { %6371 = vmatmul.mubr.msk.bf16.vlgmr.msra.gmra.mrb[40].mxu1 %vm245_vm2, %v6367_v62  ;;  %3280 = vrot.lane.b32.xlu1 %v7015_v25, %s6859_s21  ;;  %v1745_v47 = vsel %vm249_vm1, %v1727_v45, 0  ;;  %s6867_s21 = smov 45  }
  0xe4   : > { %6646 = vmatpush3.bf16.msra.mxu1 %v1317_v10  ;;  %6647 = vmatprep.mubr.msk.bf16.mxu1 %vm6854_vm3, %v6853_v29 }
  0xe5   : > { %6378 = vmatprep.subr.msk.bf16.mxu1 %vm249_vm1, %v1509_v14  ;;  %v7282_v16 = vpop.permute.xlu0 %1720  ;;  %v7284_v17 = vpop.permute.xlu1 %1925 }
  0xe6   : > { %3486 = vrot.lane.b32.xlu0 %v6921_v4, %s6860_s24  ;;  %v1728_v41 = vsel %vm1722_vm9, %v7267_v12, %v7282_v16  ;;  %v1751_v51 = vsel %vm249_vm1, %v7282_v16, 0  ;;  %vm4833_vm9 = vcmask 375808  }
  0xe7   : > { %6373 = vmatmul.mubr.msk.bf16.vlgmr.msra.gmra.mrb[44].mxu0 %vm245_vm2, %v6367_v62  ;;  %3488 = vrot.lane.b32.xlu1 %v6927_v6, %s6860_s24 }
  0xe8   : > { %1537 = vmatpush1.bf16.msra.mxu0 %v1516_v15  ;;  %1568 = vmatprep.mubr.bf16.mxu0 %v6843_v0 }
  0xe9   : > { %6380 = vmatprep.subr.msk.bf16.mxu0 %vm249_vm1, %v1511_v19  ;;  %v7298_v21 = vpop.permute.xlu1 %1929  ;;  %v7300_v22 = vpop.permute.xlu0 %1927  ;;  %v4146_v19 = vld [vmem:[%s6913_s20 + $0x14] sm:$0xff] }
  0xea   : > { %3490 = vrot.lane.b32.xlu0 %v6919_v3, %s6860_s24  ;;  %v1941_v49 = vsel %vm1939_vm10, %v7300_v22, %v7298_v21  ;;  %v1940_v52 = vsel %vm1939_vm10, %v7284_v17, %v7300_v22  ;;  %v7506_v17 = vcombine.low %v4145_v13, %v4145_v13 }
  0xeb   : > { %6648 = vmatmul.mubr.msk.bf16.vlgmr.msra.gmra.mrb[44].mxu1 %vm245_vm2, %v6367_v62  ;;  %3492 = vrot.lane.b32.xlu1 %v6925_v5, %s6860_s24  ;;  %v1950_v56 = vsel %vm249_vm1, %v1940_v52, 0 }
  0xec   : > { %1578 = vmatpush1.bf16.msra.mxu1 %v1522_v20  ;;  %1609 = vmatprep.mubr.bf16.mxu1 %v6843_v0 }
  0xed   : > { %6651 = vmatprep.subr.bf16.mxu1 %v6853_v29  ;;  %v7315_v28 = vpop.permute.xlu1 %1933  ;;  %v7317_v30 = vpop.permute.xlu0 %1931 }
  0xee   : > { %3494 = vrot.lane.b32.xlu0 %v6934_v9, %s6860_s24  ;;  %v1943_v53 = vsel %vm1939_vm10, %v7317_v30, %v7315_v28  ;;  %v1942_v57 = vsel %vm1939_vm10, %v7298_v21, %v7317_v30 }
  0xef   : > { %6377 = vmatmul.mubr.msk.bf16.vlgmr.msra.gmra.mrb[48].mxu0 %vm245_vm2, %v6375_v26  ;;  %3496 = vrot.lane.b32.xlu1 %v6932_v8, %s6860_s24  ;;  %v1956_v60 = vsel %vm249_vm1, %v1942_v57, 0 }
  0xf0   : > { %1619 = vmatpush1.bf16.msra.mxu0 %v1528_v27  ;;  %1650 = vmatprep.mubr.bf16.mxu0 %v6843_v0  ;;  %v7531_v27 = vcombine.high %v4146_v19, %v4146_v19 }
  0xf1   : > { %6384 = vmatprep.subr.msk.bf16.mxu0 %vm249_vm1, %v1724_v31  ;;  %v7331_v33 = vpop.permute.xlu1 %1937  ;;  %v7333_v34 = vpop.permute.xlu0 %1935 }
  0xf2   : > { %3498 = vrot.lane.b32.xlu0 %v7012_v23, %s6860_s24  ;;  %v1945_v58 = vsel %vm1939_vm10, %v7333_v34, %v7331_v33  ;;  %v1968_v7 = vsel %vm249_vm1, %v7331_v33, 0 }
  0xf3   : > { %6379 = vmatmul.mubr.msk.bf16.vlgmr.msra.gmra.mrb[48].mxu1 %vm245_vm2, %v6375_v26  ;;  %3500 = vrot.lane.b32.xlu1 %v7015_v25, %s6860_s24 }
  0xf4   : > { %6652 = vmatpush3.bf16.msra.mxu1 %v1534_v32  ;;  %6653 = vmatprep.mubr.msk.bf16.mxu1 %vm6854_vm3, %v6853_v29 }
  0xf5   : > { %6386 = vmatprep.subr.msk.bf16.mxu1 %vm249_vm1, %v1726_v36  ;;  %v7350_v38 = vpop.permute.xlu0 %2166  ;;  %v7352_v39 = vpop.permute.xlu1 %2168 }
  0xf6   : > { %3706 = vrot.lane.b32.xlu0 %v6921_v4, %s6861_s27 }
  0xf7   : > { %6381 = vmatmul.mubr.msk.bf16.vlgmr.msra.gmra.mrb[52].mxu0 %vm245_vm2, %v6375_v26  ;;  %3708 = vrot.lane.b32.xlu1 %v6927_v6, %s6861_s27 }
  0xf8   : > { %1754 = vmatpush1.bf16.msra.mxu0 %v1733_v37  ;;  %1785 = vmatprep.mubr.bf16.mxu0 %v6843_v0 }
  0xf9   : > { %6388 = vmatprep.subr.msk.bf16.mxu0 %vm249_vm1, %v1728_v41  ;;  %v7368_v43 = vpop.permute.xlu0 %2170  ;;  %v7370_v44 = vpop.permute.xlu1 %2172 }
  0xfa   : > { %3710 = vrot.lane.b32.xlu0 %v6919_v3, %s6861_s27  ;;  %v2184_v1 = vsel %vm2182_vm11, %v7352_v39, %v7368_v43 }
  0xfb   : > { %6654 = vmatmul.mubr.msk.bf16.vlgmr.msra.gmra.mrb[52].mxu1 %vm245_vm2, %v6375_v26  ;;  %3712 = vrot.lane.b32.xlu1 %v6925_v5, %s6861_s27  ;;  %v7526_v26 = vcombine.low %v4146_v19, %v4146_v19 }
  0xfc   : > { %1795 = vmatpush1.bf16.msra.mxu1 %v1739_v42  ;;  %1826 = vmatprep.mubr.bf16.mxu1 %v6843_v0 }
  0xfd   : > { %6657 = vmatprep.subr.bf16.mxu1 %v6853_v29  ;;  %v7386_v48 = vpop.permute.xlu0 %2174 }
  0xfe   : > { %3714 = vrot.lane.b32.xlu0 %v6934_v9, %s6861_s27  ;;  %v7393_v50 = vpop.permute.xlu1 %2176 }
  0xff   : > { %6385 = vmatmul.mubr.msk.bf16.vlgmr.msra.gmra.mrb[56].mxu0 %vm245_vm2, %v6383_v46  ;;  %3716 = vrot.lane.b32.xlu1 %v6932_v8, %s6861_s27  ;;  %v2187_v24 = vsel %vm2182_vm11, %v7386_v48, %v7393_v50 }
 0x100   : > { %1836 = vmatpush1.bf16.msra.mxu0 %v1745_v47  ;;  %1867 = vmatprep.mubr.bf16.mxu0 %v6843_v0  ;;  %v2206_v31 = vsel %vm249_vm1, %v2187_v24, 0 }
 0x101   : > { %6392 = vmatprep.subr.msk.bf16.mxu0 %vm249_vm1, %v1941_v49 }
 0x102   : > { %3718 = vrot.lane.b32.xlu0 %v7012_v23, %s6861_s27 }
 0x103   : > { %6387 = vmatmul.mubr.msk.bf16.vlgmr.msra.gmra.mrb[56].mxu1 %vm245_vm2, %v6383_v46  ;;  %v7411_v54 = vpop.permute.xlu0 %2178  ;;  %3720 = vrot.lane.b32.xlu1 %v7015_v25, %s6861_s27 }
 0x104   : > { %6658 = vmatpush3.bf16.msra.mxu1 %v1751_v51  ;;  %6659 = vmatprep.mubr.msk.bf16.mxu1 %vm6854_vm3, %v6853_v29  ;;  %v7417_v55 = vpop.permute.xlu1 %2180  ;;  %v2188_v16 = vsel %vm2182_vm11, %v7393_v50, %v7411_v54  ;;  %v6415_v50 = vld [vmem:[%s8673_s1 + $0x28] sm:$0xf] }
 0x105   : > { %6394 = vmatprep.subr.msk.bf16.mxu1 %vm249_vm1, %v1943_v53  ;;  %v2189_v33 = vsel %vm2182_vm11, %v7411_v54, %v7417_v55 }
 0x106   : > { %3926 = vrot.lane.b32.xlu0 %v6921_v4, %s6862_s30  ;;  %v1944_v4 = vsel %vm1939_vm10, %v7315_v28, %v7333_v34  ;;  %v6399_v28 = vld [vmem:[%s8673_s1 + $0x24] sm:$0xf]  ;;  %v2212_v37 = vsel %vm249_vm1, %v2189_v33, 0  ;;  %vm5050_vm10 = vcmask 367616  }
 0x107   : > { %6389 = vmatmul.mubr.msk.bf16.vlgmr.msra.gmra.mrb[60].mxu0 %vm245_vm2, %v6383_v46  ;;  %3928 = vrot.lane.b32.xlu1 %v6927_v6, %s6862_s30  ;;  %v6391_v6 = vld [vmem:[%s8673_s1 + $0x20] sm:$0xf]  ;;  %v1962_v63 = vsel %vm249_vm1, %v1944_v4, 0 }
 0x108   : > { %1971 = vmatpush1.bf16.msra.mxu0 %v1950_v56  ;;  %2002 = vmatprep.mubr.bf16.mxu0 %v6843_v0  ;;  %v7433_v59 = vpop.permute.xlu0 %2386 }
 0x109   : > { %6396 = vmatprep.subr.msk.bf16.mxu0 %vm249_vm1, %v1945_v58  ;;  %v7437_v61 = vpop.permute.xlu1 %2388 }
 0x10a   : > { %3930 = vrot.lane.b32.xlu0 %v6919_v3, %s6862_s30 }
 0x10b   : > { %6660 = vmatmul.mubr.msk.bf16.vlgmr.msra.gmra.mrb[60].mxu1 %vm245_vm2, %v6383_v46  ;;  %3932 = vrot.lane.b32.xlu1 %v6925_v5, %s6862_s30  ;;  %v4144_v5 = vld [vmem:[%s6913_s20 + $0x4] sm:$0xff]  ;;  %s6864_s20 = smov 55  }
 0x10c   : > { %2012 = vmatpush1.bf16.msra.mxu1 %v1956_v60  ;;  %2043 = vmatprep.mubr.bf16.mxu1 %v6843_v0  ;;  %v7451_v62 = vpop.permute.xlu0 %2390  ;;  %v7482_v11 = vcombine.low %v4144_v5, %v4144_v5  ;;  %v7487_v12 = vcombine.high %v4144_v5, %v4144_v5 }
 0x10d   : > { %6663 = vmatprep.subr.bf16.mxu1 %v6853_v29  ;;  %v7455_v3 = vpop.permute.xlu1 %2392  ;;  %v2404_v34 = vsel %vm2402_vm12, %v7437_v61, %v7451_v62 }
 0x10e   : > { %3934 = vrot.lane.b32.xlu0 %v6934_v9, %s6862_s30  ;;  %v2183_v9 = vsel %vm2182_vm11, %v7350_v38, %v7352_v39  ;;  %v2403_v39 = vsel %vm2402_vm12, %v7433_v59, %v7437_v61 }
 0x10f   : > { %6393 = vmatmul.mubr.msk.bf16.vlgmr.msra.gmra.mrb[64].mxu0 %vm245_vm2, %v6391_v6  ;;  %3936 = vrot.lane.b32.xlu1 %v6932_v8, %s6862_s30  ;;  %v2186_v8 = vsel %vm2182_vm11, %v7370_v44, %v7386_v48  ;;  %v2194_v15 = vsel %vm249_vm1, %v2183_v9, 0  ;;  %v2414_v42 = vsel %vm249_vm1, %v2403_v39, 0 }
 0x110   : > { %2053 = vmatpush1.bf16.msra.mxu0 %v1962_v63  ;;  %2084 = vmatprep.mubr.bf16.mxu0 %v6843_v0  ;;  %v7467_v2 = vpop.permute.xlu0 %2394 }
 0x111   : > { %6408 = vmatprep.subr.msk.bf16.mxu0 %vm249_vm1, %v2184_v1  ;;  %v7472_v10 = vpop.permute.xlu1 %2396  ;;  %v2406_v40 = vsel %vm2402_vm12, %v7455_v3, %v7467_v2 }
 0x112   : > { %3938 = vrot.lane.b32.xlu0 %v7012_v23, %s6862_s30  ;;  %v2407_v49 = vsel %vm2402_vm12, %v7467_v2, %v7472_v10 }
 0x113   : > { %6395 = vmatmul.mubr.msk.bf16.vlgmr.msra.gmra.mrb[64].mxu1 %vm245_vm2, %v6391_v6  ;;  %3940 = vrot.lane.b32.xlu1 %v7015_v25, %s6862_s30  ;;  %v2185_v25 = vsel %vm2182_vm11, %v7368_v43, %v7370_v44  ;;  %v2405_v44 = vsel %vm2402_vm12, %v7451_v62, %v7455_v3  ;;  %v2426_v52 = vsel %vm249_vm1, %v2407_v49, 0  ;;  %vm5267_vm11 = vcmask 359424  }
 0x114   : > { %6664 = vmatpush3.bf16.msra.mxu1 %v1968_v7  ;;  %6665 = vmatprep.mubr.msk.bf16.mxu1 %vm6854_vm3, %v6853_v29  ;;  %v7492_v14 = vpop.permute.xlu0 %2398  ;;  %v2200_v21 = vsel %vm249_vm1, %v2185_v25, 0  ;;  %v2420_v47 = vsel %vm249_vm1, %v2405_v44, 0  ;;  %v6423_v7 = vld [vmem:[%s8673_s1 + $0x2c] sm:$0xf] }
 0x115   : > { %6410 = vmatprep.subr.msk.bf16.mxu1 %vm249_vm1, %v2186_v8  ;;  %v7496_v23 = vpop.permute.xlu1 %2400  ;;  %v2408_v45 = vsel %vm2402_vm12, %v7472_v10, %v7492_v14 }
 0x116   : > { %4168 = vrot.lane.b32.xlu0 %v7482_v11, %s6863_s7  ;;  %v2409_v54 = vsel %vm2402_vm12, %v7492_v14, %v7496_v23  ;;  %vm5484_vm12 = vcmask 293888  }
 0x117   : > { %6397 = vmatmul.mubr.msk.bf16.vlgmr.msra.gmra.mrb[68].mxu0 %vm245_vm2, %v6391_v6  ;;  %4170 = vrot.lane.b32.xlu1 %v7487_v12, %s6863_s7  ;;  %v2432_v57 = vsel %vm249_vm1, %v2409_v54, 0 }
 0x118   : > { %2215 = vmatpush1.bf16.msra.mxu0 %v2194_v15  ;;  %2246 = vmatprep.mubr.bf16.mxu0 %v6843_v0  ;;  %v7515_v20 = vpop.permute.xlu0 %2606 }
 0x119   : > { %6412 = vmatprep.subr.msk.bf16.mxu0 %vm249_vm1, %v2188_v16  ;;  %v7519_v22 = vpop.permute.xlu1 %2608 }
 0x11a   : > { %4172 = vrot.lane.b32.xlu0 %v7506_v17, %s6863_s7  ;;  %v2623_v59 = vsel %vm2622_vm13, %v7515_v20, %v7519_v22 }
 0x11b   : > { %6666 = vmatmul.mubr.msk.bf16.vlgmr.msra.gmra.mrb[68].mxu1 %vm245_vm2, %v6391_v6  ;;  %4174 = vrot.lane.b32.xlu1 %v7511_v18, %s6863_s7  ;;  %v2634_v4 = vsel %vm249_vm1, %v2623_v59, 0 }
 0x11c   : > { %2256 = vmatpush1.bf16.msra.mxu1 %v2200_v21  ;;  %2287 = vmatprep.mubr.bf16.mxu1 %v6843_v0  ;;  %v7537_v30 = vpop.permute.xlu0 %2610 }
 0x11d   : > { %6669 = vmatprep.subr.bf16.mxu1 %v6853_v29  ;;  %v7541_v32 = vpop.permute.xlu1 %2612  ;;  %v2624_v55 = vsel %vm2622_vm13, %v7519_v22, %v7537_v30 }
 0x11e   : > { %4176 = vrot.lane.b32.xlu0 %v7526_v26, %s6863_s7  ;;  %v2625_v62 = vsel %vm2622_vm13, %v7537_v30, %v7541_v32 }
 0x11f   : > { %6409 = vmatmul.mubr.msk.bf16.vlgmr.msra.gmra.mrb[72].mxu0 %vm245_vm2, %v6399_v28  ;;  %4178 = vrot.lane.b32.xlu1 %v7531_v27, %s6863_s7  ;;  %v2640_v1 = vsel %vm249_vm1, %v2625_v62, 0 }
 0x120   : > { %2297 = vmatpush1.bf16.msra.mxu0 %v2206_v31  ;;  %2328 = vmatprep.mubr.bf16.mxu0 %v6843_v0  ;;  %v7558_v36 = vpop.permute.xlu0 %2614 }
 0x121   : > { %6416 = vmatprep.subr.msk.bf16.mxu0 %vm249_vm1, %v2404_v34  ;;  %v7562_v38 = vpop.permute.xlu1 %2616  ;;  %v2626_v60 = vsel %vm2622_vm13, %v7541_v32, %v7558_v36  ;;  %v6431_v34 = vld [vmem:[%s8673_s1 + $0x30] sm:$0xf] }
 0x122   : > { %4180 = vrot.lane.b32.xlu0 %v7552_v35, %s6863_s7  ;;  %v2627_v2 = vsel %vm2622_vm13, %v7558_v36, %v7562_v38 }
 0x123   : > { %6411 = vmatmul.mubr.msk.bf16.vlgmr.msra.gmra.mrb[72].mxu1 %vm245_vm2, %v6399_v28  ;;  %4385 = vrot.lane.b32.xlu1 %v7482_v11, %s6864_s20  ;;  %v2646_v9 = vsel %vm249_vm1, %v2627_v2, 0 }
 0x124   : > { %6670 = vmatpush3.bf16.msra.mxu1 %v2212_v37  ;;  %6671 = vmatprep.mubr.msk.bf16.mxu1 %vm6854_vm3, %v6853_v29  ;;  %v7577_v41 = vpop.permute.xlu0 %2618 }
 0x125   : > { %6418 = vmatprep.subr.msk.bf16.mxu1 %vm249_vm1, %v2406_v40  ;;  %v7581_v43 = vpop.permute.xlu1 %2620  ;;  %v2628_v63 = vsel %vm2622_vm13, %v7562_v38, %v7577_v41 }
 0x126   : > { %4387 = vrot.lane.b32.xlu0 %v7487_v12, %s6864_s20  ;;  %v2629_v13 = vsel %vm2622_vm13, %v7577_v41, %v7581_v43  ;;  %vm5701_vm13 = vcmask 285696  }
 0x127   : > { %6413 = vmatmul.mubr.msk.bf16.vlgmr.msra.gmra.mrb[76].mxu0 %vm245_vm2, %v6399_v28  ;;  %4389 = vrot.lane.b32.xlu1 %v7506_v17, %s6864_s20  ;;  %v2652_v23 = vsel %vm249_vm1, %v2629_v13, 0 }
 0x128   : > { %2435 = vmatpush1.bf16.msra.mxu0 %v2414_v42  ;;  %2466 = vmatprep.mubr.bf16.mxu0 %v6843_v0  ;;  %v7595_v46 = vpop.permute.xlu0 %2826 }
 0x129   : > { %6420 = vmatprep.subr.msk.bf16.mxu0 %vm249_vm1, %v2408_v45  ;;  %v7599_v48 = vpop.permute.xlu1 %2828 }
 0x12a   : > { %4391 = vrot.lane.b32.xlu0 %v7511_v18, %s6864_s20  ;;  %v2843_v16 = vsel %vm2842_vm14, %v7595_v46, %v7599_v48 }
 0x12b   : > { %6672 = vmatmul.mubr.msk.bf16.vlgmr.msra.gmra.mrb[76].mxu1 %vm245_vm2, %v6399_v28  ;;  %4393 = vrot.lane.b32.xlu1 %v7526_v26, %s6864_s20  ;;  %v2854_v21 = vsel %vm249_vm1, %v2843_v16, 0 }
 0x12c   : > { %2476 = vmatpush1.bf16.msra.mxu1 %v2420_v47  ;;  %2507 = vmatprep.mubr.bf16.mxu1 %v6843_v0  ;;  %v7613_v51 = vpop.permute.xlu0 %2830 }
 0x12d   : > { %6675 = vmatprep.subr.bf16.mxu1 %v6853_v29  ;;  %v7617_v53 = vpop.permute.xlu1 %2832  ;;  %v2844_v14 = vsel %vm2842_vm14, %v7599_v48, %v7613_v51 }
 0x12e   : > { %4395 = vrot.lane.b32.xlu0 %v7531_v27, %s6864_s20  ;;  %v2845_v24 = vsel %vm2842_vm14, %v7613_v51, %v7617_v53 }
 0x12f   : > { %6417 = vmatmul.mubr.msk.bf16.vlgmr.msra.gmra.mrb[80].mxu0 %vm245_vm2, %v6415_v50  ;;  %4397 = vrot.lane.b32.xlu1 %v7552_v35, %s6864_s20  ;;  %v2860_v31 = vsel %vm249_vm1, %v2845_v24, 0 }
 0x130   : > { %2517 = vmatpush1.bf16.msra.mxu0 %v2426_v52  ;;  %2548 = vmatprep.mubr.bf16.mxu0 %v6843_v0  ;;  %v7631_v56 = vpop.permute.xlu0 %2834 }
 0x131   : > { %6424 = vmatprep.subr.msk.bf16.mxu0 %vm249_vm1, %v2624_v55  ;;  %v7635_v58 = vpop.permute.xlu1 %2836  ;;  %v2846_v19 = vsel %vm2842_vm14, %v7617_v53, %v7631_v56  ;;  %v6439_v55 = vld [vmem:[%s8673_s1 + $0x34] sm:$0xf] }
 0x132   : > { %4602 = vrot.lane.b32.xlu0 %v7482_v11, %s6865_s12  ;;  %v2847_v33 = vsel %vm2842_vm14, %v7631_v56, %v7635_v58 }
 0x133   : > { %6419 = vmatmul.mubr.msk.bf16.vlgmr.msra.gmra.mrb[80].mxu1 %vm245_vm2, %v6415_v50  ;;  %4604 = vrot.lane.b32.xlu1 %v7487_v12, %s6865_s12  ;;  %v2866_v37 = vsel %vm249_vm1, %v2847_v33, 0 }
 0x134   : > { %6676 = vmatpush3.bf16.msra.mxu1 %v2432_v57  ;;  %6677 = vmatprep.mubr.msk.bf16.mxu1 %vm6854_vm3, %v6853_v29  ;;  %v7650_v61 = vpop.permute.xlu0 %2838 }
 0x135   : > { %6426 = vmatprep.subr.msk.bf16.mxu1 %vm249_vm1, %v2626_v60  ;;  %v7654_v6 = vpop.permute.xlu1 %2840  ;;  %v2848_v28 = vsel %vm2842_vm14, %v7635_v58, %v7650_v61 }
 0x136   : > { %4606 = vrot.lane.b32.xlu0 %v7506_v17, %s6865_s12  ;;  %v2849_v39 = vsel %vm2842_vm14, %v7650_v61, %v7654_v6  ;;  %vm5918_vm14 = vcmask 277504  }
 0x137   : > { %6421 = vmatmul.mubr.msk.bf16.vlgmr.msra.gmra.mrb[84].mxu0 %vm245_vm2, %v6415_v50  ;;  %4608 = vrot.lane.b32.xlu1 %v7511_v18, %s6865_s12  ;;  %v2872_v42 = vsel %vm249_vm1, %v2849_v39, 0 }
 0x138   : > { %2655 = vmatpush1.bf16.msra.mxu0 %v2634_v4  ;;  %2686 = vmatprep.mubr.bf16.mxu0 %v6843_v0  ;;  %v7668_v3 = vpop.permute.xlu0 %3046 }
 0x139   : > { %6428 = vmatprep.subr.msk.bf16.mxu0 %vm249_vm1, %v2628_v63  ;;  %v7672_v5 = vpop.permute.xlu1 %3048 }
 0x13a   : > { %4610 = vrot.lane.b32.xlu0 %v7526_v26, %s6865_s12  ;;  %v3063_v44 = vsel %vm3062_vm15, %v7668_v3, %v7672_v5 }
 0x13b   : > { %6678 = vmatmul.mubr.msk.bf16.vlgmr.msra.gmra.mrb[84].mxu1 %vm245_vm2, %v6415_v50  ;;  %4612 = vrot.lane.b32.xlu1 %v7531_v27, %s6865_s12  ;;  %v3074_v47 = vsel %vm249_vm1, %v3063_v44, 0 }
 0x13c   : > { %2696 = vmatpush1.bf16.msra.mxu1 %v2640_v1  ;;  %2727 = vmatprep.mubr.bf16.mxu1 %v6843_v0  ;;  %v7686_v10 = vpop.permute.xlu0 %3050 }
 0x13d   : > { %6681 = vmatprep.subr.bf16.mxu1 %v6853_v29  ;;  %v7690_v8 = vpop.permute.xlu1 %3052  ;;  %v3064_v40 = vsel %vm3062_vm15, %v7672_v5, %v7686_v10 }
 0x13e   : > { %4614 = vrot.lane.b32.xlu0 %v7552_v35, %s6865_s12  ;;  %v3065_v49 = vsel %vm3062_vm15, %v7686_v10, %v7690_v8 }
 0x13f   : > { %6425 = vmatmul.mubr.msk.bf16.vlgmr.msra.gmra.mrb[88].mxu0 %vm245_vm2, %v6423_v7  ;;  %4819 = vrot.lane.b32.xlu1 %v7482_v11, %s6866_s17  ;;  %v3080_v52 = vsel %vm249_vm1, %v3065_v49, 0 }
 0x140   : > { %2737 = vmatpush1.bf16.msra.mxu0 %v2646_v9  ;;  %2768 = vmatprep.mubr.bf16.mxu0 %v6843_v0  ;;  %v7704_v15 = vpop.permute.xlu0 %3054 }
 0x141   : > { %6432 = vmatprep.subr.msk.bf16.mxu0 %vm249_vm1, %v2844_v14  ;;  %v7708_v25 = vpop.permute.xlu1 %3056  ;;  %v3066_v45 = vsel %vm3062_vm15, %v7690_v8, %v7704_v15 }
 0x142   : > { %4821 = vrot.lane.b32.xlu0 %v7487_v12, %s6866_s17  ;;  %v3067_v54 = vsel %vm3062_vm15, %v7704_v15, %v7708_v25 }
 0x143   : > { %6427 = vmatmul.mubr.msk.bf16.vlgmr.msra.gmra.mrb[88].mxu1 %vm245_vm2, %v6423_v7  ;;  %4823 = vrot.lane.b32.xlu1 %v7506_v17, %s6866_s17  ;;  %v3086_v57 = vsel %vm249_vm1, %v3067_v54, 0 }
 0x144   : > { %6682 = vmatpush3.bf16.msra.mxu1 %v2652_v23  ;;  %6683 = vmatprep.mubr.msk.bf16.mxu1 %vm6854_vm3, %v6853_v29  ;;  %v7723_v20 = vpop.permute.xlu0 %3058 }
 0x145   : > { %6434 = vmatprep.subr.msk.bf16.mxu1 %vm249_vm1, %v2846_v19  ;;  %v7727_v22 = vpop.permute.xlu1 %3060  ;;  %v3068_v50 = vsel %vm3062_vm15, %v7708_v25, %v7723_v20 }
 0x146   : > { %4825 = vrot.lane.b32.xlu0 %v7511_v18, %s6866_s17  ;;  %v3069_v59 = vsel %vm3062_vm15, %v7723_v20, %v7727_v22 }
 0x147   : > { %6429 = vmatmul.mubr.msk.bf16.vlgmr.msra.gmra.mrb[92].mxu0 %vm245_vm2, %v6423_v7  ;;  %4827 = vrot.lane.b32.xlu1 %v7526_v26, %s6866_s17  ;;  %v3092_v4 = vsel %vm249_vm1, %v3069_v59, 0 }
 0x148   : > { %2875 = vmatpush1.bf16.msra.mxu0 %v2854_v21  ;;  %2906 = vmatprep.mubr.bf16.mxu0 %v6843_v0  ;;  %v7741_v30 = vpop.permute.xlu0 %3266 }
 0x149   : > { %6436 = vmatprep.subr.msk.bf16.mxu0 %vm249_vm1, %v2848_v28  ;;  %v7745_v32 = vpop.permute.xlu1 %3268 }
 0x14a   : > { %4829 = vrot.lane.b32.xlu0 %v7531_v27, %s6866_s17  ;;  %v3283_v62 = vsel %vm3282_vm0, %v7741_v30, %v7745_v32  ;;  %v6447_v30 = vld [vmem:[%s8673_s1 + $0x38] sm:$0xf] }
 0x14b   : > { %6684 = vmatmul.mubr.msk.bf16.vlgmr.msra.gmra.mrb[92].mxu1 %vm245_vm2, %v6423_v7  ;;  %4831 = vrot.lane.b32.xlu1 %v7552_v35, %s6866_s17  ;;  %v3294_v7 = vsel %vm249_vm1, %v3283_v62, 0 }
 0x14c   : > { %2916 = vmatpush1.bf16.msra.mxu1 %v2860_v31  ;;  %2947 = vmatprep.mubr.bf16.mxu1 %v6843_v0  ;;  %v7759_v36 = vpop.permute.xlu0 %3270 }
 0x14d   : > { %6687 = vmatprep.subr.bf16.mxu1 %v6853_v29  ;;  %v7763_v38 = vpop.permute.xlu1 %3272  ;;  %v3284_v60 = vsel %vm3282_vm0, %v7745_v32, %v7759_v36 }
 0x14e   : > { %5036 = vrot.lane.b32.xlu0 %v7482_v11, %s6867_s21  ;;  %v3285_v13 = vsel %vm3282_vm0, %v7759_v36, %v7763_v38 }
 0x14f   : > { %6433 = vmatmul.mubr.msk.bf16.vlgmr.msra.gmra.mrb[96].mxu0 %vm245_vm2, %v6431_v34  ;;  %5038 = vrot.lane.b32.xlu1 %v7487_v12, %s6867_s21  ;;  %v3300_v16 = vsel %vm249_vm1, %v3285_v13, 0 }
 0x150   : > { %2957 = vmatpush1.bf16.msra.mxu0 %v2866_v37  ;;  %2988 = vmatprep.mubr.bf16.mxu0 %v6843_v0  ;;  %v7777_v41 = vpop.permute.xlu0 %3274 }
 0x151   : > { %6440 = vmatprep.subr.msk.bf16.mxu0 %vm249_vm1, %v3064_v40  ;;  %v7781_v43 = vpop.permute.xlu1 %3276  ;;  %v3286_v3 = vsel %vm3282_vm0, %v7763_v38, %v7777_v41 }
 0x152   : > { %5040 = vrot.lane.b32.xlu0 %v7506_v17, %s6867_s21  ;;  %v3287_v21 = vsel %vm3282_vm0, %v7777_v41, %v7781_v43 }
 0x153   : > { %6435 = vmatmul.mubr.msk.bf16.vlgmr.msra.gmra.mrb[96].mxu1 %vm245_vm2, %v6431_v34  ;;  %5042 = vrot.lane.b32.xlu1 %v7511_v18, %s6867_s21  ;;  %v3306_v32 = vsel %vm249_vm1, %v3287_v21, 0 }
 0x154   : > { %6688 = vmatpush3.bf16.msra.mxu1 %v2872_v42  ;;  %6689 = vmatprep.mubr.msk.bf16.mxu1 %vm6854_vm3, %v6853_v29  ;;  %v7796_v46 = vpop.permute.xlu0 %3278 }
 0x155   : > { %6442 = vmatprep.subr.msk.bf16.mxu1 %vm249_vm1, %v3066_v45  ;;  %v7800_v48 = vpop.permute.xlu1 %3280  ;;  %v3288_v14 = vsel %vm3282_vm0, %v7781_v43, %v7796_v46 }
 0x156   : > { %5044 = vrot.lane.b32.xlu0 %v7526_v26, %s6867_s21  ;;  %v3289_v37 = vsel %vm3282_vm0, %v7796_v46, %v7800_v48 }
 0x157   : > { %6437 = vmatmul.mubr.msk.bf16.vlgmr.msra.gmra.mrb[100].mxu0 %vm245_vm2, %v6431_v34  ;;  %5046 = vrot.lane.b32.xlu1 %v7531_v27, %s6867_s21  ;;  %v3312_v42 = vsel %vm249_vm1, %v3289_v37, 0 }
 0x158   : > { %3095 = vmatpush1.bf16.msra.mxu0 %v3074_v47  ;;  %3126 = vmatprep.mubr.bf16.mxu0 %v6843_v0  ;;  %v7814_v51 = vpop.permute.xlu0 %3486 }
 0x159   : > { %6444 = vmatprep.subr.msk.bf16.mxu0 %vm249_vm1, %v3068_v50  ;;  %v7818_v53 = vpop.permute.xlu1 %3488 }
 0x15a   : > { %5048 = vrot.lane.b32.xlu0 %v7552_v35, %s6867_s21  ;;  %v3503_v46 = vsel %vm245_vm2, %v7814_v51, %v7818_v53 }
 0x15b   : > { %6690 = vmatmul.mubr.msk.bf16.vlgmr.msra.gmra.mrb[100].mxu1 %vm245_vm2, %v6431_v34  ;;  %5253 = vrot.lane.b32.xlu1 %v7482_v11, %s6868_s22 }
 0x15c   : > { %3136 = vmatpush1.bf16.msra.mxu1 %v3080_v52  ;;  %3167 = vmatprep.mubr.bf16.mxu1 %v6843_v0  ;;  %v7832_v56 = vpop.permute.xlu0 %3490 }
 0x15d   : > { %6693 = vmatprep.subr.bf16.mxu1 %v6853_v29  ;;  %v7836_v58 = vpop.permute.xlu1 %3492  ;;  %v3504_v38 = vsel %vm245_vm2, %v7818_v53, %v7832_v56  ;;  %v3514_v53 = vsel %vm249_vm1, %v3503_v46, 0 }
 0x15e   : > { %5255 = vrot.lane.b32.xlu0 %v7487_v12, %s6868_s22  ;;  %v3505_v59 = vsel %vm245_vm2, %v7832_v56, %v7836_v58 }
 0x15f   : > { %6441 = vmatmul.mubr.msk.bf16.vlgmr.msra.gmra.mrb[104].mxu0 %vm245_vm2, %v6439_v55  ;;  %5257 = vrot.lane.b32.xlu1 %v7506_v17, %s6868_s22 }
 0x160   : > { %3177 = vmatpush1.bf16.msra.mxu0 %v3086_v57  ;;  %3208 = vmatprep.mubr.bf16.mxu0 %v6843_v0  ;;  %v7850_v61 = vpop.permute.xlu0 %3494 }
 0x161   : > { %6448 = vmatprep.subr.msk.bf16.mxu0 %vm249_vm1, %v3284_v60  ;;  %v7854_v6 = vpop.permute.xlu1 %3496  ;;  %v3506_v47 = vsel %vm245_vm2, %v7836_v58, %v7850_v61 }
 0x162   : > { %v7859_v63 = vpop.f32.mrb[0].mxu0  ;;  %5259 = vrot.lane.b32.xlu0 %v7511_v18, %s6868_s22 }
 0x163   : > { %6443 = vmatmul.mubr.msk.bf16.vlgmr.msra.gmra.mrb[104].mxu1 %vm245_vm2, %v6439_v55  ;;  %v7867_v1 = vpop.f32.mrb[1].mxu0  ;;  %5261 = vrot.lane.b32.xlu1 %v7526_v26, %s6868_s22 }
 0x164   : > { %6694 = vmatpush3.bf16.msra.mxu1 %v3092_v4  ;;  %v309_v5 = vpop.f32.mrb[2].mxu0  ;;  %6695 = vmatprep.mubr.msk.bf16.mxu1 %vm6854_vm3, %v6853_v29  ;;  %v7873_v2 = vpop.permute.xlu0 %3498 }
 0x165   : > { %v310_v10 = vpop.f32.mrb[3].mxu0  ;;  %6450 = vmatprep.subr.msk.bf16.mxu1 %vm249_vm1, %v3286_v3  ;;  %v7877_v9 = vpop.permute.xlu1 %3500  ;;  %v3508_v60 = vsel %vm245_vm2, %v7854_v6, %v7873_v2  ;;  %v3520_v3 = vsel %vm249_vm1, %v3505_v59, 0 }
 0x166   : > { %v7879_v8 = vpop.f32.mrb[0].mxu1  ;;  %5263 = vrot.lane.b32.xlu0 %v7531_v27, %s6868_s22  ;;  %v3507_v10 = vsel %vm245_vm2, %v7850_v61, %v7854_v6  ;;  %v8009_v61 = vld [vmem:[%s8673_s1 + $0x3c] sm:$0xf] }
 0x167   : > { %6445 = vmatmul.mubr.msk.bf16.vlgmr.msra.gmra.mrb[108].mxu0 %vm245_vm2, %v6439_v55  ;;  %v7890_v15 = vpop.f32.mrb[1].mxu1  ;;  %5265 = vrot.lane.b32.xlu1 %v7552_v35, %s6868_s22 }
 0x168   : > { %3315 = vmatpush1.bf16.msra.mxu0 %v3294_v7  ;;  %v350_v23 = vpop.f32.mrb[2].mxu1  ;;  %3346 = vmatprep.mubr.bf16.mxu0 %v6843_v0  ;;  %v7895_v25 = vpop.permute.xlu0 %3706 }
 0x169   : > { %v351_v19 = vpop.f32.mrb[3].mxu1  ;;  %6452 = vmatprep.subr.msk.bf16.mxu0 %vm249_vm1, %v3288_v14  ;;  %v7899_v20 = vpop.permute.xlu1 %3708  ;;  %v3526_v23 = vsel %vm249_vm1, %v3507_v10, 0 }
 0x16a   : > { %v7904_v22 = vpop.f32.mrb[4].mxu0  ;;  %5470 = vrot.lane.b32.xlu0 %v7482_v11, %s6869_s25 }
 0x16b   : > { %6696 = vmatmul.mubr.msk.bf16.vlgmr.msra.gmra.mrb[108].mxu1 %vm245_vm2, %v6439_v55  ;;  %v7909_v24 = vpop.f32.mrb[5].mxu0  ;;  %5472 = vrot.lane.b32.xlu1 %v7487_v12, %s6869_s25 }
 0x16c   : > { %3356 = vmatpush1.bf16.msra.mxu1 %v3300_v16  ;;  %v391_v28 = vpop.f32.mrb[6].mxu0  ;;  %3387 = vmatprep.mubr.bf16.mxu1 %v6843_v0  ;;  %v7917_v31 = vpop.permute.xlu0 %3710 }
 0x16d   : > { %v392_v33 = vpop.f32.mrb[7].mxu0  ;;  %6699 = vmatprep.subr.bf16.mxu1 %v6853_v29  ;;  %v7921_v34 = vpop.permute.xlu1 %3712 }
 0x16e   : > { %v7923_v36 = vpop.f32.mrb[4].mxu1  ;;  %5474 = vrot.lane.b32.xlu0 %v7506_v17, %s6869_s25 }
 0x16f   : > { %6449 = vmatmul.mubr.msk.bf16.vlgmr.msra.gmra.mrb[112].mxu0 %vm245_vm2, %v6447_v30  ;;  %v6619_v39 = vpop.f32.mrb[5].mxu1  ;;  %5476 = vrot.lane.b32.xlu1 %v7511_v18, %s6869_s25 }
 0x170   : > { %3397 = vmatpush1.bf16.msra.mxu0 %v3306_v32  ;;  %v431_v40 = vpop.f32.mrb[6].mxu1  ;;  %3428 = vmatprep.mubr.bf16.mxu0 %v6843_v0  ;;  %v7937_v41 = vpop.permute.xlu0 %3714 }
 0x171   : > { %v6620_v43 = vpop.f32.mrb[7].mxu1  ;;  %6456 = vmatprep.subr.msk.bf16.mxu0 %vm249_vm1, %v3504_v38  ;;  %v7941_v44 = vpop.permute.xlu1 %3716  ;;  %v3723_v38 = vsel %vm3722_vm4, %v7895_v25, %v7899_v20  ;;  %v3726_v39 = vsel %vm3722_vm4, %v7921_v34, %v7937_v41 }
 0x172   : > { %v492_v45 = vpop.f32.mrb[8].mxu0  ;;  %5478 = vrot.lane.b32.xlu0 %v7526_v26, %s6869_s25 }
 0x173   : > { %v7952_v48 = vadd.f32 %v492_v45, %v7859_v63  ;;  %v494_v49 = vpop.f32.mrb[9].mxu0  ;;  %6451 = vmatmul.mubr.msk.bf16.vlgmr.msra.gmra.mrb[112].mxu1 %vm245_vm2, %v6447_v30  ;;  %5480 = vrot.lane.b32.xlu1 %v7531_v27, %s6869_s25  ;;  %v3734_v45 = vsel %vm249_vm1, %v3723_v38, 0 }
 0x174   : > { %v7958_v50 = vadd.f32 %v494_v49, %v7867_v1  ;;  %6700 = vmatpush3.bf16.msra.mxu1 %v3312_v42  ;;  %v496_v51 = vpop.f32.mrb[10].mxu0  ;;  %6701 = vmatprep.mubr.msk.bf16.mxu1 %vm6854_vm3, %v6853_v29  ;;  %v7962_v52 = vpop.permute.xlu0 %3718  ;;  %v3725_v49 = vsel %vm3722_vm4, %v7917_v31, %v7921_v34 }
 0x175   : > { %v497_v54 = vpop.f32.mrb[11].mxu0  ;;  %6458 = vmatprep.subr.msk.bf16.mxu1 %vm249_vm1, %v3506_v47  ;;  %v7966_v55 = vpop.permute.xlu1 %3720 }
 0x176   : > { %v533_v57 = vpop.f32.mrb[8].mxu1  ;;  %5482 = vrot.lane.b32.xlu0 %v7552_v35, %s6869_s25 }
 0x177   : > { %v7977_v4 = vadd.f32 %v533_v57, %v7879_v8  ;;  %v535_v62 = vpop.f32.mrb[9].mxu1  ;;  %6453 = vmatmul.mubr.msk.bf16.vlgmr.msra.gmra.mrb[116].mxu0 %vm245_vm2, %v6447_v30  ;;  %5687 = vrot.lane.b32.xlu1 %v7482_v11, %s6870_s28 }
 0x178   : > { %v7983_v63 = vadd.f32 %v535_v62, %v7890_v15  ;;  %3535 = vmatpush1.bf16.msra.mxu0 %v3514_v53  ;;  %v537_v56 = vpop.f32.mrb[10].mxu1  ;;  %3566 = vmatprep.mubr.bf16.mxu0 %v6843_v0  ;;  %v7986_v58 = vpop.permute.xlu0 %3926 }
 0x179   : > { %v538_v1 = vpop.f32.mrb[11].mxu1  ;;  %6460 = vmatprep.subr.msk.bf16.mxu0 %vm249_vm1, %v3508_v60  ;;  %v7990_v5 = vpop.permute.xlu1 %3928 }
 0x17a   : > { %v574_v7 = vpop.f32.mrb[12].mxu0  ;;  %5689 = vrot.lane.b32.xlu0 %v7487_v12, %s6870_s28 }
 0x17b   : > { %v7998_v8 = vadd.f32 %v574_v7, %v7904_v22  ;;  %v576_v13 = vpop.f32.mrb[13].mxu0  ;;  %6702 = vmatmul.mubr.msk.bf16.vlgmr.msra.gmra.mrb[116].mxu1 %vm245_vm2, %v6447_v30  ;;  %5691 = vrot.lane.b32.xlu1 %v7506_v17, %s6870_s28  ;;  %v3509_v22 = vsel %vm245_vm2, %v7873_v2, %v7877_v9  ;;  %v3729_v7 = vsel %vm3722_vm4, %v7962_v52, %v7966_v55 }
 0x17c   : > { %v8004_v14 = vadd.f32 %v576_v13, %v7909_v24  ;;  %3576 = vmatpush1.bf16.msra.mxu1 %v3520_v3  ;;  %v578_v15 = vpop.f32.mrb[14].mxu0  ;;  %3607 = vmatprep.mubr.bf16.mxu1 %v6843_v0  ;;  %v8012_v6 = vpop.permute.xlu0 %3930  ;;  %v3724_v24 = vsel %vm3722_vm4, %v7899_v20, %v7917_v31  ;;  %v3532_v9 = vsel %vm249_vm1, %v3509_v22, 0  ;;  %v3752_v55 = vsel %vm249_vm1, %v3729_v7, 0 }
 0x17d   : > { %v579_v16 = vpop.f32.mrb[15].mxu0  ;;  %6705 = vmatprep.subr.bf16.mxu1 %v6853_v29  ;;  %v8016_v19 = vpop.permute.xlu1 %3932  ;;  %v3944_v10 = vsel %vm3942_vm5, %v7990_v5, %v8012_v6 }
 0x17e   : > { %v615_v21 = vpop.f32.mrb[12].mxu1  ;;  %5693 = vrot.lane.b32.xlu0 %v7511_v18, %s6870_s28 }
 0x17f   : > { %v8027_v28 = vadd.f32 %v615_v21, %v7923_v36  ;;  %6457 = vmatmul.mubr.msk.bf16.vlgmr.msra.gmra.mrb[120].mxu0 %vm245_vm2, %v8009_v61  ;;  %v6625_v30 = vpop.f32.mrb[13].mxu1  ;;  %5695 = vrot.lane.b32.xlu1 %v7526_v26, %s6870_s28 }
 0x180   : > { %3617 = vmatpush1.bf16.msra.mxu0 %v3526_v23  ;;  %v618_v32 = vpop.f32.mrb[14].mxu1  ;;  %3648 = vmatprep.mubr.bf16.mxu0 %v6843_v0  ;;  %v8034_v2 = vpop.permute.xlu0 %3934  ;;  %v3943_v23 = vsel %vm3942_vm5, %v7986_v58, %v7990_v5 }
 0x181   : > { %v6626_v33 = vpop.f32.mrb[15].mxu1  ;;  %6464 = vmatprep.subr.msk.bf16.mxu0 %vm249_vm1, %v3724_v24  ;;  %v8038_v36 = vpop.permute.xlu1 %3936  ;;  %v3954_v5 = vsel %vm249_vm1, %v3943_v23, 0  ;;  %v3945_v32 = vsel %vm3942_vm5, %v8012_v6, %v8016_v19 }
 0x182   : > { %v702_v37 = vpop.f32.mrb[16].mxu0  ;;  %5697 = vrot.lane.b32.xlu0 %v7531_v27, %s6870_s28 }
 0x183   : > { %v8049_v40 = vadd.f32 %v702_v37, %v7952_v48  ;;  %v704_v42 = vpop.f32.mrb[17].mxu0  ;;  %6459 = vmatmul.mubr.msk.bf16.vlgmr.msra.gmra.mrb[120].mxu1 %vm245_vm2, %v8009_v61  ;;  %5699 = vrot.lane.b32.xlu1 %v7552_v35, %s6870_s28 }
 0x184   : > { %v8056_v43 = vadd.f32 %v704_v42, %v7958_v50  ;;  %6706 = vmatpush3.bf16.msra.mxu1 %v3532_v9  ;;  %v706_v25 = vpop.f32.mrb[18].mxu0  ;;  %6707 = vmatprep.mubr.msk.bf16.mxu1 %vm6854_vm3, %v6853_v29  ;;  %v8060_v20 = vpop.permute.xlu0 %3938  ;;  %v3728_v50 = vsel %vm3722_vm4, %v7941_v44, %v7962_v52  ;;  %v3960_v42 = vsel %vm249_vm1, %v3945_v32, 0 }
 0x185   : > { %v707_v46 = vpop.f32.mrb[19].mxu0  ;;  %6466 = vmatprep.subr.msk.bf16.mxu1 %vm249_vm1, %v3726_v39  ;;  %v8064_v47 = vpop.permute.xlu1 %3940  ;;  %v3948_v9 = vsel %vm3942_vm5, %v8038_v36, %v8060_v20  ;;  %v3947_v25 = vsel %vm3942_vm5, %v8034_v2, %v8038_v36 }
 0x186   : > { %v743_v48 = vpop.f32.mrb[16].mxu1  ;;  %5904 = vrot.lane.b32.xlu0 %v7482_v11, %s6871_s5  ;;  %v3740_v11 = vsel %vm249_vm1, %v3725_v49, 0 }
 0x187   : > { %v8075_v51 = vadd.f32 %v743_v48, %v7977_v4  ;;  %v745_v53 = vpop.f32.mrb[17].mxu1  ;;  %6461 = vmatmul.mubr.msk.bf16.vlgmr.msra.gmra.mrb[124].mxu0 %vm245_vm2, %v8009_v61  ;;  %5906 = vrot.lane.b32.xlu1 %v7487_v12, %s6871_s5  ;;  %v3727_v12 = vsel %vm3722_vm4, %v7937_v41, %v7941_v44 }
 0x188   : > { %v8082_v31 = vadd.f32 %v745_v53, %v7983_v63  ;;  %3755 = vmatpush1.bf16.msra.mxu0 %v3734_v45  ;;  %v747_v34 = vpop.f32.mrb[18].mxu1  ;;  %3786 = vmatprep.mubr.bf16.mxu0 %v6843_v0  ;;  %v8085_v54 = vpop.permute.xlu0 %4168  ;;  %v3746_v44 = vsel %vm249_vm1, %v3727_v12, 0 }
 0x189   : > { %v748_v57 = vpop.f32.mrb[19].mxu1  ;;  %6468 = vmatprep.subr.msk.bf16.mxu0 %vm249_vm1, %v3728_v50  ;;  %v8089_v59 = vpop.permute.xlu1 %4170  ;;  %v6471_v50 = vld [vmem:[%s8673_s1 + $0x44] sm:$0xf]  ;;  %v3949_v34 = vsel %vm3942_vm5, %v8060_v20, %v8064_v47 }
 0x18a   : > { %v784_v60 = vpop.f32.mrb[20].mxu0  ;;  %5908 = vrot.lane.b32.xlu0 %v7506_v17, %s6871_s5  ;;  %v6463_v17 = vld [vmem:[%s8673_s1 + $0x40] sm:$0xf] }
 0x18b   : > { %v8097_v4 = vadd.f32 %v784_v60, %v7998_v8  ;;  %v786_v62 = vpop.f32.mrb[21].mxu0  ;;  %6708 = vmatmul.mubr.msk.bf16.vlgmr.msra.gmra.mrb[124].mxu1 %vm245_vm2, %v8009_v61  ;;  %5910 = vrot.lane.b32.xlu1 %v7511_v18, %s6871_s5 }
 0x18c   : > { %v8104_v63 = vadd.f32 %v786_v62, %v8004_v14  ;;  %3796 = vmatpush1.bf16.msra.mxu1 %v3740_v11  ;;  %v788_v56 = vpop.f32.mrb[22].mxu0  ;;  %3827 = vmatprep.mubr.bf16.mxu1 %v6843_v0  ;;  %v8110_v41 = vpop.permute.xlu0 %4172  ;;  %v3972_v62 = vsel %vm249_vm1, %v3949_v34, 0 }
 0x18d   : > { %v789_v3 = vpop.f32.mrb[23].mxu0  ;;  %6711 = vmatprep.subr.bf16.mxu1 %v6853_v29  ;;  %v8114_v1 = vpop.permute.xlu1 %4174  ;;  %v4184_v11 = vsel %vm4182_vm6, %v8089_v59, %v8110_v41  ;;  %v4183_v56 = vsel %vm4182_vm6, %v8085_v54, %v8089_v59 }
 0x18e   : > { %v825_v18 = vpop.f32.mrb[20].mxu1  ;;  %5912 = vrot.lane.b32.xlu0 %v7526_v26, %s6871_s5 }
 0x18f   : > { %v8125_v8 = vadd.f32 %v825_v18, %v8027_v28  ;;  %6465 = vmatmul.mubr.msk.bf16.vlgmr.msra.gmra.mrb[128].mxu0 %vm245_vm2, %v6463_v17  ;;  %v6631_v13 = vpop.f32.mrb[21].mxu1  ;;  %5914 = vrot.lane.b32.xlu1 %v7531_v27, %s6871_s5  ;;  %v3946_v27 = vsel %vm3942_vm5, %v8016_v19, %v8034_v2  ;;  %v3966_v2 = vsel %vm249_vm1, %v3947_v25, 0 }
 0x190   : > { %3837 = vmatpush1.bf16.msra.mxu0 %v3746_v44  ;;  %v828_v14 = vpop.f32.mrb[22].mxu1  ;;  %3868 = vmatprep.mubr.bf16.mxu0 %v6843_v0  ;;  %v8131_v52 = vpop.permute.xlu0 %4176 }
 0x191   : > { %v6632_v15 = vpop.f32.mrb[23].mxu1  ;;  %6472 = vmatprep.subr.msk.bf16.mxu0 %vm249_vm1, %v3944_v10  ;;  %v8135_v26 = vpop.permute.xlu1 %4178  ;;  %v4185_v14 = vsel %vm4182_vm6, %v8110_v41, %v8114_v1 }
 0x192   : > { %v919_v61 = vpop.f32.mrb[24].mxu0  ;;  %5916 = vrot.lane.b32.xlu0 %v7552_v35, %s6871_s5 }
 0x193   : > { %v1048_v16 = vadd.f32 %v919_v61, %v8049_v40  ;;  %v921_v21 = vpop.f32.mrb[25].mxu0  ;;  %6467 = vmatmul.mubr.msk.bf16.vlgmr.msra.gmra.mrb[128].mxu1 %vm245_vm2, %v6463_v17 }
 0x194   : > { %v1049_v22 = vadd.f32 %v921_v21, %v8056_v43  ;;  %6712 = vmatpush3.bf16.msra.mxu1 %v3752_v55  ;;  %v923_v24 = vpop.f32.mrb[26].mxu0  ;;  %6713 = vmatprep.mubr.msk.bf16.mxu1 %vm6854_vm3, %v6853_v29  ;;  %v8150_v58 = vpop.permute.xlu0 %4180  ;;  %v4199_v21 = vsel %vm249_vm1, %v4185_v14, 0 }
 0x195   : > { %v924_v28 = vpop.f32.mrb[27].mxu0  ;;  %6474 = vmatprep.subr.msk.bf16.mxu1 %vm249_vm1, %v3946_v27  ;;  %v8154_v35 = vpop.permute.xlu1 %4385  ;;  %v4188_v55 = vsel %vm4182_vm6, %v8135_v26, %v8150_v58  ;;  %v4187_v24 = vsel %vm4182_vm6, %v8131_v52, %v8135_v26 }
 0x196   : > { %v960_v30 = vpop.f32.mrb[24].mxu1 }
 0x197   : > { %v1050_v33 = vadd.f32 %v960_v30, %v8075_v51  ;;  %v962_v37 = vpop.f32.mrb[25].mxu1  ;;  %6469 = vmatmul.mubr.msk.bf16.vlgmr.msra.gmra.mrb[132].mxu0 %vm245_vm2, %v6463_v17 }
 0x198   : > { %v1051_v38 = vadd.f32 %v962_v37, %v8082_v31  ;;  %3975 = vmatpush1.bf16.msra.mxu0 %v3954_v5  ;;  %v964_v39 = vpop.f32.mrb[26].mxu1  ;;  %4006 = vmatprep.mubr.bf16.mxu0 %v6843_v0  ;;  %v8166_v40 = vpop.permute.xlu0 %4387  ;;  %v4205_v37 = vsel %vm249_vm1, %v4187_v24, 0 }
 0x199   : > { %v965_v6 = vpop.f32.mrb[27].mxu1  ;;  %6476 = vmatprep.subr.msk.bf16.mxu0 %vm249_vm1, %v3948_v9  ;;  %v8170_v19 = vpop.permute.xlu1 %4389  ;;  %v6479_v9 = vld [vmem:[%s8673_s1 + $0x48] sm:$0xf] }
 0x19a   : > { %v1001_v43 = vpop.f32.mrb[28].mxu0  ;;  %v4401_v39 = vsel %vm4399_vm7, %v8166_v40, %v8170_v19 }
 0x19b   : > { %v1052_v45 = vadd.f32 %v1001_v43, %v8097_v4  ;;  %v1003_v46 = vpop.f32.mrb[29].mxu0  ;;  %6714 = vmatmul.mubr.msk.bf16.vlgmr.msra.gmra.mrb[132].mxu1 %vm245_vm2, %v6463_v17  ;;  %v4186_v17 = vsel %vm4182_vm6, %v8114_v1, %v8131_v52 }
 0x19c   : > { %v1053_v48 = vadd.f32 %v1003_v46, %v8104_v63  ;;  %4016 = vmatpush1.bf16.msra.mxu1 %v3960_v42  ;;  %v1005_v49 = vpop.f32.mrb[30].mxu0  ;;  %4047 = vmatprep.mubr.bf16.mxu1 %v6843_v0  ;;  %v8182_v51 = vpop.permute.xlu0 %4391 }
 0x19d   : > { %v1006_v36 = vpop.f32.mrb[31].mxu0  ;;  %6717 = vmatprep.subr.bf16.mxu1 %v6853_v29  ;;  %v8186_v53 = vpop.permute.xlu1 %4393 }
 0x19e   : > { %v1042_v31 = vpop.f32.mrb[28].mxu1 }
 0x19f   : > { %v1054_v57 = vadd.f32 %v1042_v31, %v8125_v8  ;;  %6473 = vmatmul.mubr.msk.bf16.vlgmr.msra.gmra.mrb[136].mxu0 %vm245_vm2, %v6471_v50  ;;  %v6637_v60 = vpop.f32.mrb[29].mxu1  ;;  %v4193_v8 = vsel %vm249_vm1, %v4183_v56, 0 }
 0x1a0   : > { %4057 = vmatpush1.bf16.msra.mxu0 %v3966_v2  ;;  %v1045_v12 = vpop.f32.mrb[30].mxu1  ;;  %4088 = vmatprep.mubr.bf16.mxu0 %v6843_v0  ;;  %v8197_v4 = vpop.permute.xlu0 %4395  ;;  %v4403_v2 = vsel %vm4399_vm7, %v8182_v51, %v8186_v53 }
 0x1a1   : > { %v6638_v63 = vpop.f32.mrb[31].mxu1  ;;  %6487 = vmatprep.subr.msk.bf16.mxu0 %vm249_vm1, %v4184_v11  ;;  %v8201_v20 = vpop.permute.xlu1 %4397  ;;  %v4402_v12 = vsel %vm4399_vm7, %v8170_v19, %v8182_v51  ;;  %v4404_v51 = vsel %vm4399_vm7, %v8186_v53, %v8197_v4 }
 0x1a2   : > { %v1136_v47 = vpop.f32.mrb[32].mxu0  ;;  %v4422_v53 = vsel %vm249_vm1, %v4404_v51, 0 }
 0x1a3   : > { %v1265_v44 = vadd.f32 %v1136_v47, %v1048_v16  ;;  %v1138_v3 = vpop.f32.mrb[33].mxu0  ;;  %6475 = vmatmul.mubr.msk.bf16.vlgmr.msra.gmra.mrb[136].mxu1 %vm245_vm2, %v6471_v50 }
 0x1a4   : > { %v1266_v18 = vadd.f32 %v1138_v3, %v1049_v22  ;;  %6718 = vmatpush3.bf16.msra.mxu1 %v3972_v62  ;;  %v1140_v7 = vpop.f32.mrb[34].mxu0  ;;  %6719 = vmatprep.mubr.msk.bf16.mxu1 %vm6854_vm3, %v6853_v29  ;;  %v8212_v10 = vpop.permute.xlu0 %4602  ;;  %v4405_v62 = vsel %vm4399_vm7, %v8197_v4, %v8201_v20  ;;  %v4416_v3 = vsel %vm249_vm1, %v4402_v12, 0 }
 0x1a5   : > { %v1141_v13 = vpop.f32.mrb[35].mxu0  ;;  %6489 = vmatprep.subr.msk.bf16.mxu1 %vm249_vm1, %v4186_v17  ;;  %v8216_v54 = vpop.permute.xlu1 %4604 }
 0x1a6   : > { %v1177_v59 = vpop.f32.mrb[32].mxu1 }
 0x1a7   : > { %v1267_v15 = vadd.f32 %v1177_v59, %v1050_v33  ;;  %v1179_v61 = vpop.f32.mrb[33].mxu1  ;;  %6477 = vmatmul.mubr.msk.bf16.vlgmr.msra.gmra.mrb[140].mxu0 %vm245_vm2, %v6471_v50 }
 0x1a8   : > { %v1268_v23 = vadd.f32 %v1179_v61, %v1051_v38  ;;  %4214 = vmatpush1.bf16.msra.mxu0 %v4193_v8  ;;  %v1181_v27 = vpop.f32.mrb[34].mxu1  ;;  %4245 = vmatprep.mubr.bf16.mxu0 %v6843_v0  ;;  %v8226_v16 = vpop.permute.xlu0 %4606 }
 0x1a9   : > { %v1182_v22 = vpop.f32.mrb[35].mxu1  ;;  %6491 = vmatprep.subr.msk.bf16.mxu0 %vm249_vm1, %v4188_v55  ;;  %v8230_v41 = vpop.permute.xlu1 %4608  ;;  %v6494_v55 = vld [vmem:[%s8673_s1 + $0x4c] sm:$0xf] }
 0x1aa   : > { %v1218_v1 = vpop.f32.mrb[36].mxu0 }
 0x1ab   : > { %v1269_v5 = vadd.f32 %v1218_v1, %v1052_v45  ;;  %v1220_v28 = vpop.f32.mrb[37].mxu0  ;;  %6720 = vmatmul.mubr.msk.bf16.vlgmr.msra.gmra.mrb[140].mxu1 %vm245_vm2, %v6471_v50  ;;  %v4211_v45 = vsel %vm249_vm1, %v8150_v58, 0  ;;  %v4400_v50 = vsel %vm4399_vm7, %v8154_v35, %v8166_v40  ;;  %v4428_v1 = vsel %vm249_vm1, %v8201_v20, 0 }
 0x1ac   : > { %v1270_v30 = vadd.f32 %v1220_v28, %v1053_v48  ;;  %4255 = vmatpush1.bf16.msra.mxu1 %v4199_v21  ;;  %v1222_v32 = vpop.f32.mrb[38].mxu0  ;;  %4286 = vmatprep.mubr.bf16.mxu1 %v6843_v0  ;;  %v8240_v33 = vpop.permute.xlu0 %4610 }
 0x1ad   : > { %v1223_v38 = vpop.f32.mrb[39].mxu0  ;;  %6723 = vmatprep.subr.bf16.mxu1 %v6853_v29  ;;  %v8244_v52 = vpop.permute.xlu1 %4612  ;;  %v4620_v32 = vsel %vm4616_vm8, %v8230_v41, %v8240_v33 }
 0x1ae   : > { %v1259_v26 = vpop.f32.mrb[36].mxu1 }
 0x1af   : > { %v1271_v42 = vadd.f32 %v1259_v26, %v1054_v57  ;;  %6488 = vmatmul.mubr.msk.bf16.vlgmr.msra.gmra.mrb[144].mxu0 %vm245_vm2, %v6479_v9  ;;  %v6643_v6 = vpop.f32.mrb[37].mxu1  ;;  %v4410_v57 = vsel %vm249_vm1, %v4400_v50, 0 }
 0x1b0   : > { %4296 = vmatpush1.bf16.msra.mxu0 %v4205_v37  ;;  %v1262_v43 = vpop.f32.mrb[38].mxu1  ;;  %4327 = vmatprep.mubr.bf16.mxu0 %v6843_v0  ;;  %v8251_v25 = vpop.permute.xlu0 %4614 }
 0x1b1   : > { %v6644_v46 = vpop.f32.mrb[39].mxu1  ;;  %6495 = vmatprep.subr.msk.bf16.mxu0 %vm249_vm1, %v4401_v39  ;;  %v8256_v48 = vpop.permute.xlu1 %4819  ;;  %v4622_v6 = vsel %vm4616_vm8, %v8244_v52, %v8251_v25 }
 0x1b2   : > { %v1353_v49 = vpop.f32.mrb[40].mxu0 }
 0x1b3   : > { %v1482_v36 = vadd.f32 %v1353_v49, %v1265_v44  ;;  %v1355_v31 = vpop.f32.mrb[41].mxu0  ;;  %6490 = vmatmul.mubr.msk.bf16.vlgmr.msra.gmra.mrb[144].mxu1 %vm245_vm2, %v6479_v9 }
 0x1b4   : > { %v1483_v34 = vadd.f32 %v1355_v31, %v1266_v18  ;;  %6724 = vmatpush3.bf16.msra.mxu1 %v4211_v45  ;;  %v1357_v58 = vpop.f32.mrb[42].mxu0  ;;  %6725 = vmatprep.mubr.msk.bf16.mxu1 %vm6854_vm3, %v6853_v29  ;;  %v8267_v11 = vpop.permute.xlu0 %4821  ;;  %v4621_v31 = vsel %vm4616_vm8, %v8240_v33, %v8244_v52 }
 0x1b5   : > { %v1358_v60 = vpop.f32.mrb[43].mxu0  ;;  %6497 = vmatprep.subr.msk.bf16.mxu1 %vm249_vm1, %v4403_v2  ;;  %v8271_v35 = vpop.permute.xlu1 %4823 }
 0x1b6   : > { %v1394_v40 = vpop.f32.mrb[40].mxu1 }
 0x1b7   : > { %v1484_v63 = vadd.f32 %v1394_v40, %v1267_v15  ;;  %v1396_v47 = vpop.f32.mrb[41].mxu1  ;;  %6492 = vmatmul.mubr.msk.bf16.vlgmr.msra.gmra.mrb[148].mxu0 %vm245_vm2, %v6479_v9  ;;  %v6502_v40 = vld [vmem:[%s8673_s1 + $0x50] sm:$0xf] }
 0x1b8   : > { %v1485_v56 = vadd.f32 %v1396_v47, %v1268_v23  ;;  %4431 = vmatpush1.bf16.msra.mxu0 %v4410_v57  ;;  %v1398_v17 = vpop.f32.mrb[42].mxu1  ;;  %4462 = vmatprep.mubr.bf16.mxu0 %v6843_v0  ;;  %v8281_v44 = vpop.permute.xlu0 %4825  ;;  %v4618_v23 = vsel %vm4616_vm8, %v8216_v54, %v8226_v16  ;;  %v4835_v47 = vsel %vm4833_vm9, %v8267_v11, %v8271_v35 }
 0x1b9   : > { %v1399_v18 = vpop.f32.mrb[43].mxu1  ;;  %6499 = vmatprep.subr.msk.bf16.mxu0 %vm249_vm1, %v4405_v62  ;;  %v8289_v13 = vpop.permute.xlu1 %4827  ;;  %v4639_v62 = vsel %vm249_vm1, %v4621_v31, 0 }
 0x1ba   : > { %v1435_v19 = vpop.f32.mrb[44].mxu0  ;;  %v4645_v18 = vsel %vm249_vm1, %v8251_v25, 0 }
 0x1bb   : > { %v1486_v7 = vadd.f32 %v1435_v19, %v1269_v5  ;;  %v1437_v8 = vpop.f32.mrb[45].mxu0  ;;  %6726 = vmatmul.mubr.msk.bf16.vlgmr.msra.gmra.mrb[148].mxu1 %vm245_vm2, %v6479_v9 }
 0x1bc   : > { %v1487_v59 = vadd.f32 %v1437_v8, %v1270_v30  ;;  %4472 = vmatpush1.bf16.msra.mxu1 %v4416_v3  ;;  %v1439_v14 = vpop.f32.mrb[46].mxu0  ;;  %4503 = vmatprep.mubr.bf16.mxu1 %v6843_v0  ;;  %v8295_v15 = vpop.permute.xlu0 %4829  ;;  %v4617_v30 = vsel %vm4616_vm8, %v8212_v10, %v8216_v54  ;;  %v4619_v54 = vsel %vm4616_vm8, %v8226_v16, %v8230_v41 }
 0x1bd   : > { %v1440_v4 = vpop.f32.mrb[47].mxu0  ;;  %6729 = vmatprep.subr.bf16.mxu1 %v6853_v29  ;;  %v8315_v9 = vpop.permute.xlu1 %4831  ;;  %v4627_v39 = vsel %vm249_vm1, %v4617_v30, 0  ;;  %v4837_v8 = vsel %vm4833_vm9, %v8281_v44, %v8289_v13 }
 0x1be   : > { %v1476_v61 = vpop.f32.mrb[44].mxu1 }
 0x1bf   : > { %v1488_v27 = vadd.f32 %v1476_v61, %v1271_v42  ;;  %6496 = vmatmul.mubr.msk.bf16.vlgmr.msra.gmra.mrb[152].mxu0 %vm245_vm2, %v6494_v55  ;;  %v6649_v21 = vpop.f32.mrb[45].mxu1 }
 0x1c0   : > { %4513 = vmatpush1.bf16.msra.mxu0 %v4422_v53  ;;  %v1479_v22 = vpop.f32.mrb[46].mxu1  ;;  %4544 = vmatprep.mubr.bf16.mxu0 %v6843_v0  ;;  %v8307_v5 = vpop.permute.xlu0 %5036 }
 0x1c1   : > { %v6650_v24 = vpop.f32.mrb[47].mxu1  ;;  %6503 = vmatprep.subr.msk.bf16.mxu0 %vm249_vm1, %v4618_v23  ;;  %v8328_v43 = vpop.permute.xlu1 %5038  ;;  %v4836_v23 = vsel %vm4833_vm9, %v8271_v35, %v8281_v44 }
 0x1c2   : > { %v1570_v28 = vpop.f32.mrb[48].mxu0  ;;  %v5051_v31 = vsel %vm5050_vm10, %v8307_v5, %v8328_v43 }
 0x1c3   : > { %v1699_v37 = vadd.f32 %v1570_v28, %v1482_v36  ;;  %v1572_v38 = vpop.f32.mrb[49].mxu0  ;;  %6498 = vmatmul.mubr.msk.bf16.vlgmr.msra.gmra.mrb[152].mxu1 %vm245_vm2, %v6494_v55  ;;  %v4633_v36 = vsel %vm249_vm1, %v4619_v54, 0  ;;  %v5061_v5 = vsel %vm249_vm1, %v5051_v31, 0 }
 0x1c4   : > { %v1700_v20 = vadd.f32 %v1572_v38, %v1483_v34  ;;  %6730 = vmatpush3.bf16.msra.mxu1 %v4428_v1  ;;  %v1574_v26 = vpop.f32.mrb[50].mxu0  ;;  %6731 = vmatprep.mubr.msk.bf16.mxu1 %vm6854_vm3, %v6853_v29  ;;  %v8331_v49 = vpop.permute.xlu0 %5040 }
 0x1c5   : > { %v1575_v42 = vpop.f32.mrb[51].mxu0  ;;  %6505 = vmatprep.subr.msk.bf16.mxu1 %vm249_vm1, %v4620_v32  ;;  %v8344_v12 = vpop.permute.xlu1 %5042  ;;  %v4850_v32 = vsel %vm249_vm1, %v4836_v23, 0 }
 0x1c6   : > { %v1611_v10 = vpop.f32.mrb[48].mxu1  ;;  %v6510_v42 = vld [vmem:[%s8673_s1 + $0x54] sm:$0xf] }
 0x1c7   : > { %v1701_v45 = vadd.f32 %v1611_v10, %v1484_v63  ;;  %v1613_v46 = vpop.f32.mrb[49].mxu1  ;;  %6500 = vmatmul.mubr.msk.bf16.vlgmr.msra.gmra.mrb[156].mxu0 %vm245_vm2, %v6494_v55 }
 0x1c8   : > { %v1702_v50 = vadd.f32 %v1613_v46, %v1485_v56  ;;  %4648 = vmatpush1.bf16.msra.mxu0 %v4627_v39  ;;  %v1615_v2 = vpop.f32.mrb[50].mxu1  ;;  %4679 = vmatprep.mubr.bf16.mxu0 %v6843_v0  ;;  %v8348_v33 = vpop.permute.xlu0 %5044 }
 0x1c9   : > { %v1616_v16 = vpop.f32.mrb[51].mxu1  ;;  %6507 = vmatprep.subr.msk.bf16.mxu0 %vm249_vm1, %v4622_v6  ;;  %v5052_v6 = vsel %vm5050_vm10, %v8328_v43, %v8331_v49 }
 0x1ca   : > { %v1652_v41 = vpop.f32.mrb[52].mxu0 }
 0x1cb   : > { %v1703_v34 = vadd.f32 %v1652_v41, %v1486_v7  ;;  %v1654_v58 = vpop.f32.mrb[53].mxu0  ;;  %6732 = vmatmul.mubr.msk.bf16.vlgmr.msra.gmra.mrb[156].mxu1 %vm245_vm2, %v6494_v55  ;;  %v4834_v7 = vsel %vm4833_vm9, %v8256_v48, %v8267_v11 }
 0x1cc   : > { %v1704_v57 = vadd.f32 %v1654_v58, %v1487_v59  ;;  %4689 = vmatpush1.bf16.msra.mxu1 %v4633_v36  ;;  %v1656_v60 = vpop.f32.mrb[54].mxu0  ;;  %4720 = vmatprep.mubr.bf16.mxu1 %v6843_v0  ;;  %v8364_v59 = vpop.permute.xlu1 %5046  ;;  %v4844_v48 = vsel %vm249_vm1, %v4834_v7, 0  ;;  %v4862_v36 = vsel %vm249_vm1, %v8315_v9, 0 }
 0x1cd   : > { %v1657_v63 = vpop.f32.mrb[55].mxu0  ;;  %6735 = vmatprep.subr.bf16.mxu1 %v6853_v29  ;;  %v8367_v53 = vpop.permute.xlu0 %5048 }
 0x1ce   : > { %v1693_v52 = vpop.f32.mrb[52].mxu1 }
 0x1cf   : > { %v1705_v56 = vadd.f32 %v1693_v52, %v1488_v27  ;;  %6504 = vmatmul.mubr.msk.bf16.vlgmr.msra.gmra.mrb[160].mxu0 %vm245_vm2, %v6502_v40  ;;  %v6655_v17 = vpop.f32.mrb[53].mxu1  ;;  %v4839_v27 = vsel %vm4833_vm9, %v8295_v15, %v8315_v9  ;;  %v5053_v52 = vsel %vm5050_vm10, %v8331_v49, %v8344_v12 }
 0x1d0   : > { %4730 = vmatpush1.bf16.msra.mxu0 %v4639_v62  ;;  %v1696_v3 = vpop.f32.mrb[54].mxu1  ;;  %4761 = vmatprep.mubr.bf16.mxu0 %v6843_v0  ;;  %v8383_v30 = vpop.permute.xlu1 %5253 }
 0x1d1   : > { %v6656_v19 = vpop.f32.mrb[55].mxu1  ;;  %6511 = vmatprep.subr.msk.bf16.mxu0 %vm249_vm1, %v4835_v47  ;;  %v8380_v1 = vpop.permute.xlu0 %5255  ;;  %v5056_v47 = vsel %vm5050_vm10, %v8364_v59, %v8367_v53 }
 0x1d2   : > { %v1787_v51 = vpop.f32.mrb[56].mxu0  ;;  %v5067_v19 = vsel %vm249_vm1, %v5053_v52, 0 }
 0x1d3   : > { %v1916_v14 = vadd.f32 %v1787_v51, %v1699_v37  ;;  %v1789_v55 = vpop.f32.mrb[57].mxu0  ;;  %6506 = vmatmul.mubr.msk.bf16.vlgmr.msra.gmra.mrb[160].mxu1 %vm245_vm2, %v6502_v40  ;;  %v4838_v37 = vsel %vm4833_vm9, %v8289_v13, %v8295_v15 }
 0x1d4   : > { %v1917_v25 = vadd.f32 %v1789_v55, %v1700_v20  ;;  %6736 = vmatpush3.bf16.msra.mxu1 %v4645_v18  ;;  %v1791_v4 = vpop.f32.mrb[58].mxu0  ;;  %6737 = vmatprep.mubr.msk.bf16.mxu1 %vm6854_vm3, %v6853_v29  ;;  %v4856_v10 = vsel %vm249_vm1, %v4838_v37, 0 }
 0x1d5   : > { %v1792_v11 = vpop.f32.mrb[59].mxu0  ;;  %6513 = vmatprep.subr.msk.bf16.mxu1 %vm249_vm1, %v4837_v8  ;;  %v8397_v13 = vpop.permute.xlu0 %5259 }
 0x1d6   : > { %v1828_v61 = vpop.f32.mrb[56].mxu1 }
 0x1d7   : > { %v1918_v21 = vadd.f32 %v1828_v61, %v1701_v45  ;;  %v1830_v22 = vpop.f32.mrb[57].mxu1  ;;  %6508 = vmatmul.mubr.msk.bf16.vlgmr.msra.gmra.mrb[164].mxu0 %vm245_vm2, %v6502_v40  ;;  %v8402_v45 = vpop.permute.xlu1 %5257 }
 0x1d8   : > { %v1919_v24 = vadd.f32 %v1830_v22, %v1702_v50  ;;  %4865 = vmatpush1.bf16.msra.mxu0 %v4844_v48  ;;  %v1832_v28 = vpop.f32.mrb[58].mxu1  ;;  %4896 = vmatprep.mubr.bf16.mxu0 %v6843_v0  ;;  %v6518_v48 = vld [vmem:[%s8673_s1 + $0x58] sm:$0xf] }
 0x1d9   : > { %v1833_v35 = vpop.f32.mrb[59].mxu1  ;;  %6515 = vmatprep.subr.msk.bf16.mxu0 %vm249_vm1, %v4839_v27  ;;  %v8416_v60 = vpop.permute.xlu0 %5263  ;;  %v5079_v28 = vsel %vm249_vm1, %v8367_v53, 0 }
 0x1da   : > { %v1869_v44 = vpop.f32.mrb[60].mxu0 }
 0x1db   : > { %v1920_v38 = vadd.f32 %v1869_v44, %v1703_v34  ;;  %v1871_v20 = vpop.f32.mrb[61].mxu0  ;;  %6738 = vmatmul.mubr.msk.bf16.vlgmr.msra.gmra.mrb[164].mxu1 %vm245_vm2, %v6502_v40  ;;  %v5054_v34 = vsel %vm5050_vm10, %v8344_v12, %v8348_v33  ;;  %v8420_v62 = vpop.permute.xlu1 %5261  ;;  %v5055_v12 = vsel %vm5050_vm10, %v8348_v33, %v8364_v59  ;;  %v5269_v59 = vsel %vm5267_vm11, %v8380_v1, %v8402_v45 }
 0x1dc   : > { %v1921_v26 = vadd.f32 %v1871_v20, %v1704_v57  ;;  %4906 = vmatpush1.bf16.msra.mxu1 %v4850_v32  ;;  %v1873_v39 = vpop.f32.mrb[62].mxu0  ;;  %4937 = vmatprep.mubr.bf16.mxu1 %v6843_v0  ;;  %v5073_v11 = vsel %vm249_vm1, %v5055_v12, 0  ;;  %v5268_v44 = vsel %vm5267_vm11, %v8383_v30, %v8380_v1  ;;  %v5271_v37 = vsel %vm5267_vm11, %v8397_v13, %v8420_v62 }
 0x1dd   : > { %v1874_v54 = vpop.f32.mrb[63].mxu0  ;;  %6741 = vmatprep.subr.bf16.mxu1 %v6853_v29  ;;  %v8434_v7 = vpop.permute.xlu0 %5470 }
 0x1de   : > { %v1910_v15 = vpop.f32.mrb[60].mxu1  ;;  %v5270_v54 = vsel %vm5267_vm11, %v8402_v45, %v8397_v13  ;;  %v5272_v13 = vsel %vm5267_vm11, %v8420_v62, %v8416_v60 }
 0x1df   : > { %v1922_v46 = vadd.f32 %v1910_v15, %v1705_v56  ;;  %6512 = vmatmul.mubr.msk.bf16.vlgmr.msra.gmra.mrb[168].mxu0 %vm245_vm2, %v6510_v42  ;;  %v6661_v50 = vpop.f32.mrb[61].mxu1  ;;  %v8439_v8 = vpop.permute.xlu1 %5265 }
 0x1e0   : > { %4947 = vmatpush1.bf16.msra.mxu0 %v4856_v10  ;;  %v1913_v2 = vpop.f32.mrb[62].mxu1  ;;  %4978 = vmatprep.mubr.bf16.mxu0 %v6843_v0  ;;  %v5273_v15 = vsel %vm5267_vm11, %v8416_v60, %v8439_v8 }
 0x1e1   : > { %v6662_v16 = vpop.f32.mrb[63].mxu1  ;;  %6519 = vmatprep.subr.msk.bf16.mxu0 %vm249_vm1, %v5052_v6  ;;  %v8454_v22 = vpop.permute.xlu0 %5474 }
 0x1e2   : > { %v2004_v41 = vpop.f32.mrb[64].mxu0 }
 0x1e3   : > { %v2133_v58 = vadd.f32 %v2004_v41, %v1916_v14  ;;  %v2006_v57 = vpop.f32.mrb[65].mxu0  ;;  %6514 = vmatmul.mubr.msk.bf16.vlgmr.msra.gmra.mrb[168].mxu1 %vm245_vm2, %v6510_v42  ;;  %v8451_v23 = vpop.permute.xlu1 %5472 }
 0x1e4   : > { %v2134_v40 = vadd.f32 %v2006_v57, %v1917_v25  ;;  %6742 = vmatpush3.bf16.msra.mxu1 %v4862_v36  ;;  %v2008_v9 = vpop.f32.mrb[66].mxu0  ;;  %6743 = vmatprep.mubr.msk.bf16.mxu1 %vm6854_vm3, %v6853_v29  ;;  %v5284_v36 = vsel %vm249_vm1, %v5270_v54, 0 }
 0x1e5   : > { %v2009_v43 = vpop.f32.mrb[67].mxu0  ;;  %6521 = vmatprep.subr.msk.bf16.mxu1 %vm249_vm1, %v5054_v34  ;;  %v8473_v1 = vpop.permute.xlu0 %5478  ;;  %v6526_v9 = vld [vmem:[%s8673_s1 + $0x5c] sm:$0xf] }
 0x1e6   : > { %v2045_v63 = vpop.f32.mrb[64].mxu1  ;;  %v5486_v43 = vsel %vm5484_vm12, %v8451_v23, %v8454_v22 }
 0x1e7   : > { %v2135_v56 = vadd.f32 %v2045_v63, %v1918_v21  ;;  %v2047_v17 = vpop.f32.mrb[65].mxu1  ;;  %6516 = vmatmul.mubr.msk.bf16.vlgmr.msra.gmra.mrb[172].mxu0 %vm245_vm2, %v6510_v42  ;;  %v8469_v53 = vpop.permute.xlu1 %5476 }
 0x1e8   : > { %v2136_v3 = vadd.f32 %v2047_v17, %v1919_v24  ;;  %5082 = vmatpush1.bf16.msra.mxu0 %v5061_v5  ;;  %v2049_v18 = vpop.f32.mrb[66].mxu1  ;;  %5113 = vmatprep.mubr.bf16.mxu0 %v6843_v0  ;;  %v5290_v5 = vsel %vm249_vm1, %v5272_v13, 0 }
 0x1e9   : > { %v2050_v51 = vpop.f32.mrb[67].mxu1  ;;  %6523 = vmatprep.subr.msk.bf16.mxu0 %vm249_vm1, %v5056_v47 }
 0x1ea   : > { %v2086_v49 = vpop.f32.mrb[68].mxu0  ;;  %v5485_v51 = vsel %vm5484_vm12, %v8434_v7, %v8451_v23 }
 0x1eb   : > { %v2137_v14 = vadd.f32 %v2086_v49, %v1920_v38  ;;  %v2088_v55 = vpop.f32.mrb[69].mxu0  ;;  %6744 = vmatmul.mubr.msk.bf16.vlgmr.msra.gmra.mrb[172].mxu1 %vm245_vm2, %v6510_v42  ;;  %v5278_v42 = vsel %vm249_vm1, %v5268_v44, 0  ;;  %v5481_v45 = vpop.permute.xlu1 %5480  ;;  %v5488_v49 = vsel %vm5484_vm12, %v8469_v53, %v8473_v1  ;;  %v5495_v7 = vsel %vm249_vm1, %v5485_v51, 0 }
 0x1ec   : > { %v2138_v25 = vadd.f32 %v2088_v55, %v1921_v26  ;;  %5123 = vmatpush1.bf16.msra.mxu1 %v5067_v19  ;;  %v2090_v4 = vpop.f32.mrb[70].mxu0  ;;  %5154 = vmatprep.mubr.bf16.mxu1 %v6843_v0 }
 0x1ed   : > { %v2091_v61 = vpop.f32.mrb[71].mxu0  ;;  %6747 = vmatprep.subr.bf16.mxu1 %v6853_v29 }
 0x1ee   : > { %v2127_v33 = vpop.f32.mrb[68].mxu1  ;;  %v5487_v61 = vsel %vm5484_vm12, %v8454_v22, %v8469_v53  ;;  %v5489_v22 = vsel %vm5484_vm12, %v8473_v1, %v5481_v45 }
 0x1ef   : > { %v2139_v27 = vadd.f32 %v2127_v33, %v1922_v46  ;;  %6520 = vmatmul.mubr.msk.bf16.vlgmr.msra.gmra.mrb[176].mxu0 %vm245_vm2, %v6518_v48  ;;  %v6667_v21 = vpop.f32.mrb[69].mxu1  ;;  %v8504_v17 = vpop.permute.xlu1 %5687 }
 0x1f0   : > { %5164 = vmatpush1.bf16.msra.mxu0 %v5073_v11  ;;  %v2130_v24 = vpop.f32.mrb[70].mxu1  ;;  %5195 = vmatprep.mubr.bf16.mxu0 %v6843_v0 }
 0x1f1   : > { %v6668_v32 = vpop.f32.mrb[71].mxu1  ;;  %6527 = vmatprep.subr.msk.bf16.mxu0 %vm249_vm1, %v5269_v59 }
 0x1f2   : > { %v2248_v35 = vpop.f32.mrb[72].mxu0 }
 0x1f3   : > { %v2377_v38 = vadd.f32 %v2248_v35, %v2133_v58  ;;  %v2250_v20 = vpop.f32.mrb[73].mxu0  ;;  %6522 = vmatmul.mubr.msk.bf16.vlgmr.msra.gmra.mrb[176].mxu1 %vm245_vm2, %v6518_v48  ;;  %v8489_v58 = vpop.permute.xlu0 %5482 }
 0x1f4   : > { %v2378_v26 = vadd.f32 %v2250_v20, %v2134_v40  ;;  %6748 = vmatpush3.bf16.msra.mxu1 %v5079_v28  ;;  %v2252_v39 = vpop.f32.mrb[74].mxu0  ;;  %6749 = vmatprep.mubr.msk.bf16.mxu1 %vm6854_vm3, %v6853_v29  ;;  %v5490_v33 = vsel %vm5484_vm12, %v5481_v45, %v8489_v58  ;;  %v5692_v59 = vpop.permute.xlu1 %5691  ;;  %v5501_v28 = vsel %vm249_vm1, %v5487_v61, 0 }
 0x1f5   : > { %v2253_v10 = vpop.f32.mrb[75].mxu0  ;;  %6529 = vmatprep.subr.msk.bf16.mxu1 %vm249_vm1, %v5271_v37  ;;  %v6534_v39 = vld [vmem:[%s8673_s1 + $0x60] sm:$0xf] }
 0x1f6   : > { %v2289_v30 = vpop.f32.mrb[72].mxu1 }
 0x1f7   : > { %v2379_v6 = vadd.f32 %v2289_v30, %v2135_v56  ;;  %v2291_v46 = vpop.f32.mrb[73].mxu1  ;;  %6524 = vmatmul.mubr.msk.bf16.vlgmr.msra.gmra.mrb[180].mxu0 %vm245_vm2, %v6518_v48  ;;  %v8501_v47 = vpop.permute.xlu0 %5689 }
 0x1f8   : > { %v2380_v50 = vadd.f32 %v2291_v46, %v2136_v3  ;;  %5299 = vmatpush1.bf16.msra.mxu0 %v5278_v42  ;;  %v2293_v2 = vpop.f32.mrb[74].mxu1  ;;  %5330 = vmatprep.mubr.bf16.mxu0 %v6843_v0  ;;  %v5296_v3 = vsel %vm249_vm1, %v8439_v8, 0  ;;  %v6119_v8 = vld [vmem:[%s8674_s2] sm:$0xff]  ;;  %v5696_v53 = vpop.permute.xlu1 %5695  ;;  %v5507_v42 = vsel %vm249_vm1, %v5489_v22, 0  ;;  %v5703_v30 = vsel %vm5701_vm13, %v8501_v47, %v5692_v59 }
 0x1f9   : > { %v2294_v16 = vpop.f32.mrb[75].mxu1  ;;  %6531 = vmatprep.subr.msk.bf16.mxu0 %vm249_vm1, %v5273_v15  ;;  %6122 = vperm.xlu1 %6815, %v6119_v8   ;;  %v5513_v46 = vsel %vm249_vm1, %v8489_v58, 0 }
 0x1fa   : > { %v2330_v41 = vpop.f32.mrb[76].mxu0  ;;  %v5702_v16 = vsel %vm5701_vm13, %v8504_v17, %v8501_v47 }
 0x1fb   : > { %v2381_v31 = vadd.f32 %v2330_v41, %v2137_v14  ;;  %v2332_v34 = vpop.f32.mrb[77].mxu0  ;;  %6750 = vmatmul.mubr.msk.bf16.vlgmr.msra.gmra.mrb[180].mxu1 %vm245_vm2, %v6518_v48  ;;  %v5694_v48 = vpop.permute.xlu0 %5693  ;;  %v5712_v58 = vsel %vm249_vm1, %v5702_v16, 0 }
 0x1fc   : > { %v2382_v57 = vadd.f32 %v2332_v34, %v2138_v25  ;;  %5340 = vmatpush1.bf16.msra.mxu1 %v5284_v36  ;;  %v2334_v40 = vpop.f32.mrb[78].mxu0  ;;  %5371 = vmatprep.mubr.bf16.mxu1 %v6843_v0  ;;  %v5705_v41 = vsel %vm5701_vm13, %v5694_v48, %v5696_v53  ;;  %v5700_v13 = vpop.permute.xlu1 %5699 }
 0x1fd   : > { %v2335_v60 = vpop.f32.mrb[79].mxu0  ;;  %6753 = vmatprep.subr.bf16.mxu1 %v6853_v29 }
 0x1fe   : > { %v2371_v62 = vpop.f32.mrb[76].mxu1 }
 0x1ff   : > { %v2383_v63 = vadd.f32 %v2371_v62, %v2139_v27  ;;  %6528 = vmatmul.mubr.msk.bf16.vlgmr.msra.gmra.mrb[184].mxu0 %vm245_vm2, %v6526_v9  ;;  %v6673_v52 = vpop.f32.mrb[77].mxu1 }
 0x200   : > { %5381 = vmatpush1.bf16.msra.mxu0 %v5290_v5  ;;  %v2374_v56 = vpop.f32.mrb[78].mxu1  ;;  %5412 = vmatprep.mubr.bf16.mxu0 %v6843_v0  ;;  %v5704_v5 = vsel %vm5701_vm13, %v5692_v59, %v5694_v48  ;;  %v5907_v62 = vpop.permute.xlu1 %5906 }
 0x201   : > { %v6674_v18 = vpop.f32.mrb[79].mxu1  ;;  %6535 = vmatprep.subr.msk.bf16.mxu0 %vm249_vm1, %v5486_v43  ;;  %v5718_v17 = vsel %vm249_vm1, %v5704_v5, 0 }
 0x202   : > { %v2468_v19 = vpop.f32.mrb[80].mxu0 }
 0x203   : > { %v2597_v12 = vadd.f32 %v2468_v19, %v2377_v38  ;;  %v2470_v14 = vpop.f32.mrb[81].mxu0  ;;  %6530 = vmatmul.mubr.msk.bf16.vlgmr.msra.gmra.mrb[184].mxu1 %vm245_vm2, %v6526_v9  ;;  %v5698_v38 = vpop.permute.xlu0 %5697 }
 0x204   : > { %v2598_v55 = vadd.f32 %v2470_v14, %v2378_v26  ;;  %6754 = vmatpush3.bf16.msra.mxu1 %v5296_v3  ;;  %v2472_v25 = vpop.f32.mrb[82].mxu0  ;;  %6755 = vmatprep.mubr.msk.bf16.mxu1 %vm6854_vm3, %v6853_v29  ;;  %v5707_v60 = vsel %vm5701_vm13, %v5698_v38, %v5700_v13  ;;  %v5706_v19 = vsel %vm5701_vm13, %v5696_v53, %v5698_v38 }
 0x205   : > { %v2473_v4 = vpop.f32.mrb[83].mxu0  ;;  %6537 = vmatprep.subr.msk.bf16.mxu1 %vm249_vm1, %v5488_v49  ;;  %v5911_v25 = vpop.permute.xlu1 %5910  ;;  %v5724_v8 = vsel %vm249_vm1, %v5706_v19, 0 }
 0x206   : > { %v2509_v11 = vpop.f32.mrb[80].mxu1 }
 0x207   : > { %v2599_v23 = vadd.f32 %v2509_v11, %v2379_v6  ;;  %v2511_v27 = vpop.f32.mrb[81].mxu1  ;;  %6532 = vmatmul.mubr.msk.bf16.vlgmr.msra.gmra.mrb[188].mxu0 %vm245_vm2, %v6526_v9  ;;  %v5905_v2 = vpop.permute.xlu0 %5904 }
 0x208   : > { %v2600_v21 = vadd.f32 %v2511_v27, %v2380_v50  ;;  %5516 = vmatpush1.bf16.msra.mxu0 %v5495_v7  ;;  %v2513_v24 = vpop.f32.mrb[82].mxu1  ;;  %5547 = vmatprep.mubr.bf16.mxu0 %v6843_v0 }
 0x209   : > { %v2514_v32 = vpop.f32.mrb[83].mxu1  ;;  %6539 = vmatprep.subr.msk.bf16.mxu0 %vm249_vm1, %v5490_v33  ;;  %v5919_v24 = vsel %vm5918_vm14, %v5905_v2, %v5907_v62 }
 0x20a   : > { %v2550_v35 = vpop.f32.mrb[84].mxu0  ;;  %v5915_v32 = vpop.permute.xlu1 %5914 }
 0x20b   : > { %v2601_v44 = vadd.f32 %v2550_v35, %v2381_v31  ;;  %v2552_v37 = vpop.f32.mrb[85].mxu0  ;;  %6756 = vmatmul.mubr.msk.bf16.vlgmr.msra.gmra.mrb[188].mxu1 %vm245_vm2, %v6526_v9  ;;  %v5909_v52 = vpop.permute.xlu0 %5908 }
 0x20c   : > { %v2602_v20 = vadd.f32 %v2552_v37, %v2382_v57  ;;  %5557 = vmatpush1.bf16.msra.mxu1 %v5501_v28  ;;  %v2554_v26 = vpop.f32.mrb[86].mxu0  ;;  %5588 = vmatprep.mubr.bf16.mxu1 %v6843_v0  ;;  %v5920_v11 = vsel %vm5918_vm14, %v5907_v62, %v5909_v52  ;;  %v5921_v53 = vsel %vm5918_vm14, %v5909_v52, %v5911_v25 }
 0x20d   : > { %v2555_v10 = vpop.f32.mrb[87].mxu0  ;;  %6759 = vmatprep.subr.bf16.mxu1 %v6853_v29 }
 0x20e   : > { %v2591_v1 = vpop.f32.mrb[84].mxu1 }
 0x20f   : > { %v2603_v54 = vadd.f32 %v2591_v1, %v2383_v63  ;;  %6536 = vmatmul.mubr.msk.bf16.vlgmr.msra.gmra.mrb[192].mxu0 %vm245_vm2, %v6534_v39  ;;  %v6679_v15 = vpop.f32.mrb[85].mxu1  ;;  %v5913_v4 = vpop.permute.xlu0 %5912 }
 0x210   : > { %5598 = vmatpush1.bf16.msra.mxu0 %v5507_v42  ;;  %v2594_v6 = vpop.f32.mrb[86].mxu1  ;;  %5629 = vmatprep.mubr.bf16.mxu0 %v6843_v0  ;;  %v5922_v28 = vsel %vm5918_vm14, %v5911_v25, %v5913_v4  ;;  %v5935_v15 = vsel %vm249_vm1, %v5921_v53, 0 }
 0x211   : > { %v6680_v50 = vpop.f32.mrb[87].mxu1  ;;  %6543 = vmatprep.subr.msk.bf16.mxu0 %vm249_vm1, %v5703_v30 }
 0x212   : > { %v2688_v36 = vpop.f32.mrb[88].mxu0  ;;  %v5923_v50 = vsel %vm5918_vm14, %v5913_v4, %v5915_v32 }
 0x213   : > { %v2817_v45 = vadd.f32 %v2688_v36, %v2597_v12  ;;  %v2690_v31 = vpop.f32.mrb[89].mxu0  ;;  %6538 = vmatmul.mubr.msk.bf16.vlgmr.msra.gmra.mrb[192].mxu1 %vm245_vm2, %v6534_v39 }
 0x214   : > { %v2818_v34 = vadd.f32 %v2690_v31, %v2598_v55  ;;  %6760 = vmatpush3.bf16.msra.mxu1 %v5513_v46  ;;  %v2692_v57 = vpop.f32.mrb[90].mxu0  ;;  %6761 = vmatprep.mubr.msk.bf16.mxu1 %vm6854_vm3, %v6853_v29  ;;  %v6542_v55 = vld [vmem:[%s8673_s1 + $0x64] sm:$0xf] }
 0x215   : > { %v2693_v40 = vpop.f32.mrb[91].mxu0  ;;  %6545 = vmatprep.subr.msk.bf16.mxu1 %vm249_vm1, %v5705_v41 }
 0x216   : > { %v2729_v9 = vpop.f32.mrb[88].mxu1 }
 0x217   : > { %v2819_v43 = vadd.f32 %v2729_v9, %v2599_v23  ;;  %v2731_v63 = vpop.f32.mrb[89].mxu1  ;;  %6540 = vmatmul.mubr.msk.bf16.vlgmr.msra.gmra.mrb[196].mxu0 %vm245_vm2, %v6534_v39  ;;  %v5730_v23 = vsel %vm249_vm1, %v5700_v13, 0  ;;  %v6550_v13 = vld [vmem:[%s8673_s1 + $0x68] sm:$0xf] }
 0x218   : > { %v2820_v47 = vadd.f32 %v2731_v63, %v2600_v21  ;;  %5733 = vmatpush1.bf16.msra.mxu0 %v5712_v58  ;;  %v2733_v56 = vpop.f32.mrb[90].mxu1  ;;  %5764 = vmatprep.mubr.bf16.mxu0 %v6843_v0 }
 0x219   : > { %v2734_v3 = vpop.f32.mrb[91].mxu1  ;;  %6547 = vmatprep.subr.msk.bf16.mxu0 %vm249_vm1, %v5707_v60 }
 0x21a   : > { %v2770_v18 = vpop.f32.mrb[92].mxu0 }
 0x21b   : > { %v2821_v51 = vadd.f32 %v2770_v18, %v2601_v44  ;;  %v2772_v49 = vpop.f32.mrb[93].mxu0  ;;  %6762 = vmatmul.mubr.msk.bf16.vlgmr.msra.gmra.mrb[196].mxu1 %vm245_vm2, %v6534_v39  ;;  %v5917_v44 = vpop.permute.xlu0 %5916 }
 0x21c   : > { %v2822_v12 = vadd.f32 %v2772_v49, %v2602_v20  ;;  %5774 = vmatpush1.bf16.msra.mxu1 %v5718_v17  ;;  %v2774_v14 = vpop.f32.mrb[94].mxu0  ;;  %5805 = vmatprep.mubr.bf16.mxu1 %v6843_v0  ;;  %v5929_v20 = vsel %vm249_vm1, %v5919_v24, 0  ;;  %v5924_v42 = vsel %vm5918_vm14, %v5915_v32, %v5917_v44  ;;  %v5947_v9 = vsel %vm249_vm1, %v5917_v44, 0 }
 0x21d   : > { %v2775_v7 = vpop.f32.mrb[95].mxu0  ;;  %6765 = vmatprep.subr.bf16.mxu1 %v6853_v29 }
 0x21e   : > { %v2811_v48 = vpop.f32.mrb[92].mxu1 }
 0x21f   : > { %v2823_v61 = vadd.f32 %v2811_v48, %v2603_v54  ;;  %6544 = vmatmul.mubr.msk.bf16.vlgmr.msra.gmra.mrb[200].mxu0 %vm245_vm2, %v6542_v55  ;;  %v6685_v33 = vpop.f32.mrb[93].mxu1 }
 0x220   : > { %5815 = vmatpush1.bf16.msra.mxu0 %v5724_v8  ;;  %v2814_v59 = vpop.f32.mrb[94].mxu1  ;;  %5846 = vmatprep.mubr.bf16.mxu0 %v6843_v0 }
 0x221   : > { %v6686_v27 = vpop.f32.mrb[95].mxu1  ;;  %6551 = vmatprep.subr.msk.bf16.mxu0 %vm249_vm1, %v5920_v11 }
 0x222   : > { %v2908_v21 = vpop.f32.mrb[96].mxu0 }
 0x223   : > { %v3037_v35 = vadd.f32 %v2908_v21, %v2817_v45  ;;  %v2910_v22 = vpop.f32.mrb[97].mxu0  ;;  %6546 = vmatmul.mubr.msk.bf16.vlgmr.msra.gmra.mrb[200].mxu1 %vm245_vm2, %v6542_v55  ;;  %v5941_v45 = vsel %vm249_vm1, %v5923_v50, 0 }
 0x224   : > { %v3038_v37 = vadd.f32 %v2910_v22, %v2818_v34  ;;  %6766 = vmatpush3.bf16.msra.mxu1 %v5730_v23  ;;  %v2912_v38 = vpop.f32.mrb[98].mxu0  ;;  %6767 = vmatprep.mubr.msk.bf16.mxu1 %vm6854_vm3, %v6853_v29 }
 0x225   : > { %v2913_v26 = vpop.f32.mrb[99].mxu0  ;;  %6553 = vmatprep.subr.msk.bf16.mxu1 %vm249_vm1, %v5922_v28 }
 0x226   : > { %v2949_v39 = vpop.f32.mrb[96].mxu1 }
 0x227   : > { %v3039_v10 = vadd.f32 %v2949_v39, %v2819_v43  ;;  %v2951_v1 = vpop.f32.mrb[97].mxu1  ;;  %6548 = vmatmul.mubr.msk.bf16.vlgmr.msra.gmra.mrb[204].mxu0 %vm245_vm2, %v6542_v55 }
 0x228   : > { %v3040_v30 = vadd.f32 %v2951_v1, %v2820_v47  ;;  %5950 = vmatpush1.bf16.msra.mxu0 %v5929_v20  ;;  %v2953_v54 = vpop.f32.mrb[98].mxu1  ;;  %5981 = vmatprep.mubr.bf16.mxu0 %v6843_v0 }
 0x229   : > { %v2954_v6 = vpop.f32.mrb[99].mxu1  ;;  %6555 = vmatprep.subr.msk.bf16.mxu0 %vm249_vm1, %v5924_v42  ;;  %vm6181_vm1 = vcmask 261120  }
 0x22a   : > { %v2990_v46 = vpop.f32.mrb[100].mxu0 }
 0x22b   : > { %v3041_v2 = vadd.f32 %v2990_v46, %v2821_v51  ;;  %v2992_v36 = vpop.f32.mrb[101].mxu0  ;;  %6768 = vmatmul.mubr.msk.bf16.vlgmr.msra.gmra.mrb[204].mxu1 %vm245_vm2, %v6542_v55 }
 0x22c   : > { %v3042_v16 = vadd.f32 %v2992_v36, %v2822_v12  ;;  %5991 = vmatpush1.bf16.msra.mxu1 %v5935_v15  ;;  %v2994_v41 = vpop.f32.mrb[102].mxu0  ;;  %6022 = vmatprep.mubr.bf16.mxu1 %v6843_v0 }
 0x22d   : > { %v2995_v31 = vpop.f32.mrb[103].mxu0  ;;  %6771 = vmatprep.subr.bf16.mxu1 %v6853_v29 }
 0x22e   : > { %v3031_v34 = vpop.f32.mrb[100].mxu1 }
 0x22f   : > { %v3043_v57 = vadd.f32 %v3031_v34, %v2823_v61  ;;  %6552 = vmatmul.mubr.msk.bf16.vlgmr.msra.gmra.mrb[208].mxu0 %vm245_vm2, %v6550_v13  ;;  %v6691_v58 = vpop.f32.mrb[101].mxu1 }
 0x230   : > { %6032 = vmatpush1.bf16.msra.mxu0 %v5941_v45  ;;  %v3034_v40 = vpop.f32.mrb[102].mxu1  ;;  %6063 = vmatprep.mubr.bf16.mxu0 %v6843_v0 }
 0x231   : > { %v6692_v5 = vpop.f32.mrb[103].mxu1 }
 0x232   : > { %v3128_v60 = vpop.f32.mrb[104].mxu0 }
 0x233   : > { %v3257_v62 = vadd.f32 %v3128_v60, %v3037_v35  ;;  %v3130_v43 = vpop.f32.mrb[105].mxu0  ;;  %6554 = vmatmul.mubr.msk.bf16.vlgmr.msra.gmra.mrb[208].mxu1 %vm245_vm2, %v6550_v13 }
 0x234   : > { %v3258_v63 = vadd.f32 %v3130_v43, %v3038_v37  ;;  %6772 = vmatpush3.bf16.msra.mxu1 %v5947_v9  ;;  %v3132_v52 = vpop.f32.mrb[106].mxu0  ;;  %6773 = vmatprep.mubr.msk.bf16.mxu1 %vm6854_vm3, %v6853_v29 }
 0x235   : > { %v3133_v47 = vpop.f32.mrb[107].mxu0 }
 0x236   : > { %v3169_v56 = vpop.f32.mrb[104].mxu1 }
 0x237   : > { %v3259_v17 = vadd.f32 %v3169_v56, %v3039_v10  ;;  %v3171_v3 = vpop.f32.mrb[105].mxu1  ;;  %6556 = vmatmul.mubr.msk.bf16.vlgmr.msra.gmra.mrb[212].mxu0 %vm245_vm2, %v6550_v13 }
 0x238   : > { %v3260_v0 = vadd.f32 %v3171_v3, %v3040_v30  ;;  %v3173_v18 = vpop.f32.mrb[106].mxu1 }
 0x239   : > { %v3174_v19 = vpop.f32.mrb[107].mxu1 }
 0x23a   : > { %v3210_v51 = vpop.f32.mrb[108].mxu0 }
 0x23b   : > { %v3261_v49 = vadd.f32 %v3210_v51, %v3041_v2  ;;  %v3212_v12 = vpop.f32.mrb[109].mxu0  ;;  %6774 = vmatmul.mubr.msk.bf16.vlgmr.msra.gmra.mrb[212].mxu1 %vm245_vm2, %v6550_v13 }
 0x23c   : > { %v3262_v14 = vadd.f32 %v3212_v12, %v3042_v16  ;;  %v3214_v55 = vpop.f32.mrb[110].mxu0 }
 0x23d   : > { %v3215_v25 = vpop.f32.mrb[111].mxu0 }
 0x23e   : > { %v3251_v8 = vpop.f32.mrb[108].mxu1 }
 0x23f   : > { %v3263_v7 = vadd.f32 %v3251_v8, %v3043_v57  ;;  %v6697_v29 = vpop.f32.mrb[109].mxu1 }
 0x240   : > { %v3254_v4 = vpop.f32.mrb[110].mxu1 }
 0x241   : > { %v6698_v48 = vpop.f32.mrb[111].mxu1 }
 0x242   : > { %v3348_v11 = vpop.f32.mrb[112].mxu0 }
 0x243   : > { %v3477_v61 = vadd.f32 %v3348_v11, %v3257_v62  ;;  %v3350_v33 = vpop.f32.mrb[113].mxu0 }
 0x244   : > { %v3478_v59 = vadd.f32 %v3350_v33, %v3258_v63  ;;  %v3352_v23 = vpop.f32.mrb[114].mxu0 }
 0x245   : > { %v3353_v27 = vpop.f32.mrb[115].mxu0 }
 0x246   : > { %v3389_v21 = vpop.f32.mrb[112].mxu1 }
 0x247   : > { %v3479_v24 = vadd.f32 %v3389_v21, %v3259_v17  ;;  %v3391_v28 = vpop.f32.mrb[113].mxu1 }
 0x248   : > { %v3480_v32 = vadd.f32 %v3391_v28, %v3260_v0  ;;  %v3393_v35 = vpop.f32.mrb[114].mxu1 }
 0x249   : > { %v3394_v22 = vpop.f32.mrb[115].mxu1 }
 0x24a   : > { %v3430_v44 = vpop.f32.mrb[116].mxu0 }
 0x24b   : > { %v3481_v37 = vadd.f32 %v3430_v44, %v3261_v49  ;;  %v3432_v38 = vpop.f32.mrb[117].mxu0 }
 0x24c   : > { %v3482_v20 = vadd.f32 %v3432_v38, %v3262_v14  ;;  %v3434_v26 = vpop.f32.mrb[118].mxu0 }
 0x24d   : > { %v3435_v39 = vpop.f32.mrb[119].mxu0 }
 0x24e   : > { %v3471_v53 = vpop.f32.mrb[116].mxu1 }
 0x24f   : > { %v3483_v42 = vadd.f32 %v3471_v53, %v3263_v7  ;;  %v6703_v10 = vpop.f32.mrb[117].mxu1 }
 0x250   : > { %v3474_v1 = vpop.f32.mrb[118].mxu1 }
 0x251   : > { %v6704_v30 = vpop.f32.mrb[119].mxu1 }
 0x252   : > { %v3568_v54 = vpop.f32.mrb[120].mxu0 }
 0x253   : > { %v3697_v15 = vadd.f32 %v3568_v54, %v3477_v61  ;;  %v3570_v6 = vpop.f32.mrb[121].mxu0 }
 0x254   : > { %v3698_v46 = vadd.f32 %v3570_v6, %v3478_v59  ;;  %v3572_v50 = vpop.f32.mrb[122].mxu0 }
 0x255   : > { %v3573_v2 = vpop.f32.mrb[123].mxu0 }
 0x256   : > { %v3609_v36 = vpop.f32.mrb[120].mxu1 }
 0x257   : > { %v3699_v16 = vadd.f32 %v3609_v36, %v3479_v24  ;;  %v3611_v41 = vpop.f32.mrb[121].mxu1 }
 0x258   : > { %v3700_v13 = vadd.f32 %v3611_v41, %v3480_v32  ;;  %v3613_v45 = vpop.f32.mrb[122].mxu1 }
 0x259   : > { %v3614_v31 = vpop.f32.mrb[123].mxu1 }
 0x25a   : > { %v3650_v34 = vpop.f32.mrb[124].mxu0 }
 0x25b   : > { %v3701_v57 = vadd.f32 %v3650_v34, %v3481_v37  ;;  %v3652_v58 = vpop.f32.mrb[125].mxu0 }
 0x25c   : > { %v3702_v40 = vadd.f32 %v3652_v58, %v3482_v20  ;;  %v3654_v9 = vpop.f32.mrb[126].mxu0 }
 0x25d   : > { %v3655_v5 = vpop.f32.mrb[127].mxu0 }
 0x25e   : > { %v3691_v60 = vpop.f32.mrb[124].mxu1 }
 0x25f   : > { %v3703_v62 = vadd.f32 %v3691_v60, %v3483_v42  ;;  %v6709_v43 = vpop.f32.mrb[125].mxu1 }
 0x260   : > { %v3694_v63 = vpop.f32.mrb[126].mxu1 }
 0x261   : > { %v6710_v52 = vpop.f32.mrb[127].mxu1 }
 0x262   : > { %v3788_v47 = vpop.f32.mrb[128].mxu0 }
 0x263   : > { %v3917_v56 = vadd.f32 %v3788_v47, %v3697_v15  ;;  %v3790_v17 = vpop.f32.mrb[129].mxu0 }
 0x264   : > { %v3918_v3 = vadd.f32 %v3790_v17, %v3698_v46  ;;  %v3792_v0 = vpop.f32.mrb[130].mxu0 }
 0x265   : > { %v3793_v18 = vpop.f32.mrb[131].mxu0 }
 0x266   : > { %v3829_v19 = vpop.f32.mrb[128].mxu1 }
 0x267   : > { %v3919_v51 = vadd.f32 %v3829_v19, %v3699_v16  ;;  %v3831_v49 = vpop.f32.mrb[129].mxu1 }
 0x268   : > { %v3920_v12 = vadd.f32 %v3831_v49, %v3700_v13  ;;  %v3833_v14 = vpop.f32.mrb[130].mxu1 }
 0x269   : > { %v3834_v55 = vpop.f32.mrb[131].mxu1 }
 0x26a   : > { %v3870_v25 = vpop.f32.mrb[132].mxu0 }
 0x26b   : > { %v3921_v8 = vadd.f32 %v3870_v25, %v3701_v57  ;;  %v3872_v7 = vpop.f32.mrb[133].mxu0 }
 0x26c   : > { %v3922_v29 = vadd.f32 %v3872_v7, %v3702_v40  ;;  %v3874_v4 = vpop.f32.mrb[134].mxu0 }
 0x26d   : > { %v3875_v48 = vpop.f32.mrb[135].mxu0 }
 0x26e   : > { %v3911_v11 = vpop.f32.mrb[132].mxu1 }
 0x26f   : > { %v3923_v61 = vadd.f32 %v3911_v11, %v3703_v62  ;;  %v6715_v33 = vpop.f32.mrb[133].mxu1 }
 0x270   : > { %v3914_v59 = vpop.f32.mrb[134].mxu1 }
 0x271   : > { %v6716_v23 = vpop.f32.mrb[135].mxu1 }
 0x272   : > { %v4008_v27 = vpop.f32.mrb[136].mxu0 }
 0x273   : > { %v4137_v21 = vadd.f32 %v4008_v27, %v3917_v56  ;;  %v4010_v24 = vpop.f32.mrb[137].mxu0 }
 0x274   : > { %v4138_v28 = vadd.f32 %v4010_v24, %v3918_v3  ;;  %v4012_v32 = vpop.f32.mrb[138].mxu0 }
 0x275   : > { %v4013_v35 = vpop.f32.mrb[139].mxu0 }
 0x276   : > { %v4049_v22 = vpop.f32.mrb[136].mxu1 }
 0x277   : > { %v4139_v44 = vadd.f32 %v4049_v22, %v3919_v51  ;;  %v4051_v37 = vpop.f32.mrb[137].mxu1 }
 0x278   : > { %v4140_v38 = vadd.f32 %v4051_v37, %v3920_v12  ;;  %v4053_v20 = vpop.f32.mrb[138].mxu1 }
 0x279   : > { %v4054_v26 = vpop.f32.mrb[139].mxu1 }
 0x27a   : > { %v4090_v39 = vpop.f32.mrb[140].mxu0 }
 0x27b   : > { %v4141_v53 = vadd.f32 %v4090_v39, %v3921_v8  ;;  %v4092_v42 = vpop.f32.mrb[141].mxu0 }
 0x27c   : > { %v4142_v10 = vadd.f32 %v4092_v42, %v3922_v29  ;;  %v4094_v1 = vpop.f32.mrb[142].mxu0 }
 0x27d   : > { %v4095_v30 = vpop.f32.mrb[143].mxu0 }
 0x27e   : > { %v4131_v54 = vpop.f32.mrb[140].mxu1 }
 0x27f   : > { %v4143_v15 = vadd.f32 %v4131_v54, %v3923_v61  ;;  %v6721_v6 = vpop.f32.mrb[141].mxu1 }
 0x280   : > { %v4134_v46 = vpop.f32.mrb[142].mxu1 }
 0x281   : > { %v6722_v50 = vpop.f32.mrb[143].mxu1 }
 0x282   : > { %v4247_v2 = vpop.f32.mrb[144].mxu0 }
 0x283   : > { %v4376_v36 = vadd.f32 %v4247_v2, %v4137_v21  ;;  %v4249_v16 = vpop.f32.mrb[145].mxu0 }
 0x284   : > { %v4377_v41 = vadd.f32 %v4249_v16, %v4138_v28  ;;  %v4251_v13 = vpop.f32.mrb[146].mxu0 }
 0x285   : > { %v4252_v45 = vpop.f32.mrb[147].mxu0 }
 0x286   : > { %v4288_v31 = vpop.f32.mrb[144].mxu1 }
 0x287   : > { %v4378_v34 = vadd.f32 %v4288_v31, %v4139_v44  ;;  %v4290_v57 = vpop.f32.mrb[145].mxu1 }
 0x288   : > { %v4379_v58 = vadd.f32 %v4290_v57, %v4140_v38  ;;  %v4292_v40 = vpop.f32.mrb[146].mxu1 }
 0x289   : > { %v4293_v9 = vpop.f32.mrb[147].mxu1 }
 0x28a   : > { %v4329_v5 = vpop.f32.mrb[148].mxu0 }
 0x28b   : > { %v4380_v60 = vadd.f32 %v4329_v5, %v4141_v53  ;;  %v4331_v62 = vpop.f32.mrb[149].mxu0 }
 0x28c   : > { %v4381_v43 = vadd.f32 %v4331_v62, %v4142_v10  ;;  %v4333_v63 = vpop.f32.mrb[150].mxu0 }
 0x28d   : > { %v4334_v52 = vpop.f32.mrb[151].mxu0 }
 0x28e   : > { %v4370_v47 = vpop.f32.mrb[148].mxu1 }
 0x28f   : > { %v4382_v56 = vadd.f32 %v4370_v47, %v4143_v15  ;;  %v6727_v17 = vpop.f32.mrb[149].mxu1 }
 0x290   : > { %v4373_v3 = vpop.f32.mrb[150].mxu1 }
 0x291   : > { %v6728_v0 = vpop.f32.mrb[151].mxu1 }
 0x292   : > { %v4464_v18 = vpop.f32.mrb[152].mxu0 }
 0x293   : > { %v4593_v19 = vadd.f32 %v4464_v18, %v4376_v36  ;;  %v4466_v51 = vpop.f32.mrb[153].mxu0 }
 0x294   : > { %v4594_v49 = vadd.f32 %v4466_v51, %v4377_v41  ;;  %v4468_v12 = vpop.f32.mrb[154].mxu0 }
 0x295   : > { %v4469_v14 = vpop.f32.mrb[155].mxu0 }
 0x296   : > { %v4505_v55 = vpop.f32.mrb[152].mxu1 }
 0x297   : > { %v4595_v25 = vadd.f32 %v4505_v55, %v4378_v34  ;;  %v4507_v8 = vpop.f32.mrb[153].mxu1 }
 0x298   : > { %v4596_v7 = vadd.f32 %v4507_v8, %v4379_v58  ;;  %v4509_v29 = vpop.f32.mrb[154].mxu1 }
 0x299   : > { %v4510_v4 = vpop.f32.mrb[155].mxu1 }
 0x29a   : > { %v4546_v48 = vpop.f32.mrb[156].mxu0 }
 0x29b   : > { %v4597_v11 = vadd.f32 %v4546_v48, %v4380_v60  ;;  %v4548_v61 = vpop.f32.mrb[157].mxu0 }
 0x29c   : > { %v4598_v33 = vadd.f32 %v4548_v61, %v4381_v43  ;;  %v4550_v59 = vpop.f32.mrb[158].mxu0 }
 0x29d   : > { %v4551_v23 = vpop.f32.mrb[159].mxu0 }
 0x29e   : > { %v4587_v27 = vpop.f32.mrb[156].mxu1 }
 0x29f   : > { %v4599_v21 = vadd.f32 %v4587_v27, %v4382_v56  ;;  %v6733_v24 = vpop.f32.mrb[157].mxu1 }
 0x2a0   : > { %v4590_v28 = vpop.f32.mrb[158].mxu1 }
 0x2a1   : > { %v6734_v32 = vpop.f32.mrb[159].mxu1 }
 0x2a2   : > { %v4681_v35 = vpop.f32.mrb[160].mxu0 }
 0x2a3   : > { %v4810_v22 = vadd.f32 %v4681_v35, %v4593_v19  ;;  %v4683_v44 = vpop.f32.mrb[161].mxu0 }
 0x2a4   : > { %v4811_v37 = vadd.f32 %v4683_v44, %v4594_v49  ;;  %v4685_v38 = vpop.f32.mrb[162].mxu0 }
 0x2a5   : > { %v4686_v20 = vpop.f32.mrb[163].mxu0 }
 0x2a6   : > { %v4722_v26 = vpop.f32.mrb[160].mxu1 }
 0x2a7   : > { %v4812_v39 = vadd.f32 %v4722_v26, %v4595_v25  ;;  %v4724_v53 = vpop.f32.mrb[161].mxu1 }
 0x2a8   : > { %v4813_v42 = vadd.f32 %v4724_v53, %v4596_v7  ;;  %v4726_v10 = vpop.f32.mrb[162].mxu1 }
 0x2a9   : > { %v4727_v1 = vpop.f32.mrb[163].mxu1 }
 0x2aa   : > { %v4763_v30 = vpop.f32.mrb[164].mxu0 }
 0x2ab   : > { %v4814_v54 = vadd.f32 %v4763_v30, %v4597_v11  ;;  %v4765_v15 = vpop.f32.mrb[165].mxu0 }
 0x2ac   : > { %v4815_v6 = vadd.f32 %v4765_v15, %v4598_v33  ;;  %v4767_v46 = vpop.f32.mrb[166].mxu0 }
 0x2ad   : > { %v4768_v50 = vpop.f32.mrb[167].mxu0 }
 0x2ae   : > { %v4804_v2 = vpop.f32.mrb[164].mxu1 }
 0x2af   : > { %v4816_v36 = vadd.f32 %v4804_v2, %v4599_v21  ;;  %v6739_v16 = vpop.f32.mrb[165].mxu1 }
 0x2b0   : > { %v4807_v41 = vpop.f32.mrb[166].mxu1 }
 0x2b1   : > { %v6740_v13 = vpop.f32.mrb[167].mxu1 }
 0x2b2   : > { %v4898_v45 = vpop.f32.mrb[168].mxu0 }
 0x2b3   : > { %v5027_v31 = vadd.f32 %v4898_v45, %v4810_v22  ;;  %v4900_v34 = vpop.f32.mrb[169].mxu0 }
 0x2b4   : > { %v5028_v57 = vadd.f32 %v4900_v34, %v4811_v37  ;;  %v4902_v58 = vpop.f32.mrb[170].mxu0 }
 0x2b5   : > { %v4903_v40 = vpop.f32.mrb[171].mxu0 }
 0x2b6   : > { %v4939_v9 = vpop.f32.mrb[168].mxu1 }
 0x2b7   : > { %v5029_v5 = vadd.f32 %v4939_v9, %v4812_v39  ;;  %v4941_v60 = vpop.f32.mrb[169].mxu1 }
 0x2b8   : > { %v5030_v62 = vadd.f32 %v4941_v60, %v4813_v42  ;;  %v4943_v43 = vpop.f32.mrb[170].mxu1 }
 0x2b9   : > { %v4944_v63 = vpop.f32.mrb[171].mxu1 }
 0x2ba   : > { %v4980_v52 = vpop.f32.mrb[172].mxu0 }
 0x2bb   : > { %v5031_v47 = vadd.f32 %v4980_v52, %v4814_v54  ;;  %v4982_v56 = vpop.f32.mrb[173].mxu0 }
 0x2bc   : > { %v5032_v17 = vadd.f32 %v4982_v56, %v4815_v6  ;;  %v4984_v3 = vpop.f32.mrb[174].mxu0 }
 0x2bd   : > { %v4985_v0 = vpop.f32.mrb[175].mxu0 }
 0x2be   : > { %v5021_v18 = vpop.f32.mrb[172].mxu1 }
 0x2bf   : > { %v5033_v19 = vadd.f32 %v5021_v18, %v4816_v36  ;;  %v6745_v51 = vpop.f32.mrb[173].mxu1 }
 0x2c0   : > { %v5024_v49 = vpop.f32.mrb[174].mxu1 }
 0x2c1   : > { %v6746_v12 = vpop.f32.mrb[175].mxu1 }
 0x2c2   : > { %v5115_v14 = vpop.f32.mrb[176].mxu0 }
 0x2c3   : > { %v5244_v55 = vadd.f32 %v5115_v14, %v5027_v31  ;;  %v5117_v25 = vpop.f32.mrb[177].mxu0 }
 0x2c4   : > { %v5245_v8 = vadd.f32 %v5117_v25, %v5028_v57  ;;  %v5119_v7 = vpop.f32.mrb[178].mxu0 }
 0x2c5   : > { %v5120_v29 = vpop.f32.mrb[179].mxu0 }
 0x2c6   : > { %v5156_v4 = vpop.f32.mrb[176].mxu1 }
 0x2c7   : > { %v5246_v48 = vadd.f32 %v5156_v4, %v5029_v5  ;;  %v5158_v11 = vpop.f32.mrb[177].mxu1 }
 0x2c8   : > { %v5247_v61 = vadd.f32 %v5158_v11, %v5030_v62  ;;  %v5160_v33 = vpop.f32.mrb[178].mxu1 }
 0x2c9   : > { %v5161_v59 = vpop.f32.mrb[179].mxu1 }
 0x2ca   : > { %v5197_v23 = vpop.f32.mrb[180].mxu0 }
 0x2cb   : > { %v5248_v27 = vadd.f32 %v5197_v23, %v5031_v47  ;;  %v5199_v21 = vpop.f32.mrb[181].mxu0 }
 0x2cc   : > { %v5249_v24 = vadd.f32 %v5199_v21, %v5032_v17  ;;  %v5201_v28 = vpop.f32.mrb[182].mxu0  ;;  %v6134_v21 = vlaneseq }
 0x2cd   : > { %v5202_v32 = vpop.f32.mrb[183].mxu0 }
 0x2ce   : > { %v5238_v35 = vpop.f32.mrb[180].mxu1 }
 0x2cf   : > { %v5250_v22 = vadd.f32 %v5238_v35, %v5033_v19  ;;  %v6751_v44 = vpop.f32.mrb[181].mxu1 }
 0x2d0   : > { %v5241_v37 = vpop.f32.mrb[182].mxu1 }
 0x2d1   : > { %v6752_v38 = vpop.f32.mrb[183].mxu1  ;;  %v8605_v37 = vshrl.u32 %v6134_v21, 7 }
 0x2d2   : > { %v5332_v20 = vpop.f32.mrb[184].mxu0 }
 0x2d3   : > { %v5461_v26 = vadd.f32 %v5332_v20, %v5244_v55  ;;  %v5334_v39 = vpop.f32.mrb[185].mxu0 }
 0x2d4   : > { %v5462_v53 = vadd.f32 %v5334_v39, %v5245_v8  ;;  %v5336_v42 = vpop.f32.mrb[186].mxu0 }
 0x2d5   : > { %v5337_v10 = vpop.f32.mrb[187].mxu0 }
 0x2d6   : > { %v5373_v1 = vpop.f32.mrb[184].mxu1  ;;  %v6136_v10 = vsub.s32 0, %v8605_v37 }
 0x2d7   : > { %v5463_v30 = vadd.f32 %v5373_v1, %v5246_v48  ;;  %v5375_v54 = vpop.f32.mrb[185].mxu1 }
 0x2d8   : > { %v5464_v15 = vadd.f32 %v5375_v54, %v5247_v61  ;;  %v5377_v6 = vpop.f32.mrb[186].mxu1  ;;  %v6140_v54 = vsub.s32 1, %v8605_v37 }
 0x2d9   : > { %v5378_v46 = vpop.f32.mrb[187].mxu1 }
 0x2da   : > { %v5414_v50 = vpop.f32.mrb[188].mxu0  ;;  %v8616_v46 = vpop.permute.xlu1 %6122 }
 0x2db   : > { %v5465_v2 = vadd.f32 %v5414_v50, %v5248_v27  ;;  %v5416_v36 = vpop.f32.mrb[189].mxu0 }
 0x2dc   : > { %v5466_v16 = vadd.f32 %v5416_v36, %v5249_v24  ;;  %v5418_v41 = vpop.f32.mrb[190].mxu0 }
 0x2dd   : > { %v5419_v13 = vpop.f32.mrb[191].mxu0 }
 0x2de   : > { %v5455_v45 = vpop.f32.mrb[188].mxu1 }
 0x2df   : > { %v5467_v31 = vadd.f32 %v5455_v45, %v5250_v22  ;;  %v6757_v34 = vpop.f32.mrb[189].mxu1 }
 0x2e0   : > { %v5458_v57 = vpop.f32.mrb[190].mxu1 }
 0x2e1   : > { %v6758_v58 = vpop.f32.mrb[191].mxu1 }
 0x2e2   : > { %v5549_v40 = vpop.f32.mrb[192].mxu0  ;;  %v6152_v58 = vsub.s32 4, %v8605_v37 }
 0x2e3   : > { %v5678_v9 = vadd.f32 %v5549_v40, %v5461_v26  ;;  %v5551_v5 = vpop.f32.mrb[193].mxu0 }
 0x2e4   : > { %v5679_v60 = vadd.f32 %v5551_v5, %v5462_v53  ;;  %v5553_v62 = vpop.f32.mrb[194].mxu0  ;;  %v6156_v5 = vsub.s32 5, %v8605_v37 }
 0x2e5   : > { %v5554_v43 = vpop.f32.mrb[195].mxu0 }
 0x2e6   : > { %v5590_v63 = vpop.f32.mrb[192].mxu1 }
 0x2e7   : > { %v5680_v52 = vadd.f32 %v5590_v63, %v5463_v30  ;;  %v5592_v47 = vpop.f32.mrb[193].mxu1  ;;  %v8613_v30 = vld [vmem:[%s8675_s3] sm:$0x7f] }
 0x2e8   : > { %v5681_v56 = vadd.f32 %v5592_v47, %v5464_v15  ;;  %v5594_v17 = vpop.f32.mrb[194].mxu1  ;;  %v6137_v36 = vrot.slane %v8613_v30, %v6136_v10  ;;  %v6141_v45 = vrot.slane %v8613_v30, %v6140_v54 }
 0x2e9   : > { %v5595_v3 = vpop.f32.mrb[195].mxu1 }
 0x2ea   : > { %v5631_v0 = vpop.f32.mrb[196].mxu0 }
 0x2eb   : > { %v5682_v18 = vadd.f32 %v5631_v0, %v5465_v2  ;;  %v5633_v19 = vpop.f32.mrb[197].mxu0 }
 0x2ec   : > { %v5683_v51 = vadd.f32 %v5633_v19, %v5466_v16  ;;  %v5635_v49 = vpop.f32.mrb[198].mxu0  ;;  %v6144_v16 = vsub.s32 2, %v8605_v37 }
 0x2ed   : > { %v5636_v12 = vpop.f32.mrb[199].mxu0  ;;  %v6153_v49 = vrot.slane %v8613_v30, %v6152_v58 }
 0x2ee   : > { %v5672_v14 = vpop.f32.mrb[196].mxu1  ;;  %v6145_v62 = vrot.slane %v8613_v30, %v6144_v16 }
 0x2ef   : > { %v5684_v55 = vadd.f32 %v5672_v14, %v5467_v31  ;;  %v6763_v25 = vpop.f32.mrb[197].mxu1  ;;  %v6148_v31 = vsub.s32 3, %v8605_v37 }
 0x2f0   : > { %v5675_v8 = vpop.f32.mrb[198].mxu1 }
 0x2f1   : > { %v6764_v7 = vpop.f32.mrb[199].mxu1  ;;  %v6149_v3 = vrot.slane %v8613_v30, %v6148_v31  ;;  %v6157_v8 = vrot.slane %v8613_v30, %v6156_v5 }
 0x2f2   : > { %v5766_v29 = vpop.f32.mrb[200].mxu0 }
 0x2f3   : > { %v5895_v4 = vadd.f32 %v5766_v29, %v5678_v9  ;;  %v5768_v48 = vpop.f32.mrb[201].mxu0 }
 0x2f4   : > { %v5896_v11 = vadd.f32 %v5768_v48, %v5679_v60  ;;  %v5770_v61 = vpop.f32.mrb[202].mxu0 }
 0x2f5   : > { %v5771_v33 = vpop.f32.mrb[203].mxu0 }
 0x2f6   : > { %v5807_v59 = vpop.f32.mrb[200].mxu1 }
 0x2f7   : > { %v5897_v23 = vadd.f32 %v5807_v59, %v5680_v52  ;;  %v5809_v27 = vpop.f32.mrb[201].mxu1 }
 0x2f8   : > { %v5898_v24 = vadd.f32 %v5809_v27, %v5681_v56  ;;  %v5811_v28 = vpop.f32.mrb[202].mxu1 }
 0x2f9   : > { %v5812_v32 = vpop.f32.mrb[203].mxu1 }
 0x2fa   : > { %v5848_v35 = vpop.f32.mrb[204].mxu0 }
 0x2fb   : > { %v5899_v22 = vadd.f32 %v5848_v35, %v5682_v18  ;;  %v5850_v44 = vpop.f32.mrb[205].mxu0 }
 0x2fc   : > { %v5900_v38 = vadd.f32 %v5850_v44, %v5683_v51  ;;  %v5852_v20 = vpop.f32.mrb[206].mxu0 }
 0x2fd   : > { %v5853_v26 = vpop.f32.mrb[207].mxu0 }
 0x2fe   : > { %v5889_v39 = vpop.f32.mrb[204].mxu1 }
 0x2ff   : > { %v8607_v53 = vadd.f32 %v5889_v39, %v5684_v55  ;;  %v6769_v42 = vpop.f32.mrb[205].mxu1 }
 0x300   : > { %v5892_v1 = vpop.f32.mrb[206].mxu1 }
 0x301   : > { %v6770_v15 = vpop.f32.mrb[207].mxu1 }
 0x302   : > { %v5983_v6 = vpop.f32.mrb[208].mxu0 }
 0x303   : > { %v6112_v50 = vadd.f32 %v5983_v6, %v5895_v4  ;;  %v5985_v2 = vpop.f32.mrb[209].mxu0 }
 0x304   : > { %v6113_v41 = vadd.f32 %v5985_v2, %v5896_v11  ;;  %v5987_v13 = vpop.f32.mrb[210].mxu0  ;;  %v6160_v11 = vsub.s32 6, %v8605_v37 }
 0x305   : > { %v8623_v34 = vadd.f32 %v8616_v46, %v6112_v50  ;;  %v5988_v57 = vpop.f32.mrb[211].mxu0 }
 0x306   : > { %v8627_v40 = vadd.f32 %v8616_v46, %v6113_v41  ;;  %v6024_v9 = vpop.f32.mrb[208].mxu1  ;;  %v6161_v15 = vrot.slane %v8613_v30, %v6160_v11 }
 0x307   : > { %v6114_v60 = vadd.f32 %v6024_v9, %v5897_v23  ;;  %v6169_v43 = vmul.f32 %v6137_v36, %v8623_v34  ;;  %v6187_v63 = vmul.f32 %v8623_v34, %v8623_v34  ;;  %v6026_v52 = vpop.f32.mrb[209].mxu1 }
 0x308   : > { %v6170_v47 = vmul.f32 %v6141_v45, %v8627_v40  ;;  %v6188_v56 = vmul.f32 %v8627_v40, %v8627_v40  ;;  %v6115_v17 = vadd.f32 %v6026_v52, %v5898_v24  ;;  %v6028_v0 = vpop.f32.mrb[210].mxu1 }
 0x309   : > { %v8639_v18 = vadd.f32 %v8616_v46, %v6114_v60  ;;  %v6194_v19 = vmul.f32 %v6187_v63, %v6137_v36  ;;  %v6029_v51 = vpop.f32.mrb[211].mxu1 }
 0x30a   : > { %v6176_v12 = vadd.f32 %v6170_v47, %v6169_v43  ;;  %v6195_v14 = vmul.f32 %v6188_v56, %v6141_v45  ;;  %v8643_v55 = vadd.f32 %v8616_v46, %v6115_v17  ;;  %v6065_v25 = vpop.f32.mrb[212].mxu0 }
 0x30b   : > { %v6171_v7 = vmul.f32 %v6145_v62, %v8639_v18  ;;  %v6189_v29 = vmul.f32 %v8639_v18, %v8639_v18  ;;  %v6116_v4 = vadd.f32 %v6065_v25, %v5899_v22  ;;  %v6067_v48 = vpop.f32.mrb[213].mxu0 }
 0x30c   : > { %v6201_v61 = vadd.f32 %v6195_v14, %v6194_v19  ;;  %v6172_v33 = vmul.f32 %v6149_v3, %v8643_v55  ;;  %v6190_v59 = vmul.f32 %v8643_v55, %v8643_v55  ;;  %v6117_v23 = vadd.f32 %v6067_v48, %v5900_v38  ;;  %v6069_v27 = vpop.f32.mrb[214].mxu0 }
 0x30d   : > { %v6177_v21 = vadd.f32 %v6176_v12, %v6171_v7  ;;  %v6196_v24 = vmul.f32 %v6189_v29, %v6145_v62  ;;  %v6129_v28 = vadd.f32 %v8616_v46, %v6116_v4  ;;  %v6070_v32 = vpop.f32.mrb[215].mxu0 }
 0x30e   : > { %v6197_v35 = vmul.f32 %v6190_v59, %v6149_v3  ;;  %v6130_v44 = vadd.f32 %v8616_v46, %v6117_v23  ;;  %v6106_v22 = vpop.f32.mrb[212].mxu1 }
 0x30f   : > { %v6202_v20 = vadd.f32 %v6201_v61, %v6196_v24  ;;  %v6178_v26 = vadd.f32 %v6177_v21, %v6172_v33  ;;  %v6173_v37 = vmul.f32 %v6153_v49, %v6129_v28  ;;  %v6191_v39 = vmul.f32 %v6129_v28, %v6129_v28  ;;  %v6775_v42 = vpop.f32.mrb[213].mxu1 }
 0x310   : > { %v6174_v10 = vmul.f32 %v6157_v8, %v6130_v44  ;;  %v6192_v1 = vmul.f32 %v6130_v44, %v6130_v44  ;;  %v6118_v54 = vadd.f32 %v6106_v22, %v8607_v53  ;;  %v6109_v38 = vpop.f32.mrb[214].mxu1 }
 0x311   : > { %v6198_v6 = vmul.f32 %v6191_v39, %v6153_v49  ;;  %v6776_v50 = vpop.f32.mrb[215].mxu1  ;;  %v6179_v2 = vadd.f32 %v6178_v26, %v6173_v37  ;;  %v6203_v36 = vadd.f32 %v6202_v20, %v6197_v35 }
 0x312   : > { %v6131_v16 = vadd.f32 %v8616_v46, %v6118_v54  ;;  %v6199_v41 = vmul.f32 %v6192_v1, %v6157_v8 }
 0x313   : > { %v6180_v13 = vadd.f32 %v6179_v2, %v6174_v10  ;;  %v6204_v45 = vadd.f32 %v6203_v36, %v6198_v6 }
 0x314   : > { %v6193_v31 = vmul.f32 %v6131_v16, %v6131_v16  ;;  %v6175_v57 = vmul.f32 %v6161_v15, %v6131_v16 }
 0x315   : > { %v6205_v58 = vadd.f32 %v6204_v45, %v6199_v41 }
 0x316   : > { %v6182_v9 = vsel %vm6181_vm1, %v6175_v57, 0.0  ;;  %v6200_v5 = vmul.f32 %v6193_v31, %v6161_v15 }
 0x317   : > { %v6183_v53 = vadd.f32 %v6182_v9, %v6180_v13 }
 0x318   : > { %v6206_v60 = vsel %vm6181_vm1, %v6200_v5, 0.0 }
 0x319   : > { %6184 = vadd.xlane.f32.xlu0 %v6183_v53  ;;  %v6207_v30 = vadd.f32 %v6206_v60, %v6205_v58 }
 0x31b   : > { %6208 = vadd.xlane.f32.xlu1 %v6207_v30 }
 0x3a6   : > { %v6185_v62 = vpop.xlane.xlu0 %6184 }
 0x3a7   : > { %v6186_v43 = vmul.f32 0.001953125, %v6185_v62 }
 0x3a8   : > { %v6209_v46 = vpop.xlane.xlu1 %6208 }
 0x3a9   : > { %v6210_v63 = vmul.f32 0.001953125, %v6209_v46  ;;  %v6211_v52 = vmul.f32 %v6186_v43, %v6186_v43  ;;  %v6214_v3 = vsub.f32 %v8623_v34, %v6186_v43  ;;  %v6215_v0 = vsub.f32 %v8627_v40, %v6186_v43 }
 0x3aa   : > { %v6216_v19 = vsub.f32 %v8639_v18, %v6186_v43  ;;  %v6217_v51 = vsub.f32 %v8643_v55, %v6186_v43  ;;  %v6218_v12 = vsub.f32 %v6129_v28, %v6186_v43  ;;  %v6219_v14 = vsub.f32 %v6130_v44, %v6186_v43 }
 0x3ab   : > { %v6212_v47 = vsub.f32 %v6210_v63, %v6211_v52  ;;  %v6220_v25 = vsub.f32 %v6131_v16, %v6186_v43 }
 0x3ad   : > { %v6213_v56 = vmax.f32 %v6212_v47, 0.0 }
 0x3af   : > { %v6221_v17 = vadd.f32 1e-05, %v6213_v56 }
 0x3b1   : > { %6833 = vrsqrt.f32 %v6221_v17 }
 0x3bb   : > { %v6834_v49 = vpop.eup %6833 }
 0x3bc   : > { %v6223_v8 = vmul.f32 %v6834_v49, %v6214_v3  ;;  %v6224_v7 = vmul.f32 %v6834_v49, %v6215_v0  ;;  %v6225_v29 = vmul.f32 %v6834_v49, %v6216_v19  ;;  %v6226_v4 = vmul.f32 %v6834_v49, %v6217_v51 }
 0x3bd   : > { %v6227_v48 = vmul.f32 %v6834_v49, %v6218_v12  ;;  %v6228_v11 = vmul.f32 %v6834_v49, %v6219_v14  ;;  %v6229_v61 = vmul.f32 %v6834_v49, %v6220_v25 }
 0x3be   : > { %vm6230_vm2 = vcmp.ge.f32.partialorder %v6223_v8, 0.0  ;;  %vm6231_vm3 = vcmp.ge.f32.partialorder %v6224_v7, 0.0  ;;  %vm6232_vm15 = vcmp.ge.f32.partialorder %v6225_v29, 0.0  ;;  %vm6233_vm0 = vcmp.ge.f32.partialorder %v6226_v4, 0.0 }
 0x3bf   : > { %vm6234_vm4 = vcmp.ge.f32.partialorder %v6227_v48, 0.0  ;;  %vm6235_vm5 = vcmp.ge.f32.partialorder %v6228_v11, 0.0  ;;  %vm6236_vm6 = vcmp.ge.f32.partialorder %v6229_v61, 0.0  ;;  %v6237_v34 = vmul.f32 0.01, %v6223_v8 }
 0x3c0   : > { %v6238_v40 = vmul.f32 0.01, %v6224_v7  ;;  %v6239_v18 = vmul.f32 0.01, %v6225_v29  ;;  %v6240_v55 = vmul.f32 0.01, %v6226_v4 }
 0x3c1   : > { %v6241_v33 = vmul.f32 0.01, %v6227_v48  ;;  %v6242_v59 = vmul.f32 0.01, %v6228_v11  ;;  %v6243_v23 = vmul.f32 0.01, %v6229_v61  ;;  %v6244_v27 = vsel %vm6230_vm2, %v6223_v8, %v6237_v34 }
 0x3c2   : > { %v6245_v21 = vsel %vm6231_vm3, %v6224_v7, %v6238_v40  ;;  %v6246_v24 = vsel %vm6232_vm15, %v6225_v29, %v6239_v18  ;;  %v6247_v28 = vsel %vm6233_vm0, %v6226_v4, %v6240_v55  ;;  %6251 = vst [vmem:[%s197_s10] sm:$0xff] %v6244_v27 }
 0x3c3   : > { %v6248_v32 = vsel %vm6234_vm4, %v6227_v48, %v6241_v33  ;;  %v6249_v35 = vsel %vm6235_vm5, %v6228_v11, %v6242_v59  ;;  %v6250_v44 = vsel %vm6236_vm6, %v6229_v61, %v6243_v23  ;;  %6252 = vst [vmem:[%s197_s10 + $0x8] sm:$0xff] %v6245_v21  ;;  %6253 = vst [vmem:[%s197_s10 + $0x10] sm:$0xff] %v6246_v24 }
 0x3c4   : > { %6254 = vst [vmem:[%s197_s10 + $0x18] sm:$0xff] %v6247_v28  ;;  %6255 = vst [vmem:[%s197_s10 + $0x20] sm:$0xff] %v6248_v32 }
 0x3c5   : > { %6256 = vst [vmem:[%s197_s10 + $0x28] sm:$0xff] %v6249_v35  ;;  %6257 = vst.msk [vmem:[%s197_s10 + $0x30] sm:$0xff] %vm6181_vm1, %v6250_v44 }
 0x3c6 PF: > { %s14_s15 = sadd.s32 1, %s6841_s15  }
 0x3c7   : > { %p11_p4 = scmp.ge.s32.totalorder %s14_s15, 4  }
 0x3c9   :  { %13 = sbr.rel (!%p11_p4) target bundleno = 1 (0x1), region = 92 }

</bundles_post_ra>
